<compile_context>
chip_gen: v7x
topology: tpu7x:2x2x1
jax: 0.10.0
libtpu: 0.0.40
codegen_flags: <defaults>
</compile_context>

<pallas_src>
import math

import numpy as np

import jax
import jax.numpy as jnp
from jax.experimental import pallas as pl
from jax.experimental.pallas import tpu as pltpu

# ----------------------------- configuration --------------------------------
IMG_SIZE = 16
PATCH = 8
IN_CHANS = 3
EMBED_DIM = 32
DEPTH = 2
NUM_HEADS = 4
MLP_RATIO = 4.0
SIDE_DIM = 64                                  # MultiheadAttention: dim // 64 heads -> 1 head
T = 2                                          # frames per video
B = 2                                          # videos; per-frame batch = B * T
BT = B * T
NUM_PATCHES = (IMG_SIZE // PATCH) ** 2         # 4
P = NUM_PATCHES
CPP = IN_CHANS * PATCH * PATCH                 # 192
R_TRUNK = BT * (P + 1)                         # 20 trunk token rows (BT cls rows first)
R_SIDE = BT * P                                # 16 side spatial rows
MLP_H = int(EMBED_DIM * MLP_RATIO)             # 128
SMLP_H = int(SIDE_DIM * 4.0)                   # 256
LN_EPS = 1e-5
BN_EPS = 1e-5
BN_SCALE = 1.0 / math.sqrt(1.0 + BN_EPS)       # eval-mode BatchNorm3d (w=1, b=0, rm=0, rv=1)
NEG_INF = -1e30

_NT = (((1,), (1,)), ((), ()))                 # contract last dims of both operands (q @ k.T)

# ----------------------------- input registry --------------------------------
INPUT_NAMES = (
    "patches", "side_patches", "trunk_mask", "side_mask",
    "patch_w", "trunk_add", "side_w", "side_pos",
    "vec32", "vec64", "vec128", "vec256",
    "trunk_qkv_w", "trunk_proj_w", "trunk_fc1_w", "trunk_fc2_w",
    "side_adapt_w", "side_w64", "side_fc1_w", "side_fc2_w",
)


def _vec_registry():
    v32, v64 = [], []
    for li in range(DEPTH):
        v32 += [f"blk{li}_ln1_g", f"blk{li}_ln1_b", f"blk{li}_proj_b",
                f"blk{li}_ln2_g", f"blk{li}_ln2_b", f"blk{li}_fc2_b"]
    for li in range(DEPTH):
        v32 += [f"side{li}_pre_ln_g", f"side{li}_pre_ln_b"]
    v64.append("side_b")
    for li in range(DEPTH):
        v64 += [f"side{li}_adapt_b", f"side{li}_pw1_b",
                f"side{li}_dw_w0", f"side{li}_dw_w1", f"side{li}_dw_w2", f"side{li}_dw_b",
                f"side{li}_pw2_b", f"side{li}_ln1_g", f"side{li}_ln1_b",
                f"side{li}_q_b", f"side{li}_k_b", f"side{li}_v_b", f"side{li}_o_b",
                f"side{li}_fc2_b"]
    return (tuple(v32), tuple(v64),
            {n: i for i, n in enumerate(v32)}, {n: i for i, n in enumerate(v64)})


_VEC32_NAMES, _VEC64_NAMES, _VEC32_IDX, _VEC64_IDX = _vec_registry()


# Row layout used everywhere:
#   trunk rows:  rows 0..BT-1 are the per-frame CLS tokens (frame f -> row f);
#                rows BT + f*P .. BT + (f+1)*P - 1 are frame f's patch tokens.
#   side rows:   rows f*P .. (f+1)*P - 1 are frame f's spatial tokens (f = b*T + t).
def _frame_of_trunk_row(c):
    return c if c < BT else (c - BT) // P


def _build_masks():
    tm = np.zeros((R_TRUNK, R_TRUNK), np.float32)
    for rr in range(R_TRUNK):
        for cc in range(R_TRUNK):
            if _frame_of_trunk_row(rr) != _frame_of_trunk_row(cc):
                tm[rr, cc] = NEG_INF
    # side attention: queries = 16 spatial rows, keys = [BT shifted tokens ; 16 spatial rows]
    sm = np.zeros((R_SIDE, R_TRUNK), np.float32)
    for qq in range(R_SIDE):
        for cc in range(R_TRUNK):
            if (qq // P) != _frame_of_trunk_row(cc):
                sm[qq, cc] = NEG_INF
    return tm, sm


_TRUNK_MASK_NP, _SIDE_MASK_NP = _build_masks()


# ----------------------------- in-kernel helpers ------------------------------
def _ln(x, g, b):
    m = jnp.mean(x, axis=-1, keepdims=True)
    xc = x - m
    v = jnp.mean(xc * xc, axis=-1, keepdims=True)
    return xc * jax.lax.rsqrt(v + LN_EPS) * g + b


def _gelu(x):
    # exact (erf) GELU, matching torch.nn.GELU default
    return 0.5 * x * (1.0 + jax.lax.erf(x * (1.0 / math.sqrt(2.0))))


def _softmax_rows(s):
    m = jnp.max(s, axis=-1, keepdims=True)
    p = jnp.exp(s - m)
    return p * pl.reciprocal(jnp.sum(p, axis=-1, keepdims=True), approx=True)


def _r32(tbl, name):
    i = _VEC32_IDX[name]
    return tbl[i:i + 1, :]


def _r64(tbl, name):
    i = _VEC64_IDX[name]
    return tbl[i:i + 1, :]


# ----------------------------- the fused kernel -------------------------------
def _forward_kernel(*refs):
    n_in = len(INPUT_NAMES)
    r = dict(zip(INPUT_NAMES, refs[:n_in]))
    out_ref = refs[n_in]
    o_sc, kv_sc, zo_sc, sh_sc = refs[n_in + 1:]

    f32 = jnp.float32
    D, S = EMBED_DIM, SIDE_DIM
    DH = D // NUM_HEADS
    head_scale = DH ** -0.5
    mha_scale = S ** -0.5                       # 1 head of width S

    v32 = r["vec32"][...]
    v64 = r["vec64"][...]
    v128 = r["vec128"][...]
    v256 = r["vec256"][...]
    trunk_mask = r["trunk_mask"][...]
    side_mask = r["side_mask"][...]

    # ---------------- ViT trunk: patch embed + pos + DEPTH blocks ----------------
    # patches rows 0..BT-1 are zero CLS placeholder rows; trunk_add already contains
    # cls_token+pos[0] for those rows and patch_bias+pos[1:] for the patch rows.
    x = jnp.dot(r["patches"][...], r["patch_w"][...],
                preferred_element_type=f32) + r["trunk_add"][...]            # (20, 32)

    acts = []
    for li in range(DEPTH):
        qkv_w = r["trunk_qkv_w"][li]
        proj_w = r["trunk_proj_w"][li]
        fc1_w = r["trunk_fc1_w"][li]
        fc2_w = r["trunk_fc2_w"][li]
        g1 = _r32(v32, f"blk{li}_ln1_g"); b1 = _r32(v32, f"blk{li}_ln1_b")
        g2 = _r32(v32, f"blk{li}_ln2_g"); b2 = _r32(v32, f"blk{li}_ln2_b")
        proj_b = _r32(v32, f"blk{li}_proj_b"); fc2_b = _r32(v32, f"blk{li}_fc2_b")
        fc1_b = v128[li:li + 1, :]

        qkv = jnp.dot(_ln(x, g1, b1), qkv_w, preferred_element_type=f32)     # (20, 96)
        for h in range(NUM_HEADS):
            qh = qkv[:, h * DH:(h + 1) * DH]
            kh = qkv[:, D + h * DH:D + (h + 1) * DH]
            vh = qkv[:, 2 * D + h * DH:2 * D + (h + 1) * DH]
            s = jax.lax.dot_general(qh, kh, _NT,
                                    preferred_element_type=f32) * head_scale + trunk_mask
            # assemble all heads, then ONE fused output projection matmul
            o_sc[:, h * DH:(h + 1) * DH] = jnp.dot(_softmax_rows(s), vh,
                                                   preferred_element_type=f32)
        x = x + jnp.dot(o_sc[...], proj_w, preferred_element_type=f32) + proj_b
        h1 = _gelu(jnp.dot(_ln(x, g2, b2), fc1_w, preferred_element_type=f32) + fc1_b)
        x = x + jnp.dot(h1, fc2_w, preferred_element_type=f32) + fc2_b
        acts.append(x)
    # NOTE: the trunk's final self.norm(x) never reaches the returned tensor -> skipped.

    # ---------------- side stem: Conv3d(3,S,(3,p,p)) as one K=576 matmul ---------
    xs = (jnp.dot(r["side_patches"][...], r["side_w"][...],
                  preferred_element_type=f32) + _r64(v64, "side_b")) * BN_SCALE   # (16, 64)
    side_pos = r["side_pos"][...]                                            # (16, 64)
    lane_row = jax.lax.broadcasted_iota(jnp.int32, (1, S), 1)
    fold = S // 2

    for li in range(DEPTH):
        base = li * 6
        pw1_w = r["side_w64"][base + 0]; pw2_w = r["side_w64"][base + 1]
        q_w = r["side_w64"][base + 2]; k_w = r["side_w64"][base + 3]
        v_w = r["side_w64"][base + 4]; o_w = r["side_w64"][base + 5]
        adapt_w = r["side_adapt_w"][li]
        sfc1_w = r["side_fc1_w"][li]; sfc2_w = r["side_fc2_w"][li]
        sfc1_b = v256[li:li + 1, :]

        pre_g = _r32(v32, f"side{li}_pre_ln_g"); pre_b = _r32(v32, f"side{li}_pre_ln_b")
        adapt_b = _r64(v64, f"side{li}_adapt_b")
        pw1_b = _r64(v64, f"side{li}_pw1_b"); pw2_b = _r64(v64, f"side{li}_pw2_b")
        dw0 = _r64(v64, f"side{li}_dw_w0"); dw1 = _r64(v64, f"side{li}_dw_w1")
        dw2 = _r64(v64, f"side{li}_dw_w2"); dw_b = _r64(v64, f"side{li}_dw_b")
        ln1_g = _r64(v64, f"side{li}_ln1_g"); ln1_b = _r64(v64, f"side{li}_ln1_b")
        q_b = _r64(v64, f"side{li}_q_b"); k_b = _r64(v64, f"side{li}_k_b")
        v_b = _r64(v64, f"side{li}_v_b"); o_b = _r64(v64, f"side{li}_o_b")
        sfc2_b = _r64(v64, f"side{li}_fc2_b")

        # ---- adaptation of the trunk activation of the same layer ----
        ad = jnp.dot(_ln(acts[li], pre_g, pre_b), adapt_w,
                     preferred_element_type=f32) + adapt_b                   # (20, 64)
        tok = ad[:BT, :]                                                     # cls -> x_token
        xs = 0.5 * xs + 0.5 * ad[BT:, :]
        # TODO(synk): MOSSBlock correlation branch skipped (corr_layer_index=[] and the
        #             class is not defined in the reference source).

        # ---- AttnCBlock conv branch: x += pw2(dw(pw1(bn_1(x)))) ----
        z = jnp.dot(xs * BN_SCALE, pw1_w, preferred_element_type=f32) + pw1_b  # (16, 64)
        for bb in range(B):
            for tt in range(T):
                f = bb * T + tt
                acc = z[f * P:(f + 1) * P, :] * dw1 + dw_b
                if tt + 1 < T:
                    acc = acc + z[(f + 1) * P:(f + 2) * P, :] * dw2
                if tt - 1 >= 0:
                    acc = acc + z[(f - 1) * P:f * P, :] * dw0
                zo_sc[f * P:(f + 1) * P, :] = acc
        xs = xs + jnp.dot(zo_sc[...], pw2_w, preferred_element_type=f32) + pw2_b

        # ---- shift_token (half-channel temporal shift, zero padded) ----
        for bb in range(B):
            for tt in range(T):
                f = bb * T + tt
                nxt = tok[f + 1:f + 2, :] if tt + 1 < T else jnp.zeros((1, S), f32)
                prv = tok[f - 1:f, :] if tt - 1 >= 0 else jnp.zeros((1, S), f32)
                sh_sc[f:f + 1, :] = jnp.where(lane_row < fold, nxt, prv)

        # ---- cross attention: query = spatial tokens, keys/values = [token ; spatial] ----
        tok_ln = _ln(sh_sc[...], ln1_g, ln1_b)                               # (4, 64)
        spat_ln = _ln(xs + side_pos, ln1_g, ln1_b)                           # pos only in attn
        kv_sc[0:BT, :] = tok_ln
        kv_sc[BT:, :] = spat_ln
        kv_in = kv_sc[...]                                                   # (20, 64)
        q = jnp.dot(spat_ln, q_w, preferred_element_type=f32) + q_b          # (16, 64)
        k = jnp.dot(kv_in, k_w, preferred_element_type=f32) + k_b            # (20, 64)
        v = jnp.dot(kv_in, v_w, preferred_element_type=f32) + v_b
        s = jax.lax.dot_general(q, k, _NT,
                                preferred_element_type=f32) * mha_scale + side_mask  # (16, 20)
        o = jnp.dot(_softmax_rows(s), v, preferred_element_type=f32)         # (16, 64)
        xs = xs + jnp.dot(o, o_w, preferred_element_type=f32) + o_b

        # ---- CMlp branch: x += fc2(GELU(fc1(bn_2(x)))) ----
        h1 = _gelu(jnp.dot(xs * BN_SCALE, sfc1_w, preferred_element_type=f32) + sfc1_b)
        xs = xs + jnp.dot(h1, sfc2_w, preferred_element_type=f32) + sfc2_b

    # ---------------- head: side_post_bn (eval) + mean over (t, w, h) ------------
    for bb in range(B):
        seg = xs[bb * T * P:(bb + 1) * T * P, :]                             # (T*P, 64)
        out_ref[bb:bb + 1, :] = jnp.sum(seg, axis=0, keepdims=True) * (BN_SCALE / (T * P))


# ----------------------------- host-side wrapper ------------------------------
def _patchify(x, p):
    """(BT, C, W, H) -> (BT, P, C*p*p); patch index = wp*hp_count + hp, flatten (C, pw, ph)."""
    bt, c, w, h = x.shape
    wp, hp = w // p, h // p
    pt = x.reshape(bt, c, wp, p, hp, p)
    pt = jnp.transpose(pt, (0, 2, 4, 1, 3, 5)).reshape(bt, wp * hp, c * p * p)
    return pt


@jax.jit
def vision_transformer_forward(x, params):
    x = x.astype(jnp.float32)
    pt = _patchify(x, PATCH)                                     # (BT, P, CPP)

    # trunk tokens: BT zero CLS placeholder rows first, then the BT*P patch rows.
    patch_rows = pt.reshape(BT * P, CPP)
    trunk_patches = jnp.concatenate(
        [jnp.zeros((BT, CPP), jnp.float32), patch_rows], axis=0)             # (20, 192)

    # side stem: time-shifted K-concat so the (3,p,p)/(1,p,p) Conv3d is one K=576 matmul.
    ptb = pt.reshape(B, T, P, CPP)
    zpad = jnp.zeros((B, 1, P, CPP), jnp.float32)
    prv = jnp.concatenate([zpad, ptb[:, :-1]], axis=1)
    nxt = jnp.concatenate([ptb[:, 1:], zpad], axis=1)
    side_patches = jnp.concatenate([prv, ptb, nxt], axis=-1).reshape(BT * P, 3 * CPP)

    vals = [trunk_patches, side_patches,
            jnp.asarray(_TRUNK_MASK_NP), jnp.asarray(_SIDE_MASK_NP)]
    vals += [params[n] for n in INPUT_NAMES[4:]]

    in_specs = [pl.BlockSpec(v.shape, (lambda i, nd=v.ndim: (0,) * nd)) for v in vals]
    bytes_accessed = sum(int(v.size) * 4 for v in vals) + B * SIDE_DIM * 4

    # Single grid step: all B*T frames are row-stacked inside the kernel, so there is no
    # per-step pipelining / double-buffering overhead and only one prologue DMA per input.
    # (On v7x one could re-split B across a grid of 2 with CORE_PARALLEL; at B=2 and this
    #  problem size the single-step version is kept.)
    out = pl.pallas_call(
        _forward_kernel,
        out_shape=jax.ShapeDtypeStruct((B, SIDE_DIM), jnp.float32),
        grid=(1,),
        in_specs=in_specs,
        out_specs=pl.BlockSpec((B, SIDE_DIM), lambda i: (0, 0)),
        scratch_shapes=[
            pltpu.VMEM((R_TRUNK, EMBED_DIM), jnp.float32),   # per-head attn output assembly
            pltpu.VMEM((R_TRUNK, SIDE_DIM), jnp.float32),    # [token ; spatial] K/V assembly
            pltpu.VMEM((R_SIDE, SIDE_DIM), jnp.float32),     # temporal depthwise conv output
            pltpu.VMEM((BT, SIDE_DIM), jnp.float32),         # shifted cls tokens
        ],
        compiler_params=pltpu.CompilerParams(dimension_semantics=("arbitrary",)),
        cost_estimate=pl.CostEstimate(flops=7_000_000, transcendentals=40_000,
                                      bytes_accessed=int(bytes_accessed)),
    )(*vals)
    return out


# ----------------------------- parameter init ---------------------------------
def init_params(key):
    D, S = EMBED_DIM, SIDE_DIM
    keys = iter(jax.random.split(key, 512))

    def nrm(shape, std=0.02):
        return (std * jax.random.normal(next(keys), shape)).astype(jnp.float32)

    def zeros(shape):
        return jnp.zeros(shape, jnp.float32)

    def ones(shape):
        return jnp.ones(shape, jnp.float32)

    p = {}
    # trunk patch embed (Conv2d as matmul) + cls token + positional embedding
    cls_token = nrm((1, D))
    pos_embed = nrm((P + 1, D))
    patch_b = zeros((1, D))
    p["patch_w"] = nrm((CPP, D))
    p["trunk_add"] = jnp.concatenate(
        [jnp.tile(cls_token + pos_embed[0:1, :], (BT, 1)),
         jnp.tile(patch_b + pos_embed[1:, :], (BT, 1))], axis=0)             # (20, D)

    # side stem Conv3d weight as matmul over the 3 temporal taps + spatial positions
    p["side_w"] = nrm((3 * CPP, S))
    p["side_pos"] = jnp.tile(nrm((P, S), std=0.01), (BT, 1))                 # (16, S)

    # -------- packed small-vector tables --------
    sm32, sm64 = {}, {}
    for li in range(DEPTH):
        sm32[f"blk{li}_ln1_g"] = ones((1, D)); sm32[f"blk{li}_ln1_b"] = zeros((1, D))
        sm32[f"blk{li}_proj_b"] = zeros((1, D))
        sm32[f"blk{li}_ln2_g"] = ones((1, D)); sm32[f"blk{li}_ln2_b"] = zeros((1, D))
        sm32[f"blk{li}_fc2_b"] = zeros((1, D))
        sm32[f"side{li}_pre_ln_g"] = ones((1, D)); sm32[f"side{li}_pre_ln_b"] = zeros((1, D))

    sm64["side_b"] = zeros((1, S))
    for li in range(DEPTH):
        sm64[f"side{li}_adapt_b"] = zeros((1, S))
        sm64[f"side{li}_pw1_b"] = zeros((1, S))
        sm64[f"side{li}_dw_w0"] = nrm((1, S), std=S ** -0.5)
        sm64[f"side{li}_dw_w1"] = nrm((1, S), std=S ** -0.5)
        sm64[f"side{li}_dw_w2"] = nrm((1, S), std=S ** -0.5)
        sm64[f"side{li}_dw_b"] = zeros((1, S))
        sm64[f"side{li}_pw2_b"] = zeros((1, S))
        sm64[f"side{li}_ln1_g"] = ones((1, S)); sm64[f"side{li}_ln1_b"] = zeros((1, S))
        sm64[f"side{li}_q_b"] = zeros((1, S)); sm64[f"side{li}_k_b"] = zeros((1, S))
        sm64[f"side{li}_v_b"] = zeros((1, S)); sm64[f"side{li}_o_b"] = zeros((1, S))
        sm64[f"side{li}_fc2_b"] = zeros((1, S))

    p["vec32"] = jnp.concatenate([sm32[n] for n in _VEC32_NAMES], axis=0)    # (16, 32)
    p["vec64"] = jnp.concatenate([sm64[n] for n in _VEC64_NAMES], axis=0)    # (29, 64)
    p["vec128"] = zeros((DEPTH, MLP_H))       # trunk fc1 biases (init to 0)
    p["vec256"] = zeros((DEPTH, SMLP_H))      # side  fc1 biases (init to 0)

    # -------- stacked weight matrices (leading layer axis) --------
    p["trunk_qkv_w"] = jnp.stack([nrm((D, 3 * D)) for _ in range(DEPTH)], axis=0)
    p["trunk_proj_w"] = jnp.stack([nrm((D, D)) for _ in range(DEPTH)], axis=0)
    p["trunk_fc1_w"] = jnp.stack([nrm((D, MLP_H)) for _ in range(DEPTH)], axis=0)
    p["trunk_fc2_w"] = jnp.stack([nrm((MLP_H, D)) for _ in range(DEPTH)], axis=0)

    p["side_adapt_w"] = jnp.stack([nrm((D, S)) for _ in range(DEPTH)], axis=0)
    attn_std = S ** -0.5
    proj_std = S ** -0.5 * 24 ** -0.5
    w64 = []
    for _ in range(DEPTH):
        w64 += [nrm((S, S)),                     # pw1
                nrm((S, S)),                     # pw2
                nrm((S, S), std=attn_std),       # q
                nrm((S, S), std=attn_std),       # k
                nrm((S, S), std=attn_std),       # v
                nrm((S, S), std=proj_std)]       # attn out proj
    p["side_w64"] = jnp.stack(w64, axis=0)                                    # (12, S, S)
    p["side_fc1_w"] = jnp.stack([nrm((S, SMLP_H), std=(2 * S) ** -0.5)
                                 for _ in range(DEPTH)], axis=0)
    p["side_fc2_w"] = jnp.stack([nrm((SMLP_H, S), std=proj_std)
                                 for _ in range(DEPTH)], axis=0)
    return p


# ----------------------------- main --------------------------------------------
if __name__ == "__main__":
    key = jax.random.PRNGKey(0)
    pkey, xkey = jax.random.split(key)
    params = init_params(pkey)
    x = jax.random.normal(xkey, (B * T, IN_CHANS, IMG_SIZE, IMG_SIZE), dtype=jnp.float32)
    out = vision_transformer_forward(x, params)
    out = jax.block_until_ready(out)
    assert out.shape == (B, SIDE_DIM), out.shape
    assert bool(jnp.all(jnp.isfinite(out)))
    print("KERNEL_OK")
</pallas_src>

<mosaic_0001>
module attributes {stable_mosaic.version = 11 : i64} {
  func.func @_forward_kernel(%arg0: i32, %arg1: memref<20x192xf32, #tpu.memory_space<vmem>>, %arg2: memref<16x576xf32, #tpu.memory_space<vmem>>, %arg3: memref<20x20xf32, #tpu.memory_space<vmem>>, %arg4: memref<16x20xf32, #tpu.memory_space<vmem>>, %arg5: memref<192x32xf32, #tpu.memory_space<vmem>>, %arg6: memref<20x32xf32, #tpu.memory_space<vmem>>, %arg7: memref<576x64xf32, #tpu.memory_space<vmem>>, %arg8: memref<16x64xf32, #tpu.memory_space<vmem>>, %arg9: memref<16x32xf32, #tpu.memory_space<vmem>>, %arg10: memref<29x64xf32, #tpu.memory_space<vmem>>, %arg11: memref<2x128xf32, #tpu.memory_space<vmem>>, %arg12: memref<2x256xf32, #tpu.memory_space<vmem>>, %arg13: memref<2x32x96xf32, #tpu.memory_space<vmem>>, %arg14: memref<2x32x32xf32, #tpu.memory_space<vmem>>, %arg15: memref<2x32x128xf32, #tpu.memory_space<vmem>>, %arg16: memref<2x128x32xf32, #tpu.memory_space<vmem>>, %arg17: memref<2x32x64xf32, #tpu.memory_space<vmem>>, %arg18: memref<12x64x64xf32, #tpu.memory_space<vmem>>, %arg19: memref<2x64x256xf32, #tpu.memory_space<vmem>>, %arg20: memref<2x256x64xf32, #tpu.memory_space<vmem>>, %arg21: memref<2x64xf32, #tpu.memory_space<vmem>>, %arg22: memref<20x32xf32, #tpu.memory_space<vmem>>, %arg23: memref<20x64xf32, #tpu.memory_space<vmem>>, %arg24: memref<16x64xf32, #tpu.memory_space<vmem>>, %arg25: memref<4x64xf32, #tpu.memory_space<vmem>>) attributes {dimension_semantics = [#tpu.dimension_semantics<arbitrary>], iteration_bounds = array<i64: 1>, scalar_prefetch = 0 : i64, scratch_operands = 4 : i64, tpu.core_type = #tpu.core_type<tc>, window_params = [{pipeline_mode = #tpu.pipeline_mode<synchronous>, transform_indices = @transform_0, window_bounds = array<i64: 20, 192>}, {pipeline_mode = #tpu.pipeline_mode<synchronous>, transform_indices = @transform_1, window_bounds = array<i64: 16, 576>}, {pipeline_mode = #tpu.pipeline_mode<synchronous>, transform_indices = @transform_2, window_bounds = array<i64: 20, 20>}, {pipeline_mode = #tpu.pipeline_mode<synchronous>, transform_indices = @transform_3, window_bounds = array<i64: 16, 20>}, {pipeline_mode = #tpu.pipeline_mode<synchronous>, transform_indices = @transform_4, window_bounds = array<i64: 192, 32>}, {pipeline_mode = #tpu.pipeline_mode<synchronous>, transform_indices = @transform_5, window_bounds = array<i64: 20, 32>}, {pipeline_mode = #tpu.pipeline_mode<synchronous>, transform_indices = @transform_6, window_bounds = array<i64: 576, 64>}, {pipeline_mode = #tpu.pipeline_mode<synchronous>, transform_indices = @transform_7, window_bounds = array<i64: 16, 64>}, {pipeline_mode = #tpu.pipeline_mode<synchronous>, transform_indices = @transform_8, window_bounds = array<i64: 16, 32>}, {pipeline_mode = #tpu.pipeline_mode<synchronous>, transform_indices = @transform_9, window_bounds = array<i64: 29, 64>}, {pipeline_mode = #tpu.pipeline_mode<synchronous>, transform_indices = @transform_10, window_bounds = array<i64: 2, 128>}, {pipeline_mode = #tpu.pipeline_mode<synchronous>, transform_indices = @transform_11, window_bounds = array<i64: 2, 256>}, {pipeline_mode = #tpu.pipeline_mode<synchronous>, transform_indices = @transform_12, window_bounds = array<i64: 2, 32, 96>}, {pipeline_mode = #tpu.pipeline_mode<synchronous>, transform_indices = @transform_13, window_bounds = array<i64: 2, 32, 32>}, {pipeline_mode = #tpu.pipeline_mode<synchronous>, transform_indices = @transform_14, window_bounds = array<i64: 2, 32, 128>}, {pipeline_mode = #tpu.pipeline_mode<synchronous>, transform_indices = @transform_15, window_bounds = array<i64: 2, 128, 32>}, {pipeline_mode = #tpu.pipeline_mode<synchronous>, transform_indices = @transform_16, window_bounds = array<i64: 2, 32, 64>}, {pipeline_mode = #tpu.pipeline_mode<synchronous>, transform_indices = @transform_17, window_bounds = array<i64: 12, 64, 64>}, {pipeline_mode = #tpu.pipeline_mode<synchronous>, transform_indices = @transform_18, window_bounds = array<i64: 2, 64, 256>}, {pipeline_mode = #tpu.pipeline_mode<synchronous>, transform_indices = @transform_19, window_bounds = array<i64: 2, 256, 64>}, {pipeline_mode = #tpu.pipeline_mode<synchronous>, transform_indices = @transform_20, window_bounds = array<i64: 2, 64>}]} {
    %c0 = arith.constant 0 : index
    %c0_0 = arith.constant 0 : index
    %0 = vector.load %arg9[%c0, %c0_0] : memref<16x32xf32, #tpu.memory_space<vmem>>, vector<16x32xf32>
    %c0_1 = arith.constant 0 : index
    %c0_2 = arith.constant 0 : index
    %1 = vector.load %arg10[%c0_1, %c0_2] : memref<29x64xf32, #tpu.memory_space<vmem>>, vector<29x64xf32>
    %c0_3 = arith.constant 0 : index
    %c0_4 = arith.constant 0 : index
    %2 = vector.load %arg11[%c0_3, %c0_4] : memref<2x128xf32, #tpu.memory_space<vmem>>, vector<2x128xf32>
    %c0_5 = arith.constant 0 : index
    %c0_6 = arith.constant 0 : index
    %3 = vector.load %arg12[%c0_5, %c0_6] : memref<2x256xf32, #tpu.memory_space<vmem>>, vector<2x256xf32>
    %c0_7 = arith.constant 0 : index
    %c0_8 = arith.constant 0 : index
    %4 = vector.load %arg3[%c0_7, %c0_8] : memref<20x20xf32, #tpu.memory_space<vmem>>, vector<20x20xf32>
    %c0_9 = arith.constant 0 : index
    %c0_10 = arith.constant 0 : index
    %5 = vector.load %arg4[%c0_9, %c0_10] : memref<16x20xf32, #tpu.memory_space<vmem>>, vector<16x20xf32>
    %c0_11 = arith.constant 0 : index
    %c0_12 = arith.constant 0 : index
    %6 = vector.load %arg1[%c0_11, %c0_12] : memref<20x192xf32, #tpu.memory_space<vmem>>, vector<20x192xf32>
    %c0_13 = arith.constant 0 : index
    %c0_14 = arith.constant 0 : index
    %7 = vector.load %arg5[%c0_13, %c0_14] : memref<192x32xf32, #tpu.memory_space<vmem>>, vector<192x32xf32>
    %cst = arith.constant dense<0.000000e+00> : vector<20x32xf32>
    %8 = tpu.matmul %6, %7, %cst {dimension_numbers = #tpu.dot_dimension_numbers<[1], [0], [0], [1], [0, 0, 1, 1], [], []>} : vector<20x192xf32>, vector<192x32xf32>, vector<20x32xf32> -> vector<20x32xf32>
    %c0_15 = arith.constant 0 : index
    %c0_16 = arith.constant 0 : index
    %9 = vector.load %arg6[%c0_15, %c0_16] : memref<20x32xf32, #tpu.memory_space<vmem>>, vector<20x32xf32>
    %10 = arith.addf %8, %9 : vector<20x32xf32>
    %c0_17 = arith.constant 0 : index
    %c0_18 = arith.constant 0 : index
    %c0_19 = arith.constant 0 : index
    %11 = vector.load %arg13[%c0_17, %c0_18, %c0_19] : memref<2x32x96xf32, #tpu.memory_space<vmem>>, vector<1x32x96xf32>
    %12 = vector.shape_cast %11 : vector<1x32x96xf32> to vector<32x96xf32>
    %c0_20 = arith.constant 0 : index
    %c0_21 = arith.constant 0 : index
    %c0_22 = arith.constant 0 : index
    %13 = vector.load %arg14[%c0_20, %c0_21, %c0_22] : memref<2x32x32xf32, #tpu.memory_space<vmem>>, vector<1x32x32xf32>
    %14 = vector.shape_cast %13 : vector<1x32x32xf32> to vector<32x32xf32>
    %c0_23 = arith.constant 0 : index
    %c0_24 = arith.constant 0 : index
    %c0_25 = arith.constant 0 : index
    %15 = vector.load %arg15[%c0_23, %c0_24, %c0_25] : memref<2x32x128xf32, #tpu.memory_space<vmem>>, vector<1x32x128xf32>
    %16 = vector.shape_cast %15 : vector<1x32x128xf32> to vector<32x128xf32>
    %c0_26 = arith.constant 0 : index
    %c0_27 = arith.constant 0 : index
    %c0_28 = arith.constant 0 : index
    %17 = vector.load %arg16[%c0_26, %c0_27, %c0_28] : memref<2x128x32xf32, #tpu.memory_space<vmem>>, vector<1x128x32xf32>
    %18 = vector.shape_cast %17 : vector<1x128x32xf32> to vector<128x32xf32>
    %19 = vector.extract_strided_slice %0 {offsets = [0, 0], sizes = [1, 32], strides = [1, 1]} : vector<16x32xf32> to vector<1x32xf32>
    %20 = vector.extract_strided_slice %0 {offsets = [1, 0], sizes = [1, 32], strides = [1, 1]} : vector<16x32xf32> to vector<1x32xf32>
    %21 = vector.extract_strided_slice %0 {offsets = [3, 0], sizes = [1, 32], strides = [1, 1]} : vector<16x32xf32> to vector<1x32xf32>
    %22 = vector.extract_strided_slice %0 {offsets = [4, 0], sizes = [1, 32], strides = [1, 1]} : vector<16x32xf32> to vector<1x32xf32>
    %23 = vector.extract_strided_slice %0 {offsets = [2, 0], sizes = [1, 32], strides = [1, 1]} : vector<16x32xf32> to vector<1x32xf32>
    %24 = vector.extract_strided_slice %0 {offsets = [5, 0], sizes = [1, 32], strides = [1, 1]} : vector<16x32xf32> to vector<1x32xf32>
    %25 = vector.extract_strided_slice %2 {offsets = [0, 0], sizes = [1, 128], strides = [1, 1]} : vector<2x128xf32> to vector<1x128xf32>
    %cst_29 = arith.constant dense<0.000000e+00> : vector<20xf32>
    %26 = vector.multi_reduction <add>, %10, %cst_29 [1] : vector<20x32xf32> to vector<20xf32>
    %27 = vector.shape_cast %26 : vector<20xf32> to vector<20x1xf32>
    %cst_30 = arith.constant 3.200000e+01 : f32
    %28 = vector.broadcast %cst_30 : f32 to vector<20x1xf32>
    %29 = arith.divf %27, %28 : vector<20x1xf32>
    %30 = vector.broadcast %29 : vector<20x1xf32> to vector<20x32xf32>
    %31 = arith.subf %10, %30 : vector<20x32xf32>
    %32 = arith.mulf %31, %31 : vector<20x32xf32>
    %cst_31 = arith.constant dense<0.000000e+00> : vector<20xf32>
    %33 = vector.multi_reduction <add>, %32, %cst_31 [1] : vector<20x32xf32> to vector<20xf32>
    %34 = vector.shape_cast %33 : vector<20xf32> to vector<20x1xf32>
    %cst_32 = arith.constant 3.200000e+01 : f32
    %35 = vector.broadcast %cst_32 : f32 to vector<20x1xf32>
    %36 = arith.divf %34, %35 : vector<20x1xf32>
    %cst_33 = arith.constant 9.99999974E-6 : f32
    %37 = vector.broadcast %cst_33 : f32 to vector<20x1xf32>
    %38 = arith.addf %36, %37 : vector<20x1xf32>
    %39 = math.rsqrt %38 : vector<20x1xf32>
    %40 = vector.broadcast %39 : vector<20x1xf32> to vector<20x32xf32>
    %41 = arith.mulf %31, %40 : vector<20x32xf32>
    %42 = vector.broadcast %19 : vector<1x32xf32> to vector<20x32xf32>
    %43 = arith.mulf %41, %42 : vector<20x32xf32>
    %44 = vector.broadcast %20 : vector<1x32xf32> to vector<20x32xf32>
    %45 = arith.addf %43, %44 : vector<20x32xf32>
    %cst_34 = arith.constant dense<0.000000e+00> : vector<20x96xf32>
    %46 = tpu.matmul %45, %12, %cst_34 {dimension_numbers = #tpu.dot_dimension_numbers<[1], [0], [0], [1], [0, 0, 1, 1], [], []>} : vector<20x32xf32>, vector<32x96xf32>, vector<20x96xf32> -> vector<20x96xf32>
    %47 = vector.extract_strided_slice %46 {offsets = [0, 0], sizes = [20, 8], strides = [1, 1]} : vector<20x96xf32> to vector<20x8xf32>
    %48 = vector.extract_strided_slice %46 {offsets = [0, 32], sizes = [20, 8], strides = [1, 1]} : vector<20x96xf32> to vector<20x8xf32>
    %49 = vector.extract_strided_slice %46 {offsets = [0, 64], sizes = [20, 8], strides = [1, 1]} : vector<20x96xf32> to vector<20x8xf32>
    %cst_35 = arith.constant dense<0.000000e+00> : vector<20x20xf32>
    %50 = tpu.matmul %47, %48, %cst_35 {dimension_numbers = #tpu.dot_dimension_numbers<[1], [1], [0], [0], [0, 0, 1, 0], [], []>} : vector<20x8xf32>, vector<20x8xf32>, vector<20x20xf32> -> vector<20x20xf32>
    %cst_36 = arith.constant 0.353553385 : f32
    %51 = vector.broadcast %cst_36 : f32 to vector<20x20xf32>
    %52 = arith.mulf %50, %51 : vector<20x20xf32>
    %53 = arith.addf %52, %4 : vector<20x20xf32>
    %cst_37 = arith.constant dense<0xFF800000> : vector<20xf32>
    %54 = vector.multi_reduction <maximumf>, %53, %cst_37 [1] : vector<20x20xf32> to vector<20xf32>
    %55 = vector.shape_cast %54 : vector<20xf32> to vector<20x1xf32>
    %56 = vector.broadcast %55 : vector<20x1xf32> to vector<20x20xf32>
    %57 = arith.subf %53, %56 : vector<20x20xf32>
    %58 = math.exp %57 : vector<20x20xf32>
    %cst_38 = arith.constant dense<0.000000e+00> : vector<20xf32>
    %59 = vector.multi_reduction <add>, %58, %cst_38 [1] : vector<20x20xf32> to vector<20xf32>
    %60 = vector.shape_cast %59 : vector<20xf32> to vector<20x1xf32>
    %61 = tpu.reciprocal %60 {approx = true} : vector<20x1xf32> -> vector<20x1xf32>
    %62 = vector.broadcast %61 : vector<20x1xf32> to vector<20x20xf32>
    %63 = arith.mulf %58, %62 : vector<20x20xf32>
    %cst_39 = arith.constant dense<0.000000e+00> : vector<20x8xf32>
    %64 = tpu.matmul %63, %49, %cst_39 {dimension_numbers = #tpu.dot_dimension_numbers<[1], [0], [0], [1], [0, 0, 1, 1], [], []>} : vector<20x20xf32>, vector<20x8xf32>, vector<20x8xf32> -> vector<20x8xf32>
    %c0_40 = arith.constant 0 : index
    %c0_41 = arith.constant 0 : index
    %65 = vector.load %arg22[%c0_40, %c0_41] : memref<20x32xf32, #tpu.memory_space<vmem>>, vector<20x8xf32>
    tpu.vector_store %arg22[%c0_40, %c0_41], %64 {strides = array<i32>} : memref<20x32xf32, #tpu.memory_space<vmem>>, vector<20x8xf32>,
    %66 = vector.extract_strided_slice %46 {offsets = [0, 8], sizes = [20, 8], strides = [1, 1]} : vector<20x96xf32> to vector<20x8xf32>
    %67 = vector.extract_strided_slice %46 {offsets = [0, 40], sizes = [20, 8], strides = [1, 1]} : vector<20x96xf32> to vector<20x8xf32>
    %68 = vector.extract_strided_slice %46 {offsets = [0, 72], sizes = [20, 8], strides = [1, 1]} : vector<20x96xf32> to vector<20x8xf32>
    %cst_42 = arith.constant dense<0.000000e+00> : vector<20x20xf32>
    %69 = tpu.matmul %66, %67, %cst_42 {dimension_numbers = #tpu.dot_dimension_numbers<[1], [1], [0], [0], [0, 0, 1, 0], [], []>} : vector<20x8xf32>, vector<20x8xf32>, vector<20x20xf32> -> vector<20x20xf32>
    %cst_43 = arith.constant 0.353553385 : f32
    %70 = vector.broadcast %cst_43 : f32 to vector<20x20xf32>
    %71 = arith.mulf %69, %70 : vector<20x20xf32>
    %72 = arith.addf %71, %4 : vector<20x20xf32>
    %cst_44 = arith.constant dense<0xFF800000> : vector<20xf32>
    %73 = vector.multi_reduction <maximumf>, %72, %cst_44 [1] : vector<20x20xf32> to vector<20xf32>
    %74 = vector.shape_cast %73 : vector<20xf32> to vector<20x1xf32>
    %75 = vector.broadcast %74 : vector<20x1xf32> to vector<20x20xf32>
    %76 = arith.subf %72, %75 : vector<20x20xf32>
    %77 = math.exp %76 : vector<20x20xf32>
    %cst_45 = arith.constant dense<0.000000e+00> : vector<20xf32>
    %78 = vector.multi_reduction <add>, %77, %cst_45 [1] : vector<20x20xf32> to vector<20xf32>
    %79 = vector.shape_cast %78 : vector<20xf32> to vector<20x1xf32>
    %80 = tpu.reciprocal %79 {approx = true} : vector<20x1xf32> -> vector<20x1xf32>
    %81 = vector.broadcast %80 : vector<20x1xf32> to vector<20x20xf32>
    %82 = arith.mulf %77, %81 : vector<20x20xf32>
    %cst_46 = arith.constant dense<0.000000e+00> : vector<20x8xf32>
    %83 = tpu.matmul %82, %68, %cst_46 {dimension_numbers = #tpu.dot_dimension_numbers<[1], [0], [0], [1], [0, 0, 1, 1], [], []>} : vector<20x20xf32>, vector<20x8xf32>, vector<20x8xf32> -> vector<20x8xf32>
    %c0_47 = arith.constant 0 : index
    %c8 = arith.constant 8 : index
    %84 = vector.load %arg22[%c0_47, %c8] : memref<20x32xf32, #tpu.memory_space<vmem>>, vector<20x8xf32>
    tpu.vector_store %arg22[%c0_47, %c8], %83 {strides = array<i32>} : memref<20x32xf32, #tpu.memory_space<vmem>>, vector<20x8xf32>,
    %85 = vector.extract_strided_slice %46 {offsets = [0, 16], sizes = [20, 8], strides = [1, 1]} : vector<20x96xf32> to vector<20x8xf32>
    %86 = vector.extract_strided_slice %46 {offsets = [0, 48], sizes = [20, 8], strides = [1, 1]} : vector<20x96xf32> to vector<20x8xf32>
    %87 = vector.extract_strided_slice %46 {offsets = [0, 80], sizes = [20, 8], strides = [1, 1]} : vector<20x96xf32> to vector<20x8xf32>
    %cst_48 = arith.constant dense<0.000000e+00> : vector<20x20xf32>
    %88 = tpu.matmul %85, %86, %cst_48 {dimension_numbers = #tpu.dot_dimension_numbers<[1], [1], [0], [0], [0, 0, 1, 0], [], []>} : vector<20x8xf32>, vector<20x8xf32>, vector<20x20xf32> -> vector<20x20xf32>
    %cst_49 = arith.constant 0.353553385 : f32
    %89 = vector.broadcast %cst_49 : f32 to vector<20x20xf32>
    %90 = arith.mulf %88, %89 : vector<20x20xf32>
    %91 = arith.addf %90, %4 : vector<20x20xf32>
    %cst_50 = arith.constant dense<0xFF800000> : vector<20xf32>
    %92 = vector.multi_reduction <maximumf>, %91, %cst_50 [1] : vector<20x20xf32> to vector<20xf32>
    %93 = vector.shape_cast %92 : vector<20xf32> to vector<20x1xf32>
    %94 = vector.broadcast %93 : vector<20x1xf32> to vector<20x20xf32>
    %95 = arith.subf %91, %94 : vector<20x20xf32>
    %96 = math.exp %95 : vector<20x20xf32>
    %cst_51 = arith.constant dense<0.000000e+00> : vector<20xf32>
    %97 = vector.multi_reduction <add>, %96, %cst_51 [1] : vector<20x20xf32> to vector<20xf32>
    %98 = vector.shape_cast %97 : vector<20xf32> to vector<20x1xf32>
    %99 = tpu.reciprocal %98 {approx = true} : vector<20x1xf32> -> vector<20x1xf32>
    %100 = vector.broadcast %99 : vector<20x1xf32> to vector<20x20xf32>
    %101 = arith.mulf %96, %100 : vector<20x20xf32>
    %cst_52 = arith.constant dense<0.000000e+00> : vector<20x8xf32>
    %102 = tpu.matmul %101, %87, %cst_52 {dimension_numbers = #tpu.dot_dimension_numbers<[1], [0], [0], [1], [0, 0, 1, 1], [], []>} : vector<20x20xf32>, vector<20x8xf32>, vector<20x8xf32> -> vector<20x8xf32>
    %c0_53 = arith.constant 0 : index
    %c16 = arith.constant 16 : index
    %103 = vector.load %arg22[%c0_53, %c16] : memref<20x32xf32, #tpu.memory_space<vmem>>, vector<20x8xf32>
    tpu.vector_store %arg22[%c0_53, %c16], %102 {strides = array<i32>} : memref<20x32xf32, #tpu.memory_space<vmem>>, vector<20x8xf32>,
    %104 = vector.extract_strided_slice %46 {offsets = [0, 24], sizes = [20, 8], strides = [1, 1]} : vector<20x96xf32> to vector<20x8xf32>
    %105 = vector.extract_strided_slice %46 {offsets = [0, 56], sizes = [20, 8], strides = [1, 1]} : vector<20x96xf32> to vector<20x8xf32>
    %106 = vector.extract_strided_slice %46 {offsets = [0, 88], sizes = [20, 8], strides = [1, 1]} : vector<20x96xf32> to vector<20x8xf32>
    %cst_54 = arith.constant dense<0.000000e+00> : vector<20x20xf32>
    %107 = tpu.matmul %104, %105, %cst_54 {dimension_numbers = #tpu.dot_dimension_numbers<[1], [1], [0], [0], [0, 0, 1, 0], [], []>} : vector<20x8xf32>, vector<20x8xf32>, vector<20x20xf32> -> vector<20x20xf32>
    %cst_55 = arith.constant 0.353553385 : f32
    %108 = vector.broadcast %cst_55 : f32 to vector<20x20xf32>
    %109 = arith.mulf %107, %108 : vector<20x20xf32>
    %110 = arith.addf %109, %4 : vector<20x20xf32>
    %cst_56 = arith.constant dense<0xFF800000> : vector<20xf32>
    %111 = vector.multi_reduction <maximumf>, %110, %cst_56 [1] : vector<20x20xf32> to vector<20xf32>
    %112 = vector.shape_cast %111 : vector<20xf32> to vector<20x1xf32>
    %113 = vector.broadcast %112 : vector<20x1xf32> to vector<20x20xf32>
    %114 = arith.subf %110, %113 : vector<20x20xf32>
    %115 = math.exp %114 : vector<20x20xf32>
    %cst_57 = arith.constant dense<0.000000e+00> : vector<20xf32>
    %116 = vector.multi_reduction <add>, %115, %cst_57 [1] : vector<20x20xf32> to vector<20xf32>
    %117 = vector.shape_cast %116 : vector<20xf32> to vector<20x1xf32>
    %118 = tpu.reciprocal %117 {approx = true} : vector<20x1xf32> -> vector<20x1xf32>
    %119 = vector.broadcast %118 : vector<20x1xf32> to vector<20x20xf32>
    %120 = arith.mulf %115, %119 : vector<20x20xf32>
    %cst_58 = arith.constant dense<0.000000e+00> : vector<20x8xf32>
    %121 = tpu.matmul %120, %106, %cst_58 {dimension_numbers = #tpu.dot_dimension_numbers<[1], [0], [0], [1], [0, 0, 1, 1], [], []>} : vector<20x20xf32>, vector<20x8xf32>, vector<20x8xf32> -> vector<20x8xf32>
    %c0_59 = arith.constant 0 : index
    %c24 = arith.constant 24 : index
    %122 = vector.load %arg22[%c0_59, %c24] : memref<20x32xf32, #tpu.memory_space<vmem>>, vector<20x8xf32>
    tpu.vector_store %arg22[%c0_59, %c24], %121 {strides = array<i32>} : memref<20x32xf32, #tpu.memory_space<vmem>>, vector<20x8xf32>,
    %c0_60 = arith.constant 0 : index
    %c0_61 = arith.constant 0 : index
    %123 = vector.load %arg22[%c0_60, %c0_61] : memref<20x32xf32, #tpu.memory_space<vmem>>, vector<20x32xf32>
    %cst_62 = arith.constant dense<0.000000e+00> : vector<20x32xf32>
    %124 = tpu.matmul %123, %14, %cst_62 {dimension_numbers = #tpu.dot_dimension_numbers<[1], [0], [0], [1], [0, 0, 1, 1], [], []>} : vector<20x32xf32>, vector<32x32xf32>, vector<20x32xf32> -> vector<20x32xf32>
    %125 = arith.addf %10, %124 : vector<20x32xf32>
    %126 = vector.broadcast %23 : vector<1x32xf32> to vector<20x32xf32>
    %127 = arith.addf %125, %126 : vector<20x32xf32>
    %cst_63 = arith.constant dense<0.000000e+00> : vector<20xf32>
    %128 = vector.multi_reduction <add>, %127, %cst_63 [1] : vector<20x32xf32> to vector<20xf32>
    %129 = vector.shape_cast %128 : vector<20xf32> to vector<20x1xf32>
    %cst_64 = arith.constant 3.200000e+01 : f32
    %130 = vector.broadcast %cst_64 : f32 to vector<20x1xf32>
    %131 = arith.divf %129, %130 : vector<20x1xf32>
    %132 = vector.broadcast %131 : vector<20x1xf32> to vector<20x32xf32>
    %133 = arith.subf %127, %132 : vector<20x32xf32>
    %134 = arith.mulf %133, %133 : vector<20x32xf32>
    %cst_65 = arith.constant dense<0.000000e+00> : vector<20xf32>
    %135 = vector.multi_reduction <add>, %134, %cst_65 [1] : vector<20x32xf32> to vector<20xf32>
    %136 = vector.shape_cast %135 : vector<20xf32> to vector<20x1xf32>
    %cst_66 = arith.constant 3.200000e+01 : f32
    %137 = vector.broadcast %cst_66 : f32 to vector<20x1xf32>
    %138 = arith.divf %136, %137 : vector<20x1xf32>
    %cst_67 = arith.constant 9.99999974E-6 : f32
    %139 = vector.broadcast %cst_67 : f32 to vector<20x1xf32>
    %140 = arith.addf %138, %139 : vector<20x1xf32>
    %141 = math.rsqrt %140 : vector<20x1xf32>
    %142 = vector.broadcast %141 : vector<20x1xf32> to vector<20x32xf32>
    %143 = arith.mulf %133, %142 : vector<20x32xf32>
    %144 = vector.broadcast %21 : vector<1x32xf32> to vector<20x32xf32>
    %145 = arith.mulf %143, %144 : vector<20x32xf32>
    %146 = vector.broadcast %22 : vector<1x32xf32> to vector<20x32xf32>
    %147 = arith.addf %145, %146 : vector<20x32xf32>
    %cst_68 = arith.constant dense<0.000000e+00> : vector<20x128xf32>
    %148 = tpu.matmul %147, %16, %cst_68 {dimension_numbers = #tpu.dot_dimension_numbers<[1], [0], [0], [1], [0, 0, 1, 1], [], []>} : vector<20x32xf32>, vector<32x128xf32>, vector<20x128xf32> -> vector<20x128xf32>
    %149 = vector.broadcast %25 : vector<1x128xf32> to vector<20x128xf32>
    %150 = arith.addf %148, %149 : vector<20x128xf32>
    %cst_69 = arith.constant 5.000000e-01 : f32
    %151 = vector.broadcast %cst_69 : f32 to vector<20x128xf32>
    %152 = arith.mulf %151, %150 : vector<20x128xf32>
    %cst_70 = arith.constant 0.707106769 : f32
    %153 = vector.broadcast %cst_70 : f32 to vector<20x128xf32>
    %154 = arith.mulf %150, %153 : vector<20x128xf32>
    %155 = math.erf %154 : vector<20x128xf32>
    %cst_71 = arith.constant 1.000000e+00 : f32
    %156 = vector.broadcast %cst_71 : f32 to vector<20x128xf32>
    %157 = arith.addf %156, %155 : vector<20x128xf32>
    %158 = arith.mulf %152, %157 : vector<20x128xf32>
    %cst_72 = arith.constant dense<0.000000e+00> : vector<20x32xf32>
    %159 = tpu.matmul %158, %18, %cst_72 {dimension_numbers = #tpu.dot_dimension_numbers<[1], [0], [0], [1], [0, 0, 1, 1], [], []>} : vector<20x128xf32>, vector<128x32xf32>, vector<20x32xf32> -> vector<20x32xf32>
    %160 = arith.addf %127, %159 : vector<20x32xf32>
    %161 = vector.broadcast %24 : vector<1x32xf32> to vector<20x32xf32>
    %162 = arith.addf %160, %161 : vector<20x32xf32>
    %c1 = arith.constant 1 : index
    %c0_73 = arith.constant 0 : index
    %c0_74 = arith.constant 0 : index
    %163 = vector.load %arg13[%c1, %c0_73, %c0_74] : memref<2x32x96xf32, #tpu.memory_space<vmem>>, vector<1x32x96xf32>
    %164 = vector.shape_cast %163 : vector<1x32x96xf32> to vector<32x96xf32>
    %c1_75 = arith.constant 1 : index
    %c0_76 = arith.constant 0 : index
    %c0_77 = arith.constant 0 : index
    %165 = vector.load %arg14[%c1_75, %c0_76, %c0_77] : memref<2x32x32xf32, #tpu.memory_space<vmem>>, vector<1x32x32xf32>
    %166 = vector.shape_cast %165 : vector<1x32x32xf32> to vector<32x32xf32>
    %c1_78 = arith.constant 1 : index
    %c0_79 = arith.constant 0 : index
    %c0_80 = arith.constant 0 : index
    %167 = vector.load %arg15[%c1_78, %c0_79, %c0_80] : memref<2x32x128xf32, #tpu.memory_space<vmem>>, vector<1x32x128xf32>
    %168 = vector.shape_cast %167 : vector<1x32x128xf32> to vector<32x128xf32>
    %c1_81 = arith.constant 1 : index
    %c0_82 = arith.constant 0 : index
    %c0_83 = arith.constant 0 : index
    %169 = vector.load %arg16[%c1_81, %c0_82, %c0_83] : memref<2x128x32xf32, #tpu.memory_space<vmem>>, vector<1x128x32xf32>
    %170 = vector.shape_cast %169 : vector<1x128x32xf32> to vector<128x32xf32>
    %171 = vector.extract_strided_slice %0 {offsets = [6, 0], sizes = [1, 32], strides = [1, 1]} : vector<16x32xf32> to vector<1x32xf32>
    %172 = vector.extract_strided_slice %0 {offsets = [7, 0], sizes = [1, 32], strides = [1, 1]} : vector<16x32xf32> to vector<1x32xf32>
    %173 = vector.extract_strided_slice %0 {offsets = [9, 0], sizes = [1, 32], strides = [1, 1]} : vector<16x32xf32> to vector<1x32xf32>
    %174 = vector.extract_strided_slice %0 {offsets = [10, 0], sizes = [1, 32], strides = [1, 1]} : vector<16x32xf32> to vector<1x32xf32>
    %175 = vector.extract_strided_slice %0 {offsets = [8, 0], sizes = [1, 32], strides = [1, 1]} : vector<16x32xf32> to vector<1x32xf32>
    %176 = vector.extract_strided_slice %0 {offsets = [11, 0], sizes = [1, 32], strides = [1, 1]} : vector<16x32xf32> to vector<1x32xf32>
    %177 = vector.extract_strided_slice %2 {offsets = [1, 0], sizes = [1, 128], strides = [1, 1]} : vector<2x128xf32> to vector<1x128xf32>
    %cst_84 = arith.constant dense<0.000000e+00> : vector<20xf32>
    %178 = vector.multi_reduction <add>, %162, %cst_84 [1] : vector<20x32xf32> to vector<20xf32>
    %179 = vector.shape_cast %178 : vector<20xf32> to vector<20x1xf32>
    %cst_85 = arith.constant 3.200000e+01 : f32
    %180 = vector.broadcast %cst_85 : f32 to vector<20x1xf32>
    %181 = arith.divf %179, %180 : vector<20x1xf32>
    %182 = vector.broadcast %181 : vector<20x1xf32> to vector<20x32xf32>
    %183 = arith.subf %162, %182 : vector<20x32xf32>
    %184 = arith.mulf %183, %183 : vector<20x32xf32>
    %cst_86 = arith.constant dense<0.000000e+00> : vector<20xf32>
    %185 = vector.multi_reduction <add>, %184, %cst_86 [1] : vector<20x32xf32> to vector<20xf32>
    %186 = vector.shape_cast %185 : vector<20xf32> to vector<20x1xf32>
    %cst_87 = arith.constant 3.200000e+01 : f32
    %187 = vector.broadcast %cst_87 : f32 to vector<20x1xf32>
    %188 = arith.divf %186, %187 : vector<20x1xf32>
    %cst_88 = arith.constant 9.99999974E-6 : f32
    %189 = vector.broadcast %cst_88 : f32 to vector<20x1xf32>
    %190 = arith.addf %188, %189 : vector<20x1xf32>
    %191 = math.rsqrt %190 : vector<20x1xf32>
    %192 = vector.broadcast %191 : vector<20x1xf32> to vector<20x32xf32>
    %193 = arith.mulf %183, %192 : vector<20x32xf32>
    %194 = vector.broadcast %171 : vector<1x32xf32> to vector<20x32xf32>
    %195 = arith.mulf %193, %194 : vector<20x32xf32>
    %196 = vector.broadcast %172 : vector<1x32xf32> to vector<20x32xf32>
    %197 = arith.addf %195, %196 : vector<20x32xf32>
    %cst_89 = arith.constant dense<0.000000e+00> : vector<20x96xf32>
    %198 = tpu.matmul %197, %164, %cst_89 {dimension_numbers = #tpu.dot_dimension_numbers<[1], [0], [0], [1], [0, 0, 1, 1], [], []>} : vector<20x32xf32>, vector<32x96xf32>, vector<20x96xf32> -> vector<20x96xf32>
    %199 = vector.extract_strided_slice %198 {offsets = [0, 0], sizes = [20, 8], strides = [1, 1]} : vector<20x96xf32> to vector<20x8xf32>
    %200 = vector.extract_strided_slice %198 {offsets = [0, 32], sizes = [20, 8], strides = [1, 1]} : vector<20x96xf32> to vector<20x8xf32>
    %201 = vector.extract_strided_slice %198 {offsets = [0, 64], sizes = [20, 8], strides = [1, 1]} : vector<20x96xf32> to vector<20x8xf32>
    %cst_90 = arith.constant dense<0.000000e+00> : vector<20x20xf32>
    %202 = tpu.matmul %199, %200, %cst_90 {dimension_numbers = #tpu.dot_dimension_numbers<[1], [1], [0], [0], [0, 0, 1, 0], [], []>} : vector<20x8xf32>, vector<20x8xf32>, vector<20x20xf32> -> vector<20x20xf32>
    %cst_91 = arith.constant 0.353553385 : f32
    %203 = vector.broadcast %cst_91 : f32 to vector<20x20xf32>
    %204 = arith.mulf %202, %203 : vector<20x20xf32>
    %205 = arith.addf %204, %4 : vector<20x20xf32>
    %cst_92 = arith.constant dense<0xFF800000> : vector<20xf32>
    %206 = vector.multi_reduction <maximumf>, %205, %cst_92 [1] : vector<20x20xf32> to vector<20xf32>
    %207 = vector.shape_cast %206 : vector<20xf32> to vector<20x1xf32>
    %208 = vector.broadcast %207 : vector<20x1xf32> to vector<20x20xf32>
    %209 = arith.subf %205, %208 : vector<20x20xf32>
    %210 = math.exp %209 : vector<20x20xf32>
    %cst_93 = arith.constant dense<0.000000e+00> : vector<20xf32>
    %211 = vector.multi_reduction <add>, %210, %cst_93 [1] : vector<20x20xf32> to vector<20xf32>
    %212 = vector.shape_cast %211 : vector<20xf32> to vector<20x1xf32>
    %213 = tpu.reciprocal %212 {approx = true} : vector<20x1xf32> -> vector<20x1xf32>
    %214 = vector.broadcast %213 : vector<20x1xf32> to vector<20x20xf32>
    %215 = arith.mulf %210, %214 : vector<20x20xf32>
    %cst_94 = arith.constant dense<0.000000e+00> : vector<20x8xf32>
    %216 = tpu.matmul %215, %201, %cst_94 {dimension_numbers = #tpu.dot_dimension_numbers<[1], [0], [0], [1], [0, 0, 1, 1], [], []>} : vector<20x20xf32>, vector<20x8xf32>, vector<20x8xf32> -> vector<20x8xf32>
    %c0_95 = arith.constant 0 : index
    %c0_96 = arith.constant 0 : index
    %217 = vector.load %arg22[%c0_95, %c0_96] : memref<20x32xf32, #tpu.memory_space<vmem>>, vector<20x8xf32>
    tpu.vector_store %arg22[%c0_95, %c0_96], %216 {strides = array<i32>} : memref<20x32xf32, #tpu.memory_space<vmem>>, vector<20x8xf32>,
    %218 = vector.extract_strided_slice %198 {offsets = [0, 8], sizes = [20, 8], strides = [1, 1]} : vector<20x96xf32> to vector<20x8xf32>
    %219 = vector.extract_strided_slice %198 {offsets = [0, 40], sizes = [20, 8], strides = [1, 1]} : vector<20x96xf32> to vector<20x8xf32>
    %220 = vector.extract_strided_slice %198 {offsets = [0, 72], sizes = [20, 8], strides = [1, 1]} : vector<20x96xf32> to vector<20x8xf32>
    %cst_97 = arith.constant dense<0.000000e+00> : vector<20x20xf32>
    %221 = tpu.matmul %218, %219, %cst_97 {dimension_numbers = #tpu.dot_dimension_numbers<[1], [1], [0], [0], [0, 0, 1, 0], [], []>} : vector<20x8xf32>, vector<20x8xf32>, vector<20x20xf32> -> vector<20x20xf32>
    %cst_98 = arith.constant 0.353553385 : f32
    %222 = vector.broadcast %cst_98 : f32 to vector<20x20xf32>
    %223 = arith.mulf %221, %222 : vector<20x20xf32>
    %224 = arith.addf %223, %4 : vector<20x20xf32>
    %cst_99 = arith.constant dense<0xFF800000> : vector<20xf32>
    %225 = vector.multi_reduction <maximumf>, %224, %cst_99 [1] : vector<20x20xf32> to vector<20xf32>
    %226 = vector.shape_cast %225 : vector<20xf32> to vector<20x1xf32>
    %227 = vector.broadcast %226 : vector<20x1xf32> to vector<20x20xf32>
    %228 = arith.subf %224, %227 : vector<20x20xf32>
    %229 = math.exp %228 : vector<20x20xf32>
    %cst_100 = arith.constant dense<0.000000e+00> : vector<20xf32>
    %230 = vector.multi_reduction <add>, %229, %cst_100 [1] : vector<20x20xf32> to vector<20xf32>
    %231 = vector.shape_cast %230 : vector<20xf32> to vector<20x1xf32>
    %232 = tpu.reciprocal %231 {approx = true} : vector<20x1xf32> -> vector<20x1xf32>
    %233 = vector.broadcast %232 : vector<20x1xf32> to vector<20x20xf32>
    %234 = arith.mulf %229, %233 : vector<20x20xf32>
    %cst_101 = arith.constant dense<0.000000e+00> : vector<20x8xf32>
    %235 = tpu.matmul %234, %220, %cst_101 {dimension_numbers = #tpu.dot_dimension_numbers<[1], [0], [0], [1], [0, 0, 1, 1], [], []>} : vector<20x20xf32>, vector<20x8xf32>, vector<20x8xf32> -> vector<20x8xf32>
    %c0_102 = arith.constant 0 : index
    %c8_103 = arith.constant 8 : index
    %236 = vector.load %arg22[%c0_102, %c8_103] : memref<20x32xf32, #tpu.memory_space<vmem>>, vector<20x8xf32>
    tpu.vector_store %arg22[%c0_102, %c8_103], %235 {strides = array<i32>} : memref<20x32xf32, #tpu.memory_space<vmem>>, vector<20x8xf32>,
    %237 = vector.extract_strided_slice %198 {offsets = [0, 16], sizes = [20, 8], strides = [1, 1]} : vector<20x96xf32> to vector<20x8xf32>
    %238 = vector.extract_strided_slice %198 {offsets = [0, 48], sizes = [20, 8], strides = [1, 1]} : vector<20x96xf32> to vector<20x8xf32>
    %239 = vector.extract_strided_slice %198 {offsets = [0, 80], sizes = [20, 8], strides = [1, 1]} : vector<20x96xf32> to vector<20x8xf32>
    %cst_104 = arith.constant dense<0.000000e+00> : vector<20x20xf32>
    %240 = tpu.matmul %237, %238, %cst_104 {dimension_numbers = #tpu.dot_dimension_numbers<[1], [1], [0], [0], [0, 0, 1, 0], [], []>} : vector<20x8xf32>, vector<20x8xf32>, vector<20x20xf32> -> vector<20x20xf32>
    %cst_105 = arith.constant 0.353553385 : f32
    %241 = vector.broadcast %cst_105 : f32 to vector<20x20xf32>
    %242 = arith.mulf %240, %241 : vector<20x20xf32>
    %243 = arith.addf %242, %4 : vector<20x20xf32>
    %cst_106 = arith.constant dense<0xFF800000> : vector<20xf32>
    %244 = vector.multi_reduction <maximumf>, %243, %cst_106 [1] : vector<20x20xf32> to vector<20xf32>
    %245 = vector.shape_cast %244 : vector<20xf32> to vector<20x1xf32>
    %246 = vector.broadcast %245 : vector<20x1xf32> to vector<20x20xf32>
    %247 = arith.subf %243, %246 : vector<20x20xf32>
    %248 = math.exp %247 : vector<20x20xf32>
    %cst_107 = arith.constant dense<0.000000e+00> : vector<20xf32>
    %249 = vector.multi_reduction <add>, %248, %cst_107 [1] : vector<20x20xf32> to vector<20xf32>
    %250 = vector.shape_cast %249 : vector<20xf32> to vector<20x1xf32>
    %251 = tpu.reciprocal %250 {approx = true} : vector<20x1xf32> -> vector<20x1xf32>
    %252 = vector.broadcast %251 : vector<20x1xf32> to vector<20x20xf32>
    %253 = arith.mulf %248, %252 : vector<20x20xf32>
    %cst_108 = arith.constant dense<0.000000e+00> : vector<20x8xf32>
    %254 = tpu.matmul %253, %239, %cst_108 {dimension_numbers = #tpu.dot_dimension_numbers<[1], [0], [0], [1], [0, 0, 1, 1], [], []>} : vector<20x20xf32>, vector<20x8xf32>, vector<20x8xf32> -> vector<20x8xf32>
    %c0_109 = arith.constant 0 : index
    %c16_110 = arith.constant 16 : index
    %255 = vector.load %arg22[%c0_109, %c16_110] : memref<20x32xf32, #tpu.memory_space<vmem>>, vector<20x8xf32>
    tpu.vector_store %arg22[%c0_109, %c16_110], %254 {strides = array<i32>} : memref<20x32xf32, #tpu.memory_space<vmem>>, vector<20x8xf32>,
    %256 = vector.extract_strided_slice %198 {offsets = [0, 24], sizes = [20, 8], strides = [1, 1]} : vector<20x96xf32> to vector<20x8xf32>
    %257 = vector.extract_strided_slice %198 {offsets = [0, 56], sizes = [20, 8], strides = [1, 1]} : vector<20x96xf32> to vector<20x8xf32>
    %258 = vector.extract_strided_slice %198 {offsets = [0, 88], sizes = [20, 8], strides = [1, 1]} : vector<20x96xf32> to vector<20x8xf32>
    %cst_111 = arith.constant dense<0.000000e+00> : vector<20x20xf32>
    %259 = tpu.matmul %256, %257, %cst_111 {dimension_numbers = #tpu.dot_dimension_numbers<[1], [1], [0], [0], [0, 0, 1, 0], [], []>} : vector<20x8xf32>, vector<20x8xf32>, vector<20x20xf32> -> vector<20x20xf32>
    %cst_112 = arith.constant 0.353553385 : f32
    %260 = vector.broadcast %cst_112 : f32 to vector<20x20xf32>
    %261 = arith.mulf %259, %260 : vector<20x20xf32>
    %262 = arith.addf %261, %4 : vector<20x20xf32>
    %cst_113 = arith.constant dense<0xFF800000> : vector<20xf32>
    %263 = vector.multi_reduction <maximumf>, %262, %cst_113 [1] : vector<20x20xf32> to vector<20xf32>
    %264 = vector.shape_cast %263 : vector<20xf32> to vector<20x1xf32>
    %265 = vector.broadcast %264 : vector<20x1xf32> to vector<20x20xf32>
    %266 = arith.subf %262, %265 : vector<20x20xf32>
    %267 = math.exp %266 : vector<20x20xf32>
    %cst_114 = arith.constant dense<0.000000e+00> : vector<20xf32>
    %268 = vector.multi_reduction <add>, %267, %cst_114 [1] : vector<20x20xf32> to vector<20xf32>
    %269 = vector.shape_cast %268 : vector<20xf32> to vector<20x1xf32>
    %270 = tpu.reciprocal %269 {approx = true} : vector<20x1xf32> -> vector<20x1xf32>
    %271 = vector.broadcast %270 : vector<20x1xf32> to vector<20x20xf32>
    %272 = arith.mulf %267, %271 : vector<20x20xf32>
    %cst_115 = arith.constant dense<0.000000e+00> : vector<20x8xf32>
    %273 = tpu.matmul %272, %258, %cst_115 {dimension_numbers = #tpu.dot_dimension_numbers<[1], [0], [0], [1], [0, 0, 1, 1], [], []>} : vector<20x20xf32>, vector<20x8xf32>, vector<20x8xf32> -> vector<20x8xf32>
    %c0_116 = arith.constant 0 : index
    %c24_117 = arith.constant 24 : index
    %274 = vector.load %arg22[%c0_116, %c24_117] : memref<20x32xf32, #tpu.memory_space<vmem>>, vector<20x8xf32>
    tpu.vector_store %arg22[%c0_116, %c24_117], %273 {strides = array<i32>} : memref<20x32xf32, #tpu.memory_space<vmem>>, vector<20x8xf32>,
    %c0_118 = arith.constant 0 : index
    %c0_119 = arith.constant 0 : index
    %275 = vector.load %arg22[%c0_118, %c0_119] : memref<20x32xf32, #tpu.memory_space<vmem>>, vector<20x32xf32>
    %cst_120 = arith.constant dense<0.000000e+00> : vector<20x32xf32>
    %276 = tpu.matmul %275, %166, %cst_120 {dimension_numbers = #tpu.dot_dimension_numbers<[1], [0], [0], [1], [0, 0, 1, 1], [], []>} : vector<20x32xf32>, vector<32x32xf32>, vector<20x32xf32> -> vector<20x32xf32>
    %277 = arith.addf %162, %276 : vector<20x32xf32>
    %278 = vector.broadcast %175 : vector<1x32xf32> to vector<20x32xf32>
    %279 = arith.addf %277, %278 : vector<20x32xf32>
    %cst_121 = arith.constant dense<0.000000e+00> : vector<20xf32>
    %280 = vector.multi_reduction <add>, %279, %cst_121 [1] : vector<20x32xf32> to vector<20xf32>
    %281 = vector.shape_cast %280 : vector<20xf32> to vector<20x1xf32>
    %cst_122 = arith.constant 3.200000e+01 : f32
    %282 = vector.broadcast %cst_122 : f32 to vector<20x1xf32>
    %283 = arith.divf %281, %282 : vector<20x1xf32>
    %284 = vector.broadcast %283 : vector<20x1xf32> to vector<20x32xf32>
    %285 = arith.subf %279, %284 : vector<20x32xf32>
    %286 = arith.mulf %285, %285 : vector<20x32xf32>
    %cst_123 = arith.constant dense<0.000000e+00> : vector<20xf32>
    %287 = vector.multi_reduction <add>, %286, %cst_123 [1] : vector<20x32xf32> to vector<20xf32>
    %288 = vector.shape_cast %287 : vector<20xf32> to vector<20x1xf32>
    %cst_124 = arith.constant 3.200000e+01 : f32
    %289 = vector.broadcast %cst_124 : f32 to vector<20x1xf32>
    %290 = arith.divf %288, %289 : vector<20x1xf32>
    %cst_125 = arith.constant 9.99999974E-6 : f32
    %291 = vector.broadcast %cst_125 : f32 to vector<20x1xf32>
    %292 = arith.addf %290, %291 : vector<20x1xf32>
    %293 = math.rsqrt %292 : vector<20x1xf32>
    %294 = vector.broadcast %293 : vector<20x1xf32> to vector<20x32xf32>
    %295 = arith.mulf %285, %294 : vector<20x32xf32>
    %296 = vector.broadcast %173 : vector<1x32xf32> to vector<20x32xf32>
    %297 = arith.mulf %295, %296 : vector<20x32xf32>
    %298 = vector.broadcast %174 : vector<1x32xf32> to vector<20x32xf32>
    %299 = arith.addf %297, %298 : vector<20x32xf32>
    %cst_126 = arith.constant dense<0.000000e+00> : vector<20x128xf32>
    %300 = tpu.matmul %299, %168, %cst_126 {dimension_numbers = #tpu.dot_dimension_numbers<[1], [0], [0], [1], [0, 0, 1, 1], [], []>} : vector<20x32xf32>, vector<32x128xf32>, vector<20x128xf32> -> vector<20x128xf32>
    %301 = vector.broadcast %177 : vector<1x128xf32> to vector<20x128xf32>
    %302 = arith.addf %300, %301 : vector<20x128xf32>
    %cst_127 = arith.constant 5.000000e-01 : f32
    %303 = vector.broadcast %cst_127 : f32 to vector<20x128xf32>
    %304 = arith.mulf %303, %302 : vector<20x128xf32>
    %cst_128 = arith.constant 0.707106769 : f32
    %305 = vector.broadcast %cst_128 : f32 to vector<20x128xf32>
    %306 = arith.mulf %302, %305 : vector<20x128xf32>
    %307 = math.erf %306 : vector<20x128xf32>
    %cst_129 = arith.constant 1.000000e+00 : f32
    %308 = vector.broadcast %cst_129 : f32 to vector<20x128xf32>
    %309 = arith.addf %308, %307 : vector<20x128xf32>
    %310 = arith.mulf %304, %309 : vector<20x128xf32>
    %cst_130 = arith.constant dense<0.000000e+00> : vector<20x32xf32>
    %311 = tpu.matmul %310, %170, %cst_130 {dimension_numbers = #tpu.dot_dimension_numbers<[1], [0], [0], [1], [0, 0, 1, 1], [], []>} : vector<20x128xf32>, vector<128x32xf32>, vector<20x32xf32> -> vector<20x32xf32>
    %312 = arith.addf %279, %311 : vector<20x32xf32>
    %313 = vector.broadcast %176 : vector<1x32xf32> to vector<20x32xf32>
    %314 = arith.addf %312, %313 : vector<20x32xf32>
    %c0_131 = arith.constant 0 : index
    %c0_132 = arith.constant 0 : index
    %315 = vector.load %arg2[%c0_131, %c0_132] : memref<16x576xf32, #tpu.memory_space<vmem>>, vector<16x576xf32>
    %c0_133 = arith.constant 0 : index
    %c0_134 = arith.constant 0 : index
    %316 = vector.load %arg7[%c0_133, %c0_134] : memref<576x64xf32, #tpu.memory_space<vmem>>, vector<576x64xf32>
    %cst_135 = arith.constant dense<0.000000e+00> : vector<16x64xf32>
    %317 = tpu.matmul %315, %316, %cst_135 {dimension_numbers = #tpu.dot_dimension_numbers<[1], [0], [0], [1], [0, 0, 1, 1], [], []>} : vector<16x576xf32>, vector<576x64xf32>, vector<16x64xf32> -> vector<16x64xf32>
    %318 = vector.extract_strided_slice %1 {offsets = [0, 0], sizes = [1, 64], strides = [1, 1]} : vector<29x64xf32> to vector<1x64xf32>
    %319 = vector.broadcast %318 : vector<1x64xf32> to vector<16x64xf32>
    %320 = arith.addf %317, %319 : vector<16x64xf32>
    %cst_136 = arith.constant 0.999994993 : f32
    %321 = vector.broadcast %cst_136 : f32 to vector<16x64xf32>
    %322 = arith.mulf %320, %321 : vector<16x64xf32>
    %c0_137 = arith.constant 0 : index
    %c0_138 = arith.constant 0 : index
    %323 = vector.load %arg8[%c0_137, %c0_138] : memref<16x64xf32, #tpu.memory_space<vmem>>, vector<16x64xf32>
    %324 = tpu.iota {dimensions = array<i32: 1>} : vector<1x64xi32>
    %c0_139 = arith.constant 0 : index
    %c0_140 = arith.constant 0 : index
    %c0_141 = arith.constant 0 : index
    %325 = vector.load %arg18[%c0_139, %c0_140, %c0_141] : memref<12x64x64xf32, #tpu.memory_space<vmem>>, vector<1x64x64xf32>
    %326 = vector.shape_cast %325 : vector<1x64x64xf32> to vector<64x64xf32>
    %c1_142 = arith.constant 1 : index
    %c0_143 = arith.constant 0 : index
    %c0_144 = arith.constant 0 : index
    %327 = vector.load %arg18[%c1_142, %c0_143, %c0_144] : memref<12x64x64xf32, #tpu.memory_space<vmem>>, vector<1x64x64xf32>
    %328 = vector.shape_cast %327 : vector<1x64x64xf32> to vector<64x64xf32>
    %c2 = arith.constant 2 : index
    %c0_145 = arith.constant 0 : index
    %c0_146 = arith.constant 0 : index
    %329 = vector.load %arg18[%c2, %c0_145, %c0_146] : memref<12x64x64xf32, #tpu.memory_space<vmem>>, vector<1x64x64xf32>
    %330 = vector.shape_cast %329 : vector<1x64x64xf32> to vector<64x64xf32>
    %c3 = arith.constant 3 : index
    %c0_147 = arith.constant 0 : index
    %c0_148 = arith.constant 0 : index
    %331 = vector.load %arg18[%c3, %c0_147, %c0_148] : memref<12x64x64xf32, #tpu.memory_space<vmem>>, vector<1x64x64xf32>
    %332 = vector.shape_cast %331 : vector<1x64x64xf32> to vector<64x64xf32>
    %c4 = arith.constant 4 : index
    %c0_149 = arith.constant 0 : index
    %c0_150 = arith.constant 0 : index
    %333 = vector.load %arg18[%c4, %c0_149, %c0_150] : memref<12x64x64xf32, #tpu.memory_space<vmem>>, vector<1x64x64xf32>
    %334 = vector.shape_cast %333 : vector<1x64x64xf32> to vector<64x64xf32>
    %c5 = arith.constant 5 : index
    %c0_151 = arith.constant 0 : index
    %c0_152 = arith.constant 0 : index
    %335 = vector.load %arg18[%c5, %c0_151, %c0_152] : memref<12x64x64xf32, #tpu.memory_space<vmem>>, vector<1x64x64xf32>
    %336 = vector.shape_cast %335 : vector<1x64x64xf32> to vector<64x64xf32>
    %c0_153 = arith.constant 0 : index
    %c0_154 = arith.constant 0 : index
    %c0_155 = arith.constant 0 : index
    %337 = vector.load %arg17[%c0_153, %c0_154, %c0_155] : memref<2x32x64xf32, #tpu.memory_space<vmem>>, vector<1x32x64xf32>
    %338 = vector.shape_cast %337 : vector<1x32x64xf32> to vector<32x64xf32>
    %c0_156 = arith.constant 0 : index
    %c0_157 = arith.constant 0 : index
    %c0_158 = arith.constant 0 : index
    %339 = vector.load %arg19[%c0_156, %c0_157, %c0_158] : memref<2x64x256xf32, #tpu.memory_space<vmem>>, vector<1x64x256xf32>
    %340 = vector.shape_cast %339 : vector<1x64x256xf32> to vector<64x256xf32>
    %c0_159 = arith.constant 0 : index
    %c0_160 = arith.constant 0 : index
    %c0_161 = arith.constant 0 : index
    %341 = vector.load %arg20[%c0_159, %c0_160, %c0_161] : memref<2x256x64xf32, #tpu.memory_space<vmem>>, vector<1x256x64xf32>
    %342 = vector.shape_cast %341 : vector<1x256x64xf32> to vector<256x64xf32>
    %343 = vector.extract_strided_slice %3 {offsets = [0, 0], sizes = [1, 256], strides = [1, 1]} : vector<2x256xf32> to vector<1x256xf32>
    %344 = vector.extract_strided_slice %0 {offsets = [12, 0], sizes = [1, 32], strides = [1, 1]} : vector<16x32xf32> to vector<1x32xf32>
    %345 = vector.extract_strided_slice %0 {offsets = [13, 0], sizes = [1, 32], strides = [1, 1]} : vector<16x32xf32> to vector<1x32xf32>
    %346 = vector.extract_strided_slice %1 {offsets = [1, 0], sizes = [1, 64], strides = [1, 1]} : vector<29x64xf32> to vector<1x64xf32>
    %347 = vector.extract_strided_slice %1 {offsets = [2, 0], sizes = [1, 64], strides = [1, 1]} : vector<29x64xf32> to vector<1x64xf32>
    %348 = vector.extract_strided_slice %1 {offsets = [7, 0], sizes = [1, 64], strides = [1, 1]} : vector<29x64xf32> to vector<1x64xf32>
    %349 = vector.extract_strided_slice %1 {offsets = [3, 0], sizes = [1, 64], strides = [1, 1]} : vector<29x64xf32> to vector<1x64xf32>
    %350 = vector.extract_strided_slice %1 {offsets = [4, 0], sizes = [1, 64], strides = [1, 1]} : vector<29x64xf32> to vector<1x64xf32>
    %351 = vector.extract_strided_slice %1 {offsets = [5, 0], sizes = [1, 64], strides = [1, 1]} : vector<29x64xf32> to vector<1x64xf32>
    %352 = vector.extract_strided_slice %1 {offsets = [6, 0], sizes = [1, 64], strides = [1, 1]} : vector<29x64xf32> to vector<1x64xf32>
    %353 = vector.extract_strided_slice %1 {offsets = [8, 0], sizes = [1, 64], strides = [1, 1]} : vector<29x64xf32> to vector<1x64xf32>
    %354 = vector.extract_strided_slice %1 {offsets = [9, 0], sizes = [1, 64], strides = [1, 1]} : vector<29x64xf32> to vector<1x64xf32>
    %355 = vector.extract_strided_slice %1 {offsets = [10, 0], sizes = [1, 64], strides = [1, 1]} : vector<29x64xf32> to vector<1x64xf32>
    %356 = vector.extract_strided_slice %1 {offsets = [11, 0], sizes = [1, 64], strides = [1, 1]} : vector<29x64xf32> to vector<1x64xf32>
    %357 = vector.extract_strided_slice %1 {offsets = [12, 0], sizes = [1, 64], strides = [1, 1]} : vector<29x64xf32> to vector<1x64xf32>
    %358 = vector.extract_strided_slice %1 {offsets = [13, 0], sizes = [1, 64], strides = [1, 1]} : vector<29x64xf32> to vector<1x64xf32>
    %359 = vector.extract_strided_slice %1 {offsets = [14, 0], sizes = [1, 64], strides = [1, 1]} : vector<29x64xf32> to vector<1x64xf32>
    %cst_162 = arith.constant dense<0.000000e+00> : vector<20xf32>
    %360 = vector.multi_reduction <add>, %162, %cst_162 [1] : vector<20x32xf32> to vector<20xf32>
    %361 = vector.shape_cast %360 : vector<20xf32> to vector<20x1xf32>
    %cst_163 = arith.constant 3.200000e+01 : f32
    %362 = vector.broadcast %cst_163 : f32 to vector<20x1xf32>
    %363 = arith.divf %361, %362 : vector<20x1xf32>
    %364 = vector.broadcast %363 : vector<20x1xf32> to vector<20x32xf32>
    %365 = arith.subf %162, %364 : vector<20x32xf32>
    %366 = arith.mulf %365, %365 : vector<20x32xf32>
    %cst_164 = arith.constant dense<0.000000e+00> : vector<20xf32>
    %367 = vector.multi_reduction <add>, %366, %cst_164 [1] : vector<20x32xf32> to vector<20xf32>
    %368 = vector.shape_cast %367 : vector<20xf32> to vector<20x1xf32>
    %cst_165 = arith.constant 3.200000e+01 : f32
    %369 = vector.broadcast %cst_165 : f32 to vector<20x1xf32>
    %370 = arith.divf %368, %369 : vector<20x1xf32>
    %cst_166 = arith.constant 9.99999974E-6 : f32
    %371 = vector.broadcast %cst_166 : f32 to vector<20x1xf32>
    %372 = arith.addf %370, %371 : vector<20x1xf32>
    %373 = math.rsqrt %372 : vector<20x1xf32>
    %374 = vector.broadcast %373 : vector<20x1xf32> to vector<20x32xf32>
    %375 = arith.mulf %365, %374 : vector<20x32xf32>
    %376 = vector.broadcast %344 : vector<1x32xf32> to vector<20x32xf32>
    %377 = arith.mulf %375, %376 : vector<20x32xf32>
    %378 = vector.broadcast %345 : vector<1x32xf32> to vector<20x32xf32>
    %379 = arith.addf %377, %378 : vector<20x32xf32>
    %cst_167 = arith.constant dense<0.000000e+00> : vector<20x64xf32>
    %380 = tpu.matmul %379, %338, %cst_167 {dimension_numbers = #tpu.dot_dimension_numbers<[1], [0], [0], [1], [0, 0, 1, 1], [], []>} : vector<20x32xf32>, vector<32x64xf32>, vector<20x64xf32> -> vector<20x64xf32>
    %381 = vector.broadcast %346 : vector<1x64xf32> to vector<20x64xf32>
    %382 = arith.addf %380, %381 : vector<20x64xf32>
    %383 = vector.extract_strided_slice %382 {offsets = [0, 0], sizes = [4, 64], strides = [1, 1]} : vector<20x64xf32> to vector<4x64xf32>
    %cst_168 = arith.constant 5.000000e-01 : f32
    %384 = vector.broadcast %cst_168 : f32 to vector<16x64xf32>
    %385 = arith.mulf %384, %322 : vector<16x64xf32>
    %386 = vector.extract_strided_slice %382 {offsets = [4, 0], sizes = [16, 64], strides = [1, 1]} : vector<20x64xf32> to vector<16x64xf32>
    %cst_169 = arith.constant 5.000000e-01 : f32
    %387 = vector.broadcast %cst_169 : f32 to vector<16x64xf32>
    %388 = arith.mulf %387, %386 : vector<16x64xf32>
    %389 = arith.addf %385, %388 : vector<16x64xf32>
    %cst_170 = arith.constant 0.999994993 : f32
    %390 = vector.broadcast %cst_170 : f32 to vector<16x64xf32>
    %391 = arith.mulf %389, %390 : vector<16x64xf32>
    %cst_171 = arith.constant dense<0.000000e+00> : vector<16x64xf32>
    %392 = tpu.matmul %391, %326, %cst_171 {dimension_numbers = #tpu.dot_dimension_numbers<[1], [0], [0], [1], [0, 0, 1, 1], [], []>} : vector<16x64xf32>, vector<64x64xf32>, vector<16x64xf32> -> vector<16x64xf32>
    %393 = vector.broadcast %347 : vector<1x64xf32> to vector<16x64xf32>
    %394 = arith.addf %392, %393 : vector<16x64xf32>
    %395 = vector.extract_strided_slice %394 {offsets = [0, 0], sizes = [4, 64], strides = [1, 1]} : vector<16x64xf32> to vector<4x64xf32>
    %396 = vector.broadcast %350 : vector<1x64xf32> to vector<4x64xf32>
    %397 = arith.mulf %395, %396 : vector<4x64xf32>
    %398 = vector.broadcast %352 : vector<1x64xf32> to vector<4x64xf32>
    %399 = arith.addf %397, %398 : vector<4x64xf32>
    %400 = vector.extract_strided_slice %394 {offsets = [4, 0], sizes = [4, 64], strides = [1, 1]} : vector<16x64xf32> to vector<4x64xf32>
    %401 = vector.broadcast %351 : vector<1x64xf32> to vector<4x64xf32>
    %402 = arith.mulf %400, %401 : vector<4x64xf32>
    %403 = arith.addf %399, %402 : vector<4x64xf32>
    %c0_172 = arith.constant 0 : index
    %c0_173 = arith.constant 0 : index
    %404 = vector.load %arg24[%c0_172, %c0_173] : memref<16x64xf32, #tpu.memory_space<vmem>>, vector<4x64xf32>
    tpu.vector_store %arg24[%c0_172, %c0_173], %403 {strides = array<i32>} : memref<16x64xf32, #tpu.memory_space<vmem>>, vector<4x64xf32>,
    %405 = vector.extract_strided_slice %394 {offsets = [4, 0], sizes = [4, 64], strides = [1, 1]} : vector<16x64xf32> to vector<4x64xf32>
    %406 = vector.broadcast %350 : vector<1x64xf32> to vector<4x64xf32>
    %407 = arith.mulf %405, %406 : vector<4x64xf32>
    %408 = vector.broadcast %352 : vector<1x64xf32> to vector<4x64xf32>
    %409 = arith.addf %407, %408 : vector<4x64xf32>
    %410 = vector.extract_strided_slice %394 {offsets = [0, 0], sizes = [4, 64], strides = [1, 1]} : vector<16x64xf32> to vector<4x64xf32>
    %411 = vector.broadcast %349 : vector<1x64xf32> to vector<4x64xf32>
    %412 = arith.mulf %410, %411 : vector<4x64xf32>
    %413 = arith.addf %409, %412 : vector<4x64xf32>
    %c4_174 = arith.constant 4 : index
    %c0_175 = arith.constant 0 : index
    %414 = vector.load %arg24[%c4_174, %c0_175] : memref<16x64xf32, #tpu.memory_space<vmem>>, vector<4x64xf32>
    tpu.vector_store %arg24[%c4_174, %c0_175], %413 {strides = array<i32>} : memref<16x64xf32, #tpu.memory_space<vmem>>, vector<4x64xf32>,
    %415 = vector.extract_strided_slice %394 {offsets = [8, 0], sizes = [4, 64], strides = [1, 1]} : vector<16x64xf32> to vector<4x64xf32>
    %416 = vector.broadcast %350 : vector<1x64xf32> to vector<4x64xf32>
    %417 = arith.mulf %415, %416 : vector<4x64xf32>
    %418 = vector.broadcast %352 : vector<1x64xf32> to vector<4x64xf32>
    %419 = arith.addf %417, %418 : vector<4x64xf32>
    %420 = vector.extract_strided_slice %394 {offsets = [12, 0], sizes = [4, 64], strides = [1, 1]} : vector<16x64xf32> to vector<4x64xf32>
    %421 = vector.broadcast %351 : vector<1x64xf32> to vector<4x64xf32>
    %422 = arith.mulf %420, %421 : vector<4x64xf32>
    %423 = arith.addf %419, %422 : vector<4x64xf32>
    %c8_176 = arith.constant 8 : index
    %c0_177 = arith.constant 0 : index
    %424 = vector.load %arg24[%c8_176, %c0_177] : memref<16x64xf32, #tpu.memory_space<vmem>>, vector<4x64xf32>
    tpu.vector_store %arg24[%c8_176, %c0_177], %423 {strides = array<i32>} : memref<16x64xf32, #tpu.memory_space<vmem>>, vector<4x64xf32>,
    %425 = vector.extract_strided_slice %394 {offsets = [12, 0], sizes = [4, 64], strides = [1, 1]} : vector<16x64xf32> to vector<4x64xf32>
    %426 = vector.broadcast %350 : vector<1x64xf32> to vector<4x64xf32>
    %427 = arith.mulf %425, %426 : vector<4x64xf32>
    %428 = vector.broadcast %352 : vector<1x64xf32> to vector<4x64xf32>
    %429 = arith.addf %427, %428 : vector<4x64xf32>
    %430 = vector.extract_strided_slice %394 {offsets = [8, 0], sizes = [4, 64], strides = [1, 1]} : vector<16x64xf32> to vector<4x64xf32>
    %431 = vector.broadcast %349 : vector<1x64xf32> to vector<4x64xf32>
    %432 = arith.mulf %430, %431 : vector<4x64xf32>
    %433 = arith.addf %429, %432 : vector<4x64xf32>
    %c12 = arith.constant 12 : index
    %c0_178 = arith.constant 0 : index
    %434 = vector.load %arg24[%c12, %c0_178] : memref<16x64xf32, #tpu.memory_space<vmem>>, vector<4x64xf32>
    tpu.vector_store %arg24[%c12, %c0_178], %433 {strides = array<i32>} : memref<16x64xf32, #tpu.memory_space<vmem>>, vector<4x64xf32>,
    %c0_179 = arith.constant 0 : index
    %c0_180 = arith.constant 0 : index
    %435 = vector.load %arg24[%c0_179, %c0_180] : memref<16x64xf32, #tpu.memory_space<vmem>>, vector<16x64xf32>
    %cst_181 = arith.constant dense<0.000000e+00> : vector<16x64xf32>
    %436 = tpu.matmul %435, %328, %cst_181 {dimension_numbers = #tpu.dot_dimension_numbers<[1], [0], [0], [1], [0, 0, 1, 1], [], []>} : vector<16x64xf32>, vector<64x64xf32>, vector<16x64xf32> -> vector<16x64xf32>
    %437 = arith.addf %389, %436 : vector<16x64xf32>
    %438 = vector.broadcast %348 : vector<1x64xf32> to vector<16x64xf32>
    %439 = arith.addf %437, %438 : vector<16x64xf32>
    %440 = vector.extract_strided_slice %383 {offsets = [1, 0], sizes = [1, 64], strides = [1, 1]} : vector<4x64xf32> to vector<1x64xf32>
    %cst_182 = arith.constant 0.000000e+00 : f32
    %441 = vector.broadcast %cst_182 : f32 to vector<1x64xf32>
    %c32_i32 = arith.constant 32 : i32
    %442 = vector.broadcast %c32_i32 : i32 to vector<1x64xi32>
    %443 = arith.cmpi slt, %324, %442 : vector<1x64xi32>
    %444 = arith.select %443, %440, %441 : vector<1x64xi1>, vector<1x64xf32>
    %c0_183 = arith.constant 0 : index
    %c0_184 = arith.constant 0 : index
    %445 = vector.load %arg25[%c0_183, %c0_184] : memref<4x64xf32, #tpu.memory_space<vmem>>, vector<1x64xf32>
    tpu.vector_store %arg25[%c0_183, %c0_184], %444 {strides = array<i32>} : memref<4x64xf32, #tpu.memory_space<vmem>>, vector<1x64xf32>,
    %cst_185 = arith.constant 0.000000e+00 : f32
    %446 = vector.broadcast %cst_185 : f32 to vector<1x64xf32>
    %447 = vector.extract_strided_slice %383 {offsets = [0, 0], sizes = [1, 64], strides = [1, 1]} : vector<4x64xf32> to vector<1x64xf32>
    %c32_i32_186 = arith.constant 32 : i32
    %448 = vector.broadcast %c32_i32_186 : i32 to vector<1x64xi32>
    %449 = arith.cmpi slt, %324, %448 : vector<1x64xi32>
    %450 = arith.select %449, %446, %447 : vector<1x64xi1>, vector<1x64xf32>
    %c1_187 = arith.constant 1 : index
    %c0_188 = arith.constant 0 : index
    %451 = vector.load %arg25[%c1_187, %c0_188] : memref<4x64xf32, #tpu.memory_space<vmem>>, vector<1x64xf32>
    tpu.vector_store %arg25[%c1_187, %c0_188], %450 {strides = array<i32>} : memref<4x64xf32, #tpu.memory_space<vmem>>, vector<1x64xf32>,
    %452 = vector.extract_strided_slice %383 {offsets = [3, 0], sizes = [1, 64], strides = [1, 1]} : vector<4x64xf32> to vector<1x64xf32>
    %cst_189 = arith.constant 0.000000e+00 : f32
    %453 = vector.broadcast %cst_189 : f32 to vector<1x64xf32>
    %c32_i32_190 = arith.constant 32 : i32
    %454 = vector.broadcast %c32_i32_190 : i32 to vector<1x64xi32>
    %455 = arith.cmpi slt, %324, %454 : vector<1x64xi32>
    %456 = arith.select %455, %452, %453 : vector<1x64xi1>, vector<1x64xf32>
    %c2_191 = arith.constant 2 : index
    %c0_192 = arith.constant 0 : index
    %457 = vector.load %arg25[%c2_191, %c0_192] : memref<4x64xf32, #tpu.memory_space<vmem>>, vector<1x64xf32>
    tpu.vector_store %arg25[%c2_191, %c0_192], %456 {strides = array<i32>} : memref<4x64xf32, #tpu.memory_space<vmem>>, vector<1x64xf32>,
    %cst_193 = arith.constant 0.000000e+00 : f32
    %458 = vector.broadcast %cst_193 : f32 to vector<1x64xf32>
    %459 = vector.extract_strided_slice %383 {offsets = [2, 0], sizes = [1, 64], strides = [1, 1]} : vector<4x64xf32> to vector<1x64xf32>
    %c32_i32_194 = arith.constant 32 : i32
    %460 = vector.broadcast %c32_i32_194 : i32 to vector<1x64xi32>
    %461 = arith.cmpi slt, %324, %460 : vector<1x64xi32>
    %462 = arith.select %461, %458, %459 : vector<1x64xi1>, vector<1x64xf32>
    %c3_195 = arith.constant 3 : index
    %c0_196 = arith.constant 0 : index
    %463 = vector.load %arg25[%c3_195, %c0_196] : memref<4x64xf32, #tpu.memory_space<vmem>>, vector<1x64xf32>
    tpu.vector_store %arg25[%c3_195, %c0_196], %462 {strides = array<i32>} : memref<4x64xf32, #tpu.memory_space<vmem>>, vector<1x64xf32>,
    %c0_197 = arith.constant 0 : index
    %c0_198 = arith.constant 0 : index
    %464 = vector.load %arg25[%c0_197, %c0_198] : memref<4x64xf32, #tpu.memory_space<vmem>>, vector<4x64xf32>
    %cst_199 = arith.constant dense<0.000000e+00> : vector<4xf32>
    %465 = vector.multi_reduction <add>, %464, %cst_199 [1] : vector<4x64xf32> to vector<4xf32>
    %466 = vector.shape_cast %465 : vector<4xf32> to vector<4x1xf32>
    %cst_200 = arith.constant 6.400000e+01 : f32
    %467 = vector.broadcast %cst_200 : f32 to vector<4x1xf32>
    %468 = arith.divf %466, %467 : vector<4x1xf32>
    %469 = vector.broadcast %468 : vector<4x1xf32> to vector<4x64xf32>
    %470 = arith.subf %464, %469 : vector<4x64xf32>
    %471 = arith.mulf %470, %470 : vector<4x64xf32>
    %cst_201 = arith.constant dense<0.000000e+00> : vector<4xf32>
    %472 = vector.multi_reduction <add>, %471, %cst_201 [1] : vector<4x64xf32> to vector<4xf32>
    %473 = vector.shape_cast %472 : vector<4xf32> to vector<4x1xf32>
    %cst_202 = arith.constant 6.400000e+01 : f32
    %474 = vector.broadcast %cst_202 : f32 to vector<4x1xf32>
    %475 = arith.divf %473, %474 : vector<4x1xf32>
    %cst_203 = arith.constant 9.99999974E-6 : f32
    %476 = vector.broadcast %cst_203 : f32 to vector<4x1xf32>
    %477 = arith.addf %475, %476 : vector<4x1xf32>
    %478 = math.rsqrt %477 : vector<4x1xf32>
    %479 = vector.broadcast %478 : vector<4x1xf32> to vector<4x64xf32>
    %480 = arith.mulf %470, %479 : vector<4x64xf32>
    %481 = vector.broadcast %353 : vector<1x64xf32> to vector<4x64xf32>
    %482 = arith.mulf %480, %481 : vector<4x64xf32>
    %483 = vector.broadcast %354 : vector<1x64xf32> to vector<4x64xf32>
    %484 = arith.addf %482, %483 : vector<4x64xf32>
    %485 = arith.addf %439, %323 : vector<16x64xf32>
    %cst_204 = arith.constant dense<0.000000e+00> : vector<16xf32>
    %486 = vector.multi_reduction <add>, %485, %cst_204 [1] : vector<16x64xf32> to vector<16xf32>
    %487 = vector.shape_cast %486 : vector<16xf32> to vector<16x1xf32>
    %cst_205 = arith.constant 6.400000e+01 : f32
    %488 = vector.broadcast %cst_205 : f32 to vector<16x1xf32>
    %489 = arith.divf %487, %488 : vector<16x1xf32>
    %490 = vector.broadcast %489 : vector<16x1xf32> to vector<16x64xf32>
    %491 = arith.subf %485, %490 : vector<16x64xf32>
    %492 = arith.mulf %491, %491 : vector<16x64xf32>
    %cst_206 = arith.constant dense<0.000000e+00> : vector<16xf32>
    %493 = vector.multi_reduction <add>, %492, %cst_206 [1] : vector<16x64xf32> to vector<16xf32>
    %494 = vector.shape_cast %493 : vector<16xf32> to vector<16x1xf32>
    %cst_207 = arith.constant 6.400000e+01 : f32
    %495 = vector.broadcast %cst_207 : f32 to vector<16x1xf32>
    %496 = arith.divf %494, %495 : vector<16x1xf32>
    %cst_208 = arith.constant 9.99999974E-6 : f32
    %497 = vector.broadcast %cst_208 : f32 to vector<16x1xf32>
    %498 = arith.addf %496, %497 : vector<16x1xf32>
    %499 = math.rsqrt %498 : vector<16x1xf32>
    %500 = vector.broadcast %499 : vector<16x1xf32> to vector<16x64xf32>
    %501 = arith.mulf %491, %500 : vector<16x64xf32>
    %502 = vector.broadcast %353 : vector<1x64xf32> to vector<16x64xf32>
    %503 = arith.mulf %501, %502 : vector<16x64xf32>
    %504 = vector.broadcast %354 : vector<1x64xf32> to vector<16x64xf32>
    %505 = arith.addf %503, %504 : vector<16x64xf32>
    %c0_209 = arith.constant 0 : index
    %c0_210 = arith.constant 0 : index
    %506 = vector.load %arg23[%c0_209, %c0_210] : memref<20x64xf32, #tpu.memory_space<vmem>>, vector<4x64xf32>
    tpu.vector_store %arg23[%c0_209, %c0_210], %484 {strides = array<i32>} : memref<20x64xf32, #tpu.memory_space<vmem>>, vector<4x64xf32>,
    %c4_211 = arith.constant 4 : index
    %c0_212 = arith.constant 0 : index
    %507 = vector.load %arg23[%c4_211, %c0_212] : memref<20x64xf32, #tpu.memory_space<vmem>>, vector<16x64xf32>
    tpu.vector_store %arg23[%c4_211, %c0_212], %505 {strides = array<i32>} : memref<20x64xf32, #tpu.memory_space<vmem>>, vector<16x64xf32>,
    %c0_213 = arith.constant 0 : index
    %c0_214 = arith.constant 0 : index
    %508 = vector.load %arg23[%c0_213, %c0_214] : memref<20x64xf32, #tpu.memory_space<vmem>>, vector<20x64xf32>
    %cst_215 = arith.constant dense<0.000000e+00> : vector<16x64xf32>
    %509 = tpu.matmul %505, %330, %cst_215 {dimension_numbers = #tpu.dot_dimension_numbers<[1], [0], [0], [1], [0, 0, 1, 1], [], []>} : vector<16x64xf32>, vector<64x64xf32>, vector<16x64xf32> -> vector<16x64xf32>
    %510 = vector.broadcast %355 : vector<1x64xf32> to vector<16x64xf32>
    %511 = arith.addf %509, %510 : vector<16x64xf32>
    %cst_216 = arith.constant dense<0.000000e+00> : vector<20x64xf32>
    %512 = tpu.matmul %508, %332, %cst_216 {dimension_numbers = #tpu.dot_dimension_numbers<[1], [0], [0], [1], [0, 0, 1, 1], [], []>} : vector<20x64xf32>, vector<64x64xf32>, vector<20x64xf32> -> vector<20x64xf32>
    %513 = vector.broadcast %356 : vector<1x64xf32> to vector<20x64xf32>
    %514 = arith.addf %512, %513 : vector<20x64xf32>
    %cst_217 = arith.constant dense<0.000000e+00> : vector<20x64xf32>
    %515 = tpu.matmul %508, %334, %cst_217 {dimension_numbers = #tpu.dot_dimension_numbers<[1], [0], [0], [1], [0, 0, 1, 1], [], []>} : vector<20x64xf32>, vector<64x64xf32>, vector<20x64xf32> -> vector<20x64xf32>
    %516 = vector.broadcast %357 : vector<1x64xf32> to vector<20x64xf32>
    %517 = arith.addf %515, %516 : vector<20x64xf32>
    %cst_218 = arith.constant dense<0.000000e+00> : vector<16x20xf32>
    %518 = tpu.matmul %511, %514, %cst_218 {dimension_numbers = #tpu.dot_dimension_numbers<[1], [1], [0], [0], [0, 0, 1, 0], [], []>} : vector<16x64xf32>, vector<20x64xf32>, vector<16x20xf32> -> vector<16x20xf32>
    %cst_219 = arith.constant 1.250000e-01 : f32
    %519 = vector.broadcast %cst_219 : f32 to vector<16x20xf32>
    %520 = arith.mulf %518, %519 : vector<16x20xf32>
    %521 = arith.addf %520, %5 : vector<16x20xf32>
    %cst_220 = arith.constant dense<0xFF800000> : vector<16xf32>
    %522 = vector.multi_reduction <maximumf>, %521, %cst_220 [1] : vector<16x20xf32> to vector<16xf32>
    %523 = vector.shape_cast %522 : vector<16xf32> to vector<16x1xf32>
    %524 = vector.broadcast %523 : vector<16x1xf32> to vector<16x20xf32>
    %525 = arith.subf %521, %524 : vector<16x20xf32>
    %526 = math.exp %525 : vector<16x20xf32>
    %cst_221 = arith.constant dense<0.000000e+00> : vector<16xf32>
    %527 = vector.multi_reduction <add>, %526, %cst_221 [1] : vector<16x20xf32> to vector<16xf32>
    %528 = vector.shape_cast %527 : vector<16xf32> to vector<16x1xf32>
    %529 = tpu.reciprocal %528 {approx = true} : vector<16x1xf32> -> vector<16x1xf32>
    %530 = vector.broadcast %529 : vector<16x1xf32> to vector<16x20xf32>
    %531 = arith.mulf %526, %530 : vector<16x20xf32>
    %cst_222 = arith.constant dense<0.000000e+00> : vector<16x64xf32>
    %532 = tpu.matmul %531, %517, %cst_222 {dimension_numbers = #tpu.dot_dimension_numbers<[1], [0], [0], [1], [0, 0, 1, 1], [], []>} : vector<16x20xf32>, vector<20x64xf32>, vector<16x64xf32> -> vector<16x64xf32>
    %cst_223 = arith.constant dense<0.000000e+00> : vector<16x64xf32>
    %533 = tpu.matmul %532, %336, %cst_223 {dimension_numbers = #tpu.dot_dimension_numbers<[1], [0], [0], [1], [0, 0, 1, 1], [], []>} : vector<16x64xf32>, vector<64x64xf32>, vector<16x64xf32> -> vector<16x64xf32>
    %534 = arith.addf %439, %533 : vector<16x64xf32>
    %535 = vector.broadcast %358 : vector<1x64xf32> to vector<16x64xf32>
    %536 = arith.addf %534, %535 : vector<16x64xf32>
    %cst_224 = arith.constant 0.999994993 : f32
    %537 = vector.broadcast %cst_224 : f32 to vector<16x64xf32>
    %538 = arith.mulf %536, %537 : vector<16x64xf32>
    %cst_225 = arith.constant dense<0.000000e+00> : vector<16x256xf32>
    %539 = tpu.matmul %538, %340, %cst_225 {dimension_numbers = #tpu.dot_dimension_numbers<[1], [0], [0], [1], [0, 0, 1, 1], [], []>} : vector<16x64xf32>, vector<64x256xf32>, vector<16x256xf32> -> vector<16x256xf32>
    %540 = vector.broadcast %343 : vector<1x256xf32> to vector<16x256xf32>
    %541 = arith.addf %539, %540 : vector<16x256xf32>
    %cst_226 = arith.constant 5.000000e-01 : f32
    %542 = vector.broadcast %cst_226 : f32 to vector<16x256xf32>
    %543 = arith.mulf %542, %541 : vector<16x256xf32>
    %cst_227 = arith.constant 0.707106769 : f32
    %544 = vector.broadcast %cst_227 : f32 to vector<16x256xf32>
    %545 = arith.mulf %541, %544 : vector<16x256xf32>
    %546 = math.erf %545 : vector<16x256xf32>
    %cst_228 = arith.constant 1.000000e+00 : f32
    %547 = vector.broadcast %cst_228 : f32 to vector<16x256xf32>
    %548 = arith.addf %547, %546 : vector<16x256xf32>
    %549 = arith.mulf %543, %548 : vector<16x256xf32>
    %cst_229 = arith.constant dense<0.000000e+00> : vector<16x64xf32>
    %550 = tpu.matmul %549, %342, %cst_229 {dimension_numbers = #tpu.dot_dimension_numbers<[1], [0], [0], [1], [0, 0, 1, 1], [], []>} : vector<16x256xf32>, vector<256x64xf32>, vector<16x64xf32> -> vector<16x64xf32>
    %551 = arith.addf %536, %550 : vector<16x64xf32>
    %552 = vector.broadcast %359 : vector<1x64xf32> to vector<16x64xf32>
    %553 = arith.addf %551, %552 : vector<16x64xf32>
    %c6 = arith.constant 6 : index
    %c0_230 = arith.constant 0 : index
    %c0_231 = arith.constant 0 : index
    %554 = vector.load %arg18[%c6, %c0_230, %c0_231] : memref<12x64x64xf32, #tpu.memory_space<vmem>>, vector<1x64x64xf32>
    %555 = vector.shape_cast %554 : vector<1x64x64xf32> to vector<64x64xf32>
    %c7 = arith.constant 7 : index
    %c0_232 = arith.constant 0 : index
    %c0_233 = arith.constant 0 : index
    %556 = vector.load %arg18[%c7, %c0_232, %c0_233] : memref<12x64x64xf32, #tpu.memory_space<vmem>>, vector<1x64x64xf32>
    %557 = vector.shape_cast %556 : vector<1x64x64xf32> to vector<64x64xf32>
    %c8_234 = arith.constant 8 : index
    %c0_235 = arith.constant 0 : index
    %c0_236 = arith.constant 0 : index
    %558 = vector.load %arg18[%c8_234, %c0_235, %c0_236] : memref<12x64x64xf32, #tpu.memory_space<vmem>>, vector<1x64x64xf32>
    %559 = vector.shape_cast %558 : vector<1x64x64xf32> to vector<64x64xf32>
    %c9 = arith.constant 9 : index
    %c0_237 = arith.constant 0 : index
    %c0_238 = arith.constant 0 : index
    %560 = vector.load %arg18[%c9, %c0_237, %c0_238] : memref<12x64x64xf32, #tpu.memory_space<vmem>>, vector<1x64x64xf32>
    %561 = vector.shape_cast %560 : vector<1x64x64xf32> to vector<64x64xf32>
    %c10 = arith.constant 10 : index
    %c0_239 = arith.constant 0 : index
    %c0_240 = arith.constant 0 : index
    %562 = vector.load %arg18[%c10, %c0_239, %c0_240] : memref<12x64x64xf32, #tpu.memory_space<vmem>>, vector<1x64x64xf32>
    %563 = vector.shape_cast %562 : vector<1x64x64xf32> to vector<64x64xf32>
    %c11 = arith.constant 11 : index
    %c0_241 = arith.constant 0 : index
    %c0_242 = arith.constant 0 : index
    %564 = vector.load %arg18[%c11, %c0_241, %c0_242] : memref<12x64x64xf32, #tpu.memory_space<vmem>>, vector<1x64x64xf32>
    %565 = vector.shape_cast %564 : vector<1x64x64xf32> to vector<64x64xf32>
    %c1_243 = arith.constant 1 : index
    %c0_244 = arith.constant 0 : index
    %c0_245 = arith.constant 0 : index
    %566 = vector.load %arg17[%c1_243, %c0_244, %c0_245] : memref<2x32x64xf32, #tpu.memory_space<vmem>>, vector<1x32x64xf32>
    %567 = vector.shape_cast %566 : vector<1x32x64xf32> to vector<32x64xf32>
    %c1_246 = arith.constant 1 : index
    %c0_247 = arith.constant 0 : index
    %c0_248 = arith.constant 0 : index
    %568 = vector.load %arg19[%c1_246, %c0_247, %c0_248] : memref<2x64x256xf32, #tpu.memory_space<vmem>>, vector<1x64x256xf32>
    %569 = vector.shape_cast %568 : vector<1x64x256xf32> to vector<64x256xf32>
    %c1_249 = arith.constant 1 : index
    %c0_250 = arith.constant 0 : index
    %c0_251 = arith.constant 0 : index
    %570 = vector.load %arg20[%c1_249, %c0_250, %c0_251] : memref<2x256x64xf32, #tpu.memory_space<vmem>>, vector<1x256x64xf32>
    %571 = vector.shape_cast %570 : vector<1x256x64xf32> to vector<256x64xf32>
    %572 = vector.extract_strided_slice %3 {offsets = [1, 0], sizes = [1, 256], strides = [1, 1]} : vector<2x256xf32> to vector<1x256xf32>
    %573 = vector.extract_strided_slice %0 {offsets = [14, 0], sizes = [1, 32], strides = [1, 1]} : vector<16x32xf32> to vector<1x32xf32>
    %574 = vector.extract_strided_slice %0 {offsets = [15, 0], sizes = [1, 32], strides = [1, 1]} : vector<16x32xf32> to vector<1x32xf32>
    %575 = vector.extract_strided_slice %1 {offsets = [15, 0], sizes = [1, 64], strides = [1, 1]} : vector<29x64xf32> to vector<1x64xf32>
    %576 = vector.extract_strided_slice %1 {offsets = [16, 0], sizes = [1, 64], strides = [1, 1]} : vector<29x64xf32> to vector<1x64xf32>
    %577 = vector.extract_strided_slice %1 {offsets = [21, 0], sizes = [1, 64], strides = [1, 1]} : vector<29x64xf32> to vector<1x64xf32>
    %578 = vector.extract_strided_slice %1 {offsets = [17, 0], sizes = [1, 64], strides = [1, 1]} : vector<29x64xf32> to vector<1x64xf32>
    %579 = vector.extract_strided_slice %1 {offsets = [18, 0], sizes = [1, 64], strides = [1, 1]} : vector<29x64xf32> to vector<1x64xf32>
    %580 = vector.extract_strided_slice %1 {offsets = [19, 0], sizes = [1, 64], strides = [1, 1]} : vector<29x64xf32> to vector<1x64xf32>
    %581 = vector.extract_strided_slice %1 {offsets = [20, 0], sizes = [1, 64], strides = [1, 1]} : vector<29x64xf32> to vector<1x64xf32>
    %582 = vector.extract_strided_slice %1 {offsets = [22, 0], sizes = [1, 64], strides = [1, 1]} : vector<29x64xf32> to vector<1x64xf32>
    %583 = vector.extract_strided_slice %1 {offsets = [23, 0], sizes = [1, 64], strides = [1, 1]} : vector<29x64xf32> to vector<1x64xf32>
    %584 = vector.extract_strided_slice %1 {offsets = [24, 0], sizes = [1, 64], strides = [1, 1]} : vector<29x64xf32> to vector<1x64xf32>
    %585 = vector.extract_strided_slice %1 {offsets = [25, 0], sizes = [1, 64], strides = [1, 1]} : vector<29x64xf32> to vector<1x64xf32>
    %586 = vector.extract_strided_slice %1 {offsets = [26, 0], sizes = [1, 64], strides = [1, 1]} : vector<29x64xf32> to vector<1x64xf32>
    %587 = vector.extract_strided_slice %1 {offsets = [27, 0], sizes = [1, 64], strides = [1, 1]} : vector<29x64xf32> to vector<1x64xf32>
    %588 = vector.extract_strided_slice %1 {offsets = [28, 0], sizes = [1, 64], strides = [1, 1]} : vector<29x64xf32> to vector<1x64xf32>
    %cst_252 = arith.constant dense<0.000000e+00> : vector<20xf32>
    %589 = vector.multi_reduction <add>, %314, %cst_252 [1] : vector<20x32xf32> to vector<20xf32>
    %590 = vector.shape_cast %589 : vector<20xf32> to vector<20x1xf32>
    %cst_253 = arith.constant 3.200000e+01 : f32
    %591 = vector.broadcast %cst_253 : f32 to vector<20x1xf32>
    %592 = arith.divf %590, %591 : vector<20x1xf32>
    %593 = vector.broadcast %592 : vector<20x1xf32> to vector<20x32xf32>
    %594 = arith.subf %314, %593 : vector<20x32xf32>
    %595 = arith.mulf %594, %594 : vector<20x32xf32>
    %cst_254 = arith.constant dense<0.000000e+00> : vector<20xf32>
    %596 = vector.multi_reduction <add>, %595, %cst_254 [1] : vector<20x32xf32> to vector<20xf32>
    %597 = vector.shape_cast %596 : vector<20xf32> to vector<20x1xf32>
    %cst_255 = arith.constant 3.200000e+01 : f32
    %598 = vector.broadcast %cst_255 : f32 to vector<20x1xf32>
    %599 = arith.divf %597, %598 : vector<20x1xf32>
    %cst_256 = arith.constant 9.99999974E-6 : f32
    %600 = vector.broadcast %cst_256 : f32 to vector<20x1xf32>
    %601 = arith.addf %599, %600 : vector<20x1xf32>
    %602 = math.rsqrt %601 : vector<20x1xf32>
    %603 = vector.broadcast %602 : vector<20x1xf32> to vector<20x32xf32>
    %604 = arith.mulf %594, %603 : vector<20x32xf32>
    %605 = vector.broadcast %573 : vector<1x32xf32> to vector<20x32xf32>
    %606 = arith.mulf %604, %605 : vector<20x32xf32>
    %607 = vector.broadcast %574 : vector<1x32xf32> to vector<20x32xf32>
    %608 = arith.addf %606, %607 : vector<20x32xf32>
    %cst_257 = arith.constant dense<0.000000e+00> : vector<20x64xf32>
    %609 = tpu.matmul %608, %567, %cst_257 {dimension_numbers = #tpu.dot_dimension_numbers<[1], [0], [0], [1], [0, 0, 1, 1], [], []>} : vector<20x32xf32>, vector<32x64xf32>, vector<20x64xf32> -> vector<20x64xf32>
    %610 = vector.broadcast %575 : vector<1x64xf32> to vector<20x64xf32>
    %611 = arith.addf %609, %610 : vector<20x64xf32>
    %612 = vector.extract_strided_slice %611 {offsets = [0, 0], sizes = [4, 64], strides = [1, 1]} : vector<20x64xf32> to vector<4x64xf32>
    %cst_258 = arith.constant 5.000000e-01 : f32
    %613 = vector.broadcast %cst_258 : f32 to vector<16x64xf32>
    %614 = arith.mulf %613, %553 : vector<16x64xf32>
    %615 = vector.extract_strided_slice %611 {offsets = [4, 0], sizes = [16, 64], strides = [1, 1]} : vector<20x64xf32> to vector<16x64xf32>
    %cst_259 = arith.constant 5.000000e-01 : f32
    %616 = vector.broadcast %cst_259 : f32 to vector<16x64xf32>
    %617 = arith.mulf %616, %615 : vector<16x64xf32>
    %618 = arith.addf %614, %617 : vector<16x64xf32>
    %cst_260 = arith.constant 0.999994993 : f32
    %619 = vector.broadcast %cst_260 : f32 to vector<16x64xf32>
    %620 = arith.mulf %618, %619 : vector<16x64xf32>
    %cst_261 = arith.constant dense<0.000000e+00> : vector<16x64xf32>
    %621 = tpu.matmul %620, %555, %cst_261 {dimension_numbers = #tpu.dot_dimension_numbers<[1], [0], [0], [1], [0, 0, 1, 1], [], []>} : vector<16x64xf32>, vector<64x64xf32>, vector<16x64xf32> -> vector<16x64xf32>
    %622 = vector.broadcast %576 : vector<1x64xf32> to vector<16x64xf32>
    %623 = arith.addf %621, %622 : vector<16x64xf32>
    %624 = vector.extract_strided_slice %623 {offsets = [0, 0], sizes = [4, 64], strides = [1, 1]} : vector<16x64xf32> to vector<4x64xf32>
    %625 = vector.broadcast %579 : vector<1x64xf32> to vector<4x64xf32>
    %626 = arith.mulf %624, %625 : vector<4x64xf32>
    %627 = vector.broadcast %581 : vector<1x64xf32> to vector<4x64xf32>
    %628 = arith.addf %626, %627 : vector<4x64xf32>
    %629 = vector.extract_strided_slice %623 {offsets = [4, 0], sizes = [4, 64], strides = [1, 1]} : vector<16x64xf32> to vector<4x64xf32>
    %630 = vector.broadcast %580 : vector<1x64xf32> to vector<4x64xf32>
    %631 = arith.mulf %629, %630 : vector<4x64xf32>
    %632 = arith.addf %628, %631 : vector<4x64xf32>
    %c0_262 = arith.constant 0 : index
    %c0_263 = arith.constant 0 : index
    %633 = vector.load %arg24[%c0_262, %c0_263] : memref<16x64xf32, #tpu.memory_space<vmem>>, vector<4x64xf32>
    tpu.vector_store %arg24[%c0_262, %c0_263], %632 {strides = array<i32>} : memref<16x64xf32, #tpu.memory_space<vmem>>, vector<4x64xf32>,
    %634 = vector.extract_strided_slice %623 {offsets = [4, 0], sizes = [4, 64], strides = [1, 1]} : vector<16x64xf32> to vector<4x64xf32>
    %635 = vector.broadcast %579 : vector<1x64xf32> to vector<4x64xf32>
    %636 = arith.mulf %634, %635 : vector<4x64xf32>
    %637 = vector.broadcast %581 : vector<1x64xf32> to vector<4x64xf32>
    %638 = arith.addf %636, %637 : vector<4x64xf32>
    %639 = vector.extract_strided_slice %623 {offsets = [0, 0], sizes = [4, 64], strides = [1, 1]} : vector<16x64xf32> to vector<4x64xf32>
    %640 = vector.broadcast %578 : vector<1x64xf32> to vector<4x64xf32>
    %641 = arith.mulf %639, %640 : vector<4x64xf32>
    %642 = arith.addf %638, %641 : vector<4x64xf32>
    %c4_264 = arith.constant 4 : index
    %c0_265 = arith.constant 0 : index
    %643 = vector.load %arg24[%c4_264, %c0_265] : memref<16x64xf32, #tpu.memory_space<vmem>>, vector<4x64xf32>
    tpu.vector_store %arg24[%c4_264, %c0_265], %642 {strides = array<i32>} : memref<16x64xf32, #tpu.memory_space<vmem>>, vector<4x64xf32>,
    %644 = vector.extract_strided_slice %623 {offsets = [8, 0], sizes = [4, 64], strides = [1, 1]} : vector<16x64xf32> to vector<4x64xf32>
    %645 = vector.broadcast %579 : vector<1x64xf32> to vector<4x64xf32>
    %646 = arith.mulf %644, %645 : vector<4x64xf32>
    %647 = vector.broadcast %581 : vector<1x64xf32> to vector<4x64xf32>
    %648 = arith.addf %646, %647 : vector<4x64xf32>
    %649 = vector.extract_strided_slice %623 {offsets = [12, 0], sizes = [4, 64], strides = [1, 1]} : vector<16x64xf32> to vector<4x64xf32>
    %650 = vector.broadcast %580 : vector<1x64xf32> to vector<4x64xf32>
    %651 = arith.mulf %649, %650 : vector<4x64xf32>
    %652 = arith.addf %648, %651 : vector<4x64xf32>
    %c8_266 = arith.constant 8 : index
    %c0_267 = arith.constant 0 : index
    %653 = vector.load %arg24[%c8_266, %c0_267] : memref<16x64xf32, #tpu.memory_space<vmem>>, vector<4x64xf32>
    tpu.vector_store %arg24[%c8_266, %c0_267], %652 {strides = array<i32>} : memref<16x64xf32, #tpu.memory_space<vmem>>, vector<4x64xf32>,
    %654 = vector.extract_strided_slice %623 {offsets = [12, 0], sizes = [4, 64], strides = [1, 1]} : vector<16x64xf32> to vector<4x64xf32>
    %655 = vector.broadcast %579 : vector<1x64xf32> to vector<4x64xf32>
    %656 = arith.mulf %654, %655 : vector<4x64xf32>
    %657 = vector.broadcast %581 : vector<1x64xf32> to vector<4x64xf32>
    %658 = arith.addf %656, %657 : vector<4x64xf32>
    %659 = vector.extract_strided_slice %623 {offsets = [8, 0], sizes = [4, 64], strides = [1, 1]} : vector<16x64xf32> to vector<4x64xf32>
    %660 = vector.broadcast %578 : vector<1x64xf32> to vector<4x64xf32>
    %661 = arith.mulf %659, %660 : vector<4x64xf32>
    %662 = arith.addf %658, %661 : vector<4x64xf32>
    %c12_268 = arith.constant 12 : index
    %c0_269 = arith.constant 0 : index
    %663 = vector.load %arg24[%c12_268, %c0_269] : memref<16x64xf32, #tpu.memory_space<vmem>>, vector<4x64xf32>
    tpu.vector_store %arg24[%c12_268, %c0_269], %662 {strides = array<i32>} : memref<16x64xf32, #tpu.memory_space<vmem>>, vector<4x64xf32>,
    %c0_270 = arith.constant 0 : index
    %c0_271 = arith.constant 0 : index
    %664 = vector.load %arg24[%c0_270, %c0_271] : memref<16x64xf32, #tpu.memory_space<vmem>>, vector<16x64xf32>
    %cst_272 = arith.constant dense<0.000000e+00> : vector<16x64xf32>
    %665 = tpu.matmul %664, %557, %cst_272 {dimension_numbers = #tpu.dot_dimension_numbers<[1], [0], [0], [1], [0, 0, 1, 1], [], []>} : vector<16x64xf32>, vector<64x64xf32>, vector<16x64xf32> -> vector<16x64xf32>
    %666 = arith.addf %618, %665 : vector<16x64xf32>
    %667 = vector.broadcast %577 : vector<1x64xf32> to vector<16x64xf32>
    %668 = arith.addf %666, %667 : vector<16x64xf32>
    %669 = vector.extract_strided_slice %612 {offsets = [1, 0], sizes = [1, 64], strides = [1, 1]} : vector<4x64xf32> to vector<1x64xf32>
    %cst_273 = arith.constant 0.000000e+00 : f32
    %670 = vector.broadcast %cst_273 : f32 to vector<1x64xf32>
    %c32_i32_274 = arith.constant 32 : i32
    %671 = vector.broadcast %c32_i32_274 : i32 to vector<1x64xi32>
    %672 = arith.cmpi slt, %324, %671 : vector<1x64xi32>
    %673 = arith.select %672, %669, %670 : vector<1x64xi1>, vector<1x64xf32>
    %c0_275 = arith.constant 0 : index
    %c0_276 = arith.constant 0 : index
    %674 = vector.load %arg25[%c0_275, %c0_276] : memref<4x64xf32, #tpu.memory_space<vmem>>, vector<1x64xf32>
    tpu.vector_store %arg25[%c0_275, %c0_276], %673 {strides = array<i32>} : memref<4x64xf32, #tpu.memory_space<vmem>>, vector<1x64xf32>,
    %cst_277 = arith.constant 0.000000e+00 : f32
    %675 = vector.broadcast %cst_277 : f32 to vector<1x64xf32>
    %676 = vector.extract_strided_slice %612 {offsets = [0, 0], sizes = [1, 64], strides = [1, 1]} : vector<4x64xf32> to vector<1x64xf32>
    %c32_i32_278 = arith.constant 32 : i32
    %677 = vector.broadcast %c32_i32_278 : i32 to vector<1x64xi32>
    %678 = arith.cmpi slt, %324, %677 : vector<1x64xi32>
    %679 = arith.select %678, %675, %676 : vector<1x64xi1>, vector<1x64xf32>
    %c1_279 = arith.constant 1 : index
    %c0_280 = arith.constant 0 : index
    %680 = vector.load %arg25[%c1_279, %c0_280] : memref<4x64xf32, #tpu.memory_space<vmem>>, vector<1x64xf32>
    tpu.vector_store %arg25[%c1_279, %c0_280], %679 {strides = array<i32>} : memref<4x64xf32, #tpu.memory_space<vmem>>, vector<1x64xf32>,
    %681 = vector.extract_strided_slice %612 {offsets = [3, 0], sizes = [1, 64], strides = [1, 1]} : vector<4x64xf32> to vector<1x64xf32>
    %cst_281 = arith.constant 0.000000e+00 : f32
    %682 = vector.broadcast %cst_281 : f32 to vector<1x64xf32>
    %c32_i32_282 = arith.constant 32 : i32
    %683 = vector.broadcast %c32_i32_282 : i32 to vector<1x64xi32>
    %684 = arith.cmpi slt, %324, %683 : vector<1x64xi32>
    %685 = arith.select %684, %681, %682 : vector<1x64xi1>, vector<1x64xf32>
    %c2_283 = arith.constant 2 : index
    %c0_284 = arith.constant 0 : index
    %686 = vector.load %arg25[%c2_283, %c0_284] : memref<4x64xf32, #tpu.memory_space<vmem>>, vector<1x64xf32>
    tpu.vector_store %arg25[%c2_283, %c0_284], %685 {strides = array<i32>} : memref<4x64xf32, #tpu.memory_space<vmem>>, vector<1x64xf32>,
    %cst_285 = arith.constant 0.000000e+00 : f32
    %687 = vector.broadcast %cst_285 : f32 to vector<1x64xf32>
    %688 = vector.extract_strided_slice %612 {offsets = [2, 0], sizes = [1, 64], strides = [1, 1]} : vector<4x64xf32> to vector<1x64xf32>
    %c32_i32_286 = arith.constant 32 : i32
    %689 = vector.broadcast %c32_i32_286 : i32 to vector<1x64xi32>
    %690 = arith.cmpi slt, %324, %689 : vector<1x64xi32>
    %691 = arith.select %690, %687, %688 : vector<1x64xi1>, vector<1x64xf32>
    %c3_287 = arith.constant 3 : index
    %c0_288 = arith.constant 0 : index
    %692 = vector.load %arg25[%c3_287, %c0_288] : memref<4x64xf32, #tpu.memory_space<vmem>>, vector<1x64xf32>
    tpu.vector_store %arg25[%c3_287, %c0_288], %691 {strides = array<i32>} : memref<4x64xf32, #tpu.memory_space<vmem>>, vector<1x64xf32>,
    %c0_289 = arith.constant 0 : index
    %c0_290 = arith.constant 0 : index
    %693 = vector.load %arg25[%c0_289, %c0_290] : memref<4x64xf32, #tpu.memory_space<vmem>>, vector<4x64xf32>
    %cst_291 = arith.constant dense<0.000000e+00> : vector<4xf32>
    %694 = vector.multi_reduction <add>, %693, %cst_291 [1] : vector<4x64xf32> to vector<4xf32>
    %695 = vector.shape_cast %694 : vector<4xf32> to vector<4x1xf32>
    %cst_292 = arith.constant 6.400000e+01 : f32
    %696 = vector.broadcast %cst_292 : f32 to vector<4x1xf32>
    %697 = arith.divf %695, %696 : vector<4x1xf32>
    %698 = vector.broadcast %697 : vector<4x1xf32> to vector<4x64xf32>
    %699 = arith.subf %693, %698 : vector<4x64xf32>
    %700 = arith.mulf %699, %699 : vector<4x64xf32>
    %cst_293 = arith.constant dense<0.000000e+00> : vector<4xf32>
    %701 = vector.multi_reduction <add>, %700, %cst_293 [1] : vector<4x64xf32> to vector<4xf32>
    %702 = vector.shape_cast %701 : vector<4xf32> to vector<4x1xf32>
    %cst_294 = arith.constant 6.400000e+01 : f32
    %703 = vector.broadcast %cst_294 : f32 to vector<4x1xf32>
    %704 = arith.divf %702, %703 : vector<4x1xf32>
    %cst_295 = arith.constant 9.99999974E-6 : f32
    %705 = vector.broadcast %cst_295 : f32 to vector<4x1xf32>
    %706 = arith.addf %704, %705 : vector<4x1xf32>
    %707 = math.rsqrt %706 : vector<4x1xf32>
    %708 = vector.broadcast %707 : vector<4x1xf32> to vector<4x64xf32>
    %709 = arith.mulf %699, %708 : vector<4x64xf32>
    %710 = vector.broadcast %582 : vector<1x64xf32> to vector<4x64xf32>
    %711 = arith.mulf %709, %710 : vector<4x64xf32>
    %712 = vector.broadcast %583 : vector<1x64xf32> to vector<4x64xf32>
    %713 = arith.addf %711, %712 : vector<4x64xf32>
    %714 = arith.addf %668, %323 : vector<16x64xf32>
    %cst_296 = arith.constant dense<0.000000e+00> : vector<16xf32>
    %715 = vector.multi_reduction <add>, %714, %cst_296 [1] : vector<16x64xf32> to vector<16xf32>
    %716 = vector.shape_cast %715 : vector<16xf32> to vector<16x1xf32>
    %cst_297 = arith.constant 6.400000e+01 : f32
    %717 = vector.broadcast %cst_297 : f32 to vector<16x1xf32>
    %718 = arith.divf %716, %717 : vector<16x1xf32>
    %719 = vector.broadcast %718 : vector<16x1xf32> to vector<16x64xf32>
    %720 = arith.subf %714, %719 : vector<16x64xf32>
    %721 = arith.mulf %720, %720 : vector<16x64xf32>
    %cst_298 = arith.constant dense<0.000000e+00> : vector<16xf32>
    %722 = vector.multi_reduction <add>, %721, %cst_298 [1] : vector<16x64xf32> to vector<16xf32>
    %723 = vector.shape_cast %722 : vector<16xf32> to vector<16x1xf32>
    %cst_299 = arith.constant 6.400000e+01 : f32
    %724 = vector.broadcast %cst_299 : f32 to vector<16x1xf32>
    %725 = arith.divf %723, %724 : vector<16x1xf32>
    %cst_300 = arith.constant 9.99999974E-6 : f32
    %726 = vector.broadcast %cst_300 : f32 to vector<16x1xf32>
    %727 = arith.addf %725, %726 : vector<16x1xf32>
    %728 = math.rsqrt %727 : vector<16x1xf32>
    %729 = vector.broadcast %728 : vector<16x1xf32> to vector<16x64xf32>
    %730 = arith.mulf %720, %729 : vector<16x64xf32>
    %731 = vector.broadcast %582 : vector<1x64xf32> to vector<16x64xf32>
    %732 = arith.mulf %730, %731 : vector<16x64xf32>
    %733 = vector.broadcast %583 : vector<1x64xf32> to vector<16x64xf32>
    %734 = arith.addf %732, %733 : vector<16x64xf32>
    %c0_301 = arith.constant 0 : index
    %c0_302 = arith.constant 0 : index
    %735 = vector.load %arg23[%c0_301, %c0_302] : memref<20x64xf32, #tpu.memory_space<vmem>>, vector<4x64xf32>
    tpu.vector_store %arg23[%c0_301, %c0_302], %713 {strides = array<i32>} : memref<20x64xf32, #tpu.memory_space<vmem>>, vector<4x64xf32>,
    %c4_303 = arith.constant 4 : index
    %c0_304 = arith.constant 0 : index
    %736 = vector.load %arg23[%c4_303, %c0_304] : memref<20x64xf32, #tpu.memory_space<vmem>>, vector<16x64xf32>
    tpu.vector_store %arg23[%c4_303, %c0_304], %734 {strides = array<i32>} : memref<20x64xf32, #tpu.memory_space<vmem>>, vector<16x64xf32>,
    %c0_305 = arith.constant 0 : index
    %c0_306 = arith.constant 0 : index
    %737 = vector.load %arg23[%c0_305, %c0_306] : memref<20x64xf32, #tpu.memory_space<vmem>>, vector<20x64xf32>
    %cst_307 = arith.constant dense<0.000000e+00> : vector<16x64xf32>
    %738 = tpu.matmul %734, %559, %cst_307 {dimension_numbers = #tpu.dot_dimension_numbers<[1], [0], [0], [1], [0, 0, 1, 1], [], []>} : vector<16x64xf32>, vector<64x64xf32>, vector<16x64xf32> -> vector<16x64xf32>
    %739 = vector.broadcast %584 : vector<1x64xf32> to vector<16x64xf32>
    %740 = arith.addf %738, %739 : vector<16x64xf32>
    %cst_308 = arith.constant dense<0.000000e+00> : vector<20x64xf32>
    %741 = tpu.matmul %737, %561, %cst_308 {dimension_numbers = #tpu.dot_dimension_numbers<[1], [0], [0], [1], [0, 0, 1, 1], [], []>} : vector<20x64xf32>, vector<64x64xf32>, vector<20x64xf32> -> vector<20x64xf32>
    %742 = vector.broadcast %585 : vector<1x64xf32> to vector<20x64xf32>
    %743 = arith.addf %741, %742 : vector<20x64xf32>
    %cst_309 = arith.constant dense<0.000000e+00> : vector<20x64xf32>
    %744 = tpu.matmul %737, %563, %cst_309 {dimension_numbers = #tpu.dot_dimension_numbers<[1], [0], [0], [1], [0, 0, 1, 1], [], []>} : vector<20x64xf32>, vector<64x64xf32>, vector<20x64xf32> -> vector<20x64xf32>
    %745 = vector.broadcast %586 : vector<1x64xf32> to vector<20x64xf32>
    %746 = arith.addf %744, %745 : vector<20x64xf32>
    %cst_310 = arith.constant dense<0.000000e+00> : vector<16x20xf32>
    %747 = tpu.matmul %740, %743, %cst_310 {dimension_numbers = #tpu.dot_dimension_numbers<[1], [1], [0], [0], [0, 0, 1, 0], [], []>} : vector<16x64xf32>, vector<20x64xf32>, vector<16x20xf32> -> vector<16x20xf32>
    %cst_311 = arith.constant 1.250000e-01 : f32
    %748 = vector.broadcast %cst_311 : f32 to vector<16x20xf32>
    %749 = arith.mulf %747, %748 : vector<16x20xf32>
    %750 = arith.addf %749, %5 : vector<16x20xf32>
    %cst_312 = arith.constant dense<0xFF800000> : vector<16xf32>
    %751 = vector.multi_reduction <maximumf>, %750, %cst_312 [1] : vector<16x20xf32> to vector<16xf32>
    %752 = vector.shape_cast %751 : vector<16xf32> to vector<16x1xf32>
    %753 = vector.broadcast %752 : vector<16x1xf32> to vector<16x20xf32>
    %754 = arith.subf %750, %753 : vector<16x20xf32>
    %755 = math.exp %754 : vector<16x20xf32>
    %cst_313 = arith.constant dense<0.000000e+00> : vector<16xf32>
    %756 = vector.multi_reduction <add>, %755, %cst_313 [1] : vector<16x20xf32> to vector<16xf32>
    %757 = vector.shape_cast %756 : vector<16xf32> to vector<16x1xf32>
    %758 = tpu.reciprocal %757 {approx = true} : vector<16x1xf32> -> vector<16x1xf32>
    %759 = vector.broadcast %758 : vector<16x1xf32> to vector<16x20xf32>
    %760 = arith.mulf %755, %759 : vector<16x20xf32>
    %cst_314 = arith.constant dense<0.000000e+00> : vector<16x64xf32>
    %761 = tpu.matmul %760, %746, %cst_314 {dimension_numbers = #tpu.dot_dimension_numbers<[1], [0], [0], [1], [0, 0, 1, 1], [], []>} : vector<16x20xf32>, vector<20x64xf32>, vector<16x64xf32> -> vector<16x64xf32>
    %cst_315 = arith.constant dense<0.000000e+00> : vector<16x64xf32>
    %762 = tpu.matmul %761, %565, %cst_315 {dimension_numbers = #tpu.dot_dimension_numbers<[1], [0], [0], [1], [0, 0, 1, 1], [], []>} : vector<16x64xf32>, vector<64x64xf32>, vector<16x64xf32> -> vector<16x64xf32>
    %763 = arith.addf %668, %762 : vector<16x64xf32>
    %764 = vector.broadcast %587 : vector<1x64xf32> to vector<16x64xf32>
    %765 = arith.addf %763, %764 : vector<16x64xf32>
    %cst_316 = arith.constant 0.999994993 : f32
    %766 = vector.broadcast %cst_316 : f32 to vector<16x64xf32>
    %767 = arith.mulf %765, %766 : vector<16x64xf32>
    %cst_317 = arith.constant dense<0.000000e+00> : vector<16x256xf32>
    %768 = tpu.matmul %767, %569, %cst_317 {dimension_numbers = #tpu.dot_dimension_numbers<[1], [0], [0], [1], [0, 0, 1, 1], [], []>} : vector<16x64xf32>, vector<64x256xf32>, vector<16x256xf32> -> vector<16x256xf32>
    %769 = vector.broadcast %572 : vector<1x256xf32> to vector<16x256xf32>
    %770 = arith.addf %768, %769 : vector<16x256xf32>
    %cst_318 = arith.constant 5.000000e-01 : f32
    %771 = vector.broadcast %cst_318 : f32 to vector<16x256xf32>
    %772 = arith.mulf %771, %770 : vector<16x256xf32>
    %cst_319 = arith.constant 0.707106769 : f32
    %773 = vector.broadcast %cst_319 : f32 to vector<16x256xf32>
    %774 = arith.mulf %770, %773 : vector<16x256xf32>
    %775 = math.erf %774 : vector<16x256xf32>
    %cst_320 = arith.constant 1.000000e+00 : f32
    %776 = vector.broadcast %cst_320 : f32 to vector<16x256xf32>
    %777 = arith.addf %776, %775 : vector<16x256xf32>
    %778 = arith.mulf %772, %777 : vector<16x256xf32>
    %cst_321 = arith.constant dense<0.000000e+00> : vector<16x64xf32>
    %779 = tpu.matmul %778, %571, %cst_321 {dimension_numbers = #tpu.dot_dimension_numbers<[1], [0], [0], [1], [0, 0, 1, 1], [], []>} : vector<16x256xf32>, vector<256x64xf32>, vector<16x64xf32> -> vector<16x64xf32>
    %780 = arith.addf %765, %779 : vector<16x64xf32>
    %781 = vector.broadcast %588 : vector<1x64xf32> to vector<16x64xf32>
    %782 = arith.addf %780, %781 : vector<16x64xf32>
    %783 = vector.extract_strided_slice %782 {offsets = [0, 0], sizes = [8, 64], strides = [1, 1]} : vector<16x64xf32> to vector<8x64xf32>
    %cst_322 = arith.constant dense<0.000000e+00> : vector<64xf32>
    %784 = vector.multi_reduction <add>, %783, %cst_322 [0] : vector<8x64xf32> to vector<64xf32>
    %785 = vector.shape_cast %784 : vector<64xf32> to vector<1x64xf32>
    %cst_323 = arith.constant 0.124999374 : f32
    %786 = vector.broadcast %cst_323 : f32 to vector<1x64xf32>
    %787 = arith.mulf %785, %786 : vector<1x64xf32>
    %c0_324 = arith.constant 0 : index
    %c0_325 = arith.constant 0 : index
    %788 = vector.load %arg21[%c0_324, %c0_325] : memref<2x64xf32, #tpu.memory_space<vmem>>, vector<1x64xf32>
    tpu.vector_store %arg21[%c0_324, %c0_325], %787 {strides = array<i32>} : memref<2x64xf32, #tpu.memory_space<vmem>>, vector<1x64xf32>,
    %789 = vector.extract_strided_slice %782 {offsets = [8, 0], sizes = [8, 64], strides = [1, 1]} : vector<16x64xf32> to vector<8x64xf32>
    %cst_326 = arith.constant dense<0.000000e+00> : vector<64xf32>
    %790 = vector.multi_reduction <add>, %789, %cst_326 [0] : vector<8x64xf32> to vector<64xf32>
    %791 = vector.shape_cast %790 : vector<64xf32> to vector<1x64xf32>
    %cst_327 = arith.constant 0.124999374 : f32
    %792 = vector.broadcast %cst_327 : f32 to vector<1x64xf32>
    %793 = arith.mulf %791, %792 : vector<1x64xf32>
    %c1_328 = arith.constant 1 : index
    %c0_329 = arith.constant 0 : index
    %794 = vector.load %arg21[%c1_328, %c0_329] : memref<2x64xf32, #tpu.memory_space<vmem>>, vector<1x64xf32>
    tpu.vector_store %arg21[%c1_328, %c0_329], %793 {strides = array<i32>} : memref<2x64xf32, #tpu.memory_space<vmem>>, vector<1x64xf32>,
    return
  }
  func.func @transform_0(%arg0: i32) -> (i32, i32) {
    %c0_i32 = arith.constant 0 : i32
    %c0_i32_0 = arith.constant 0 : i32
    %c0_i32_1 = arith.constant 0 : i32
    return %c0_i32, %c0_i32_0 : i32, i32
  }
  func.func @transform_1(%arg0: i32) -> (i32, i32) {
    %c0_i32 = arith.constant 0 : i32
    %c0_i32_0 = arith.constant 0 : i32
    %c0_i32_1 = arith.constant 0 : i32
    return %c0_i32, %c0_i32_0 : i32, i32
  }
  func.func @transform_2(%arg0: i32) -> (i32, i32) {
    %c0_i32 = arith.constant 0 : i32
    %c0_i32_0 = arith.constant 0 : i32
    %c0_i32_1 = arith.constant 0 : i32
    return %c0_i32, %c0_i32_0 : i32, i32
  }
  func.func @transform_3(%arg0: i32) -> (i32, i32) {
    %c0_i32 = arith.constant 0 : i32
    %c0_i32_0 = arith.constant 0 : i32
    %c0_i32_1 = arith.constant 0 : i32
    return %c0_i32, %c0_i32_0 : i32, i32
  }
  func.func @transform_4(%arg0: i32) -> (i32, i32) {
    %c0_i32 = arith.constant 0 : i32
    %c0_i32_0 = arith.constant 0 : i32
    %c0_i32_1 = arith.constant 0 : i32
    return %c0_i32, %c0_i32_0 : i32, i32
  }
  func.func @transform_5(%arg0: i32) -> (i32, i32) {
    %c0_i32 = arith.constant 0 : i32
    %c0_i32_0 = arith.constant 0 : i32
    %c0_i32_1 = arith.constant 0 : i32
    return %c0_i32, %c0_i32_0 : i32, i32
  }
  func.func @transform_6(%arg0: i32) -> (i32, i32) {
    %c0_i32 = arith.constant 0 : i32
    %c0_i32_0 = arith.constant 0 : i32
    %c0_i32_1 = arith.constant 0 : i32
    return %c0_i32, %c0_i32_0 : i32, i32
  }
  func.func @transform_7(%arg0: i32) -> (i32, i32) {
    %c0_i32 = arith.constant 0 : i32
    %c0_i32_0 = arith.constant 0 : i32
    %c0_i32_1 = arith.constant 0 : i32
    return %c0_i32, %c0_i32_0 : i32, i32
  }
  func.func @transform_8(%arg0: i32) -> (i32, i32) {
    %c0_i32 = arith.constant 0 : i32
    %c0_i32_0 = arith.constant 0 : i32
    %c0_i32_1 = arith.constant 0 : i32
    return %c0_i32, %c0_i32_0 : i32, i32
  }
  func.func @transform_9(%arg0: i32) -> (i32, i32) {
    %c0_i32 = arith.constant 0 : i32
    %c0_i32_0 = arith.constant 0 : i32
    %c0_i32_1 = arith.constant 0 : i32
    return %c0_i32, %c0_i32_0 : i32, i32
  }
  func.func @transform_10(%arg0: i32) -> (i32, i32) {
    %c0_i32 = arith.constant 0 : i32
    %c0_i32_0 = arith.constant 0 : i32
    %c0_i32_1 = arith.constant 0 : i32
    return %c0_i32, %c0_i32_0 : i32, i32
  }
  func.func @transform_11(%arg0: i32) -> (i32, i32) {
    %c0_i32 = arith.constant 0 : i32
    %c0_i32_0 = arith.constant 0 : i32
    %c0_i32_1 = arith.constant 0 : i32
    return %c0_i32, %c0_i32_0 : i32, i32
  }
  func.func @transform_12(%arg0: i32) -> (i32, i32, i32) {
    %c0_i32 = arith.constant 0 : i32
    %c0_i32_0 = arith.constant 0 : i32
    %c0_i32_1 = arith.constant 0 : i32
    %c0_i32_2 = arith.constant 0 : i32
    return %c0_i32, %c0_i32_0, %c0_i32_1 : i32, i32, i32
  }
  func.func @transform_13(%arg0: i32) -> (i32, i32, i32) {
    %c0_i32 = arith.constant 0 : i32
    %c0_i32_0 = arith.constant 0 : i32
    %c0_i32_1 = arith.constant 0 : i32
    %c0_i32_2 = arith.constant 0 : i32
    return %c0_i32, %c0_i32_0, %c0_i32_1 : i32, i32, i32
  }
  func.func @transform_14(%arg0: i32) -> (i32, i32, i32) {
    %c0_i32 = arith.constant 0 : i32
    %c0_i32_0 = arith.constant 0 : i32
    %c0_i32_1 = arith.constant 0 : i32
    %c0_i32_2 = arith.constant 0 : i32
    return %c0_i32, %c0_i32_0, %c0_i32_1 : i32, i32, i32
  }
  func.func @transform_15(%arg0: i32) -> (i32, i32, i32) {
    %c0_i32 = arith.constant 0 : i32
    %c0_i32_0 = arith.constant 0 : i32
    %c0_i32_1 = arith.constant 0 : i32
    %c0_i32_2 = arith.constant 0 : i32
    return %c0_i32, %c0_i32_0, %c0_i32_1 : i32, i32, i32
  }
  func.func @transform_16(%arg0: i32) -> (i32, i32, i32) {
    %c0_i32 = arith.constant 0 : i32
    %c0_i32_0 = arith.constant 0 : i32
    %c0_i32_1 = arith.constant 0 : i32
    %c0_i32_2 = arith.constant 0 : i32
    return %c0_i32, %c0_i32_0, %c0_i32_1 : i32, i32, i32
  }
  func.func @transform_17(%arg0: i32) -> (i32, i32, i32) {
    %c0_i32 = arith.constant 0 : i32
    %c0_i32_0 = arith.constant 0 : i32
    %c0_i32_1 = arith.constant 0 : i32
    %c0_i32_2 = arith.constant 0 : i32
    return %c0_i32, %c0_i32_0, %c0_i32_1 : i32, i32, i32
  }
  func.func @transform_18(%arg0: i32) -> (i32, i32, i32) {
    %c0_i32 = arith.constant 0 : i32
    %c0_i32_0 = arith.constant 0 : i32
    %c0_i32_1 = arith.constant 0 : i32
    %c0_i32_2 = arith.constant 0 : i32
    return %c0_i32, %c0_i32_0, %c0_i32_1 : i32, i32, i32
  }
  func.func @transform_19(%arg0: i32) -> (i32, i32, i32) {
    %c0_i32 = arith.constant 0 : i32
    %c0_i32_0 = arith.constant 0 : i32
    %c0_i32_1 = arith.constant 0 : i32
    %c0_i32_2 = arith.constant 0 : i32
    return %c0_i32, %c0_i32_0, %c0_i32_1 : i32, i32, i32
  }
  func.func @transform_20(%arg0: i32) -> (i32, i32) {
    %c0_i32 = arith.constant 0 : i32
    %c0_i32_0 = arith.constant 0 : i32
    %c0_i32_1 = arith.constant 0 : i32
    return %c0_i32, %c0_i32_0 : i32, i32
  }
}

</mosaic_0001>

<bundles_post_ra>
// kernel: vision_transformer_forward.1
= control target key start
LH: loop header
LB: loop body
LE: loop exit
PB: predicated region body
PF: predicated region fallthrough
CT: control target
= control target key end

     0   :  { %s11303_s0 = inlined_call_operand.vmem [shape: f32[20,192], index: 0, kind: input, shape index: {}]   ;;  %s11304_s1 = inlined_call_operand.vmem [shape: f32[16,576], index: 1, kind: input, shape index: {}]   ;;  %s11305_s2 = inlined_call_operand.vmem [shape: f32[20,20], index: 2, kind: input, shape index: {}]   ;;  %s11306_s3 = inlined_call_operand.vmem [shape: f32[16,20], index: 3, kind: input, shape index: {}]   ;;  %s11307_s4 = inlined_call_operand.vmem [shape: f32[192,32], index: 4, kind: input, shape index: {}]   ;;  %s11308_s5 = inlined_call_operand.vmem [shape: f32[20,32], index: 5, kind: input, shape index: {}]   ;;  %s11309_s6 = inlined_call_operand.vmem [shape: f32[576,64], index: 6, kind: input, shape index: {}]   ;;  %s11310_s7 = inlined_call_operand.vmem [shape: f32[16,64], index: 7, kind: input, shape index: {}]   ;;  %s11311_s8 = inlined_call_operand.vmem [shape: f32[16,32], index: 8, kind: input, shape index: {}]   ;;  %s11312_s9 = inlined_call_operand.vmem [shape: f32[29,64], index: 9, kind: input, shape index: {}]   ;;  %s11313_s10 = inlined_call_operand.vmem [shape: f32[2,128], index: 10, kind: input, shape index: {}]   ;;  %s11314_s11 = inlined_call_operand.vmem [shape: f32[2,256], index: 11, kind: input, shape index: {}]   ;;  %s11315_s12 = inlined_call_operand.vmem [shape: f32[2,32,96], index: 12, kind: input, shape index: {}]   ;;  %s11316_s13 = inlined_call_operand.vmem [shape: f32[2,32,32], index: 13, kind: input, shape index: {}]   ;;  %s11317_s14 = inlined_call_operand.vmem [shape: f32[2,32,128], index: 14, kind: input, shape index: {}]   ;;  %s11318_s15 = inlined_call_operand.vmem [shape: f32[2,128,32], index: 15, kind: input, shape index: {}]   ;;  %s11319_s16 = inlined_call_operand.vmem [shape: f32[2,32,64], index: 16, kind: input, shape index: {}]   ;;  %s11320_s17 = inlined_call_operand.vmem [shape: f32[12,64,64], index: 17, kind: input, shape index: {}]   ;;  %s11321_s18 = inlined_call_operand.vmem [shape: f32[2,64,256], index: 18, kind: input, shape index: {}]   ;;  %s11322_s19 = inlined_call_operand.vmem [shape: f32[2,256,64], index: 19, kind: input, shape index: {}]   ;;  %s11323_s20 = inlined_call_operand.hbm [shape: f32[2,64], index: 20, kind: output, shape index: {}]  }
   0x1   :  { %11345 = sst [smem:[#allocation9_spill]] %s11303_s0 }
   0x2   :  { %11346 = sst [smem:[#allocation10_spill]] %s11304_s1 }
   0x3   :  { %11347 = sst [smem:[#allocation11_spill]] %s11305_s2 }
   0x4   :  { %11348 = sst [smem:[#allocation12_spill]] %s11306_s3 }
   0x5   :  { %11349 = sst [smem:[#allocation13_spill]] %s11307_s4 }
   0x6   :  { %s11350_s23 = sld [smem:[#allocation13_spill]]  ;;  %v8711_v3 = vmov 0.0|0.0   ;;  %vm112_vm0 = vcmask 523264   ;;  %s11351_s25 = sld [smem:[#allocation9_spill]] }
   0x7   :  { %7837 = vmatprep.subr.bf16.mxu0 %v8711_v3  ;;  %7873 = vmatprep.subr.bf16.mxu1 %v8711_v3 }
   0xc   :  { %v85_v0 = vld [vmem:[%s11350_s23] sm:$0xff]  ;;  %v86_v1 = vld [vmem:[%s11350_s23 + $0x8] sm:$0xff]  ;;  %v87_v2 = vld [vmem:[%s11350_s23 + $0x10] sm:$0xff] }
   0xd   :  { %v7838_v4 = vpack.c.bf16 %v86_v1, %v85_v0  ;;  %v88_v5 = vld [vmem:[%s11350_s23 + $0x18] sm:$0xff]  ;;  %v89_v7 = vld [vmem:[%s11350_s23 + $0x20] sm:$0xff]  ;;  %v90_v8 = vld [vmem:[%s11350_s23 + $0x28] sm:$0xff] }
   0xe   :  { %v7841_v6 = vpack.c.bf16 %v88_v5, %v87_v2  ;;  %v7844_v9 = vpack.c.bf16 %v90_v8, %v89_v7  ;;  %v91_v10 = vld [vmem:[%s11350_s23 + $0x30] sm:$0xff]  ;;  %v92_v11 = vld [vmem:[%s11350_s23 + $0x38] sm:$0xff]  ;;  %v80_v12 = vld [vmem:[%s11351_s25 + $0x8] sm:$0xff] }
   0xf   :  { %7839 = vmatpush1.bf16.msra.mxu0 %v7838_v4  ;;  %6251 = vmatprep.mubr.msk.f32.mxu0 %vm112_vm0, %v80_v12 }
  0x10   :  { %7840 = vmatprep.subr.bf16.mxu0 %v8711_v3 }
  0x13   :  { %7842 = vmatpush1.bf16.msra.mxu0 %v7841_v6 }
  0x14   :  { %7843 = vmatprep.subr.bf16.mxu0 %v8711_v3 }
  0x15   :  { %25 = vsyncpa [#allocation7], 0  ;;  %v7847_v13 = vpack.c.bf16 %v92_v11, %v91_v10  ;;  %v93_v14 = vld [vmem:[%s11350_s23 + $0x40] sm:$0xff]  ;;  %v94_v15 = vld [vmem:[%s11350_s23 + $0x48] sm:$0xff]  ;;  %vm230_vm1 = vcmask 261120   ;;  %vm237_vm2 = vcmask 257024  }
  0x16   :  { %v7850_v16 = vpack.c.bf16 %v94_v15, %v93_v14  ;;  %v95_v17 = vld [vmem:[%s11350_s23 + $0x50] sm:$0xff]  ;;  %v96_v18 = vld [vmem:[%s11350_s23 + $0x58] sm:$0xff]  ;;  %v97_v20 = vld [vmem:[%s11350_s23 + $0x60] sm:$0xff]  ;;  %vm8712_vm3 = vmmov 0   ;;  %v8713_v15 = vmov 0.0   ;;  %s8714_s27 = smov 96  }
  0x17   :  { %7845 = vmatpush1.bf16.msra.mxu0 %v7844_v9  ;;  %v7853_v19 = vpack.c.bf16 %v96_v18, %v95_v17  ;;  %v98_v21 = vld [vmem:[%s11350_s23 + $0x68] sm:$0xff]  ;;  %v99_v23 = vld [vmem:[%s11350_s23 + $0x70] sm:$0xff]  ;;  %v100_v24 = vld [vmem:[%s11350_s23 + $0x78] sm:$0xff]  ;;  %7080 = vmatprep.mubr.msk.f32.mxu1 %vm8712_vm3, %v8713_v15  ;;  %vm384_vm4 = vcmask 64512   ;;  %s11354_s29 = sld [smem:[#allocation11_spill]]  ;;  %vm483_vm6 = vcmask 162816  }
  0x18   :  { %7846 = vmatprep.subr.bf16.mxu0 %v8711_v3  ;;  %v7856_v22 = vpack.c.bf16 %v98_v21, %v97_v20  ;;  %v7859_v25 = vpack.c.bf16 %v100_v24, %v99_v23  ;;  %v101_v26 = vld [vmem:[%s11350_s23 + $0x80] sm:$0xff]  ;;  %v102_v27 = vld [vmem:[%s11350_s23 + $0x88] sm:$0xff]  ;;  %v103_v29 = vld [vmem:[%s11350_s23 + $0x90] sm:$0xff]  ;;  %vm490_vm7 = vcmask 158720   ;;  %s11335_s21 = smov 64   ;;  %s8716_s1 = smov 88  }
  0x19   :  { %v7862_v28 = vpack.c.bf16 %v102_v27, %v101_v26  ;;  %v104_v30 = vld [vmem:[%s11350_s23 + $0x98] sm:$0xff]  ;;  %v105_v32 = vld [vmem:[%s11350_s23 + $0xa0] sm:$0xff]  ;;  %v106_v33 = vld [vmem:[%s11350_s23 + $0xa8] sm:$0xff]  ;;  %s8717_s22 = smov 80   ;;  %s8719_s24 = smov 112   ;;  %vm535_vm8 = vcmask 1043456  }
  0x1a   :  { %v7865_v31 = vpack.c.bf16 %v104_v30, %v103_v29  ;;  %v7868_v34 = vpack.c.bf16 %v106_v33, %v105_v32  ;;  %v107_v35 = vld [vmem:[%s11350_s23 + $0xb0] sm:$0xff]  ;;  %v108_v36 = vld [vmem:[%s11350_s23 + $0xb8] sm:$0xff]  ;;  %v79_v38 = vld [vmem:[%s11351_s25] sm:$0xff]  ;;  %s8718_s23 = smov 120   ;;  %s8720_s2 = smov 104   ;;  %vm620_vm9 = vcmask 60416  }
  0x1b   :  { %7848 = vmatpush1.bf16.msra.mxu0 %v7847_v13  ;;  %v7871_v37 = vpack.c.bf16 %v108_v36, %v107_v35  ;;  %v82_v39 = vld [vmem:[%s11351_s25 + $0x18] sm:$0xff]  ;;  %v81_v40 = vld [vmem:[%s11351_s25 + $0x10] sm:$0xff]  ;;  %v84_v41 = vld [vmem:[%s11351_s25 + $0x28] sm:$0xf]  ;;  %s11343_s3 = smov 72   ;;  %s11333_s26 = smov 56  }
  0x1c   :  { %7849 = vmatprep.subr.bf16.mxu0 %v8711_v3  ;;  %v83_v42 = vld [vmem:[%s11351_s25 + $0x20] sm:$0xf]  ;;  %v110_v47 = vld [vmem:[%s11308_s5 + $0x8] sm:$0xff]  ;;  %v111_v52 = vld [vmem:[%s11308_s5 + $0x10] sm:$0xf]  ;;  %s11331_s28 = smov 48  }
  0x1d   :  { %v109_v43 = vld [vmem:[%s11308_s5] sm:$0xff]  ;;  %v203_v11 = vld [vmem:[%s11315_s12 + $0x8] sm:$0xff]  ;;  %v204_v13 = vld [vmem:[%s11315_s12 + $0x10] sm:$0xff]  ;;  %s11329_s4 = smov 40   ;;  %s11341_s25 = smov 8   ;;  %vm876_vm10 = vcmask 130112  }
  0x1e   :  { %v202_v10 = vld [vmem:[%s11315_s12] sm:$0xff]  ;;  %v205_v14 = vld [vmem:[%s11315_s12 + $0x18] sm:$0xff]  ;;  %vm9029_vm5 = vmpackc.low %vm384_vm4, %vm384_vm4  ;;  %vm1135_vm11 = vcmask 195712   ;;  %vm1394_vm12 = vcmask 261312   ;;  %vm879_vm13 = vcmask 126016   ;;  %vm1138_vm14 = vcmask 191616  }
  0x1f   :  { %7851 = vmatpush1.bf16.msra.mxu0 %v7850_v16  ;;  %v7874_v12 = vpack.c.bf16 %v203_v11, %v202_v10  ;;  %v7877_v16 = vpack.c.bf16 %v205_v14, %v204_v13  ;;  %v8995_v29 = vld [vmem:[%s11311_s8] sm:$0xff]  ;;  %v9066_v10 = vld [vmem:[%s11354_s29 + $0x10] sm:$0xf]  ;;  %vm1397_vm15 = vcmask 257216   ;;  %s11356_s5 = smov 64   ;;  %s11361_s30 = smov 16  }
  0x20   :  { %7852 = vmatprep.subr.bf16.mxu0 %v8711_v3 }
  0x21   :  { %7875 = vmatpush3.bf16.msra.mxu1 %v7874_v12 }
  0x22   :  { %7876 = vmatprep.subr.bf16.mxu1 %v8711_v3 }
  0x23   :  { %7854 = vmatpush1.bf16.msra.mxu0 %v7853_v19  ;;  %v272_v19 = vlaneseq }
  0x24   :  { %7855 = vmatprep.subr.bf16.mxu0 %v8711_v3 }
  0x25   :  { %7878 = vmatpush3.bf16.msra.mxu1 %v7877_v16  ;;  %v8987_v23 = vshrl.u32 %v272_v19, 7 }
  0x26   :  { %7879 = vmatprep.subr.bf16.mxu1 %v8711_v3 }
  0x27   :  { %7857 = vmatpush1.bf16.msra.mxu0 %v7856_v22  ;;  %v8990_v27 = vsub.s32 0, %v8987_v23  ;;  %v8998_v30 = vsub.s32 1, %v8987_v23 }
  0x28   :  { %7858 = vmatprep.subr.bf16.mxu0 %v8711_v3 }
  0x2b   :  { %7860 = vmatpush1.bf16.msra.mxu0 %v7859_v25 }
  0x2c   :  { %7861 = vmatprep.subr.bf16.mxu0 %v8711_v3 }
  0x2f   :  { %7863 = vmatpush1.bf16.msra.mxu0 %v7862_v28 }
  0x30   :  { %7864 = vmatprep.subr.bf16.mxu0 %v8711_v3 }
  0x33   :  { %7866 = vmatpush1.bf16.msra.mxu0 %v7865_v31  ;;  %v275_v31 = vrot.slane %v8995_v29, %v8990_v27 }
  0x34   :  { %7867 = vmatprep.subr.bf16.mxu0 %v8711_v3 }
  0x37   :  { %7869 = vmatpush1.bf16.msra.mxu0 %v7868_v34  ;;  %v282_v34 = vrot.slane %v8995_v29, %v8998_v30 }
  0x38   :  { %7870 = vmatprep.subr.bf16.mxu0 %v8711_v3 }
  0x3b   :  { %7872 = vmatpush1.bf16.msra.mxu0 %v7871_v37 }
  0x3c   :  { %7893 = vmatprep.subr.bf16.mxu0 %v8711_v3 }
  0x3e   :  { %187 = vmatmul.mubr.f32.vlgmr.msra.gmra.mrb[0].mxu0 %v79_v38 }
  0x3f   :  { %6252 = vmatprep.mubr.msk.f32.mxu0 %vm112_vm0, %v82_v39 }
  0x42   :  { %192 = vmatmul.mubr.f32.gmra.mrb[2].mxu0 %v81_v40 }
  0x43   :  { %6253 = vmatprep.mubr.msk.f32.mxu0 %vm112_vm0, %v84_v41 }
  0x46   :  { %197 = vmatmul.mubr.f32.gmra.mrb[4].mxu0 %v83_v42 }
  0x47   :  { %7155 = vmatprep.mubr.msk.f32.mxu0 %vm8712_vm3, %v8713_v15 }
 0x111   :  { %v188_v44 = vpop.f32.mrb[0].mxu0 }
 0x112   :  { %v8944_v45 = vadd.f32 %v188_v44, %v109_v43  ;;  %v190_v46 = vpop.f32.mrb[1].mxu0 }
 0x114   :  { %v231_v48 = vsel %vm230_vm1, %v8944_v45, 0.0 }
 0x115   :  { %v193_v49 = vpop.f32.mrb[2].mxu0  ;;  %232 = vadd.xlane.f32.xlu0 %v231_v48 }
 0x116   :  { %v8951_v50 = vadd.f32 %v193_v49, %v110_v47  ;;  %v195_v51 = vpop.f32.mrb[3].mxu0 }
 0x118   :  { %v234_v53 = vsel %vm230_vm1, %v8951_v50, 0.0 }
 0x119   :  { %v198_v54 = vpop.f32.mrb[4].mxu0  ;;  %235 = vadd.xlane.f32.xlu0 %v234_v53 }
 0x11a   :  { %v8958_v55 = vadd.f32 %v198_v54, %v111_v52  ;;  %v200_v56 = vpop.f32.mrb[5].mxu0 }
 0x11c   :  { %v238_v57 = vsel %vm237_vm2, %v8958_v55, 0.0 }
 0x11d   :  { %239 = vadd.xlane.f32.xlu1 %v238_v57 }
 0x1a2   :  { %v233_v58 = vpop.xlane.xlu0 %232 }
 0x1a3   :  { %v242_v59 = vmul.f32 0.03125, %v233_v58 }
 0x1a5   :  { %v245_v60 = vsub.f32 %v8944_v45, %v242_v59 }
 0x1a6   :  { %v236_v61 = vpop.xlane.xlu0 %235 }
 0x1a7   :  { %v243_v62 = vmul.f32 0.03125, %v236_v61  ;;  %v248_v63 = vmul.f32 %v245_v60, %v245_v60 }
 0x1a9   :  { %v246_v0 = vsub.f32 %v8951_v50, %v243_v62  ;;  %v251_v1 = vsel %vm230_vm1, %v248_v63, 0.0  ;;  %v9053_v62 = vld [vmem:[%s11354_s29] sm:$0xff] }
 0x1aa   :  { %v240_v2 = vpop.xlane.xlu1 %239  ;;  %252 = vadd.xlane.f32.xlu1 %v251_v1 }
 0x1ab   :  { %v244_v4 = vmul.f32 0.03125, %v240_v2  ;;  %v249_v5 = vmul.f32 %v246_v0, %v246_v0 }
 0x1ad   :  { %v247_v6 = vsub.f32 %v8958_v55, %v244_v4  ;;  %v254_v7 = vsel %vm230_vm1, %v249_v5, 0.0  ;;  %v9059_v4 = vld [vmem:[%s11354_s29 + $0x8] sm:$0xff] }
 0x1ae   :  { %255 = vadd.xlane.f32.xlu0 %v254_v7 }
 0x1af   :  { %v250_v8 = vmul.f32 %v247_v6, %v247_v6 }
 0x1b1   :  { %v257_v9 = vsel %vm237_vm2, %v250_v8, 0.0 }
 0x1b2   :  { %258 = vadd.xlane.f32.xlu1 %v257_v9 }
 0x237   :  { %v253_v17 = vpop.xlane.xlu1 %252 }
 0x238   :  { %v260_v18 = vmul.f32 0.03125, %v253_v17 }
 0x23a   :  { %v263_v20 = vadd.f32 1e-05, %v260_v18 }
 0x23b   :  { %v256_v21 = vpop.xlane.xlu0 %255 }
 0x23c   :  { %8495 = vrsqrt.f32 %v263_v20  ;;  %v261_v22 = vmul.f32 0.03125, %v256_v21 }
 0x23e   :  { %v264_v24 = vadd.f32 1e-05, %v261_v22 }
 0x23f   :  { %v259_v25 = vpop.xlane.xlu1 %258 }
 0x240   :  { %8497 = vrsqrt.f32 %v264_v24  ;;  %v262_v26 = vmul.f32 0.03125, %v259_v25 }
 0x242   :  { %v265_v28 = vadd.f32 1e-05, %v262_v26 }
 0x244   :  { %8499 = vrsqrt.f32 %v265_v28 }
 0x246   :  { %v8496_v32 = vpop.eup %8495 }
 0x247   :  { %v269_v33 = vmul.f32 %v8496_v32, %v245_v60 }
 0x249   :  { %v276_v35 = vmul.f32 %v275_v31, %v269_v33 }
 0x24a   :  { %v8498_v36 = vpop.eup %8497 }
 0x24b   :  { %v283_v37 = vadd.f32 %v282_v34, %v276_v35  ;;  %v270_v38 = vmul.f32 %v8498_v36, %v246_v0 }
 0x24d   :  { %7081 = vmatmul.mubr.msk.f32.vlgmr.msra.gmra.mrb[0].mxu1 %vm230_vm1, %v283_v37  ;;  %v277_v39 = vmul.f32 %v275_v31, %v270_v38 }
 0x24e   :  { %v8500_v40 = vpop.eup %8499  ;;  %7083 = vmatprep.mubr.msk.f32.mxu1 %vm8712_vm3, %v8713_v15 }
 0x24f   :  { %v284_v41 = vadd.f32 %v282_v34, %v277_v39  ;;  %v271_v42 = vmul.f32 %v8500_v40, %v247_v6 }
 0x251   :  { %7084 = vmatmul.mubr.msk.f32.gmra.mrb[2].mxu1 %vm230_vm1, %v284_v41  ;;  %v278_v43 = vmul.f32 %v275_v31, %v271_v42 }
 0x252   :  { %7086 = vmatprep.mubr.msk.f32.mxu1 %vm8712_vm3, %v8713_v15 }
 0x253   :  { %v285_v44 = vadd.f32 %v282_v34, %v278_v43 }
 0x255   :  { %7087 = vmatmul.mubr.msk.f32.gmra.mrb[4].mxu1 %vm230_vm1, %v285_v44 }
 0x256   :  { %7095 = vmatprep.mubr.msk.f32.mxu1 %vm8712_vm3, %v8713_v15 }
 0x320   :  { %v9013_v46 = vpop.f32.mrb[0].mxu1 }
 0x321   :  { %v7082_v47 = vpop.f32.mrb[1].mxu1 }
 0x324   :  { %v9015_v48 = vpop.f32.mrb[2].mxu1 }
 0x325   :  { %v7085_v49 = vpop.f32.mrb[3].mxu1  ;;  %v9019_v51 = vpack.i.bf16 %v9015_v48, %v9013_v46 }
 0x327   :  { %8416 = vrot.lane.b32.xlu0 %v9019_v51, %s8714_s27 }
 0x328   :  { %v9023_v52 = vpop.f32.mrb[4].mxu1 }
 0x329   :  { %382 = vrot.lane.b32.xlu1 %v9023_v52, %s8714_s27  ;;  %v7088_v53 = vpop.f32.mrb[5].mxu1 }
 0x399   :  { %v8417_v54 = vpop.permute.xlu0 %8416 }
 0x39a   :  { %v8419_v56 = vunpack.i.h.bf16 %v8417_v54  ;;  %v8418_v57 = vunpack.i.l.bf16 %v8417_v54 }
 0x39b   :  { %v383_v60 = vpop.permute.xlu1 %382 }
 0x39c   :  { %v7880_v59 = vpack.c.bf16 %v8419_v56, %v8418_v57 }
 0x39e   :  { %7882 = vmatpush3.bf16.xpose.msk.msra.mxu1 %vm9029_vm5, %v7880_v59 }
 0x39f   :  { %7093 = vmatprep.subr.mxu1 %v8713_v15 }
 0x3a6   :  { %7094 = vmatpush3.xpose.msk.msra.mxu1 %vm384_vm4, %v383_v60 }
 0x3a7   :  { %7883 = vmatprep.subr.bf16.mxu1 %v8711_v3 }
 0x3a9   :  { %7096 = vmatmul.mubr.msk.f32.vlgmr.msra.gmra.mrb[6].mxu1 %vm384_vm4, %v9013_v46 }
 0x3aa   :  { %7098 = vmatprep.mubr.msk.f32.mxu1 %vm8712_vm3, %v8713_v15 }
 0x3ad   :  { %7099 = vmatmul.mubr.msk.f32.gmra.mrb[8].mxu1 %vm384_vm4, %v9015_v48 }
 0x3ae   :  { %7101 = vmatprep.mubr.msk.f32.mxu1 %vm8712_vm3, %v8713_v15 }
 0x3b1   :  { %7102 = vmatmul.mubr.msk.f32.gmra.mrb[10].mxu1 %vm384_vm4, %v9023_v52 }
 0x3b2   :  { %7110 = vmatprep.mubr.msk.f32.mxu1 %vm8712_vm3, %v8713_v15 }
 0x47c   :  { %v463_v61 = vpop.f32.mrb[6].mxu1 }
 0x47d   :  { %v477_v63 = vmul.f32 0.35355338, %v463_v61  ;;  %v7097_v0 = vpop.f32.mrb[7].mxu1 }
 0x47f   :  { %v480_v1 = vadd.f32 %v477_v63, %v9053_v62 }
 0x480   :  { %v468_v2 = vpop.f32.mrb[8].mxu1 }
 0x481   :  { %v478_v5 = vmul.f32 0.35355338, %v468_v2  ;;  %v7100_v6 = vpop.f32.mrb[9].mxu1  ;;  %v484_v7 = vsel %vm483_vm6, %v480_v1, -inf }
 0x482   :  { %485 = vmax.xlane.f32.xlu1 %v484_v7 }
 0x483   :  { %v481_v8 = vadd.f32 %v478_v5, %v9059_v4 }
 0x484   :  { %v473_v9 = vpop.f32.mrb[10].mxu1 }
 0x485   :  { %v479_v11 = vmul.f32 0.35355338, %v473_v9  ;;  %v7103_v12 = vpop.f32.mrb[11].mxu1  ;;  %v487_v13 = vsel %vm483_vm6, %v481_v8, -inf }
 0x486   :  { %488 = vmax.xlane.f32.xlu0 %v487_v13 }
 0x487   :  { %v482_v14 = vadd.f32 %v479_v11, %v9066_v10 }
 0x489   :  { %v491_v16 = vsel %vm490_vm7, %v482_v14, -inf }
 0x48a   :  { %492 = vmax.xlane.f32.xlu0 %v491_v16 }
 0x50f   :  { %v486_v17 = vpop.xlane.xlu1 %485 }
 0x510   :  { %v494_v18 = vsub.f32 %v480_v1, %v486_v17 }
 0x512   :  { %v497_v20 = vmul.f32 1.442695, %v494_v18 }
 0x513   :  { %v489_v21 = vpop.xlane.xlu0 %488 }
 0x514   :  { %8501 = vpow2.f32 %v497_v20  ;;  %v495_v22 = vsub.f32 %v481_v8, %v489_v21 }
 0x516   :  { %v499_v24 = vmul.f32 1.442695, %v495_v22 }
 0x517   :  { %v493_v32 = vpop.xlane.xlu0 %492 }
 0x518   :  { %8503 = vpow2.f32 %v499_v24  ;;  %v496_v33 = vsub.f32 %v482_v14, %v493_v32 }
 0x51a   :  { %v501_v34 = vmul.f32 1.442695, %v496_v33 }
 0x51c   :  { %8505 = vpow2.f32 %v501_v34 }
 0x51e   :  { %v8502_v25 = vpop.eup %8501 }
 0x51f   :  { %v503_v26 = vsel %vm483_vm6, %v8502_v25, 0.0 }
 0x520   :  { %504 = vadd.xlane.f32.xlu1 %v503_v26 }
 0x522   :  { %v9072_v28 = vpop.eup %8503 }
 0x523   :  { %v506_v31 = vsel %vm483_vm6, %v9072_v28, 0.0 }
 0x524   :  { %507 = vadd.xlane.f32.xlu0 %v506_v31 }
 0x526   :  { %v8506_v35 = vpop.eup %8505 }
 0x527   :  { %v509_v36 = vsel %vm490_vm7, %v8506_v35, 0.0 }
 0x531   :  { %522 = vrot.lane.b32.xlu1 %v9023_v52, %s11335_s21 }
 0x535   :  { %8426 = vrot.lane.b32.xlu1 %v9019_v51, %s8716_s1 }
 0x539   :  { %632 = vrot.lane.b32.xlu1 %v9023_v52, %s8716_s1 }
 0x53a   :  { %8421 = vrot.lane.b32.xlu0 %v9019_v51, %s11335_s21  ;;  %s11337_s21 = smov 24  }
 0x53e   :  { %8431 = vrot.lane.b32.xlu0 %v9019_v51, %s8717_s22 }
 0x542   :  { %624 = vrot.lane.b32.xlu0 %v9015_v48, %s8718_s23 }
 0x546   :  { %891 = vrot.lane.b32.xlu0 %v9023_v52, %s8717_s22 }
 0x54a   :  { %881 = vrot.lane.b32.xlu0 %v9013_v46, %s8719_s24 }
 0x54e   :  { %885 = vrot.lane.b32.xlu0 %v9023_v52, %s8719_s24 }
 0x552   :  { %1140 = vrot.lane.b32.xlu0 %v9013_v46, %s8720_s2 }
 0x556   :  { %1144 = vrot.lane.b32.xlu0 %v9023_v52, %s8720_s2 }
 0x55d   :  { %510 = vadd.xlane.f32.xlu1 %v509_v36 }
 0x56e   :  { %622 = vrot.lane.b32.xlu1 %v9013_v46, %s8718_s23 }
 0x572   :  { %626 = vrot.lane.b32.xlu1 %v9023_v52, %s8718_s23 }
 0x576   :  { %8436 = vrot.lane.b32.xlu1 %v9019_v51, %s11343_s3 }
 0x57a   :  { %883 = vrot.lane.b32.xlu1 %v9015_v48, %s8719_s24 }
 0x57e   :  { %1150 = vrot.lane.b32.xlu1 %v9023_v52, %s11343_s3 }
 0x582   :  { %1142 = vrot.lane.b32.xlu1 %v9015_v48, %s8720_s2 }
 0x5ad   :  { %v505_v37 = vpop.xlane.xlu1 %504 }
 0x5ae   :  { %8507 = vrcp.f32 %v505_v37 }
 0x5b1   :  { %v508_v38 = vpop.xlane.xlu0 %507  ;;  %v523_v40 = vpop.permute.xlu1 %522 }
 0x5b2   :  { %8509 = vrcp.f32 %v508_v38 }
 0x5b5   :  { %v8422_v39 = vpop.permute.xlu0 %8421  ;;  %v8427_v53 = vpop.permute.xlu1 %8426 }
 0x5b6   :  { %v8424_v41 = vunpack.i.h.bf16 %v8422_v39  ;;  %v8423_v42 = vunpack.i.l.bf16 %v8422_v39  ;;  %v8429_v59 = vunpack.i.h.bf16 %v8427_v53  ;;  %v8428_v60 = vunpack.i.l.bf16 %v8427_v53 }
 0x5b8   :  { %v7884_v43 = vpack.c.bf16 %v8424_v41, %v8423_v42  ;;  %v8508_v46 = vpop.eup %8507  ;;  %v7887_v0 = vpack.c.bf16 %v8429_v59, %v8428_v60 }
 0x5b9   :  { %v8432_v44 = vpop.permute.xlu0 %8431  ;;  %v515_v48 = vmul.f32 %v8508_v46, %v8502_v25  ;;  %v633_v2 = vpop.permute.xlu1 %632 }
 0x5ba   :  { %v8434_v47 = vunpack.i.h.bf16 %v8432_v44  ;;  %v8433_v49 = vunpack.i.l.bf16 %v8432_v44  ;;  %7885 = vmatpush3.bf16.msra.mxu1 %v7884_v43 }
 0x5bb   :  { %7108 = vmatprep.subr.mxu1 %v8713_v15 }
 0x5bc   :  { %v7894_v54 = vpack.c.bf16 %v8434_v47, %v8433_v49  ;;  %v8510_v57 = vpop.eup %8509 }
 0x5bd   :  { %v625_v56 = vpop.permute.xlu0 %624  ;;  %v516_v61 = vmul.f32 %v8510_v57, %v9072_v28 }
 0x5be   :  { %7109 = vmatpush3.msk.msra.mxu1 %vm535_vm8, %v523_v40  ;;  %7896 = vmatpush3.bf16.xpose.msk.msra.mxu0 %vm9029_vm5, %v7894_v54 }
 0x5bf   :  { %7111 = vmatmul.mubr.msk.f32.vlgmr.msra.gmra.mrb[12].mxu1 %vm483_vm6, %v515_v48  ;;  %7886 = vmatprep.subr.bf16.mxu1 %v8711_v3 }
 0x5c0   :  { %7113 = vmatprep.mubr.msk.f32.mxu1 %vm8712_vm3, %v8713_v15  ;;  %7153 = vmatprep.subr.mxu0 %v8713_v15 }
 0x5c1   :  { %v892_v63 = vpop.permute.xlu0 %891 }
 0x5c3   :  { %7114 = vmatmul.mubr.msk.f32.gmra.mrb[14].mxu1 %vm483_vm6, %v516_v61 }
 0x5c4   :  { %7116 = vmatprep.mubr.msk.f32.mxu1 %vm8712_vm3, %v8713_v15 }
 0x5c5   :  { %7889 = vmatpush3.bf16.xpose.msk.msra.mxu1 %vm9029_vm5, %v7887_v0  ;;  %v882_v1 = vpop.permute.xlu0 %881 }
 0x5c6   :  { %7154 = vmatpush3.xpose.msk.msra.mxu0 %vm384_vm4, %v892_v63  ;;  %7123 = vmatprep.subr.mxu1 %v8713_v15 }
 0x5c7   :  { %7900 = vmatprep.subr.bf16.mxu0 %v8711_v3 }
 0x5c9   :  { %7156 = vmatmul.mubr.msk.f32.vlgmr.msra.gmra.mrb[6].mxu0 %vm384_vm4, %v882_v1  ;;  %v886_v17 = vpop.permute.xlu0 %885 }
 0x5ca   :  { %7158 = vmatprep.mubr.msk.f32.mxu0 %vm8712_vm3, %v8713_v15 }
 0x5cd   :  { %7124 = vmatpush3.xpose.msk.msra.mxu1 %vm384_vm4, %v633_v2  ;;  %v1141_v20 = vpop.permute.xlu0 %1140 }
 0x5ce   :  { %7890 = vmatprep.subr.bf16.mxu1 %v8711_v3 }
 0x5d1   :  { %v1145_v22 = vpop.permute.xlu0 %1144 }
 0x5ea   :  { %v511_v5 = vpop.xlane.xlu1 %510 }
 0x5eb   :  { %8511 = vrcp.f32 %v511_v5 }
 0x5ee   :  { %v623_v6 = vpop.permute.xlu1 %622 }
 0x5f2   :  { %v627_v7 = vpop.permute.xlu1 %626 }
 0x5f5   :  { %v8512_v8 = vpop.eup %8511 }
 0x5f6   :  { %v8437_v9 = vpop.permute.xlu1 %8436  ;;  %v517_v11 = vmul.f32 %v8512_v8, %v8506_v35 }
 0x5f7   :  { %v8439_v12 = vunpack.i.h.bf16 %v8437_v9  ;;  %v8438_v13 = vunpack.i.l.bf16 %v8437_v9 }
 0x5f8   :  { %7117 = vmatmul.mubr.msk.f32.gmra.mrb[16].mxu1 %vm483_vm6, %v517_v11 }
 0x5f9   :  { %v7901_v14 = vpack.c.bf16 %v8439_v12, %v8438_v13  ;;  %7125 = vmatprep.mubr.msk.f32.mxu1 %vm8712_vm3, %v8713_v15 }
 0x5fa   :  { %v884_v16 = vpop.permute.xlu1 %883 }
 0x5fb   :  { %7159 = vmatmul.mubr.msk.f32.gmra.mrb[8].mxu0 %vm384_vm4, %v884_v16 }
 0x5fc   :  { %7903 = vmatpush3.bf16.xpose.msk.msra.mxu0 %vm9029_vm5, %v7901_v14  ;;  %7126 = vmatmul.mubr.msk.f32.vlgmr.msra.gmra.mrb[18].mxu1 %vm384_vm4, %v623_v6 }
 0x5fd   :  { %7161 = vmatprep.mubr.msk.f32.mxu0 %vm8712_vm3, %v8713_v15  ;;  %7128 = vmatprep.mubr.msk.f32.mxu1 %vm8712_vm3, %v8713_v15 }
 0x5fe   :  { %7183 = vmatprep.subr.mxu0 %v8713_v15  ;;  %v1151_v18 = vpop.permute.xlu1 %1150 }
 0x5ff   :  { %7162 = vmatmul.mubr.msk.f32.gmra.mrb[10].mxu0 %vm384_vm4, %v886_v17 }
 0x600   :  { %7129 = vmatmul.mubr.msk.f32.gmra.mrb[20].mxu1 %vm384_vm4, %v625_v56  ;;  %7185 = vmatprep.mubr.msk.f32.mxu0 %vm8712_vm3, %v8713_v15 }
 0x601   :  { %7131 = vmatprep.mubr.msk.f32.mxu1 %vm8712_vm3, %v8713_v15 }
 0x602   :  { %v1143_v21 = vpop.permute.xlu1 %1142 }
 0x604   :  { %7184 = vmatpush3.xpose.msk.msra.mxu0 %vm384_vm4, %v1151_v18  ;;  %7132 = vmatmul.mubr.msk.f32.gmra.mrb[22].mxu1 %vm384_vm4, %v627_v7 }
 0x605   :  { %7140 = vmatprep.mubr.msk.f32.mxu1 %vm8712_vm3, %v8713_v15  ;;  %7907 = vmatprep.subr.bf16.mxu0 %v8711_v3 }
 0x607   :  { %7186 = vmatmul.mubr.msk.f32.vlgmr.msra.gmra.mrb[12].mxu0 %vm384_vm4, %v1141_v20 }
 0x608   :  { %7188 = vmatprep.mubr.msk.f32.mxu0 %vm8712_vm3, %v8713_v15 }
 0x60b   :  { %7189 = vmatmul.mubr.msk.f32.gmra.mrb[14].mxu0 %vm384_vm4, %v1143_v21 }
 0x60c   :  { %7191 = vmatprep.mubr.msk.f32.mxu0 %vm8712_vm3, %v8713_v15 }
 0x60f   :  { %7192 = vmatmul.mubr.msk.f32.gmra.mrb[16].mxu0 %vm384_vm4, %v1145_v22 }
 0x610   :  { %7217 = vmatprep.mubr.msk.f32.mxu0 %vm8712_vm3, %v8713_v15 }
 0x692   :  { %v604_v24 = vpop.f32.mrb[12].mxu1 }
 0x693   :  { %618 = vst.msk [vmem:[#allocation2] sm:$0xff] %vm384_vm4, %v604_v24  ;;  %v7112_v25 = vpop.f32.mrb[13].mxu1 }
 0x696   :  { %v609_v26 = vpop.f32.mrb[14].mxu1 }
 0x697   :  { %619 = vst.msk [vmem:[#allocation2 + $0x8] sm:$0xff] %vm384_vm4, %v609_v26  ;;  %v7115_v28 = vpop.f32.mrb[15].mxu1 }
 0x69c   :  { %v971_v31 = vpop.f32.mrb[6].mxu0 }
 0x69d   :  { %v985_v32 = vmul.f32 0.35355338, %v971_v31  ;;  %v7157_v33 = vpop.f32.mrb[7].mxu0 }
 0x69f   :  { %v988_v34 = vadd.f32 %v985_v32, %v9053_v62 }
 0x6a1   :  { %v991_v35 = vsel %vm483_vm6, %v988_v34, -inf }
 0x6a2   :  { %992 = vmax.xlane.f32.xlu0 %v991_v35 }
 0x6cb   :  { %v614_v36 = vpop.f32.mrb[16].mxu1 }
 0x6cc   :  { %621 = vst.msk [vmem:[#allocation2 + $0x10] sm:$0xf] %vm620_vm9, %v614_v36  ;;  %v7118_v37 = vpop.f32.mrb[17].mxu1 }
 0x6ce   :  { %v976_v38 = vpop.f32.mrb[8].mxu0 }
 0x6cf   :  { %v712_v39 = vpop.f32.mrb[18].mxu1  ;;  %v7160_v40 = vpop.f32.mrb[9].mxu0  ;;  %v986_v41 = vmul.f32 0.35355338, %v976_v38 }
 0x6d0   :  { %v726_v42 = vmul.f32 0.35355338, %v712_v39  ;;  %v7127_v43 = vpop.f32.mrb[19].mxu1 }
 0x6d1   :  { %v989_v56 = vadd.f32 %v986_v41, %v9059_v4 }
 0x6d2   :  { %v981_v44 = vpop.f32.mrb[10].mxu0  ;;  %v9172_v46 = vadd.f32 %v726_v42, %v9053_v62 }
 0x6d3   :  { %v987_v47 = vmul.f32 0.35355338, %v981_v44  ;;  %v717_v49 = vpop.f32.mrb[20].mxu1  ;;  %v7163_v53 = vpop.f32.mrb[11].mxu0  ;;  %v994_v63 = vsel %vm483_vm6, %v989_v56, -inf }
 0x6d4   :  { %v7130_v54 = vpop.f32.mrb[21].mxu1  ;;  %v732_v48 = vsel %vm483_vm6, %v9172_v46, -inf  ;;  %v727_v41 = vmul.f32 0.35355338, %v717_v49 }
 0x6d5   :  { %733 = vmax.xlane.f32.xlu1 %v732_v48  ;;  %v990_v57 = vadd.f32 %v987_v47, %v9066_v10 }
 0x6d6   :  { %v730_v53 = vadd.f32 %v727_v41, %v9059_v4 }
 0x6d7   :  { %v722_v59 = vpop.f32.mrb[22].mxu1  ;;  %v997_v60 = vsel %vm490_vm7, %v990_v57, -inf }
 0x6d8   :  { %998 = vmax.xlane.f32.xlu0 %v997_v60  ;;  %v7133_v61 = vpop.f32.mrb[23].mxu1  ;;  %v728_v44 = vmul.f32 0.35355338, %v722_v59  ;;  %v735_v54 = vsel %vm483_vm6, %v730_v53, -inf }
 0x6d9   :  { %995 = vmax.xlane.f32.xlu1 %v994_v63 }
 0x6da   :  { %v1230_v0 = vpop.f32.mrb[12].mxu0  ;;  %v731_v48 = vadd.f32 %v728_v44, %v9066_v10 }
 0x6db   :  { %v1244_v1 = vmul.f32 0.35355338, %v1230_v0  ;;  %v7187_v2 = vpop.f32.mrb[13].mxu0 }
 0x6dc   :  { %v738_v49 = vsel %vm490_vm7, %v731_v48, -inf }
 0x6dd   :  { %v1247_v5 = vadd.f32 %v1244_v1, %v9053_v62 }
 0x6de   :  { %v1235_v6 = vpop.f32.mrb[14].mxu0 }
 0x6df   :  { %v1245_v7 = vmul.f32 0.35355338, %v1235_v6  ;;  %v7190_v8 = vpop.f32.mrb[15].mxu0  ;;  %v1250_v9 = vsel %vm483_vm6, %v1247_v5, -inf }
 0x6e0   :  { %1251 = vmax.xlane.f32.xlu1 %v1250_v9 }
 0x6e1   :  { %v9183_v11 = vadd.f32 %v1245_v7, %v9059_v4 }
 0x6e2   :  { %v1240_v12 = vpop.f32.mrb[16].mxu0 }
 0x6e3   :  { %v1246_v13 = vmul.f32 0.35355338, %v1240_v12  ;;  %v7193_v14 = vpop.f32.mrb[17].mxu0  ;;  %v1253_v16 = vsel %vm483_vm6, %v9183_v11, -inf }
 0x6e4   :  { %1254 = vmax.xlane.f32.xlu0 %v1253_v16 }
 0x6e5   :  { %v9188_v17 = vadd.f32 %v1246_v13, %v9066_v10 }
 0x6e7   :  { %v1256_v62 = vsel %vm490_vm7, %v9188_v17, -inf }
 0x6e8   :  { %1257 = vmax.xlane.f32.xlu1 %v1256_v62 }
 0x72f   :  { %v993_v18 = vpop.xlane.xlu0 %992 }
 0x730   :  { %v1000_v20 = vsub.f32 %v988_v34, %v993_v18 }
 0x732   :  { %v1003_v21 = vmul.f32 1.442695, %v1000_v20 }
 0x734   :  { %8513 = vpow2.f32 %v1003_v21 }
 0x73e   :  { %v9192_v22 = vpop.eup %8513 }
 0x73f   :  { %v1009_v24 = vsel %vm483_vm6, %v9192_v22, 0.0 }
 0x740   :  { %1010 = vadd.xlane.f32.xlu1 %v1009_v24 }
 0x751   :  { %8441 = vrot.lane.b32.xlu1 %v9019_v51, %s11333_s26 }
 0x762   :  { %v734_v25 = vpop.xlane.xlu1 %733 }
 0x765   :  { %v999_v26 = vpop.xlane.xlu0 %998 }
 0x766   :  { %v1002_v28 = vsub.f32 %v990_v57, %v999_v26  ;;  %v996_v31 = vpop.xlane.xlu1 %995 }
 0x767   :  { %v1001_v32 = vsub.f32 %v989_v56, %v996_v31  ;;  %v741_v56 = vsub.f32 %v9172_v46, %v734_v25 }
 0x768   :  { %v1007_v33 = vmul.f32 1.442695, %v1002_v28 }
 0x769   :  { %v1005_v35 = vmul.f32 1.442695, %v1001_v32  ;;  %v744_v57 = vmul.f32 1.442695, %v741_v56 }
 0x76b   :  { %8515 = vpow2.f32 %v1005_v35 }
 0x76c   :  { %8517 = vpow2.f32 %v1007_v33 }
 0x76d   :  { %v1252_v34 = vpop.xlane.xlu1 %1251 }
 0x76e   :  { %v1259_v36 = vsub.f32 %v1247_v5, %v1252_v34 }
 0x770   :  { %v1262_v37 = vmul.f32 1.442695, %v1259_v36 }
 0x771   :  { %v1255_v46 = vpop.xlane.xlu0 %1254 }
 0x772   :  { %8519 = vpow2.f32 %v1262_v37  ;;  %v1260_v7 = vsub.f32 %v9183_v11, %v1255_v46 }
 0x773   :  { %8521 = vpow2.f32 %v744_v57 }
 0x774   :  { %v1264_v12 = vmul.f32 1.442695, %v1260_v7 }
 0x775   :  { %v9198_v38 = vpop.eup %8515  ;;  %v1258_v4 = vpop.xlane.xlu1 %1257 }
 0x776   :  { %v1012_v39 = vsel %vm483_vm6, %v9198_v38, 0.0  ;;  %v9202_v40 = vpop.eup %8517  ;;  %v1261_v28 = vsub.f32 %v9188_v17, %v1258_v4 }
 0x777   :  { %1013 = vadd.xlane.f32.xlu0 %v1012_v39  ;;  %v1015_v42 = vsel %vm490_vm7, %v9202_v40, 0.0 }
 0x778   :  { %v1266_v31 = vmul.f32 1.442695, %v1261_v28 }
 0x77b   :  { %1016 = vadd.xlane.f32.xlu0 %v1015_v42 }
 0x77c   :  { %v9206_v43 = vpop.eup %8519 }
 0x77d   :  { %v1268_v47 = vsel %vm483_vm6, %v9206_v43, 0.0  ;;  %v8522_v59 = vpop.eup %8521 }
 0x77e   :  { %v750_v60 = vsel %vm483_vm6, %v8522_v59, 0.0 }
 0x77f   :  { %1269 = vadd.xlane.f32.xlu0 %v1268_v47 }
 0x783   :  { %736 = vmax.xlane.f32.xlu0 %v735_v54 }
 0x787   :  { %739 = vmax.xlane.f32.xlu0 %v738_v49 }
 0x79d   :  { %769 = vrot.lane.b32.xlu0 %v9023_v52, %s11333_s26  ;;  %s11358_s26 = smov 48  }
 0x7bc   :  { %751 = vadd.xlane.f32.xlu0 %v750_v60 }
 0x7cd   :  { %v1011_v61 = vpop.xlane.xlu1 %1010 }
 0x7d1   :  { %v8442_v63 = vpop.permute.xlu1 %8441 }
 0x7d2   :  { %v8444_v0 = vunpack.i.h.bf16 %v8442_v63  ;;  %v8443_v10 = vunpack.i.l.bf16 %v8442_v63  ;;  %8446 = vrot.lane.b32.xlu0 %v9019_v51, %s11331_s28 }
 0x7d4   :  { %v7891_v1 = vpack.c.bf16 %v8444_v0, %v8443_v10 }
 0x7d6   :  { %7892 = vmatpush3.bf16.msra.mxu1 %v7891_v1 }
 0x7d7   :  { %7138 = vmatprep.subr.mxu1 %v8713_v15 }
 0x804   :  { %v1014_v2 = vpop.xlane.xlu0 %1013 }
 0x808   :  { %v1017_v5 = vpop.xlane.xlu0 %1016 }
 0x80c   :  { %v9221_v6 = vpop.xlane.xlu0 %1269 }
 0x810   :  { %v737_v8 = vpop.xlane.xlu0 %736 }
 0x811   :  { %v742_v9 = vsub.f32 %v730_v53, %v737_v8 }
 0x813   :  { %v746_v13 = vmul.f32 1.442695, %v742_v9 }
 0x814   :  { %v740_v14 = vpop.xlane.xlu0 %739 }
 0x815   :  { %8523 = vpow2.f32 %v746_v13  ;;  %v743_v16 = vsub.f32 %v731_v48, %v740_v14  ;;  %v206_v14 = vld [vmem:[%s11316_s13] sm:$0xff] }
 0x816   :  { %8525 = vpow2.f32 %v1264_v12 }
 0x817   :  { %v748_v62 = vmul.f32 1.442695, %v743_v16  ;;  %v207_v16 = vld [vmem:[%s11316_s13 + $0x8] sm:$0xff] }
 0x818   :  { %v770_v18 = vpop.permute.xlu0 %769 }
 0x819   :  { %8527 = vpow2.f32 %v748_v62  ;;  %7139 = vmatpush3.msk.msra.mxu1 %vm535_vm8, %v770_v18  ;;  %v7908_v18 = vpack.c.bf16 %v207_v16, %v206_v14  ;;  %v210_v14 = vld [vmem:[%s11317_s14] sm:$0xff]  ;;  %v211_v16 = vld [vmem:[%s11317_s14 + $0x8] sm:$0xff] }
 0x81a   :  { %7897 = vmatprep.subr.bf16.mxu1 %v8711_v3 }
 0x81b   :  { %7909 = vmatpush3.bf16.msra.mxu0 %v7908_v18 }
 0x81c   :  { %7910 = vmatprep.subr.bf16.mxu0 %v8711_v3 }
 0x81f   :  { %v8524_v20 = vpop.eup %8523 }
 0x820   :  { %v753_v21 = vsel %vm483_vm6, %v8524_v20, 0.0  ;;  %v9227_v24 = vpop.eup %8525 }
 0x821   :  { %754 = vadd.xlane.f32.xlu1 %v753_v21  ;;  %v1271_v25 = vsel %vm483_vm6, %v9227_v24, 0.0  ;;  %v208_v21 = vld [vmem:[%s11316_s13 + $0x10] sm:$0xff] }
 0x823   :  { %v8528_v11 = vpop.eup %8527 }
 0x824   :  { %v756_v26 = vsel %vm490_vm7, %v8528_v11, 0.0 }
 0x825   :  { %1272 = vadd.xlane.f32.xlu1 %v1271_v25  ;;  %757 = vadd.xlane.f32.xlu0 %v756_v26 }
 0x836   :  { %8451 = vrot.lane.b32.xlu1 %v9019_v51, %s11329_s4 }
 0x83a   :  { %1287 = vrot.lane.b32.xlu1 %v9023_v52, %s11329_s4  ;;  %s11359_s4 = smov 40  }
 0x83b   :  { %1028 = vrot.lane.b32.xlu0 %v9023_v52, %s11331_s28  ;;  %s11339_s28 = smov 16  }
 0x849   :  { %v752_v32 = vpop.xlane.xlu0 %751 }
 0x84a   :  { %8529 = vrcp.f32 %v752_v32 }
 0x84b   :  { %8531 = vpow2.f32 %v1266_v31 }
 0x84d   :  { %v8447_v33 = vpop.permute.xlu0 %8446 }
 0x84e   :  { %v8449_v35 = vunpack.i.h.bf16 %v8447_v33  ;;  %v8448_v34 = vunpack.i.l.bf16 %v8447_v33 }
 0x850   :  { %v7898_v41 = vpack.c.bf16 %v8449_v35, %v8448_v34 }
 0x854   :  { %v8530_v36 = vpop.eup %8529 }
 0x855   :  { %v762_v37 = vmul.f32 %v8530_v36, %v8522_v59  ;;  %v8532_v39 = vpop.eup %8531 }
 0x856   :  { %v1274_v51 = vsel %vm490_vm7, %v8532_v39, 0.0 }
 0x857   :  { %7141 = vmatmul.mubr.msk.f32.vlgmr.msra.gmra.mrb[24].mxu1 %vm483_vm6, %v762_v37 }
 0x858   :  { %7899 = vmatpush3.bf16.msra.mxu1 %v7898_v41  ;;  %7143 = vmatprep.mubr.msk.f32.mxu1 %vm8712_vm3, %v8713_v15 }
 0x859   :  { %7168 = vmatprep.subr.mxu1 %v8713_v15 }
 0x85a   :  { %1275 = vadd.xlane.f32.xlu0 %v1274_v51 }
 0x8ae   :  { %v755_v52 = vpop.xlane.xlu1 %754 }
 0x8af   :  { %8533 = vrcp.f32 %v755_v52 }
 0x8b2   :  { %v758_v17 = vpop.xlane.xlu0 %757  ;;  %v1273_v44 = vpop.xlane.xlu1 %1272 }
 0x8b3   :  { %8535 = vrcp.f32 %v758_v17 }
 0x8b4   :  { %8537 = vrcp.f32 %v1011_v61 }
 0x8b5   :  { %8539 = vrcp.f32 %v1014_v2 }
 0x8b6   :  { %v1029_v42 = vpop.permute.xlu0 %1028  ;;  %v8452_v54 = vpop.permute.xlu1 %8451  ;;  %8541 = vrcp.f32 %v1017_v5 }
 0x8b7   :  { %7169 = vmatpush3.msk.msra.mxu1 %vm535_vm8, %v1029_v42  ;;  %v8454_v57 = vunpack.i.h.bf16 %v8452_v54  ;;  %v8453_v59 = vunpack.i.l.bf16 %v8452_v54  ;;  %8543 = vrcp.f32 %v9221_v6 }
 0x8b8   :  { %7904 = vmatprep.subr.bf16.mxu1 %v8711_v3  ;;  %8545 = vrcp.f32 %v1273_v44 }
 0x8b9   :  { %v8534_v47 = vpop.eup %8533  ;;  %v7905_v61 = vpack.c.bf16 %v8454_v57, %v8453_v59 }
 0x8ba   :  { %v763_v53 = vmul.f32 %v8534_v47, %v8524_v20  ;;  %v1288_v10 = vpop.permute.xlu1 %1287 }
 0x8bc   :  { %7144 = vmatmul.mubr.msk.f32.gmra.mrb[26].mxu1 %vm483_vm6, %v763_v53 }
 0x8bd   :  { %7146 = vmatprep.mubr.msk.f32.mxu1 %vm8712_vm3, %v8713_v15  ;;  %v8536_v48 = vpop.eup %8535 }
 0x8be   :  { %v764_v49 = vmul.f32 %v8536_v48, %v8528_v11  ;;  %v8538_v56 = vpop.eup %8537 }
 0x8bf   :  { %v1021_v60 = vmul.f32 %v8538_v56, %v9192_v22  ;;  %v8540_v4 = vpop.eup %8539  ;;  %v9321_v56 = vsub.s32 2, %v8987_v23 }
 0x8c0   :  { %7147 = vmatmul.mubr.msk.f32.gmra.mrb[28].mxu1 %vm483_vm6, %v764_v49  ;;  %v1022_v63 = vmul.f32 %v8540_v4, %v9198_v38  ;;  %v8542_v0 = vpop.eup %8541 }
 0x8c1   :  { %7170 = vmatprep.mubr.msk.f32.mxu1 %vm8712_vm3, %v8713_v15  ;;  %v1023_v22 = vmul.f32 %v8542_v0, %v9202_v40  ;;  %v8544_v1 = vpop.eup %8543  ;;  %v1497_v57 = vrot.slane %v8995_v29, %v9321_v56 }
 0x8c2   :  { %v1280_v38 = vmul.f32 %v8544_v1, %v9206_v43  ;;  %v8546_v46 = vpop.eup %8545 }
 0x8c3   :  { %v1281_v2 = vmul.f32 %v8546_v46, %v9227_v24  ;;  %v209_v24 = vld [vmem:[%s11316_s13 + $0x18] sm:$0xff] }
 0x8c4   :  { %7171 = vmatmul.mubr.msk.f32.vlgmr.msra.gmra.mrb[30].mxu1 %vm483_vm6, %v1021_v60  ;;  %v7911_v25 = vpack.c.bf16 %v209_v24, %v208_v21  ;;  %v212_v21 = vld [vmem:[%s11317_s14 + $0x10] sm:$0xff]  ;;  %v213_v24 = vld [vmem:[%s11317_s14 + $0x18] sm:$0xff] }
 0x8c5   :  { %7906 = vmatpush3.bf16.msra.mxu1 %v7905_v61  ;;  %7173 = vmatprep.mubr.msk.f32.mxu1 %vm8712_vm3, %v8713_v15 }
 0x8c6   :  { %7198 = vmatprep.subr.mxu1 %v8713_v15  ;;  %7912 = vmatpush3.bf16.msra.mxu0 %v7911_v25  ;;  %v7917_v25 = vpack.c.bf16 %v213_v24, %v212_v21  ;;  %v228_v21 = vld [vmem:[%s11318_s15 + $0x70] sm:$0xff]  ;;  %v229_v24 = vld [vmem:[%s11318_s15 + $0x78] sm:$0xff] }
 0x8c7   :  { %7919 = vmatprep.subr.bf16.mxu0 %v8711_v3 }
 0x8c8   :  { %7174 = vmatmul.mubr.msk.f32.gmra.mrb[32].mxu1 %vm483_vm6, %v1022_v63 }
 0x8c9   :  { %7199 = vmatpush3.msk.msra.mxu1 %vm535_vm8, %v1288_v10  ;;  %7176 = vmatprep.mubr.msk.f32.mxu1 %vm8712_vm3, %v8713_v15 }
 0x8ca   :  { %7913 = vmatprep.subr.bf16.mxu1 %v8711_v3 }
 0x8cc   :  { %7177 = vmatmul.mubr.msk.f32.gmra.mrb[34].mxu1 %vm483_vm6, %v1023_v22 }
 0x8cd   :  { %7200 = vmatprep.mubr.msk.f32.mxu1 %vm8712_vm3, %v8713_v15 }
 0x8d0   :  { %7201 = vmatmul.mubr.msk.f32.vlgmr.msra.gmra.mrb[36].mxu1 %vm483_vm6, %v1280_v38 }
 0x8d1   :  { %7203 = vmatprep.mubr.msk.f32.mxu1 %vm8712_vm3, %v8713_v15 }
 0x8d4   :  { %7204 = vmatmul.mubr.msk.f32.gmra.mrb[38].mxu1 %vm483_vm6, %v1281_v2 }
 0x8d5   :  { %7206 = vmatprep.mubr.msk.f32.mxu1 %vm8712_vm3, %v8713_v15 }
 0x8e7   :  { %v1276_v40 = vpop.xlane.xlu0 %1275 }
 0x8e8   :  { %8547 = vrcp.f32 %v1276_v40 }
 0x8f2   :  { %v8548_v5 = vpop.eup %8547 }
 0x8f3   :  { %v1282_v6 = vmul.f32 %v8548_v5, %v8532_v39 }
 0x8f5   :  { %7207 = vmatmul.mubr.msk.f32.gmra.mrb[40].mxu1 %vm483_vm6, %v1282_v6 }
 0x8f6   :  { %7234 = vmatprep.mubr.msk.f32.mxu1 %vm8712_vm3, %v8713_v15 }
 0x92a   :  { %v850_v43 = vpop.f32.mrb[24].mxu1 }
 0x92b   :  { %867 = vrot.lane.b32.xlu0 %v850_v43, %s11341_s25  ;;  %v7142_v7 = vpop.f32.mrb[25].mxu1 }
 0x98f   :  { %v855_v8 = vpop.f32.mrb[26].mxu1 }
 0x990   :  { %869 = vrot.lane.b32.xlu1 %v855_v8, %s11341_s25  ;;  %v7145_v9 = vpop.f32.mrb[27].mxu1 }
 0x993   :  { %v860_v12 = vpop.f32.mrb[28].mxu1 }
 0x994   :  { %v7148_v13 = vpop.f32.mrb[29].mxu1 }
 0x997   :  { %v1109_v62 = vpop.f32.mrb[30].mxu1 }
 0x998   :  { %1126 = vrot.lane.b32.xlu1 %v1109_v62, %s11339_s28  ;;  %v7172_v20 = vpop.f32.mrb[31].mxu1  ;;  %v7914_v62 = vpack.c.bf16 %v211_v16, %v210_v14  ;;  %v225_v14 = vld [vmem:[%s11318_s15 + $0x58] sm:$0xff] }
 0x99a   :  { %7915 = vmatpush3.bf16.msra.mxu1 %v7914_v62  ;;  %v226_v62 = vld [vmem:[%s11318_s15 + $0x60] sm:$0xff] }
 0x99b   :  { %v1114_v11 = vpop.f32.mrb[32].mxu1  ;;  %7916 = vmatprep.subr.bf16.mxu1 %v8711_v3 }
 0x99c   :  { %1128 = vrot.lane.b32.xlu1 %v1114_v11, %s11339_s28  ;;  %v7175_v26 = vpop.f32.mrb[33].mxu1 }
 0x99d   :  { %v868_v28 = vpop.permute.xlu0 %867 }
 0x99e   :  { %877 = vst.msk [vmem:[#allocation2] sm:$0xff] %vm876_vm10, %v868_v28  ;;  %7918 = vmatpush3.bf16.msra.mxu1 %v7917_v25  ;;  %v72_v25 = vld [vmem:[%s11313_s10] sm:$0x3] }
 0x99f   :  { %v1119_v31 = vpop.f32.mrb[34].mxu1  ;;  %7943 = vmatprep.subr.bf16.mxu1 %v8711_v3 }
 0x9a0   :  { %1130 = vrot.lane.b32.xlu0 %v1119_v31, %s11339_s28  ;;  %v7178_v32 = vpop.f32.mrb[35].mxu1  ;;  %v214_v31 = vld [vmem:[%s11318_s15] sm:$0xff] }
 0x9a1   :  { %v215_v32 = vld [vmem:[%s11318_s15 + $0x8] sm:$0xff] }
 0x9a3   :  { %v1368_v33 = vpop.f32.mrb[36].mxu1 }
 0x9a4   :  { %1385 = vrot.lane.b32.xlu1 %v1368_v33, %s11337_s21  ;;  %v7202_v35 = vpop.f32.mrb[37].mxu1  ;;  %v216_v33 = vld [vmem:[%s11318_s15 + $0x10] sm:$0xff] }
 0x9a5   :  { %v7920_v35 = vpack.c.bf16 %v215_v32, %v214_v31 }
 0x9a7   :  { %v1373_v34 = vpop.f32.mrb[38].mxu1 }
 0x9a8   :  { %1387 = vrot.lane.b32.xlu1 %v1373_v34, %s11337_s21  ;;  %v7205_v36 = vpop.f32.mrb[39].mxu1  ;;  %v217_v34 = vld [vmem:[%s11318_s15 + $0x18] sm:$0xff] }
 0x9a9   :  { %v7923_v36 = vpack.c.bf16 %v217_v34, %v216_v33 }
 0x9ac   :  { %871 = vrot.lane.b32.xlu1 %v860_v12, %s11341_s25 }
 0x9c8   :  { %v1378_v37 = vpop.f32.mrb[40].mxu1 }
 0x9c9   :  { %1389 = vrot.lane.b32.xlu1 %v1378_v37, %s11337_s21  ;;  %v7208_v39 = vpop.f32.mrb[41].mxu1  ;;  %v218_v37 = vld [vmem:[%s11318_s15 + $0x20] sm:$0xff]  ;;  %s11360_s21 = smov 8  }
 0x9ca   :  { %v219_v39 = vld [vmem:[%s11318_s15 + $0x28] sm:$0xff] }
 0xa02   :  { %v870_v41 = vpop.permute.xlu1 %869 }
 0xa03   :  { %878 = vst.msk [vmem:[#allocation2 + $0x8] sm:$0xff] %vm876_vm10, %v870_v41  ;;  %v7926_v41 = vpack.c.bf16 %v219_v39, %v218_v37 }
 0xa0a   :  { %v1127_v51 = vpop.permute.xlu1 %1126 }
 0xa0b   :  { %1136 = vst.msk [vmem:[#allocation2] sm:$0xff] %vm1135_vm11, %v1127_v51 }
 0xa0e   :  { %v1129_v52 = vpop.permute.xlu1 %1128 }
 0xa0f   :  { %1137 = vst.msk [vmem:[#allocation2 + $0x8] sm:$0xff] %vm1135_vm11, %v1129_v52 }
 0xa12   :  { %v1131_v53 = vpop.permute.xlu0 %1130 }
 0xa16   :  { %v1386_v17 = vpop.permute.xlu1 %1385 }
 0xa17   :  { %1395 = vst.msk [vmem:[#allocation2] sm:$0xff] %vm1394_vm12, %v1386_v17 }
 0xa1a   :  { %v1388_v42 = vpop.permute.xlu1 %1387 }
 0xa1b   :  { %1396 = vst.msk [vmem:[#allocation2 + $0x8] sm:$0xff] %vm1394_vm12, %v1388_v42 }
 0xa1e   :  { %v872_v44 = vpop.permute.xlu1 %871  ;;  %v1399_v47 = vld [vmem:[#allocation2] sm:$0xff] }
 0xa1f   :  { %880 = vst.msk [vmem:[#allocation2 + $0x10] sm:$0xf] %vm879_vm13, %v872_v44  ;;  %7218 = vmatmul.mubr.msk.f32.vlgmr.msra.gmra.mrb[18].mxu0 %vm230_vm1, %v1399_v47 }
 0xa20   :  { %7220 = vmatprep.mubr.msk.f32.mxu0 %vm8712_vm3, %v8713_v15  ;;  %1139 = vst.msk [vmem:[#allocation2 + $0x10] sm:$0xf] %vm1138_vm14, %v1131_v53  ;;  %7921 = vmatpush3.bf16.msra.mxu0 %v7920_v35  ;;  %v9382_v53 = vsub.s32 3, %v8987_v23 }
 0xa21   :  { %7922 = vmatprep.subr.bf16.mxu0 %v8711_v3 }
 0xa22   :  { %v1400_v54 = vld [vmem:[#allocation2 + $0x8] sm:$0xff] }
 0xa23   :  { %7221 = vmatmul.mubr.msk.f32.gmra.mrb[20].mxu0 %vm230_vm1, %v1400_v54  ;;  %v9385_v54 = vsub.s32 4, %v8987_v23 }
 0xa24   :  { %7223 = vmatprep.mubr.msk.f32.mxu0 %vm8712_vm3, %v8713_v15  ;;  %7924 = vmatpush3.bf16.msra.mxu0 %v7923_v36 }
 0xa25   :  { %7925 = vmatprep.subr.bf16.mxu0 %v8711_v3 }
 0xa28   :  { %7927 = vmatpush3.bf16.msra.mxu0 %v7926_v41 }
 0xa29   :  { %7928 = vmatprep.subr.bf16.mxu0 %v8711_v3 }
 0xa3b   :  { %v1390_v48 = vpop.permute.xlu1 %1389 }
 0xa3c   :  { %1398 = vst.msk [vmem:[#allocation2 + $0x10] sm:$0xf] %vm1397_vm15, %v1390_v48  ;;  %v9390_v48 = vld [vmem:[%s11311_s8] sm:$0xff] }
 0xa43   :  { %v1401_v49 = vld [vmem:[#allocation2 + $0x10] sm:$0xf] }
 0xa44   :  { %7224 = vmatmul.mubr.msk.f32.gmra.mrb[22].mxu0 %vm230_vm1, %v1401_v49  ;;  %v1543_v49 = vrot.slane %v9390_v48, %v9382_v53 }
 0xa45   :  { %7275 = vmatprep.mubr.msk.f32.mxu0 %vm8712_vm3, %v8713_v15 }
 0xaf2   :  { %v1477_v59 = vpop.f32.mrb[18].mxu0 }
 0xaf3   :  { %v1491_v60 = vadd.f32 %v1477_v59, %v8944_v45  ;;  %v7219_v4 = vpop.f32.mrb[19].mxu0 }
 0xaf5   :  { %v9326_v61 = vadd.f32 %v1497_v57, %v1491_v60  ;;  %v1550_v60 = vrot.slane %v9390_v48, %v9385_v54 }
 0xaf6   :  { %v1482_v63 = vpop.f32.mrb[20].mxu0 }
 0xaf7   :  { %v1492_v0 = vadd.f32 %v1482_v63, %v8951_v50  ;;  %v7222_v10 = vpop.f32.mrb[21].mxu0  ;;  %v1501_v22 = vsel %vm230_vm1, %v9326_v61, 0.0 }
 0xaf8   :  { %1502 = vadd.xlane.f32.xlu0 %v1501_v22 }
 0xaf9   :  { %v9331_v1 = vadd.f32 %v1497_v57, %v1492_v0 }
 0xafb   :  { %v1504_v38 = vsel %vm230_vm1, %v9331_v1, 0.0 }
 0xafc   :  { %1505 = vadd.xlane.f32.xlu1 %v1504_v38 }
 0xb17   :  { %v1487_v29 = vpop.f32.mrb[22].mxu0 }
 0xb18   :  { %v1493_v45 = vadd.f32 %v1487_v29, %v8958_v55  ;;  %v7225_v46 = vpop.f32.mrb[23].mxu0 }
 0xb1a   :  { %v9336_v2 = vadd.f32 %v1497_v57, %v1493_v45 }
 0xb1c   :  { %v1507_v50 = vsel %vm237_vm2, %v9336_v2, 0.0 }
 0xb1d   :  { %1508 = vadd.xlane.f32.xlu0 %v1507_v50 }
 0xb85   :  { %v1503_v40 = vpop.xlane.xlu0 %1502 }
 0xb86   :  { %v1510_v5 = vmul.f32 0.03125, %v1503_v40 }
 0xb88   :  { %v1513_v6 = vsub.f32 %v9326_v61, %v1510_v5 }
 0xb89   :  { %v1506_v43 = vpop.xlane.xlu1 %1505 }
 0xb8a   :  { %v1511_v7 = vmul.f32 0.03125, %v1506_v43  ;;  %v1516_v8 = vmul.f32 %v1513_v6, %v1513_v6  ;;  %v220_v43 = vld [vmem:[%s11318_s15 + $0x30] sm:$0xff] }
 0xb8c   :  { %v1514_v9 = vsub.f32 %v9331_v1, %v1511_v7  ;;  %v1519_v12 = vsel %vm230_vm1, %v1516_v8, 0.0  ;;  %v221_v7 = vld [vmem:[%s11318_s15 + $0x38] sm:$0xff] }
 0xb8d   :  { %1520 = vadd.xlane.f32.xlu0 %v1519_v12  ;;  %v7929_v8 = vpack.c.bf16 %v221_v7, %v220_v43  ;;  %v223_v12 = vld [vmem:[%s11318_s15 + $0x48] sm:$0xff] }
 0xb8e   :  { %v1517_v55 = vmul.f32 %v1514_v9, %v1514_v9 }
 0xb8f   :  { %7930 = vmatpush3.bf16.msra.mxu0 %v7929_v8 }
 0xb90   :  { %v1522_v13 = vsel %vm230_vm1, %v1517_v55, 0.0  ;;  %7931 = vmatprep.subr.bf16.mxu0 %v8711_v3 }
 0xb91   :  { %1523 = vadd.xlane.f32.xlu0 %v1522_v13  ;;  %v224_v13 = vld [vmem:[%s11318_s15 + $0x50] sm:$0xff] }
 0xb92   :  { %v7935_v16 = vpack.c.bf16 %v225_v14, %v224_v13 }
 0xbaa   :  { %v1509_v18 = vpop.xlane.xlu0 %1508 }
 0xbab   :  { %v1512_v20 = vmul.f32 0.03125, %v1509_v18  ;;  %v227_v18 = vld [vmem:[%s11318_s15 + $0x68] sm:$0xff] }
 0xbad   :  { %v1515_v11 = vsub.f32 %v9336_v2, %v1512_v20  ;;  %v7938_v20 = vpack.c.bf16 %v227_v18, %v226_v62 }
 0xbaf   :  { %v1518_v26 = vmul.f32 %v1515_v11, %v1515_v11 }
 0xbb1   :  { %v1525_v28 = vsel %vm237_vm2, %v1518_v26, 0.0  ;;  %v1557_v26 = vrot.slane %v72_v25, %v8990_v27  ;;  %v6303_v25 = vld [vmem:[%s11315_s12 + $0x20] sm:$0xff] }
 0xbb2   :  { %1526 = vadd.xlane.f32.xlu1 %v1525_v28 }
 0xc1a   :  { %v1521_v51 = vpop.xlane.xlu0 %1520 }
 0xc1b   :  { %v1528_v52 = vmul.f32 0.03125, %v1521_v51 }
 0xc1d   :  { %v1531_v17 = vadd.f32 1e-05, %v1528_v52 }
 0xc1e   :  { %v1524_v42 = vpop.xlane.xlu0 %1523 }
 0xc1f   :  { %8549 = vrsqrt.f32 %v1531_v17  ;;  %v1529_v44 = vmul.f32 0.03125, %v1524_v42 }
 0xc21   :  { %v1532_v47 = vadd.f32 1e-05, %v1529_v44 }
 0xc23   :  { %8551 = vrsqrt.f32 %v1532_v47 }
 0xc29   :  { %v8550_v57 = vpop.eup %8549 }
 0xc2a   :  { %v1537_v59 = vmul.f32 %v8550_v57, %v1513_v6 }
 0xc2c   :  { %v1544_v4 = vmul.f32 %v1543_v49, %v1537_v59 }
 0xc2d   :  { %v8552_v63 = vpop.eup %8551 }
 0xc2e   :  { %v1551_v0 = vadd.f32 %v1550_v60, %v1544_v4  ;;  %v1538_v10 = vmul.f32 %v8552_v63, %v1514_v9  ;;  %v222_v9 = vld [vmem:[%s11318_s15 + $0x40] sm:$0xff] }
 0xc2f   :  { %v7932_v55 = vpack.c.bf16 %v223_v12, %v222_v9 }
 0xc30   :  { %7235 = vmatmul.mubr.msk.f32.vlgmr.msra.gmra.mrb[42].mxu1 %vm230_vm1, %v1551_v0  ;;  %v1545_v22 = vmul.f32 %v1543_v49, %v1538_v10 }
 0xc31   :  { %7237 = vmatprep.mubr.msk.f32.mxu1 %vm8712_vm3, %v8713_v15  ;;  %7933 = vmatpush3.bf16.msra.mxu0 %v7932_v55 }
 0xc32   :  { %v1552_v38 = vadd.f32 %v1550_v60, %v1545_v22  ;;  %7934 = vmatprep.subr.bf16.mxu0 %v8711_v3  ;;  %v9451_v22 = vsub.s32 5, %v8987_v23 }
 0xc34   :  { %7238 = vmatmul.mubr.msk.f32.gmra.mrb[44].mxu1 %vm230_vm1, %v1552_v38  ;;  %v1748_v38 = vrot.slane %v9390_v48, %v9451_v22 }
 0xc35   :  { %7240 = vmatprep.mubr.msk.f32.mxu1 %vm8712_vm3, %v8713_v15  ;;  %7936 = vmatpush3.bf16.msra.mxu0 %v7935_v16 }
 0xc36   :  { %7937 = vmatprep.subr.bf16.mxu0 %v8711_v3 }
 0xc39   :  { %7939 = vmatpush3.bf16.msra.mxu0 %v7938_v20 }
 0xc3a   :  { %7940 = vmatprep.subr.bf16.mxu0 %v8711_v3 }
 0xc3f   :  { %v1527_v29 = vpop.xlane.xlu1 %1526 }
 0xc40   :  { %v1530_v45 = vmul.f32 0.03125, %v1527_v29 }
 0xc42   :  { %v1533_v46 = vadd.f32 1e-05, %v1530_v45 }
 0xc44   :  { %8553 = vrsqrt.f32 %v1533_v46 }
 0xc4e   :  { %v8554_v50 = vpop.eup %8553 }
 0xc4f   :  { %v1539_v40 = vmul.f32 %v8554_v50, %v1515_v11  ;;  %v7941_v11 = vpack.c.bf16 %v229_v24, %v228_v21 }
 0xc51   :  { %v1546_v5 = vmul.f32 %v1543_v49, %v1539_v40  ;;  %7942 = vmatpush3.bf16.msra.mxu0 %v7941_v11 }
 0xc52   :  { %7953 = vmatprep.subr.bf16.mxu0 %v8711_v3 }
 0xc53   :  { %v1553_v6 = vadd.f32 %v1550_v60, %v1546_v5 }
 0xc55   :  { %7241 = vmatmul.mubr.msk.f32.gmra.mrb[46].mxu1 %vm230_vm1, %v1553_v6 }
 0xc56   :  { %7292 = vmatprep.mubr.msk.f32.mxu1 %vm8712_vm3, %v8713_v15 }
 0xd03   :  { %v1633_v28 = vpop.f32.mrb[42].mxu1 }
 0xd04   :  { %v1634_v31 = vadd.f32 %v1633_v28, %v1557_v26  ;;  %v7236_v32 = vpop.f32.mrb[43].mxu1 }
 0xd06   :  { %v1650_v33 = vmul.f32 0.70710677, %v1634_v31  ;;  %v1647_v41 = vmul.f32 0.5, %v1634_v31 }
 0xd07   :  { %v1638_v35 = vpop.f32.mrb[44].mxu1 }
 0xd08   :  { %8555 = verf.f32 %v1650_v33  ;;  %v1639_v34 = vadd.f32 %v1638_v35, %v1557_v26  ;;  %v7239_v36 = vpop.f32.mrb[45].mxu1  ;;  %v6305_v33 = vld [vmem:[%s11315_s12 + $0x30] sm:$0xff]  ;;  %v6306_v35 = vld [vmem:[%s11315_s12 + $0x38] sm:$0xff] }
 0xd09   :  { %v7947_v36 = vpack.c.bf16 %v6306_v35, %v6305_v33 }
 0xd0a   :  { %v1651_v37 = vmul.f32 0.70710677, %v1639_v34  ;;  %v1648_v42 = vmul.f32 0.5, %v1639_v34 }
 0xd0c   :  { %8557 = verf.f32 %v1651_v37 }
 0xd12   :  { %v8556_v39 = vpop.eup %8555 }
 0xd13   :  { %v1656_v51 = vadd.f32 1.0, %v8556_v39 }
 0xd15   :  { %v1659_v52 = vmul.f32 %v1656_v51, %v1647_v41 }
 0xd16   :  { %v8558_v17 = vpop.eup %8557 }
 0xd17   :  { %v1657_v44 = vadd.f32 1.0, %v8558_v17  ;;  %7276 = vmatmul.mubr.f32.vlgmr.msra.gmra.mrb[24].mxu0 %v1659_v52 }
 0xd18   :  { %7278 = vmatprep.mubr.msk.f32.mxu0 %vm8712_vm3, %v8713_v15 }
 0xd19   :  { %v1660_v47 = vmul.f32 %v1657_v44, %v1648_v42 }
 0xd1b   :  { %7279 = vmatmul.mubr.f32.gmra.mrb[26].mxu0 %v1660_v47  ;;  %v9491_v47 = vsub.s32 6, %v8987_v23 }
 0xd1c   :  { %7281 = vmatprep.mubr.msk.f32.mxu0 %vm8712_vm3, %v8713_v15 }
 0xd28   :  { %v1643_v49 = vpop.f32.mrb[46].mxu1 }
 0xd29   :  { %v1644_v57 = vadd.f32 %v1643_v49, %v1557_v26  ;;  %v7242_v59 = vpop.f32.mrb[47].mxu1  ;;  %v6304_v26 = vld [vmem:[%s11315_s12 + $0x28] sm:$0xff]  ;;  %v9494_v49 = vsub.s32 7, %v8987_v23  ;;  %s11355_s12 = smov 72  }
 0xd2a   :  { %v7944_v28 = vpack.c.bf16 %v6304_v26, %v6303_v25 }
 0xd2b   :  { %v1652_v60 = vmul.f32 0.70710677, %v1644_v57  ;;  %v1649_v63 = vmul.f32 0.5, %v1644_v57  ;;  %v1826_v57 = vrot.slane %v9390_v48, %v9491_v47 }
 0xd2c   :  { %7945 = vmatpush3.bf16.msra.mxu1 %v7944_v28 }
 0xd2d   :  { %8559 = verf.f32 %v1652_v60  ;;  %7946 = vmatprep.subr.bf16.mxu1 %v8711_v3  ;;  %v1833_v60 = vrot.slane %v9390_v48, %v9494_v49 }
 0xd30   :  { %7948 = vmatpush3.bf16.msra.mxu1 %v7947_v36 }
 0xd31   :  { %7949 = vmatprep.subr.bf16.mxu1 %v8711_v3 }
 0xd37   :  { %v8560_v4 = vpop.eup %8559 }
 0xd38   :  { %v1658_v0 = vadd.f32 1.0, %v8560_v4 }
 0xd3a   :  { %v1661_v10 = vmul.f32 %v1658_v0, %v1649_v63 }
 0xd3c   :  { %7282 = vmatmul.mubr.f32.gmra.mrb[28].mxu0 %v1661_v10 }
 0xd3d   :  { %7322 = vmatprep.mubr.msk.f32.mxu0 %vm8712_vm3, %v8713_v15 }
 0xdea   :  { %v1728_v29 = vpop.f32.mrb[24].mxu0 }
 0xdeb   :  { %v1742_v45 = vadd.f32 %v1728_v29, %v9326_v61  ;;  %v7277_v46 = vpop.f32.mrb[25].mxu0 }
 0xded   :  { %v9456_v50 = vadd.f32 %v1748_v38, %v1742_v45 }
 0xdee   :  { %v1733_v40 = vpop.f32.mrb[26].mxu0 }
 0xdef   :  { %v1743_v5 = vadd.f32 %v1733_v40, %v9331_v1  ;;  %v7280_v6 = vpop.f32.mrb[27].mxu0  ;;  %v1784_v43 = vsel %vm230_vm1, %v9456_v50, 0.0 }
 0xdf0   :  { %1785 = vadd.xlane.f32.xlu0 %v1784_v43 }
 0xdf1   :  { %v9461_v7 = vadd.f32 %v1748_v38, %v1743_v5 }
 0xdf3   :  { %v1787_v8 = vsel %vm230_vm1, %v9461_v7, 0.0 }
 0xdf4   :  { %1788 = vadd.xlane.f32.xlu1 %v1787_v8 }
 0xe0f   :  { %v1738_v9 = vpop.f32.mrb[28].mxu0 }
 0xe10   :  { %v1744_v61 = vadd.f32 %v1738_v9, %v9336_v2  ;;  %v7283_v12 = vpop.f32.mrb[29].mxu0 }
 0xe12   :  { %v9466_v55 = vadd.f32 %v1748_v38, %v1744_v61 }
 0xe14   :  { %v1790_v1 = vsel %vm237_vm2, %v9466_v55, 0.0 }
 0xe15   :  { %1791 = vadd.xlane.f32.xlu0 %v1790_v1 }
 0xe7d   :  { %v1786_v13 = vpop.xlane.xlu0 %1785 }
 0xe7e   :  { %v1793_v14 = vmul.f32 0.03125, %v1786_v13 }
 0xe80   :  { %v1796_v16 = vsub.f32 %v9456_v50, %v1793_v14 }
 0xe81   :  { %v1789_v62 = vpop.xlane.xlu1 %1788 }
 0xe82   :  { %v1794_v18 = vmul.f32 0.03125, %v1789_v62  ;;  %v1799_v20 = vmul.f32 %v1796_v16, %v1796_v16 }
 0xe84   :  { %v1797_v21 = vsub.f32 %v9461_v7, %v1794_v18  ;;  %v1802_v24 = vsel %vm230_vm1, %v1799_v20, 0.0 }
 0xe85   :  { %1803 = vadd.xlane.f32.xlu1 %v1802_v24 }
 0xe86   :  { %v1800_v2 = vmul.f32 %v1797_v21, %v1797_v21 }
 0xe88   :  { %v1805_v11 = vsel %vm230_vm1, %v1800_v2, 0.0 }
 0xe89   :  { %1806 = vadd.xlane.f32.xlu0 %v1805_v11 }
 0xea2   :  { %v1792_v31 = vpop.xlane.xlu0 %1791 }
 0xea3   :  { %v1795_v32 = vmul.f32 0.03125, %v1792_v31 }
 0xea5   :  { %v1798_v34 = vsub.f32 %v9466_v55, %v1795_v32 }
 0xea7   :  { %v1801_v37 = vmul.f32 %v1798_v34, %v1798_v34 }
 0xea9   :  { %v1808_v39 = vsel %vm237_vm2, %v1801_v37, 0.0 }
 0xeaa   :  { %1809 = vadd.xlane.f32.xlu1 %v1808_v39 }
 0xf12   :  { %v1804_v41 = vpop.xlane.xlu1 %1803 }
 0xf13   :  { %v1811_v51 = vmul.f32 0.03125, %v1804_v41 }
 0xf15   :  { %v1814_v52 = vadd.f32 1e-05, %v1811_v51 }
 0xf16   :  { %v1807_v17 = vpop.xlane.xlu0 %1806 }
 0xf17   :  { %8561 = vrsqrt.f32 %v1814_v52  ;;  %v1812_v42 = vmul.f32 0.03125, %v1807_v17 }
 0xf19   :  { %v1815_v44 = vadd.f32 1e-05, %v1812_v42 }
 0xf1b   :  { %8563 = vrsqrt.f32 %v1815_v44 }
 0xf21   :  { %v8562_v59 = vpop.eup %8561 }
 0xf22   :  { %v9500_v4 = vmul.f32 %v8562_v59, %v1796_v16 }
 0xf24   :  { %v1827_v63 = vmul.f32 %v1826_v57, %v9500_v4 }
 0xf25   :  { %v8564_v0 = vpop.eup %8563 }
 0xf26   :  { %v1834_v10 = vadd.f32 %v1833_v60, %v1827_v63  ;;  %v9503_v38 = vmul.f32 %v8564_v0, %v1797_v21 }
 0xf28   :  { %7293 = vmatmul.mubr.msk.f32.vlgmr.msra.gmra.mrb[48].mxu1 %vm230_vm1, %v1834_v10  ;;  %v1828_v23 = vmul.f32 %v1826_v57, %v9503_v38 }
 0xf29   :  { %7295 = vmatprep.mubr.msk.f32.mxu1 %vm8712_vm3, %v8713_v15 }
 0xf2a   :  { %v1835_v29 = vadd.f32 %v1833_v60, %v1828_v23  ;;  %v9610_v23 = vld [vmem:[%s11354_s29] sm:$0xff] }
 0xf2c   :  { %7296 = vmatmul.mubr.msk.f32.gmra.mrb[50].mxu1 %vm230_vm1, %v1835_v29 }
 0xf2d   :  { %7298 = vmatprep.mubr.msk.f32.mxu1 %vm8712_vm3, %v8713_v15 }
 0xf37   :  { %v1810_v48 = vpop.xlane.xlu1 %1809 }
 0xf38   :  { %v1813_v45 = vmul.f32 0.03125, %v1810_v48 }
 0xf3a   :  { %v1816_v46 = vadd.f32 1e-05, %v1813_v45 }
 0xf3c   :  { %8565 = vrsqrt.f32 %v1816_v46 }
 0xf46   :  { %v8566_v40 = vpop.eup %8565 }
 0xf47   :  { %v9512_v5 = vmul.f32 %v8566_v40, %v1798_v34 }
 0xf49   :  { %v1829_v6 = vmul.f32 %v1826_v57, %v9512_v5 }
 0xf4b   :  { %v1836_v43 = vadd.f32 %v1833_v60, %v1829_v6  ;;  %v8679_v6 = vld [vmem:[%s11354_s29 + $0x8] sm:$0xff] }
 0xf4d   :  { %7299 = vmatmul.mubr.msk.f32.gmra.mrb[52].mxu1 %vm230_vm1, %v1836_v43 }
 0xf4e   :  { %7307 = vmatprep.mubr.msk.f32.mxu1 %vm8712_vm3, %v8713_v15 }
 0xffb   :  { %v1912_v8 = vpop.f32.mrb[48].mxu1 }
 0xffc   :  { %v7294_v9 = vpop.f32.mrb[49].mxu1 }
 0xfff   :  { %v1917_v61 = vpop.f32.mrb[50].mxu1 }
0x1000   :  { %v7297_v12 = vpop.f32.mrb[51].mxu1  ;;  %v9518_v1 = vpack.i.bf16 %v1917_v61, %v1912_v8 }
0x1002   :  { %8456 = vrot.lane.b32.xlu0 %v9518_v1, %s8714_s27 }
0x1006   :  { %8466 = vrot.lane.b32.xlu0 %v9518_v1, %s8717_s22 }
0x100a   :  { %2170 = vrot.lane.b32.xlu0 %v1917_v61, %s8718_s23 }
0x1020   :  { %v9525_v13 = vpop.f32.mrb[52].mxu1 }
0x1021   :  { %2435 = vrot.lane.b32.xlu0 %v9525_v13, %s8717_s22  ;;  %1933 = vrot.lane.b32.xlu1 %v9525_v13, %s8714_s27  ;;  %v7300_v14 = vpop.f32.mrb[53].mxu1 }
0x1022   :  { %v8680_v14 = vld [vmem:[%s11354_s29 + $0x10] sm:$0xf]  ;;  %s11357_s29 = smov 56  }
0x1025   :  { %2425 = vrot.lane.b32.xlu0 %v1912_v8, %s8719_s24  ;;  %8461 = vrot.lane.b32.xlu1 %v9518_v1, %s8716_s1 }
0x1029   :  { %2429 = vrot.lane.b32.xlu0 %v9525_v13, %s8719_s24  ;;  %2178 = vrot.lane.b32.xlu1 %v9525_v13, %s8716_s1 }
0x102d   :  { %2682 = vrot.lane.b32.xlu0 %v1912_v8, %s8720_s2  ;;  %2168 = vrot.lane.b32.xlu1 %v1912_v8, %s8718_s23 }
0x1031   :  { %2686 = vrot.lane.b32.xlu0 %v9525_v13, %s8720_s2  ;;  %2172 = vrot.lane.b32.xlu1 %v9525_v13, %s8718_s23  ;;  %s11362_s23 = smov 24  }
0x1035   :  { %8471 = vrot.lane.b32.xlu1 %v9518_v1, %s11355_s12 }
0x1039   :  { %2427 = vrot.lane.b32.xlu1 %v1917_v61, %s8719_s24 }
0x103d   :  { %2692 = vrot.lane.b32.xlu1 %v9525_v13, %s11355_s12 }
0x1041   :  { %2684 = vrot.lane.b32.xlu1 %v1917_v61, %s8720_s2 }
0x1074   :  { %v8457_v16 = vpop.permute.xlu0 %8456 }
0x1075   :  { %v8459_v62 = vunpack.i.h.bf16 %v8457_v16  ;;  %v8458_v18 = vunpack.i.l.bf16 %v8457_v16 }
0x1077   :  { %v7950_v20 = vpack.c.bf16 %v8459_v62, %v8458_v18 }
0x1078   :  { %v8467_v28 = vpop.permute.xlu0 %8466 }
0x1079   :  { %7952 = vmatpush3.bf16.xpose.msk.msra.mxu1 %vm9029_vm5, %v7950_v20  ;;  %v8469_v32 = vunpack.i.h.bf16 %v8467_v28  ;;  %v8468_v33 = vunpack.i.l.bf16 %v8467_v28 }
0x107a   :  { %7305 = vmatprep.subr.mxu1 %v8713_v15 }
0x107b   :  { %v7964_v34 = vpack.c.bf16 %v8469_v32, %v8468_v33 }
0x107c   :  { %v2171_v36 = vpop.permute.xlu0 %2170 }
0x1093   :  { %v1934_v21 = vpop.permute.xlu1 %1933  ;;  %v2436_v39 = vpop.permute.xlu0 %2435 }
0x1094   :  { %7306 = vmatpush3.xpose.msk.msra.mxu1 %vm384_vm4, %v1934_v21 }
0x1095   :  { %7956 = vmatprep.subr.bf16.mxu1 %v8711_v3 }
0x1097   :  { %7308 = vmatmul.mubr.msk.f32.vlgmr.msra.gmra.mrb[54].mxu1 %vm384_vm4, %v1912_v8  ;;  %v8462_v24 = vpop.permute.xlu1 %8461  ;;  %v2426_v52 = vpop.permute.xlu0 %2425 }
0x1098   :  { %v8464_v2 = vunpack.i.h.bf16 %v8462_v24  ;;  %v8463_v11 = vunpack.i.l.bf16 %v8462_v24  ;;  %7310 = vmatprep.mubr.msk.f32.mxu1 %vm8712_vm3, %v8713_v15 }
0x109a   :  { %v7957_v25 = vpack.c.bf16 %v8464_v2, %v8463_v11 }
0x109b   :  { %7311 = vmatmul.mubr.msk.f32.gmra.mrb[56].mxu1 %vm384_vm4, %v1917_v61  ;;  %v2179_v26 = vpop.permute.xlu1 %2178  ;;  %v2430_v44 = vpop.permute.xlu0 %2429 }
0x109c   :  { %7959 = vmatpush3.bf16.xpose.msk.msra.mxu1 %vm9029_vm5, %v7957_v25  ;;  %7313 = vmatprep.mubr.msk.f32.mxu1 %vm8712_vm3, %v8713_v15 }
0x109d   :  { %7335 = vmatprep.subr.mxu1 %v8713_v15 }
0x109f   :  { %7314 = vmatmul.mubr.msk.f32.gmra.mrb[58].mxu1 %vm384_vm4, %v9525_v13  ;;  %v2169_v31 = vpop.permute.xlu1 %2168  ;;  %v2683_v58 = vpop.permute.xlu0 %2682 }
0x10a0   :  { %7337 = vmatprep.mubr.msk.f32.mxu1 %vm8712_vm3, %v8713_v15 }
0x10a3   :  { %v2173_v35 = vpop.permute.xlu1 %2172  ;;  %v2687_v60 = vpop.permute.xlu0 %2686 }
0x10a4   :  { %7336 = vmatpush3.xpose.msk.msra.mxu1 %vm384_vm4, %v2179_v26 }
0x10a5   :  { %7963 = vmatprep.subr.bf16.mxu1 %v8711_v3 }
0x10a7   :  { %7338 = vmatmul.mubr.msk.f32.vlgmr.msra.gmra.mrb[60].mxu1 %vm384_vm4, %v2169_v31  ;;  %v8472_v37 = vpop.permute.xlu1 %8471 }
0x10a8   :  { %7966 = vmatpush3.bf16.xpose.msk.msra.mxu1 %vm9029_vm5, %v7964_v34  ;;  %7340 = vmatprep.mubr.msk.f32.mxu1 %vm8712_vm3, %v8713_v15  ;;  %v8474_v41 = vunpack.i.h.bf16 %v8472_v37  ;;  %v8473_v51 = vunpack.i.l.bf16 %v8472_v37 }
0x10a9   :  { %7365 = vmatprep.subr.mxu1 %v8713_v15 }
0x10aa   :  { %v7971_v17 = vpack.c.bf16 %v8474_v41, %v8473_v51 }
0x10ab   :  { %7341 = vmatmul.mubr.msk.f32.gmra.mrb[62].mxu1 %vm384_vm4, %v2171_v36  ;;  %v2428_v42 = vpop.permute.xlu1 %2427 }
0x10ac   :  { %7343 = vmatprep.mubr.msk.f32.mxu1 %vm8712_vm3, %v8713_v15 }
0x10af   :  { %7344 = vmatmul.mubr.msk.f32.gmra.mrb[64].mxu1 %vm384_vm4, %v2173_v35  ;;  %v2693_v57 = vpop.permute.xlu1 %2692 }
0x10b0   :  { %7366 = vmatpush3.xpose.msk.msra.mxu1 %vm384_vm4, %v2436_v39  ;;  %7367 = vmatprep.mubr.msk.f32.mxu1 %vm8712_vm3, %v8713_v15 }
0x10b1   :  { %7970 = vmatprep.subr.bf16.mxu1 %v8711_v3 }
0x10b3   :  { %7368 = vmatmul.mubr.msk.f32.vlgmr.msra.gmra.mrb[66].mxu1 %vm384_vm4, %v2426_v52  ;;  %v2685_v59 = vpop.permute.xlu1 %2684 }
0x10b4   :  { %7973 = vmatpush3.bf16.xpose.msk.msra.mxu1 %vm9029_vm5, %v7971_v17  ;;  %7370 = vmatprep.mubr.msk.f32.mxu1 %vm8712_vm3, %v8713_v15  ;;  %vm4070_vm5 = vcmask 517121  }
0x10b5   :  { %7395 = vmatprep.subr.mxu1 %v8713_v15 }
0x10b7   :  { %7371 = vmatmul.mubr.msk.f32.gmra.mrb[68].mxu1 %vm384_vm4, %v2428_v42 }
0x10b8   :  { %7373 = vmatprep.mubr.msk.f32.mxu1 %vm8712_vm3, %v8713_v15 }
0x10bb   :  { %7374 = vmatmul.mubr.msk.f32.gmra.mrb[70].mxu1 %vm384_vm4, %v2430_v44 }
0x10bc   :  { %7396 = vmatpush3.xpose.msk.msra.mxu1 %vm384_vm4, %v2693_v57  ;;  %7397 = vmatprep.mubr.msk.f32.mxu1 %vm8712_vm3, %v8713_v15 }
0x10bd   :  { %7977 = vmatprep.subr.bf16.mxu1 %v8711_v3 }
0x10bf   :  { %7398 = vmatmul.mubr.msk.f32.vlgmr.msra.gmra.mrb[72].mxu1 %vm384_vm4, %v2683_v58 }
0x10c0   :  { %7400 = vmatprep.mubr.msk.f32.mxu1 %vm8712_vm3, %v8713_v15 }
0x10c3   :  { %7401 = vmatmul.mubr.msk.f32.gmra.mrb[74].mxu1 %vm384_vm4, %v2685_v59 }
0x10c4   :  { %7403 = vmatprep.mubr.msk.f32.mxu1 %vm8712_vm3, %v8713_v15 }
0x10c7   :  { %7404 = vmatmul.mubr.msk.f32.gmra.mrb[76].mxu1 %vm384_vm4, %v2687_v60 }
0x10c8   :  { %7429 = vmatprep.mubr.msk.f32.mxu1 %vm8712_vm3, %v8713_v15 }
0x116a   :  { %v2013_v63 = vpop.f32.mrb[54].mxu1 }
0x116b   :  { %v2027_v0 = vmul.f32 0.35355338, %v2013_v63  ;;  %v7309_v10 = vpop.f32.mrb[55].mxu1 }
0x116d   :  { %v9613_v29 = vadd.f32 %v9610_v23, %v2027_v0 }
0x116e   :  { %v2018_v48 = vpop.f32.mrb[56].mxu1 }
0x116f   :  { %v2028_v45 = vmul.f32 0.35355338, %v2018_v48  ;;  %v7312_v46 = vpop.f32.mrb[57].mxu1  ;;  %v2033_v40 = vsel %vm483_vm6, %v9613_v29, -inf }
0x1170   :  { %2034 = vmax.xlane.f32.xlu1 %v2033_v40 }
0x1171   :  { %v9620_v43 = vadd.f32 %v8679_v6, %v2028_v45 }
0x1172   :  { %v2023_v8 = vpop.f32.mrb[58].mxu1 }
0x1173   :  { %v2029_v9 = vmul.f32 0.35355338, %v2023_v8  ;;  %v7315_v61 = vpop.f32.mrb[59].mxu1  ;;  %v2036_v12 = vsel %vm483_vm6, %v9620_v43, -inf }
0x1174   :  { %2037 = vmax.xlane.f32.xlu0 %v2036_v12 }
0x1175   :  { %v9627_v16 = vadd.f32 %v8680_v14, %v2029_v9 }
0x1177   :  { %v2039_v62 = vsel %vm490_vm7, %v9627_v16, -inf }
0x1178   :  { %2040 = vmax.xlane.f32.xlu0 %v2039_v62 }
0x117a   :  { %v2258_v18 = vpop.f32.mrb[60].mxu1 }
0x117b   :  { %v2272_v20 = vmul.f32 0.35355338, %v2258_v18  ;;  %v7339_v21 = vpop.f32.mrb[61].mxu1 }
0x117d   :  { %v9632_v24 = vadd.f32 %v9610_v23, %v2272_v20 }
0x117e   :  { %v2263_v2 = vpop.f32.mrb[62].mxu1 }
0x117f   :  { %v7342_v11 = vpop.f32.mrb[63].mxu1  ;;  %v2278_v25 = vsel %vm483_vm6, %v9632_v24, -inf  ;;  %v2273_v42 = vmul.f32 0.35355338, %v2263_v2 }
0x1180   :  { %2279 = vmax.xlane.f32.xlu0 %v2278_v25 }
0x1181   :  { %2070 = vrot.lane.b32.xlu1 %v9525_v13, %s11356_s5  ;;  %v9642_v44 = vadd.f32 %v8679_v6, %v2273_v42 }
0x1182   :  { %v2268_v26 = vpop.f32.mrb[64].mxu1 }
0x1183   :  { %v7345_v28 = vpop.f32.mrb[65].mxu1  ;;  %v2281_v60 = vsel %vm483_vm6, %v9642_v44, -inf  ;;  %v2274_v63 = vmul.f32 0.35355338, %v2268_v26 }
0x1185   :  { %8481 = vrot.lane.b32.xlu1 %v9518_v1, %s11357_s29  ;;  %v9653_v45 = vadd.f32 %v8680_v14, %v2274_v63 }
0x1186   :  { %v2515_v31 = vpop.f32.mrb[66].mxu1 }
0x1187   :  { %v7369_v32 = vpop.f32.mrb[67].mxu1  ;;  %v2529_v57 = vmul.f32 0.35355338, %v2515_v31  ;;  %v2284_v12 = vsel %vm490_vm7, %v9653_v45, -inf }
0x1189   :  { %v9645_v58 = vadd.f32 %v9610_v23, %v2529_v57 }
0x118a   :  { %v2520_v33 = vpop.f32.mrb[68].mxu1 }
0x118b   :  { %v7372_v35 = vpop.f32.mrb[69].mxu1  ;;  %v2535_v48 = vsel %vm483_vm6, %v9645_v58, -inf  ;;  %v2530_v46 = vmul.f32 0.35355338, %v2520_v33 }
0x118d   :  { %v9659_v9 = vadd.f32 %v8679_v6, %v2530_v46 }
0x118e   :  { %v2525_v34 = vpop.f32.mrb[70].mxu1 }
0x118f   :  { %v7375_v36 = vpop.f32.mrb[71].mxu1  ;;  %v2531_v59 = vmul.f32 0.35355338, %v2525_v34  ;;  %v2538_v21 = vsel %vm483_vm6, %v9659_v9, -inf }
0x1191   :  { %v9649_v0 = vadd.f32 %v8680_v14, %v2531_v59 }
0x1192   :  { %v2772_v37 = vpop.f32.mrb[72].mxu1 }
0x1193   :  { %v7399_v39 = vpop.f32.mrb[73].mxu1  ;;  %v2541_v8 = vsel %vm490_vm7, %v9649_v0, -inf  ;;  %v2786_v61 = vmul.f32 0.35355338, %v2772_v37 }
0x1195   :  { %v9666_v18 = vadd.f32 %v9610_v23, %v2786_v61 }
0x1196   :  { %8476 = vrot.lane.b32.xlu0 %v9518_v1, %s11356_s5  ;;  %v2777_v41 = vpop.f32.mrb[74].mxu1 }
0x1197   :  { %v7402_v51 = vpop.f32.mrb[75].mxu1  ;;  %v2787_v10 = vmul.f32 0.35355338, %v2777_v41 }
0x1199   :  { %v9655_v40 = vadd.f32 %v8679_v6, %v2787_v10  ;;  %v2792_v6 = vsel %vm483_vm6, %v9666_v18, -inf }
0x119a   :  { %v2782_v52 = vpop.f32.mrb[76].mxu1 }
0x119b   :  { %v7405_v17 = vpop.f32.mrb[77].mxu1  ;;  %v2795_v62 = vsel %vm483_vm6, %v9655_v40, -inf  ;;  %v2788_v20 = vmul.f32 0.35355338, %v2782_v52 }
0x119d   :  { %v9670_v2 = vadd.f32 %v8680_v14, %v2788_v20 }
0x119f   :  { %v2798_v11 = vsel %vm490_vm7, %v9670_v2, -inf }
0x11a9   :  { %2282 = vmax.xlane.f32.xlu1 %v2281_v60 }
0x11ad   :  { %2536 = vmax.xlane.f32.xlu1 %v2535_v48 }
0x11b1   :  { %2542 = vmax.xlane.f32.xlu1 %v2541_v8 }
0x11b5   :  { %2285 = vmax.xlane.f32.xlu0 %v2284_v12  ;;  %2796 = vmax.xlane.f32.xlu1 %v2795_v62 }
0x11b9   :  { %2539 = vmax.xlane.f32.xlu0 %v2538_v21 }
0x11bd   :  { %2793 = vmax.xlane.f32.xlu0 %v2792_v6 }
0x11c1   :  { %2799 = vmax.xlane.f32.xlu0 %v2798_v11 }
0x11c6   :  { %8486 = vrot.lane.b32.xlu1 %v9518_v1, %s11358_s26 }
0x11d7   :  { %2315 = vrot.lane.b32.xlu0 %v9525_v13, %s11357_s29 }
0x11fd   :  { %v2035_v23 = vpop.xlane.xlu1 %2034 }
0x11fe   :  { %v2042_v25 = vsub.f32 %v9613_v29, %v2035_v23 }
0x1200   :  { %v2045_v26 = vmul.f32 1.442695, %v2042_v25 }
0x1201   :  { %v2038_v14 = vpop.xlane.xlu0 %2037 }
0x1202   :  { %8567 = vpow2.f32 %v2045_v26  ;;  %v2043_v28 = vsub.f32 %v9620_v43, %v2038_v14 }
0x1204   :  { %v2047_v31 = vmul.f32 1.442695, %v2043_v28 }
0x1205   :  { %v2041_v32 = vpop.xlane.xlu0 %2040 }
0x1206   :  { %8569 = vpow2.f32 %v2047_v31  ;;  %v2044_v33 = vsub.f32 %v9627_v16, %v2041_v32 }
0x1208   :  { %v2049_v35 = vmul.f32 1.442695, %v2044_v33 }
0x120a   :  { %8571 = vpow2.f32 %v2049_v35 }
0x120c   :  { %v9683_v34 = vpop.eup %8567 }
0x120d   :  { %v2280_v36 = vpop.xlane.xlu0 %2279  ;;  %v2051_v37 = vsel %vm483_vm6, %v9683_v34, 0.0 }
0x120e   :  { %v2287_v29 = vsub.f32 %v9632_v24, %v2280_v36  ;;  %2052 = vadd.xlane.f32.xlu1 %v2051_v37  ;;  %v2071_v24 = vpop.permute.xlu1 %2070 }
0x1210   :  { %v9688_v39 = vpop.eup %8569  ;;  %v2290_v41 = vmul.f32 1.442695, %v2287_v29 }
0x1211   :  { %v8477_v43 = vpop.permute.xlu0 %8476  ;;  %v2054_v51 = vsel %vm483_vm6, %v9688_v39, 0.0 }
0x1212   :  { %8573 = vpow2.f32 %v2290_v41  ;;  %v8479_v16 = vunpack.i.h.bf16 %v8477_v43  ;;  %v8478_v52 = vunpack.i.l.bf16 %v8477_v43  ;;  %2055 = vadd.xlane.f32.xlu0 %v2054_v51  ;;  %v9703_v63 = vpop.permute.xlu1 %8481 }
0x1214   :  { %v9692_v17 = vpop.eup %8571  ;;  %v7954_v42 = vpack.c.bf16 %v8479_v16, %v8478_v52 }
0x1215   :  { %v2057_v57 = vsel %vm490_vm7, %v9692_v17, 0.0 }
0x1216   :  { %7955 = vmatpush3.bf16.msra.mxu0 %v7954_v42  ;;  %2058 = vadd.xlane.f32.xlu1 %v2057_v57 }
0x1217   :  { %7320 = vmatprep.subr.mxu0 %v8713_v15 }
0x121a   :  { %7321 = vmatpush3.msk.msra.mxu0 %vm535_vm8, %v2071_v24 }
0x121b   :  { %7960 = vmatprep.subr.bf16.mxu0 %v8711_v3 }
0x121c   :  { %v9699_v59 = vpop.eup %8573 }
0x121d   :  { %v2296_v60 = vsel %vm483_vm6, %v9699_v59, 0.0 }
0x121e   :  { %2297 = vadd.xlane.f32.xlu0 %v2296_v60 }
0x1236   :  { %v2283_v10 = vpop.xlane.xlu1 %2282 }
0x1237   :  { %v2288_v48 = vsub.f32 %v9642_v44, %v2283_v10 }
0x1239   :  { %v2292_v46 = vmul.f32 1.442695, %v2288_v48 }
0x123a   :  { %v2537_v8 = vpop.xlane.xlu1 %2536 }
0x123b   :  { %8575 = vpow2.f32 %v2292_v46  ;;  %v2544_v61 = vsub.f32 %v9645_v58, %v2537_v8  ;;  %v8484_v8 = vunpack.i.h.bf16 %v9703_v63 }
0x123d   :  { %v2547_v6 = vmul.f32 1.442695, %v2544_v61  ;;  %v8483_v61 = vunpack.i.l.bf16 %v9703_v63 }
0x123e   :  { %v2543_v12 = vpop.xlane.xlu1 %2542 }
0x123f   :  { %v2546_v11 = vsub.f32 %v9649_v0, %v2543_v12 }
0x1241   :  { %v2551_v58 = vmul.f32 1.442695, %v2546_v11 }
0x1242   :  { %v2286_v62 = vpop.xlane.xlu0 %2285  ;;  %v2797_v43 = vpop.xlane.xlu1 %2796 }
0x1243   :  { %v2289_v20 = vsub.f32 %v9653_v45, %v2286_v62  ;;  %v2802_v51 = vsub.f32 %v9655_v40, %v2797_v43 }
0x1245   :  { %v9708_v21 = vpop.eup %8575  ;;  %v2294_v23 = vmul.f32 1.442695, %v2289_v20  ;;  %v2806_v52 = vmul.f32 1.442695, %v2802_v51  ;;  %v7961_v20 = vpack.c.bf16 %v8484_v8, %v8483_v61 }
0x1246   :  { %v2540_v25 = vpop.xlane.xlu0 %2539  ;;  %v2299_v26 = vsel %vm483_vm6, %v9708_v21, 0.0  ;;  %v8487_v40 = vpop.permute.xlu1 %8486 }
0x1247   :  { %8577 = vpow2.f32 %v2294_v23  ;;  %v2545_v44 = vsub.f32 %v9659_v9, %v2540_v25  ;;  %2300 = vadd.xlane.f32.xlu1 %v2299_v26  ;;  %v8489_v25 = vunpack.i.h.bf16 %v8487_v40 }
0x1248   :  { %8579 = vpow2.f32 %v2547_v6 }
0x1249   :  { %v2549_v14 = vmul.f32 1.442695, %v2545_v44 }
0x124a   :  { %v2794_v28 = vpop.xlane.xlu0 %2793 }
0x124b   :  { %8581 = vpow2.f32 %v2549_v14  ;;  %v2801_v45 = vsub.f32 %v9666_v18, %v2794_v28 }
0x124c   :  { %8583 = vpow2.f32 %v2551_v58 }
0x124d   :  { %v2804_v31 = vmul.f32 1.442695, %v2801_v45 }
0x124e   :  { %v2800_v16 = vpop.xlane.xlu0 %2799 }
0x124f   :  { %8585 = vpow2.f32 %v2804_v31  ;;  %v2803_v42 = vsub.f32 %v9670_v2, %v2800_v16 }
0x1250   :  { %8587 = vpow2.f32 %v2806_v52 }
0x1251   :  { %v9715_v0 = vpop.eup %8577  ;;  %v2808_v57 = vmul.f32 1.442695, %v2803_v42 }
0x1252   :  { %v2302_v32 = vsel %vm490_vm7, %v9715_v0, 0.0  ;;  %v9719_v33 = vpop.eup %8579  ;;  %v2316_v10 = vpop.permute.xlu0 %2315 }
0x1253   :  { %2303 = vadd.xlane.f32.xlu1 %v2302_v32  ;;  %v2553_v35 = vsel %vm483_vm6, %v9719_v33, 0.0  ;;  %8589 = vpow2.f32 %v2808_v57 }
0x1255   :  { %v9721_v9 = vpop.eup %8581 }
0x1256   :  { %v2556_v36 = vsel %vm483_vm6, %v9721_v9, 0.0  ;;  %v9727_v18 = vpop.eup %8583 }
0x1257   :  { %2554 = vadd.xlane.f32.xlu1 %v2553_v35  ;;  %2557 = vadd.xlane.f32.xlu0 %v2556_v36  ;;  %v2559_v29 = vsel %vm490_vm7, %v9727_v18, 0.0 }
0x1259   :  { %v9729_v37 = vpop.eup %8585 }
0x125a   :  { %v2810_v41 = vsel %vm483_vm6, %v9729_v37, 0.0  ;;  %v9743_v24 = vpop.eup %8587 }
0x125b   :  { %2560 = vadd.xlane.f32.xlu1 %v2559_v29  ;;  %2811 = vadd.xlane.f32.xlu0 %v2810_v41 }
0x125d   :  { %v9747_v60 = vpop.eup %8589 }
0x126c   :  { %8491 = vrot.lane.b32.xlu1 %v9518_v1, %s11359_s4  ;;  %v2813_v1 = vsel %vm483_vm6, %v9743_v24, 0.0 }
0x1270   :  { %2829 = vrot.lane.b32.xlu1 %v9525_v13, %s11359_s4  ;;  %s11366_s4 = sld [smem:[#allocation12_spill]] }
0x1271   :  { %2572 = vrot.lane.b32.xlu0 %v9525_v13, %s11358_s26  ;;  %v2816_v13 = vsel %vm490_vm7, %v9747_v60, 0.0  ;;  %vm4073_vm7 = vcmask 516096  }
0x1290   :  { %2814 = vadd.xlane.f32.xlu0 %v2813_v1 }
0x1294   :  { %2817 = vadd.xlane.f32.xlu1 %v2816_v13 }
0x129b   :  { %v2053_v48 = vpop.xlane.xlu1 %2052 }
0x129c   :  { %8591 = vrcp.f32 %v2053_v48 }
0x129f   :  { %v2056_v2 = vpop.xlane.xlu0 %2055 }
0x12a0   :  { %8593 = vrcp.f32 %v2056_v2 }
0x12a3   :  { %v2059_v46 = vpop.xlane.xlu1 %2058 }
0x12a4   :  { %8595 = vrcp.f32 %v2059_v46 }
0x12a6   :  { %v8592_v12 = vpop.eup %8591 }
0x12a7   :  { %v2063_v62 = vmul.f32 %v8592_v12, %v9683_v34 }
0x12a9   :  { %7323 = vmatmul.mubr.msk.f32.vlgmr.msra.gmra.mrb[30].mxu0 %vm483_vm6, %v2063_v62 }
0x12aa   :  { %v8594_v6 = vpop.eup %8593  ;;  %7962 = vmatpush3.bf16.msra.mxu0 %v7961_v20  ;;  %7325 = vmatprep.mubr.msk.f32.mxu0 %vm8712_vm3, %v8713_v15 }
0x12ab   :  { %v2298_v11 = vpop.xlane.xlu0 %2297  ;;  %7350 = vmatprep.subr.mxu0 %v8713_v15  ;;  %v2064_v23 = vmul.f32 %v8594_v6, %v9688_v39  ;;  %v8488_v39 = vunpack.i.l.bf16 %v8487_v40 }
0x12ac   :  { %8597 = vrcp.f32 %v2298_v11 }
0x12ad   :  { %7326 = vmatmul.mubr.msk.f32.gmra.mrb[32].mxu0 %vm483_vm6, %v2064_v23  ;;  %v7968_v58 = vpack.c.bf16 %v8489_v25, %v8488_v39  ;;  %v6307_v39 = vld [vmem:[%s11316_s13 + $0x20] sm:$0xff] }
0x12ae   :  { %v8596_v63 = vpop.eup %8595  ;;  %7351 = vmatpush3.msk.msra.mxu0 %vm535_vm8, %v2316_v10  ;;  %7328 = vmatprep.mubr.msk.f32.mxu0 %vm8712_vm3, %v8713_v15 }
0x12af   :  { %v2065_v34 = vmul.f32 %v8596_v63, %v9692_v17  ;;  %7967 = vmatprep.subr.bf16.mxu0 %v8711_v3 }
0x12b1   :  { %7329 = vmatmul.mubr.msk.f32.gmra.mrb[34].mxu0 %vm483_vm6, %v2065_v34 }
0x12b2   :  { %7352 = vmatprep.mubr.msk.f32.mxu0 %vm8712_vm3, %v8713_v15 }
0x12b6   :  { %v8598_v26 = vpop.eup %8597 }
0x12b7   :  { %v2308_v44 = vmul.f32 %v8598_v26, %v9699_v59  ;;  %v6308_v26 = vld [vmem:[%s11316_s13 + $0x28] sm:$0xff] }
0x12b9   :  { %7353 = vmatmul.mubr.msk.f32.vlgmr.msra.gmra.mrb[36].mxu0 %vm483_vm6, %v2308_v44 }
0x12ba   :  { %7969 = vmatpush3.bf16.msra.mxu0 %v7968_v58  ;;  %7355 = vmatprep.mubr.msk.f32.mxu0 %vm8712_vm3, %v8713_v15  ;;  %v7978_v58 = vpack.c.bf16 %v6308_v26, %v6307_v39 }
0x12bb   :  { %7380 = vmatprep.subr.mxu0 %v8713_v15 }
0x12bc   :  { %7979 = vmatpush3.bf16.msra.mxu1 %v7978_v58 }
0x12bd   :  { %7980 = vmatprep.subr.bf16.mxu1 %v8711_v3 }
0x12d4   :  { %v2301_v17 = vpop.xlane.xlu1 %2300 }
0x12d5   :  { %8599 = vrcp.f32 %v2301_v17 }
0x12df   :  { %v8600_v14 = vpop.eup %8599 }
0x12e0   :  { %v2304_v28 = vpop.xlane.xlu1 %2303  ;;  %v2309_v45 = vmul.f32 %v8600_v14, %v9708_v21  ;;  %v6309_v14 = vld [vmem:[%s11316_s13 + $0x30] sm:$0xff] }
0x12e1   :  { %8601 = vrcp.f32 %v2304_v28  ;;  %v6310_v28 = vld [vmem:[%s11316_s13 + $0x38] sm:$0xff] }
0x12e2   :  { %7356 = vmatmul.mubr.msk.f32.gmra.mrb[38].mxu0 %vm483_vm6, %v2309_v45 }
0x12e3   :  { %7358 = vmatprep.mubr.msk.f32.mxu0 %vm8712_vm3, %v8713_v15 }
0x12e4   :  { %v2555_v59 = vpop.xlane.xlu1 %2554  ;;  %v2558_v31 = vpop.xlane.xlu0 %2557 }
0x12e5   :  { %8603 = vrcp.f32 %v2555_v59  ;;  %v7981_v59 = vpack.c.bf16 %v6310_v28, %v6309_v14  ;;  %v6314_v14 = vld [vmem:[%s11317_s14 + $0x38] sm:$0xff] }
0x12e6   :  { %8605 = vrcp.f32 %v2558_v31 }
0x12e7   :  { %7982 = vmatpush3.bf16.msra.mxu1 %v7981_v59  ;;  %v3319_v59 = vld [vmem:[%s11309_s6 + $0x88] sm:$0xff] }
0x12e8   :  { %v2561_v32 = vpop.xlane.xlu1 %2560  ;;  %v2812_v35 = vpop.xlane.xlu0 %2811  ;;  %7989 = vmatprep.subr.bf16.mxu1 %v8711_v3 }
0x12e9   :  { %8607 = vrcp.f32 %v2561_v32 }
0x12ea   :  { %8609 = vrcp.f32 %v2812_v35 }
0x12eb   :  { %v8602_v36 = vpop.eup %8601 }
0x12ec   :  { %v8492_v29 = vpop.permute.xlu1 %8491  ;;  %v2573_v41 = vpop.permute.xlu0 %2572  ;;  %v2310_v43 = vmul.f32 %v8602_v36, %v9715_v0 }
0x12ed   :  { %v8494_v51 = vunpack.i.h.bf16 %v8492_v29  ;;  %v8493_v21 = vunpack.i.l.bf16 %v8492_v29  ;;  %7381 = vmatpush3.msk.msra.mxu0 %vm535_vm8, %v2573_v41 }
0x12ee   :  { %7359 = vmatmul.mubr.msk.f32.gmra.mrb[40].mxu0 %vm483_vm6, %v2310_v43  ;;  %7974 = vmatprep.subr.bf16.mxu0 %v8711_v3 }
0x12ef   :  { %v8604_v16 = vpop.eup %8603  ;;  %v7975_v52 = vpack.c.bf16 %v8494_v51, %v8493_v21  ;;  %7382 = vmatprep.mubr.msk.f32.mxu0 %vm8712_vm3, %v8713_v15 }
0x12f0   :  { %v2565_v42 = vmul.f32 %v8604_v16, %v9719_v33  ;;  %v8606_v57 = vpop.eup %8605  ;;  %v2830_v13 = vpop.permute.xlu1 %2829 }
0x12f1   :  { %v2566_v0 = vmul.f32 %v8606_v57, %v9721_v9 }
0x12f2   :  { %7383 = vmatmul.mubr.msk.f32.vlgmr.msra.gmra.mrb[42].mxu0 %vm483_vm6, %v2565_v42 }
0x12f3   :  { %7976 = vmatpush3.bf16.msra.mxu0 %v7975_v52  ;;  %7385 = vmatprep.mubr.msk.f32.mxu0 %vm8712_vm3, %v8713_v15  ;;  %v8608_v1 = vpop.eup %8607 }
0x12f4   :  { %7410 = vmatprep.subr.mxu0 %v8713_v15  ;;  %v2567_v33 = vmul.f32 %v8608_v1, %v9727_v18  ;;  %v8610_v40 = vpop.eup %8609 }
0x12f5   :  { %v2822_v9 = vmul.f32 %v8610_v40, %v9729_v37 }
0x12f6   :  { %7386 = vmatmul.mubr.msk.f32.gmra.mrb[44].mxu0 %vm483_vm6, %v2566_v0 }
0x12f7   :  { %7411 = vmatpush3.msk.msra.mxu0 %vm535_vm8, %v2830_v13  ;;  %7388 = vmatprep.mubr.msk.f32.mxu0 %vm8712_vm3, %v8713_v15 }
0x12f8   :  { %7983 = vmatprep.subr.bf16.mxu0 %v8711_v3 }
0x12fa   :  { %7389 = vmatmul.mubr.msk.f32.gmra.mrb[46].mxu0 %vm483_vm6, %v2567_v33 }
0x12fb   :  { %7412 = vmatprep.mubr.msk.f32.mxu0 %vm8712_vm3, %v8713_v15 }
0x12fe   :  { %7413 = vmatmul.mubr.msk.f32.vlgmr.msra.gmra.mrb[48].mxu0 %vm483_vm6, %v2822_v9 }
0x12ff   :  { %7415 = vmatprep.mubr.msk.f32.mxu0 %vm8712_vm3, %v8713_v15 }
0x131d   :  { %v2815_v10 = vpop.xlane.xlu0 %2814 }
0x131e   :  { %8611 = vrcp.f32 %v2815_v10 }
0x1321   :  { %v2818_v48 = vpop.xlane.xlu1 %2817 }
0x1322   :  { %8613 = vrcp.f32 %v2818_v48  ;;  %v9857_v48 = vld [vmem:[%s11311_s8 + $0x8] sm:$0xff] }
0x1328   :  { %v8612_v18 = vpop.eup %8611 }
0x1329   :  { %v2823_v2 = vmul.f32 %v8612_v18, %v9743_v24  ;;  %v3037_v18 = vrot.slane %v9857_v48, %v8990_v27 }
0x132b   :  { %7416 = vmatmul.mubr.msk.f32.gmra.mrb[50].mxu0 %vm483_vm6, %v2823_v2 }
0x132c   :  { %v8614_v46 = vpop.eup %8613  ;;  %7418 = vmatprep.mubr.msk.f32.mxu0 %vm8712_vm3, %v8713_v15 }
0x132d   :  { %v2824_v37 = vmul.f32 %v8614_v46, %v9747_v60 }
0x132f   :  { %7419 = vmatmul.mubr.msk.f32.gmra.mrb[52].mxu0 %vm483_vm6, %v2824_v37 }
0x1330   :  { %7446 = vmatprep.mubr.msk.f32.mxu0 %vm8712_vm3, %v8713_v15 }
0x137c   :  { %v2151_v8 = vpop.f32.mrb[30].mxu0 }
0x137d   :  { %2165 = vst.msk [vmem:[#allocation2] sm:$0xff] %vm384_vm4, %v2151_v8  ;;  %v7324_v61 = vpop.f32.mrb[31].mxu0 }
0x1380   :  { %v2156_v12 = vpop.f32.mrb[32].mxu0 }
0x1381   :  { %2166 = vst.msk [vmem:[#allocation2 + $0x8] sm:$0xff] %vm384_vm4, %v2156_v12  ;;  %v7327_v24 = vpop.f32.mrb[33].mxu0 }
0x1384   :  { %v2161_v62 = vpop.f32.mrb[34].mxu0 }
0x1385   :  { %2167 = vst.msk [vmem:[#allocation2 + $0x10] sm:$0xf] %vm620_vm9, %v2161_v62  ;;  %v7330_v20 = vpop.f32.mrb[35].mxu0  ;;  %vm4075_vm9 = vcmask 519171  }
0x138c   :  { %v2396_v6 = vpop.f32.mrb[36].mxu0 }
0x138d   :  { %2413 = vrot.lane.b32.xlu0 %v2396_v6, %s11360_s21  ;;  %v7354_v60 = vpop.f32.mrb[37].mxu0 }
0x13b5   :  { %v2401_v11 = vpop.f32.mrb[38].mxu0 }
0x13b6   :  { %v7357_v23 = vpop.f32.mrb[39].mxu0 }
0x13c1   :  { %v2406_v63 = vpop.f32.mrb[40].mxu0 }
0x13c2   :  { %v7360_v34 = vpop.f32.mrb[41].mxu0 }
0x13c5   :  { %v2653_v25 = vpop.f32.mrb[42].mxu0 }
0x13c6   :  { %2670 = vrot.lane.b32.xlu1 %v2653_v25, %s11361_s30  ;;  %v7384_v44 = vpop.f32.mrb[43].mxu0 }
0x13c7   :  { %v6312_v44 = vld [vmem:[%s11317_s14 + $0x28] sm:$0xff] }
0x13c9   :  { %v2658_v17 = vpop.f32.mrb[44].mxu0 }
0x13ca   :  { %2672 = vrot.lane.b32.xlu1 %v2658_v17, %s11361_s30  ;;  %v7387_v45 = vpop.f32.mrb[45].mxu0  ;;  %v6313_v17 = vld [vmem:[%s11317_s14 + $0x30] sm:$0xff] }
0x13cb   :  { %v7987_v28 = vpack.c.bf16 %v6314_v14, %v6313_v17  ;;  %v3318_v45 = vld [vmem:[%s11309_s6 + $0x80] sm:$0xff]  ;;  %v3307_v14 = vld [vmem:[%s11309_s6 + $0x28] sm:$0xff] }
0x13cc   :  { %v3306_v17 = vld [vmem:[%s11309_s6 + $0x20] sm:$0xff] }
0x13cd   :  { %v2663_v31 = vpop.f32.mrb[46].mxu0 }
0x13ce   :  { %2417 = vrot.lane.b32.xlu1 %v2406_v63, %s11360_s21  ;;  %v7390_v32 = vpop.f32.mrb[47].mxu0 }
0x13d1   :  { %v2910_v35 = vpop.f32.mrb[48].mxu0 }
0x13d2   :  { %2927 = vrot.lane.b32.xlu0 %v2910_v35, %s11362_s23  ;;  %v7414_v36 = vpop.f32.mrb[49].mxu0 }
0x13d6   :  { %2415 = vrot.lane.b32.xlu0 %v2401_v11, %s11360_s21 }
0x13fe   :  { %v2915_v29 = vpop.f32.mrb[50].mxu0 }
0x13ff   :  { %2929 = vrot.lane.b32.xlu0 %v2915_v29, %s11362_s23  ;;  %v7417_v41 = vpop.f32.mrb[51].mxu0  ;;  %v2414_v43 = vpop.permute.xlu0 %2413 }
0x1400   :  { %2422 = vst.msk [vmem:[#allocation2] sm:$0xff] %vm876_vm10, %v2414_v43 }
0x1402   :  { %v2920_v51 = vpop.f32.mrb[52].mxu0 }
0x1403   :  { %2674 = vrot.lane.b32.xlu0 %v2663_v31, %s11361_s30  ;;  %2931 = vrot.lane.b32.xlu1 %v2920_v51, %s11362_s23  ;;  %v7420_v21 = vpop.f32.mrb[53].mxu0  ;;  %v8013_v31 = vpack.c.bf16 %v3319_v59, %v3318_v45  ;;  %v3325_v45 = vld [vmem:[%s11309_s6 + $0xb8] sm:$0xff]  ;;  %v8023_v59 = vpack.c.bf16 %v3307_v14, %v3306_v17  ;;  %s11363_s30 = sld [smem:[#allocation10_spill]] }
0x1438   :  { %v2671_v16 = vpop.permute.xlu1 %2670 }
0x1439   :  { %2679 = vst.msk [vmem:[#allocation2] sm:$0xff] %vm1135_vm11, %v2671_v16 }
0x143c   :  { %v2673_v52 = vpop.permute.xlu1 %2672 }
0x1440   :  { %v2418_v42 = vpop.permute.xlu1 %2417 }
0x1441   :  { %2424 = vst.msk [vmem:[#allocation2 + $0x10] sm:$0xf] %vm879_vm13, %v2418_v42  ;;  %v6315_v42 = vld [vmem:[%s11318_s15 + $0x80] sm:$0xff]  ;;  %vm10541_vm13 = vmpackc.low %vm112_vm0, %vm112_vm0 }
0x1444   :  { %v2928_v57 = vpop.permute.xlu0 %2927 }
0x1445   :  { %2936 = vst.msk [vmem:[#allocation2] sm:$0xff] %vm1394_vm12, %v2928_v57  ;;  %v6316_v57 = vld [vmem:[%s11318_s15 + $0x88] sm:$0xff] }
0x1448   :  { %v2416_v0 = vpop.permute.xlu0 %2415 }
0x1449   :  { %2423 = vst.msk [vmem:[#allocation2 + $0x8] sm:$0xff] %vm876_vm10, %v2416_v0  ;;  %v6317_v0 = vld [vmem:[%s11318_s15 + $0x90] sm:$0xff]  ;;  %vm4077_vm10 = vcmask 518146  }
0x144a   :  { %2680 = vst.msk [vmem:[#allocation2 + $0x8] sm:$0xff] %vm1135_vm11, %v2673_v52  ;;  %vm3950_vm11 = vcmask 519168  }
0x144c   :  { %v2939_v1 = vld [vmem:[#allocation2] sm:$0xff] }
0x144d   :  { %7430 = vmatmul.mubr.msk.f32.vlgmr.msra.gmra.mrb[78].mxu1 %vm230_vm1, %v2939_v1  ;;  %v7990_v1 = vpack.c.bf16 %v6316_v57, %v6315_v42  ;;  %v3328_v42 = vld [vmem:[%s11309_s6 + $0xd0] sm:$0xff]  ;;  %v3329_v57 = vld [vmem:[%s11309_s6 + $0xd8] sm:$0xff] }
0x144e   :  { %7432 = vmatprep.mubr.msk.f32.mxu1 %vm8712_vm3, %v8713_v15 }
0x144f   :  { %7991 = vmatpush3.bf16.msra.mxu1 %v7990_v1  ;;  %v8033_v1 = vpack.c.bf16 %v3329_v57, %v3328_v42 }
0x1450   :  { %7992 = vmatprep.subr.bf16.mxu1 %v8711_v3 }
0x1471   :  { %v2930_v13 = vpop.permute.xlu0 %2929 }
0x1472   :  { %2937 = vst.msk [vmem:[#allocation2 + $0x8] sm:$0xff] %vm1394_vm12, %v2930_v13  ;;  %v6318_v13 = vld [vmem:[%s11318_s15 + $0x98] sm:$0xff]  ;;  %vm3961_vm12 = vcmask 523268  }
0x1475   :  { %v2932_v33 = vpop.permute.xlu1 %2931  ;;  %v2675_v40 = vpop.permute.xlu0 %2674 }
0x1476   :  { %2681 = vst.msk [vmem:[#allocation2 + $0x10] sm:$0xf] %vm1138_vm14, %v2675_v40  ;;  %v6319_v40 = vld [vmem:[%s11318_s15 + $0xa0] sm:$0xff] }
0x1477   :  { %2938 = vst.msk [vmem:[#allocation2 + $0x10] sm:$0xf] %vm1397_vm15, %v2932_v33  ;;  %v7993_v33 = vpack.c.bf16 %v6318_v13, %v6317_v0  ;;  %v3312_v13 = vld [vmem:[%s11309_s6 + $0x50] sm:$0xff] }
0x1479   :  { %v2940_v9 = vld [vmem:[#allocation2 + $0x8] sm:$0xff]  ;;  %7994 = vmatpush3.bf16.msra.mxu1 %v7993_v33  ;;  %v3313_v33 = vld [vmem:[%s11309_s6 + $0x58] sm:$0xff] }
0x147a   :  { %7433 = vmatmul.mubr.msk.f32.gmra.mrb[80].mxu1 %vm230_vm1, %v2940_v9  ;;  %v6320_v9 = vld [vmem:[%s11318_s15 + $0xa8] sm:$0xff]  ;;  %7995 = vmatprep.subr.bf16.mxu1 %v8711_v3 }
0x147b   :  { %7435 = vmatprep.mubr.msk.f32.mxu1 %vm8712_vm3, %v8713_v15 }
0x147e   :  { %v2941_v10 = vld [vmem:[#allocation2 + $0x10] sm:$0xf] }
0x147f   :  { %7436 = vmatmul.mubr.msk.f32.gmra.mrb[82].mxu1 %vm230_vm1, %v2941_v10  ;;  %v7996_v10 = vpack.c.bf16 %v6320_v9, %v6319_v40  ;;  %v3330_v40 = vld [vmem:[%s11309_s6 + $0xe0] sm:$0xff]  ;;  %v3331_v9 = vld [vmem:[%s11309_s6 + $0xe8] sm:$0xff] }
0x1480   :  { %7487 = vmatprep.mubr.msk.f32.mxu1 %vm8712_vm3, %v8713_v15 }
0x1481   :  { %7997 = vmatpush3.bf16.msra.mxu1 %v7996_v10  ;;  %v8035_v10 = vpack.c.bf16 %v3313_v33, %v3312_v13  ;;  %v6324_v33 = vld [vmem:[%s11318_s15 + $0xc8] sm:$0xff] }
0x1482   :  { %7998 = vmatprep.subr.bf16.mxu1 %v8711_v3 }
0x1520   :  { %v3017_v2 = vpop.f32.mrb[78].mxu1 }
0x1521   :  { %v3031_v46 = vadd.f32 %v3017_v2, %v9456_v50  ;;  %v7431_v37 = vpop.f32.mrb[79].mxu1 }
0x1522   :  { %v9932_v37 = vrot.slane %v9857_v48, %v8998_v30 }
0x1523   :  { %v9862_v8 = vadd.f32 %v3037_v18, %v3031_v46 }
0x1525   :  { %v3041_v61 = vsel %vm230_vm1, %v9862_v8, 0.0 }
0x1526   :  { %3042 = vadd.xlane.f32.xlu0 %v3041_v61 }
0x154d   :  { %v3022_v12 = vpop.f32.mrb[80].mxu1 }
0x154e   :  { %v3032_v24 = vadd.f32 %v3022_v12, %v9461_v7  ;;  %v7434_v62 = vpop.f32.mrb[81].mxu1  ;;  %v9936_v12 = vrot.slane %v9857_v48, %v9321_v56 }
0x154f   :  { %v3302_v62 = vld [vmem:[%s11309_s6] sm:$0xff] }
0x1550   :  { %v9867_v20 = vadd.f32 %v3037_v18, %v3032_v24 }
0x1552   :  { %v3027_v6 = vpop.f32.mrb[82].mxu1  ;;  %v3044_v60 = vsel %vm230_vm1, %v9867_v20, 0.0 }
0x1553   :  { %v3033_v11 = vadd.f32 %v3027_v6, %v9466_v55  ;;  %3045 = vadd.xlane.f32.xlu1 %v3044_v60  ;;  %v7437_v50 = vpop.f32.mrb[83].mxu1  ;;  %v6311_v55 = vld [vmem:[%s11317_s14 + $0x20] sm:$0xff]  ;;  %v3303_v6 = vld [vmem:[%s11309_s6 + $0x8] sm:$0xff]  ;;  %v3320_v60 = vld [vmem:[%s11309_s6 + $0x90] sm:$0xff] }
0x1554   :  { %v7984_v58 = vpack.c.bf16 %v6312_v44, %v6311_v55  ;;  %v3323_v55 = vld [vmem:[%s11309_s6 + $0xa8] sm:$0xff] }
0x1555   :  { %v9872_v23 = vadd.f32 %v3037_v18, %v3033_v11  ;;  %v3321_v11 = vld [vmem:[%s11309_s6 + $0x98] sm:$0xff] }
0x1556   :  { %7985 = vmatpush3.bf16.msra.mxu0 %v7984_v58 }
0x1557   :  { %v3047_v63 = vsel %vm237_vm2, %v9872_v23, 0.0  ;;  %7986 = vmatprep.subr.bf16.mxu0 %v8711_v3 }
0x1558   :  { %3048 = vadd.xlane.f32.xlu0 %v3047_v63  ;;  %v8015_v63 = vpack.c.bf16 %v3303_v6, %v3302_v62 }
0x155a   :  { %7988 = vmatpush3.bf16.msra.mxu0 %v7987_v28  ;;  %v3324_v28 = vld [vmem:[%s11309_s6 + $0xb0] sm:$0xff] }
0x155b   :  { %8014 = vmatprep.subr.bf16.mxu0 %v8013_v31  ;;  %v8025_v31 = vpack.c.bf16 %v3325_v45, %v3324_v28 }
0x15b3   :  { %v3043_v34 = vpop.xlane.xlu0 %3042 }
0x15b4   :  { %v3050_v25 = vmul.f32 0.03125, %v3043_v34 }
0x15b6   :  { %v3053_v7 = vsub.f32 %v9862_v8, %v3050_v25  ;;  %v8017_v25 = vpack.c.bf16 %v3321_v11, %v3320_v60  ;;  %v3316_v60 = vld [vmem:[%s11309_s6 + $0x70] sm:$0xff]  ;;  %v3317_v11 = vld [vmem:[%s11309_s6 + $0x78] sm:$0xff] }
0x15b8   :  { %v3056_v39 = vmul.f32 %v3053_v7, %v3053_v7 }
0x15ba   :  { %v3059_v26 = vsel %vm230_vm1, %v3056_v39, 0.0  ;;  %v3305_v39 = vld [vmem:[%s11309_s6 + $0x18] sm:$0xff] }
0x15bb   :  { %3060 = vadd.xlane.f32.xlu0 %v3059_v26  ;;  %v3322_v26 = vld [vmem:[%s11309_s6 + $0xa0] sm:$0xff] }
0x15bc   :  { %v8021_v58 = vpack.c.bf16 %v3323_v55, %v3322_v26 }
0x15e0   :  { %v3046_v32 = vpop.xlane.xlu1 %3045 }
0x15e1   :  { %v3051_v35 = vmul.f32 0.03125, %v3046_v32  ;;  %v3308_v32 = vld [vmem:[%s11309_s6 + $0x30] sm:$0xff] }
0x15e3   :  { %v9898_v36 = vsub.f32 %v9867_v20, %v3051_v35  ;;  %v3309_v35 = vld [vmem:[%s11309_s6 + $0x38] sm:$0xff] }
0x15e5   :  { %v3049_v29 = vpop.xlane.xlu0 %3048  ;;  %v3057_v41 = vmul.f32 %v9898_v36, %v9898_v36 }
0x15e6   :  { %v3052_v43 = vmul.f32 0.03125, %v3049_v29  ;;  %v3326_v29 = vld [vmem:[%s11309_s6 + $0xc0] sm:$0xff] }
0x15e7   :  { %v3062_v51 = vsel %vm230_vm1, %v3057_v41, 0.0  ;;  %v3327_v41 = vld [vmem:[%s11309_s6 + $0xc8] sm:$0xff] }
0x15e8   :  { %v9904_v21 = vsub.f32 %v9872_v23, %v3052_v43  ;;  %3063 = vadd.xlane.f32.xlu0 %v3062_v51  ;;  %v8027_v43 = vpack.c.bf16 %v3309_v35, %v3308_v32  ;;  %v8029_v51 = vpack.c.bf16 %v3327_v41, %v3326_v29  ;;  %v3723_v32 = vrot.slane %v9857_v48, %v9385_v54  ;;  %v3298_v35 = vld [vmem:[%s11363_s30 + $0x30] sm:$0xff]  ;;  %v3671_v41 = vld [vmem:[%s11319_s16 + $0x18] sm:$0xff] }
0x15e9   :  { %v3670_v29 = vld [vmem:[%s11319_s16 + $0x10] sm:$0xff] }
0x15ea   :  { %v3058_v16 = vmul.f32 %v9904_v21, %v9904_v21  ;;  %v3725_v57 = vmul.f32 %v3723_v32, %v9503_v38  ;;  %v6321_v38 = vld [vmem:[%s11318_s15 + $0xb0] sm:$0xff] }
0x15ec   :  { %v3065_v52 = vsel %vm237_vm2, %v3058_v16, 0.0  ;;  %v3310_v16 = vld [vmem:[%s11309_s6 + $0x40] sm:$0xff] }
0x15ed   :  { %3066 = vadd.xlane.f32.xlu1 %v3065_v52  ;;  %v3311_v52 = vld [vmem:[%s11309_s6 + $0x48] sm:$0xff] }
0x15ee   :  { %v8031_v0 = vpack.c.bf16 %v3311_v52, %v3310_v16  ;;  %v3730_v16 = vrot.slane %v9857_v48, %v9451_v22  ;;  %v3724_v52 = vmul.f32 %v3723_v32, %v9500_v4  ;;  %v3726_v48 = vmul.f32 %v3723_v32, %v9512_v5  ;;  %v6323_v5 = vld [vmem:[%s11318_s15 + $0xc0] sm:$0xff]  ;;  %v3355_v32 = vld [vmem:[%s11309_s6 + $0x1a8] sm:$0xff] }
0x15f0   :  { %v3731_v42 = vadd.f32 %v3730_v16, %v3724_v52  ;;  %v3733_v4 = vadd.f32 %v3730_v16, %v3726_v48  ;;  %v3358_v48 = vld [vmem:[%s11309_s6 + $0x1c0] sm:$0xff] }
0x1648   :  { %v3061_v18 = vpop.xlane.xlu0 %3060 }
0x1649   :  { %v3068_v2 = vmul.f32 0.03125, %v3061_v18  ;;  %v8037_v18 = vpack.c.bf16 %v3331_v9, %v3330_v40  ;;  %v8002_v40 = vpack.c.bf16 %v6324_v33, %v6323_v5  ;;  %v6325_v9 = vld [vmem:[%s11318_s15 + $0xd0] sm:$0xff]  ;;  %v3343_v5 = vld [vmem:[%s11309_s6 + $0x148] sm:$0xff] }
0x164a   :  { %v3360_v33 = vld [vmem:[%s11309_s6 + $0x1d0] sm:$0xff] }
0x164b   :  { %v3071_v46 = vadd.f32 1e-05, %v3068_v2  ;;  %v3314_v2 = vld [vmem:[%s11309_s6 + $0x60] sm:$0xff] }
0x164d   :  { %8615 = vrsqrt.f32 %v3071_v46  ;;  %v3315_v46 = vld [vmem:[%s11309_s6 + $0x68] sm:$0xff] }
0x164e   :  { %v8039_v62 = vpack.c.bf16 %v3315_v46, %v3314_v2  ;;  %v6327_v2 = vld [vmem:[%s11318_s15 + $0xe0] sm:$0xff]  ;;  %v6328_v46 = vld [vmem:[%s11318_s15 + $0xe8] sm:$0xff] }
0x1657   :  { %v8616_v61 = vpop.eup %8615 }
0x1658   :  { %v3077_v24 = vmul.f32 %v8616_v61, %v3053_v7  ;;  %v3304_v7 = vld [vmem:[%s11309_s6 + $0x10] sm:$0xff] }
0x1659   :  { %v8019_v44 = vpack.c.bf16 %v3305_v39, %v3304_v7  ;;  %v3332_v61 = vld [vmem:[%s11309_s6 + $0xf0] sm:$0xff] }
0x165a   :  { %v3084_v50 = vmul.f32 %v9932_v37, %v3077_v24  ;;  %v3333_v24 = vld [vmem:[%s11309_s6 + $0xf8] sm:$0xff] }
0x165b   :  { %v8041_v6 = vpack.c.bf16 %v3333_v24, %v3332_v61  ;;  %v8008_v61 = vpack.c.bf16 %v6328_v46, %v6327_v2  ;;  %v6329_v24 = vld [vmem:[%s11318_s15 + $0xf0] sm:$0xff]  ;;  %v3345_v2 = vld [vmem:[%s11309_s6 + $0x158] sm:$0xff]  ;;  %v3362_v46 = vld [vmem:[%s11309_s6 + $0x1e0] sm:$0xff] }
0x165c   :  { %v3091_v34 = vadd.f32 %v9936_v12, %v3084_v50 }
0x165e   :  { %7447 = vmatmul.mubr.msk.f32.vlgmr.msra.gmra.mrb[54].mxu0 %vm230_vm1, %v3091_v34  ;;  %v8043_v34 = vpack.c.bf16 %v3317_v11, %v3316_v60  ;;  %v3350_v60 = vld [vmem:[%s11309_s6 + $0x180] sm:$0xff]  ;;  %v3351_v11 = vld [vmem:[%s11309_s6 + $0x188] sm:$0xff] }
0x165f   :  { %8016 = vmatpush3.bf16.msra.mxu0 %v8015_v63  ;;  %7449 = vmatprep.mubr.msk.f32.mxu0 %vm8712_vm3, %v8713_v15 }
0x1660   :  { %8018 = vmatprep.subr.bf16.mxu0 %v8017_v25 }
0x1663   :  { %8020 = vmatpush3.bf16.msra.mxu0 %v8019_v44 }
0x1664   :  { %8022 = vmatprep.subr.bf16.mxu0 %v8021_v58 }
0x1667   :  { %8024 = vmatpush3.bf16.msra.mxu0 %v8023_v59 }
0x1668   :  { %8026 = vmatprep.subr.bf16.mxu0 %v8025_v31  ;;  %v3668_v31 = vld [vmem:[%s11319_s16] sm:$0xff] }
0x166b   :  { %8028 = vmatpush3.bf16.msra.mxu0 %v8027_v43  ;;  %v3297_v43 = vld [vmem:[%s11363_s30 + $0x28] sm:$0xff] }
0x166c   :  { %8030 = vmatprep.subr.bf16.mxu0 %v8029_v51  ;;  %v8097_v51 = vpack.c.bf16 %v3671_v41, %v3670_v29  ;;  %v3338_v41 = vld [vmem:[%s11309_s6 + $0x120] sm:$0xff] }
0x166f   :  { %8032 = vmatpush3.bf16.msra.mxu0 %v8031_v0  ;;  %v3732_v0 = vadd.f32 %v3730_v16, %v3725_v57  ;;  %v3357_v16 = vld [vmem:[%s11309_s6 + $0x1b8] sm:$0xff]  ;;  %v3340_v57 = vld [vmem:[%s11309_s6 + $0x130] sm:$0xff] }
0x1670   :  { %8034 = vmatprep.subr.bf16.mxu0 %v8033_v1  ;;  %v6322_v1 = vld [vmem:[%s11318_s15 + $0xb8] sm:$0xff] }
0x1671   :  { %v7999_v13 = vpack.c.bf16 %v6322_v1, %v6321_v38 }
0x1673   :  { %8036 = vmatpush3.bf16.msra.mxu0 %v8035_v10  ;;  %8000 = vmatpush3.bf16.msra.mxu1 %v7999_v13  ;;  %v6326_v10 = vld [vmem:[%s11318_s15 + $0xd8] sm:$0xff]  ;;  %v3342_v13 = vld [vmem:[%s11309_s6 + $0x140] sm:$0xff] }
0x1674   :  { %8038 = vmatprep.subr.bf16.mxu0 %v8037_v18  ;;  %8001 = vmatprep.subr.bf16.mxu1 %v8711_v3  ;;  %v8005_v18 = vpack.c.bf16 %v6326_v10, %v6325_v9  ;;  %v8063_v9 = vpack.c.bf16 %v3343_v5, %v3342_v13 }
0x1675   :  { %v3064_v50 = vpop.xlane.xlu0 %3063 }
0x1676   :  { %v3069_v63 = vmul.f32 0.03125, %v3064_v50  ;;  %v8045_v50 = vpack.c.bf16 %v3351_v11, %v3350_v60  ;;  %v3347_v60 = vld [vmem:[%s11309_s6 + $0x168] sm:$0xff]  ;;  %v3364_v11 = vld [vmem:[%s11309_s6 + $0x1f0] sm:$0xff] }
0x1677   :  { %8040 = vmatpush3.bf16.msra.mxu0 %v8039_v62  ;;  %8003 = vmatpush3.bf16.msra.mxu1 %v8002_v40  ;;  %v6330_v62 = vld [vmem:[%s11318_s15 + $0xf8] sm:$0xff] }
0x1678   :  { %v3072_v25 = vadd.f32 1e-05, %v3069_v63  ;;  %8042 = vmatprep.subr.bf16.mxu0 %v8041_v6  ;;  %8004 = vmatprep.subr.bf16.mxu1 %v8711_v3  ;;  %v8011_v6 = vpack.c.bf16 %v6330_v62, %v6329_v24  ;;  %v8681_v63 = vld [vmem:[%s11313_s10] sm:$0x3]  ;;  %v3361_v40 = vld [vmem:[%s11309_s6 + $0x1d8] sm:$0xff] }
0x1679   :  { %v8065_v10 = vpack.c.bf16 %v3361_v40, %v3360_v33 }
0x167a   :  { %8617 = vrsqrt.f32 %v3072_v25  ;;  %v3067_v7 = vpop.xlane.xlu1 %3066 }
0x167b   :  { %v3070_v39 = vmul.f32 0.03125, %v3067_v7  ;;  %8044 = vmatpush3.bf16.msra.mxu0 %v8043_v34  ;;  %8006 = vmatpush3.bf16.msra.mxu1 %v8005_v18  ;;  %v10129_v34 = vrot.slane %v8681_v63, %v8998_v30  ;;  %v3344_v18 = vld [vmem:[%s11309_s6 + $0x150] sm:$0xff] }
0x167c   :  { %8093 = vmatprep.subr.bf16.mxu0 %v8711_v3  ;;  %8007 = vmatprep.subr.bf16.mxu1 %v8711_v3  ;;  %v8067_v24 = vpack.c.bf16 %v3345_v2, %v3344_v18  ;;  %v3295_v2 = vld [vmem:[%s11363_s30 + $0x18] sm:$0xff] }
0x167d   :  { %v3073_v26 = vadd.f32 1e-05, %v3070_v39 }
0x167f   :  { %8619 = vrsqrt.f32 %v3073_v26  ;;  %8009 = vmatpush3.bf16.msra.mxu1 %v8008_v61  ;;  %v3363_v61 = vld [vmem:[%s11309_s6 + $0x1e8] sm:$0xff] }
0x1680   :  { %8010 = vmatprep.subr.bf16.mxu1 %v8711_v3  ;;  %v8069_v62 = vpack.c.bf16 %v3363_v61, %v3362_v46  ;;  %v3368_v61 = vld [vmem:[%s11309_s6 + $0x210] sm:$0xff] }
0x1683   :  { %8012 = vmatpush3.bf16.msra.mxu1 %v8011_v6  ;;  %v3346_v6 = vld [vmem:[%s11309_s6 + $0x160] sm:$0xff] }
0x1684   :  { %v8618_v55 = vpop.eup %8617  ;;  %8046 = vmatprep.subr.bf16.mxu1 %v8045_v50  ;;  %v3365_v50 = vld [vmem:[%s11309_s6 + $0x1f8] sm:$0xff]  ;;  %v8071_v63 = vpack.c.bf16 %v3347_v60, %v3346_v6 }
0x1685   :  { %v3078_v44 = vmul.f32 %v8618_v55, %v9898_v36  ;;  %v3293_v36 = vld [vmem:[%s11363_s30 + $0x8] sm:$0xff]  ;;  %v3334_v55 = vld [vmem:[%s11309_s6 + $0x100] sm:$0xff] }
0x1687   :  { %v3085_v58 = vmul.f32 %v9932_v37, %v3078_v44  ;;  %v3335_v44 = vld [vmem:[%s11309_s6 + $0x108] sm:$0xff] }
0x1689   :  { %v8620_v17 = vpop.eup %8619  ;;  %v3092_v14 = vadd.f32 %v9936_v12, %v3085_v58 }
0x168a   :  { %v3079_v28 = vmul.f32 %v8620_v17, %v9904_v21  ;;  %v3669_v21 = vld [vmem:[%s11319_s16 + $0x8] sm:$0xff]  ;;  %v3352_v17 = vld [vmem:[%s11309_s6 + $0x190] sm:$0xff] }
0x168b   :  { %7450 = vmatmul.mubr.msk.f32.gmra.mrb[56].mxu0 %vm230_vm1, %v3092_v14  ;;  %v3353_v14 = vld [vmem:[%s11309_s6 + $0x198] sm:$0xff] }
0x168c   :  { %7452 = vmatprep.mubr.msk.f32.mxu0 %vm8712_vm3, %v8713_v15  ;;  %v3086_v45 = vmul.f32 %v9932_v37, %v3079_v28  ;;  %v3292_v37 = vld [vmem:[%s11363_s30] sm:$0xff] }
0x168e   :  { %v3093_v59 = vadd.f32 %v9936_v12, %v3086_v45  ;;  %v8094_v12 = vpack.c.bf16 %v3669_v21, %v3668_v31  ;;  %v8049_v31 = vpack.c.bf16 %v3353_v14, %v3352_v17  ;;  %v3336_v21 = vld [vmem:[%s11309_s6 + $0x110] sm:$0xff] }
0x1690   :  { %7453 = vmatmul.mubr.msk.f32.gmra.mrb[58].mxu0 %vm230_vm1, %v3093_v59  ;;  %v8047_v59 = vpack.c.bf16 %v3335_v44, %v3334_v55  ;;  %v3367_v55 = vld [vmem:[%s11309_s6 + $0x208] sm:$0xff] }
0x1691   :  { %3448 = vmatprep.mubr.f32.mxu0 %v3293_v36 }
0x1694   :  { %3449 = vmatmul.mubr.f32.vlgmr.msra.gmra.mrb[60].mxu0 %v3292_v37  ;;  %v3337_v37 = vld [vmem:[%s11309_s6 + $0x118] sm:$0xff] }
0x1695   :  { %8095 = vmatpush3.bf16.msra.mxu0 %v8094_v12  ;;  %3453 = vmatprep.mubr.f32.mxu0 %v3298_v35  ;;  %v3354_v12 = vld [vmem:[%s11309_s6 + $0x1a0] sm:$0xff]  ;;  %v8051_v35 = vpack.c.bf16 %v3337_v37, %v3336_v21 }
0x1696   :  { %8096 = vmatprep.subr.bf16.mxu0 %v8711_v3  ;;  %v8053_v29 = vpack.c.bf16 %v3355_v32, %v3354_v12  ;;  %v10238_v32 = vld [vmem:[%s11312_s9] sm:$0xff] }
0x1698   :  { %3454 = vmatmul.mubr.f32.gmra.mrb[62].mxu0 %v3297_v43  ;;  %v3339_v43 = vld [vmem:[%s11309_s6 + $0x128] sm:$0xff] }
0x1699   :  { %8098 = vmatpush3.bf16.msra.mxu0 %v8097_v51  ;;  %7523 = vmatprep.mubr.msk.f32.mxu0 %vm8712_vm3, %v8713_v15  ;;  %v3356_v51 = vld [vmem:[%s11309_s6 + $0x1b0] sm:$0xff]  ;;  %v8055_v52 = vpack.c.bf16 %v3339_v43, %v3338_v41  ;;  %v10243_v41 = vand.u32 127, %v272_v19 }
0x169b   :  { %vm4068_vm4 = vcmp.lt.s32.totalorder %v10243_v41, 32 }
0x169c   :  { %7524 = vmatmul.mubr.msk.f32.vlgmr.msra.gmra.mrb[64].mxu0 %vm230_vm1, %v3731_v42  ;;  %v8057_v42 = vpack.c.bf16 %v3357_v16, %v3356_v51 }
0x169d   :  { %7526 = vmatprep.mubr.msk.f32.mxu0 %vm8712_vm3, %v8713_v15 }
0x16a0   :  { %7527 = vmatmul.mubr.msk.f32.gmra.mrb[66].mxu0 %vm230_vm1, %v3732_v0  ;;  %v3341_v0 = vld [vmem:[%s11309_s6 + $0x138] sm:$0xff] }
0x16a1   :  { %7529 = vmatprep.mubr.msk.f32.mxu0 %vm8712_vm3, %v8713_v15  ;;  %v8059_v38 = vpack.c.bf16 %v3341_v0, %v3340_v57 }
0x16a4   :  { %7530 = vmatmul.mubr.msk.f32.gmra.mrb[68].mxu0 %vm230_vm1, %v3733_v4  ;;  %v3359_v4 = vld [vmem:[%s11309_s6 + $0x1c8] sm:$0xff] }
0x16a5   :  { %v8061_v1 = vpack.c.bf16 %v3359_v4, %v3358_v48 }
0x1731   :  { %v3173_v25 = vpop.f32.mrb[54].mxu0 }
0x1732   :  { %v3174_v7 = vadd.f32 %v3173_v25, %v10129_v34  ;;  %v7448_v39 = vpop.f32.mrb[55].mxu0  ;;  %v8073_v25 = vpack.c.bf16 %v3365_v50, %v3364_v11 }
0x1733   :  { %v3349_v39 = vld [vmem:[%s11309_s6 + $0x178] sm:$0xff] }
0x1734   :  { %v3190_v26 = vmul.f32 0.70710677, %v3174_v7  ;;  %v3187_v28 = vmul.f32 0.5, %v3174_v7  ;;  %v3348_v7 = vld [vmem:[%s11309_s6 + $0x170] sm:$0xff] }
0x1736   :  { %8621 = verf.f32 %v3190_v26  ;;  %v3366_v26 = vld [vmem:[%s11309_s6 + $0x200] sm:$0xff] }
0x1740   :  { %v8622_v58 = vpop.eup %8621 }
0x1741   :  { %v3196_v45 = vadd.f32 1.0, %v8622_v58  ;;  %v8075_v58 = vpack.c.bf16 %v3349_v39, %v3348_v7  ;;  %v3300_v7 = vld [vmem:[%s11363_s30 + $0x40] sm:$0xff] }
0x1743   :  { %v3199_v36 = vmul.f32 %v3196_v45, %v3187_v28  ;;  %v10231_v28 = vpack.c.bf16 %v3367_v55, %v3366_v26  ;;  %v3370_v55 = vld [vmem:[%s11309_s6 + $0x220] sm:$0xff] }
0x1745   :  { %7488 = vmatmul.mubr.f32.vlgmr.msra.gmra.mrb[84].mxu1 %v3199_v36 }
0x1746   :  { %8048 = vmatpush3.bf16.msra.mxu1 %v8047_v59  ;;  %7490 = vmatprep.mubr.msk.f32.mxu1 %vm8712_vm3, %v8713_v15 }
0x1747   :  { %8050 = vmatprep.subr.bf16.mxu1 %v8049_v31 }
0x174a   :  { %8052 = vmatpush3.bf16.msra.mxu1 %v8051_v35 }
0x174b   :  { %8054 = vmatprep.subr.bf16.mxu1 %v8053_v29 }
0x174e   :  { %8056 = vmatpush3.bf16.msra.mxu1 %v8055_v52 }
0x174f   :  { %8058 = vmatprep.subr.bf16.mxu1 %v8057_v42 }
0x1752   :  { %8060 = vmatpush3.bf16.msra.mxu1 %v8059_v38 }
0x1753   :  { %8062 = vmatprep.subr.bf16.mxu1 %v8061_v1 }
0x1756   :  { %8064 = vmatpush3.bf16.msra.mxu1 %v8063_v9 }
0x1757   :  { %8066 = vmatprep.subr.bf16.mxu1 %v8065_v10 }
0x175a   :  { %8068 = vmatpush3.bf16.msra.mxu1 %v8067_v24  ;;  %v3369_v24 = vld [vmem:[%s11309_s6 + $0x218] sm:$0xff] }
0x175b   :  { %8070 = vmatprep.subr.bf16.mxu1 %v8069_v62 }
0x175e   :  { %v3178_v44 = vpop.f32.mrb[56].mxu0  ;;  %8072 = vmatpush3.bf16.msra.mxu1 %v8071_v63  ;;  %v3294_v63 = vld [vmem:[%s11363_s30 + $0x10] sm:$0xff] }
0x175f   :  { %v3179_v17 = vadd.f32 %v3178_v44, %v10129_v34  ;;  %v7451_v14 = vpop.f32.mrb[57].mxu0  ;;  %8074 = vmatprep.subr.bf16.mxu1 %v8073_v25  ;;  %v8081_v25 = vpack.c.bf16 %v3369_v24, %v3368_v61  ;;  %v3371_v44 = vld [vmem:[%s11309_s6 + $0x228] sm:$0xff] }
0x1761   :  { %v3191_v45 = vmul.f32 0.70710677, %v3179_v17  ;;  %v3188_v52 = vmul.f32 0.5, %v3179_v17 }
0x1762   :  { %8076 = vmatpush3.bf16.msra.mxu1 %v8075_v58 }
0x1763   :  { %8623 = verf.f32 %v3191_v45  ;;  %v3183_v59 = vpop.f32.mrb[58].mxu0  ;;  %8078 = vmatprep.subr.bf16.mxu1 %v10231_v28  ;;  %v3299_v45 = vld [vmem:[%s11363_s30 + $0x38] sm:$0xff] }
0x1764   :  { %v3184_v36 = vadd.f32 %v3183_v59, %v10129_v34  ;;  %v7454_v31 = vpop.f32.mrb[59].mxu0  ;;  %v3737_v34 = vrot.slane %v10238_v32, %v8998_v30  ;;  %v8085_v59 = vpack.c.bf16 %v3371_v44, %v3370_v55 }
0x1765   :  { %v3372_v31 = vld [vmem:[%s11309_s6 + $0x230] sm:$0xff] }
0x1766   :  { %v3192_v21 = vmul.f32 0.70710677, %v3184_v36  ;;  %v3189_v13 = vmul.f32 0.5, %v3184_v36  ;;  %v3296_v36 = vld [vmem:[%s11363_s30 + $0x20] sm:$0xff] }
0x1767   :  { %v6784_v37 = vpop.f32.mrb[60].mxu0 }
0x1768   :  { %8625 = verf.f32 %v3192_v21  ;;  %v6785_v12 = vpop.f32.mrb[61].mxu0 }
0x1769   :  { %v10240_v35 = vadd.f32 %v6785_v12, %v6784_v37  ;;  %v3301_v12 = vld [vmem:[%s11363_s30 + $0x48] sm:$0xff] }
0x176b   :  { %v6787_v29 = vpop.f32.mrb[62].mxu0 }
0x176c   :  { %v6788_v43 = vpop.f32.mrb[63].mxu0 }
0x176d   :  { %v8624_v51 = vpop.eup %8623  ;;  %v10247_v16 = vadd.f32 %v6788_v43, %v6787_v29  ;;  %v3615_v29 = vld [vmem:[%s11320_s17] sm:$0xff]  ;;  %v3616_v43 = vld [vmem:[%s11320_s17 + $0x8] sm:$0xff] }
0x176e   :  { %v3197_v42 = vadd.f32 1.0, %v8624_v51  ;;  %v3617_v51 = vld [vmem:[%s11320_s17 + $0x10] sm:$0xff] }
0x176f   :  { %v3813_v57 = vpop.f32.mrb[64].mxu0 }
0x1770   :  { %v3814_v0 = vadd.f32 %v3813_v57, %v3737_v34  ;;  %v7525_v48 = vpop.f32.mrb[65].mxu0  ;;  %v3200_v19 = vmul.f32 %v3197_v42, %v3188_v52  ;;  %v3618_v52 = vld [vmem:[%s11320_s17 + $0x18] sm:$0xff]  ;;  %v3619_v57 = vld [vmem:[%s11320_s17 + $0x20] sm:$0xff] }
0x1771   :  { %v8103_v42 = vpack.c.bf16 %v3618_v52, %v3617_v51  ;;  %v6389_v51 = vld [vmem:[%s11320_s17 + $0x78] sm:$0xff] }
0x1772   :  { %v8626_v4 = vpop.eup %8625  ;;  %v4069_v38 = vsel %vm4068_vm4, %v3814_v0, 0.0  ;;  %v4072_v1 = vsel %vm4068_vm4, 0.0, %v3814_v0  ;;  %7491 = vmatmul.mubr.f32.gmra.mrb[86].mxu1 %v3200_v19  ;;  %v3829_v40 = vmul.f32 0.5, %v3814_v0  ;;  %v3620_v0 = vld [vmem:[%s11320_s17 + $0x28] sm:$0xff]  ;;  %v3621_v19 = vld [vmem:[%s11320_s17 + $0x30] sm:$0xff] }
0x1773   :  { %v3198_v5 = vadd.f32 1.0, %v8626_v4  ;;  %4071 = vst.msk [vmem:[#allocation5 - $0x1] sm:$0x2] %vm4070_vm5, %v4069_v38  ;;  %v3818_v33 = vpop.f32.mrb[66].mxu0  ;;  %7493 = vmatprep.mubr.msk.f32.mxu1 %vm8712_vm3, %v8713_v15  ;;  %v8107_v48 = vpack.c.bf16 %v3620_v0, %v3619_v57  ;;  %v3622_v4 = vld [vmem:[%s11320_s17 + $0x38] sm:$0xff]  ;;  %v3934_v57 = vrot.slane %v10238_v32, %v9385_v54  ;;  %v3944_v0 = vrot.slane %v10238_v32, %v9451_v22 }
0x1774   :  { %4074 = vst.msk [vmem:[#allocation5 + $0x1] sm:$0x1] %vm4073_vm7, %v4072_v1  ;;  %v3819_v9 = vadd.f32 %v3818_v33, %v3737_v34  ;;  %v7528_v10 = vpop.f32.mrb[67].mxu0  ;;  %v3835_v6 = vrot.slane %v3829_v40, 4  ;;  %v3377_v40 = vrot.slane %v10238_v32, %v8990_v27 }
0x1775   :  { %4076 = vst.msk [vmem:[#allocation5 - $0x1] sm:$0x8] %vm4075_vm9, %v4069_v38  ;;  %v3201_v18 = vmul.f32 %v3198_v5, %v3189_v13  ;;  %v8111_v38 = vpack.c.bf16 %v3622_v4, %v3621_v19 }
0x1776   :  { %4078 = vst.msk [vmem:[#allocation5 + $0x1] sm:$0x4] %vm4077_vm10, %v4072_v1  ;;  %v3830_v46 = vmul.f32 0.5, %v3819_v9  ;;  %v3456_v24 = vadd.f32 %v10247_v16, %v3377_v40 }
0x1777   :  { %7494 = vmatmul.mubr.f32.gmra.mrb[88].mxu1 %v3201_v18  ;;  %v3823_v62 = vpop.f32.mrb[68].mxu0  ;;  %v3451_v18 = vadd.f32 %v10240_v35, %v3377_v40 }
0x1778   :  { %v3836_v60 = vrot.slane %v3830_v46, 4  ;;  %v3824_v11 = vadd.f32 %v3823_v62, %v3737_v34  ;;  %v7531_v50 = vpop.f32.mrb[69].mxu0  ;;  %3523 = vmatprep.mubr.f32.mxu1 %v3295_v2  ;;  %v8099_v34 = vpack.c.bf16 %v3616_v43, %v3615_v29  ;;  %v6387_v29 = vld [vmem:[%s11320_s17 + $0x68] sm:$0xff] }
0x177a   :  { %v3831_v39 = vmul.f32 0.5, %v3824_v11  ;;  %v10284_v58 = vsel %vm535_vm8, %v3835_v6, %v3836_v60 }
0x177b   :  { %3524 = vmatmul.mubr.f32.vlgmr.msra.gmra.mrb[90].mxu1 %v3294_v63 }
0x177c   :  { %v3838_v14 = vrot.slane %v3831_v39, 4  ;;  %8080 = vmatpush3.bf16.msra.mxu1 %v10231_v28  ;;  %3528 = vmatprep.mubr.f32.mxu1 %v3300_v7  ;;  %v3373_v28 = vld [vmem:[%s11309_s6 + $0x238] sm:$0xff] }
0x177d   :  { %v10275_v26 = vld [vmem:[#allocation5] sm:$0xf]  ;;  %8082 = vmatprep.subr.bf16.mxu1 %v8081_v25  ;;  %v8089_v37 = vpack.c.bf16 %v3373_v28, %v3372_v31  ;;  %v6383_v31 = vld [vmem:[%s11320_s17 + $0x48] sm:$0xff] }
0x177e   :  { %v4080_v17 = vsel %vm3950_vm11, %v10275_v26, 0.0  ;;  %v3839_v21 = vsel %vm535_vm8, %v3836_v60, %v3838_v14 }
0x177f   :  { %4081 = vadd.xlane.f32.xlu0 %v4080_v17  ;;  %3529 = vmatmul.mubr.f32.gmra.mrb[92].mxu1 %v3299_v45 }
0x1780   :  { %8084 = vmatpush3.bf16.msra.mxu1 %v8081_v25  ;;  %7512 = vmatprep.mubr.msk.f32.mxu1 %vm112_vm0, %v3296_v36  ;;  %v6382_v36 = vld [vmem:[%s11320_s17 + $0x40] sm:$0xff] }
0x1781   :  { %8086 = vmatprep.subr.bf16.mxu1 %v8085_v59  ;;  %v8115_v28 = vpack.c.bf16 %v6383_v31, %v6382_v36 }
0x1783   :  { %8116 = vmatprep.subr.bf16.mxu0 %v8115_v28 }
0x1784   :  { %8088 = vmatpush3.bf16.msra.mxu1 %v8085_v59  ;;  %8118 = vmatpush3.bf16.msra.mxu0 %v8115_v28 }
0x1785   :  { %8090 = vmatprep.subr.bf16.mxu1 %v8089_v37 }
0x1788   :  { %8092 = vmatpush3.bf16.msra.mxu1 %v8089_v37 }
0x1789   :  { %8100 = vmatprep.subr.bf16.mxu1 %v8099_v34 }
0x178b   :  { %7513 = vmatmul.mubr.msk.f32.vlgmr.msra.gmra.mrb[94].mxu1 %vm112_vm0, %v3301_v12  ;;  %v6386_v12 = vld [vmem:[%s11320_s17 + $0x60] sm:$0xff] }
0x178c   :  { %8102 = vmatpush3.bf16.msra.mxu1 %v8099_v34  ;;  %v8123_v43 = vpack.c.bf16 %v6387_v29, %v6386_v12  ;;  %v6388_v34 = vld [vmem:[%s11320_s17 + $0x70] sm:$0xff] }
0x178d   :  { %8104 = vmatprep.subr.bf16.mxu1 %v8103_v42  ;;  %v8127_v52 = vpack.c.bf16 %v6389_v51, %v6388_v34 }
0x1790   :  { %8106 = vmatpush3.bf16.msra.mxu1 %v8103_v42  ;;  %v3849_v42 = vrot.slane %v10238_v32, %v9321_v56 }
0x1791   :  { %8108 = vmatprep.subr.bf16.mxu1 %v8107_v48 }
0x1794   :  { %8110 = vmatpush3.bf16.msra.mxu1 %v8107_v48  ;;  %v3955_v48 = vrot.slane %v10238_v32, %v9382_v53 }
0x1795   :  { %8112 = vmatprep.subr.bf16.mxu1 %v8111_v38 }
0x1798   :  { %8114 = vmatpush3.bf16.msra.mxu1 %v8111_v38  ;;  %v3939_v38 = vrot.slane %v10238_v32, %v9491_v47 }
0x1818   :  { %v10331_v1 = vpop.f32.mrb[84].mxu1 }
0x1819   :  { %v7489_v13 = vpop.f32.mrb[85].mxu1 }
0x1845   :  { %v10333_v5 = vpop.f32.mrb[86].mxu1 }
0x1846   :  { %v7492_v33 = vpop.f32.mrb[87].mxu1 }
0x184a   :  { %v10337_v9 = vpop.f32.mrb[88].mxu1 }
0x184b   :  { %v7495_v10 = vpop.f32.mrb[89].mxu1 }
0x184e   :  { %v6822_v2 = vpop.f32.mrb[90].mxu1 }
0x184f   :  { %v6823_v46 = vpop.f32.mrb[91].mxu1 }
0x1850   :  { %v6824_v61 = vadd.f32 %v6823_v46, %v6822_v2 }
0x1852   :  { %v6825_v62 = vpop.f32.mrb[92].mxu1  ;;  %v3526_v6 = vadd.f32 %v6824_v61, %v3451_v18 }
0x1853   :  { %v6826_v60 = vpop.f32.mrb[93].mxu1 }
0x1854   :  { %v6827_v11 = vadd.f32 %v6826_v60, %v6825_v62 }
0x1856   :  { %v3531_v50 = vadd.f32 %v6827_v11, %v3456_v24 }
0x185e   :  { %v7514_v63 = vpop.f32.mrb[94].mxu1 }
0x185f   :  { %v3606_v25 = vadd.f32 %v7514_v63, %v3531_v50  ;;  %v3600_v7 = vpop.f32.mrb[95].mxu1 }
0x1860   :  { %v3601_v39 = vadd.f32 %v3600_v7, %v3526_v6 }
0x1861   :  { %v3610_v55 = vmul.f32 0.999995, %v3606_v25 }
0x1862   :  { %v3609_v44 = vmul.f32 0.999995, %v3601_v39 }
0x1863   :  { %v3828_v17 = vmul.f32 0.5, %v3610_v55 }
0x1864   :  { %v3827_v14 = vmul.f32 0.5, %v3609_v44 }
0x1865   :  { %v10341_v45 = vadd.f32 %v3839_v21, %v3828_v17  ;;  %v6385_v21 = vld [vmem:[%s11320_s17 + $0x58] sm:$0xff]  ;;  %v4082_v17 = vpop.xlane.xlu0 %4081 }
0x1866   :  { %v10344_v35 = vadd.f32 %v10284_v58, %v3827_v14  ;;  %v6384_v58 = vld [vmem:[%s11320_s17 + $0x50] sm:$0xff]  ;;  %v4065_v14 = vrot.slane %v10238_v32, %v9494_v49 }
0x1867   :  { %v3845_v59 = vmul.f32 0.999995, %v10341_v45  ;;  %v8119_v37 = vpack.c.bf16 %v6385_v21, %v6384_v58  ;;  %v3612_v58 = vld [vmem:[%s11310_s7 + $0x8] sm:$0xff] }
0x1868   :  { %v3844_v16 = vmul.f32 0.999995, %v10344_v35 }
0x1869   :  { %8120 = vmatprep.subr.bf16.mxu0 %v8119_v37 }
0x186a   :  { %7548 = vmatprep.mubr.msk.f32.mxu1 %vm112_vm0, %v3844_v16  ;;  %8122 = vmatpush3.bf16.msra.mxu0 %v8119_v37  ;;  %v4084_v16 = vmul.f32 0.015625, %v4082_v17  ;;  %v3611_v37 = vld [vmem:[%s11310_s7] sm:$0xff] }
0x186b   :  { %7549 = vmatmul.mubr.msk.f32.vlgmr.msra.gmra.mrb[96].mxu1 %vm112_vm0, %v3845_v59  ;;  %8124 = vmatprep.subr.bf16.mxu0 %v8123_v43  ;;  %v6398_v17 = vld [vmem:[%s11320_s17 + $0xc0] sm:$0xff] }
0x186c   :  { %v4085_v12 = vsub.f32 %v10275_v26, %v4084_v16 }
0x186e   :  { %8126 = vmatpush3.bf16.msra.mxu0 %v8123_v43  ;;  %v4086_v34 = vmul.f32 %v4085_v12, %v4085_v12 }
0x186f   :  { %8128 = vmatprep.subr.bf16.mxu0 %v8127_v52 }
0x1870   :  { %v4087_v51 = vsel %vm3950_vm11, %v4086_v34, 0.0 }
0x1872   :  { %8130 = vmatpush3.bf16.msra.mxu0 %v8127_v52 }
0x1873   :  { %8147 = vmatprep.subr.bf16.mxu0 %v8711_v3 }
0x193e   :  { %v7550_v19 = vpop.f32.mrb[96].mxu1 }
0x193f   :  { %v3928_v4 = vadd.f32 %v7550_v19, %v3849_v42  ;;  %v3922_v13 = vpop.f32.mrb[97].mxu1 }
0x1940   :  { %v3923_v33 = vadd.f32 %v3922_v13, %v3849_v42 }
0x1941   :  { %v3963_v40 = vmul.f32 %v3934_v57, %v3928_v4  ;;  %v3965_v10 = vmul.f32 %v3944_v0, %v3928_v4  ;;  %v3971_v18 = vmul.f32 %v3955_v48, %v3928_v4 }
0x1942   :  { %v3935_v2 = vmul.f32 %v3934_v57, %v3923_v33  ;;  %v3945_v46 = vmul.f32 %v3944_v0, %v3923_v33  ;;  %v3956_v61 = vmul.f32 %v3955_v48, %v3923_v33 }
0x1943   :  { %v3964_v24 = vadd.f32 %v3963_v40, %v3939_v38  ;;  %v3967_v62 = vrot.slane %v3965_v10, 4  ;;  %v3973_v6 = vrot.slane %v3971_v18, 4  ;;  %v10426_v18 = vld [vmem:[%s11312_s9 + $0x8] sm:$0xff] }
0x1944   :  { %v3940_v60 = vadd.f32 %v3939_v38, %v3935_v2  ;;  %v3947_v11 = vrot.slane %v3945_v46, 4  ;;  %v3958_v50 = vrot.slane %v3956_v61, 4  ;;  %v4097_v2 = vrot.slane %v10426_v18, %v8990_v27 }
0x1945   :  { %v3969_v63 = vadd.f32 %v3967_v62, %v3964_v24  ;;  %v3975_v25 = vadd.f32 %v3973_v6, %v3964_v24  ;;  %v4102_v24 = vrot.slane %v10426_v18, %v8998_v30 }
0x1946   :  { %v3949_v7 = vadd.f32 %v3947_v11, %v3940_v60  ;;  %v3960_v39 = vadd.f32 %v3958_v50, %v3940_v60  ;;  %v6390_v60 = vld [vmem:[%s11320_s17 + $0x80] sm:$0xff]  ;;  %v6391_v11 = vld [vmem:[%s11320_s17 + $0x88] sm:$0xff] }
0x1947   :  { %3970 = vst.msk [vmem:[#allocation4 + $0x8] sm:$0xf] %vm3950_vm11, %v3969_v63  ;;  %v8131_v50 = vpack.c.bf16 %v6391_v11, %v6390_v60  ;;  %v6392_v63 = vld [vmem:[%s11320_s17 + $0x90] sm:$0xff]  ;;  %v6411_v11 = vld [vmem:[%s11320_s17 + $0x128] sm:$0xff] }
0x1948   :  { %3976 = vst.msk [vmem:[#allocation4 + $0x8] sm:$0xf0] %vm3961_vm12, %v3975_v25  ;;  %3962 = vst.msk [vmem:[#allocation4] sm:$0xf0] %vm3961_vm12, %v3960_v39  ;;  %v6393_v25 = vld [vmem:[%s11320_s17 + $0x98] sm:$0xff]  ;;  %v6394_v39 = vld [vmem:[%s11320_s17 + $0xa0] sm:$0xff] }
0x1949   :  { %3951 = vst.msk [vmem:[#allocation4] sm:$0xf] %vm3950_vm11, %v3949_v7  ;;  %8132 = vmatprep.subr.bf16.mxu1 %v8131_v50  ;;  %v8135_v7 = vpack.c.bf16 %v6393_v25, %v6392_v63  ;;  %v6412_v25 = vld [vmem:[%s11320_s17 + $0x130] sm:$0xff] }
0x194a   :  { %8134 = vmatpush3.bf16.msra.mxu1 %v8131_v50 }
0x194b   :  { %8136 = vmatprep.subr.bf16.mxu1 %v8135_v7 }
0x194e   :  { %8138 = vmatpush3.bf16.msra.mxu1 %v8135_v7  ;;  %v6413_v7 = vld [vmem:[%s11320_s17 + $0x138] sm:$0xff] }
0x194f   :  { %v3978_v44 = vld [vmem:[#allocation4 + $0x8] sm:$0xff] }
0x1950   :  { %v3977_v55 = vld [vmem:[#allocation4] sm:$0xff] }
0x1951   :  { %7567 = vmatprep.mubr.msk.f32.mxu0 %vm112_vm0, %v3977_v55  ;;  %v6395_v55 = vld [vmem:[%s11320_s17 + $0xa8] sm:$0xff] }
0x1952   :  { %7568 = vmatmul.mubr.msk.f32.vlgmr.msra.gmra.mrb[70].mxu0 %vm112_vm0, %v3978_v44  ;;  %v8139_v44 = vpack.c.bf16 %v6395_v55, %v6394_v39  ;;  %v8169_v39 = vpack.c.bf16 %v6413_v7, %v6412_v25 }
0x1953   :  { %7605 = vmatprep.mubr.msk.f32.mxu0 %vm8712_vm3, %v8713_v15 }
0x1954   :  { %8140 = vmatprep.subr.bf16.mxu1 %v8139_v44 }
0x1955   :  { %8142 = vmatpush3.bf16.msra.mxu1 %v8139_v44 }
0x1a25   :  { %v7569_v59 = vpop.f32.mrb[70].mxu0 }
0x1a26   :  { %v4061_v36 = vadd.f32 %v7569_v59, %v10341_v45  ;;  %v4051_v31 = vpop.f32.mrb[71].mxu0  ;;  %v6396_v59 = vld [vmem:[%s11320_s17 + $0xb0] sm:$0xff] }
0x1a27   :  { %v4060_v28 = vadd.f32 %v4051_v31, %v10344_v35  ;;  %v6400_v31 = vld [vmem:[%s11320_s17 + $0xd0] sm:$0xff] }
0x1a28   :  { %v10400_v21 = vadd.f32 %v4065_v14, %v4061_v36  ;;  %v6397_v36 = vld [vmem:[%s11320_s17 + $0xb8] sm:$0xff] }
0x1a29   :  { %v10406_v32 = vadd.f32 %v4065_v14, %v4060_v28  ;;  %v6399_v14 = vld [vmem:[%s11320_s17 + $0xc8] sm:$0xff]  ;;  %v8143_v28 = vpack.c.bf16 %v6397_v36, %v6396_v59 }
0x1a2a   :  { %v4105_v29 = vadd.f32 %v10400_v21, %v3612_v58  ;;  %v8148_v16 = vpack.c.bf16 %v6399_v14, %v6398_v17  ;;  %v6401_v58 = vld [vmem:[%s11320_s17 + $0xd8] sm:$0xff]  ;;  %v4145_v17 = vrot.slane %v10426_v18, %v9321_v56 }
0x1a2b   :  { %v4104_v45 = vadd.f32 %v10406_v32, %v3611_v37  ;;  %v8151_v37 = vpack.c.bf16 %v6401_v58, %v6400_v31  ;;  %8144 = vmatprep.subr.bf16.mxu1 %v8143_v28  ;;  %v4230_v31 = vrot.slane %v10426_v18, %v9382_v53 }
0x1a2c   :  { %v4109_v35 = vsel %vm112_vm0, %v4105_v29, 0.0  ;;  %8149 = vmatpush3.bf16.msra.mxu0 %v8148_v16  ;;  %8146 = vmatpush3.bf16.msra.mxu1 %v8143_v28 }
0x1a2d   :  { %4110 = vadd.xlane.f32.xlu0 %v4109_v35  ;;  %v4106_v43 = vsel %vm112_vm0, %v4104_v45, 0.0  ;;  %8150 = vmatprep.subr.bf16.mxu0 %v8711_v3  ;;  %v6404_v35 = vld [vmem:[%s11320_s17 + $0xf0] sm:$0xff] }
0x1a2e   :  { %4107 = vadd.xlane.f32.xlu1 %v4106_v43  ;;  %8159 = vmatprep.subr.bf16.mxu1 %v8711_v3  ;;  %v6405_v43 = vld [vmem:[%s11320_s17 + $0xf8] sm:$0xff] }
0x1a2f   :  { %v8157_v34 = vpack.c.bf16 %v6405_v43, %v6404_v35 }
0x1a30   :  { %8152 = vmatpush3.bf16.msra.mxu0 %v8151_v37 }
0x1a31   :  { %8153 = vmatprep.subr.bf16.mxu0 %v8711_v3 }
0x1a32   :  { %4088 = vadd.xlane.f32.xlu1 %v4087_v51 }
0x1aba   :  { %v4111_v52 = vpop.xlane.xlu0 %4110 }
0x1abb   :  { %v4113_v42 = vmul.f32 0.015625, %v4111_v52  ;;  %v4108_v57 = vpop.xlane.xlu1 %4107 }
0x1abc   :  { %v4112_v26 = vmul.f32 0.015625, %v4108_v57 }
0x1abd   :  { %v10413_v0 = vsub.f32 %v4105_v29, %v4113_v42  ;;  %v6403_v29 = vld [vmem:[%s11320_s17 + $0xe8] sm:$0xff] }
0x1abe   :  { %v10415_v48 = vsub.f32 %v4104_v45, %v4112_v26 }
0x1abf   :  { %v4089_v19 = vpop.xlane.xlu1 %4088  ;;  %v4117_v4 = vmul.f32 %v10413_v0, %v10413_v0 }
0x1ac0   :  { %v4090_v38 = vmul.f32 0.015625, %v4089_v19  ;;  %v4116_v13 = vmul.f32 %v10415_v48, %v10415_v48 }
0x1ac1   :  { %v4121_v33 = vsel %vm112_vm0, %v4117_v4, 0.0 }
0x1ac2   :  { %v4091_v40 = vadd.f32 1e-05, %v4090_v38  ;;  %4122 = vadd.xlane.f32.xlu1 %v4121_v33  ;;  %v4118_v10 = vsel %vm112_vm0, %v4116_v13, 0.0 }
0x1ac3   :  { %4119 = vadd.xlane.f32.xlu0 %v4118_v10  ;;  %v6406_v10 = vld [vmem:[%s11320_s17 + $0x100] sm:$0xff] }
0x1ac4   :  { %8627 = vrsqrt.f32 %v4091_v40 }
0x1ace   :  { %v8628_v46 = vpop.eup %8627 }
0x1acf   :  { %v4093_v61 = vmul.f32 %v8628_v46, %v4085_v12  ;;  %v6402_v12 = vld [vmem:[%s11320_s17 + $0xe0] sm:$0xff]  ;;  %v6407_v46 = vld [vmem:[%s11320_s17 + $0x108] sm:$0xff] }
0x1ad0   :  { %v8154_v45 = vpack.c.bf16 %v6403_v29, %v6402_v12  ;;  %v8160_v60 = vpack.c.bf16 %v6407_v46, %v6406_v10 }
0x1ad1   :  { %v4098_v62 = vmul.f32 %v4097_v2, %v4093_v61 }
0x1ad2   :  { %8155 = vmatpush3.bf16.msra.mxu0 %v8154_v45 }
0x1ad3   :  { %v4103_v6 = vadd.f32 %v4102_v24, %v4098_v62  ;;  %8156 = vmatprep.subr.bf16.mxu0 %v8711_v3 }
0x1ad5   :  { %4136 = vst.msk [vmem:[#allocation3] sm:$0xf] %vm3950_vm11, %v4103_v6 }
0x1ad6   :  { %8158 = vmatpush3.bf16.msra.mxu0 %v8157_v34 }
0x1b4f   :  { %v4123_v51 = vpop.xlane.xlu1 %4122 }
0x1b50   :  { %v4125_v52 = vmul.f32 0.015625, %v4123_v51  ;;  %v4120_v42 = vpop.xlane.xlu0 %4119 }
0x1b51   :  { %v4124_v57 = vmul.f32 0.015625, %v4120_v42  ;;  %v4323_v42 = vrot.slane %v10426_v18, %v9385_v54 }
0x1b52   :  { %v4127_v26 = vadd.f32 1e-05, %v4125_v52 }
0x1b53   :  { %v4126_v19 = vadd.f32 1e-05, %v4124_v57 }
0x1b54   :  { %8629 = vrsqrt.f32 %v4127_v26 }
0x1b55   :  { %8631 = vrsqrt.f32 %v4126_v19 }
0x1b5e   :  { %v8630_v4 = vpop.eup %8629 }
0x1b5f   :  { %v8632_v38 = vpop.eup %8631  ;;  %v4131_v13 = vmul.f32 %v8630_v4, %v10413_v0  ;;  %v6408_v0 = vld [vmem:[%s11320_s17 + $0x110] sm:$0xff] }
0x1b60   :  { %v4130_v33 = vmul.f32 %v8632_v38, %v10415_v48  ;;  %v6409_v48 = vld [vmem:[%s11320_s17 + $0x118] sm:$0xff] }
0x1b61   :  { %v4133_v40 = vmul.f32 %v4131_v13, %v4097_v2 }
0x1b62   :  { %v4132_v61 = vmul.f32 %v4130_v33, %v4097_v2  ;;  %v8163_v2 = vpack.c.bf16 %v6409_v48, %v6408_v0 }
0x1b63   :  { %v4135_v62 = vadd.f32 %v4133_v40, %v4102_v24 }
0x1b64   :  { %v4134_v6 = vadd.f32 %v4132_v61, %v4102_v24  ;;  %v6410_v24 = vld [vmem:[%s11320_s17 + $0x120] sm:$0xff]  ;;  %v78_v61 = vld [vmem:[%s11366_s4 + $0x8] sm:$0xff] }
0x1b65   :  { %4138 = vst.msk [vmem:[#allocation3 + $0xc] sm:$0xff] %vm112_vm0, %v4135_v62  ;;  %v8166_v50 = vpack.c.bf16 %v6411_v11, %v6410_v24 }
0x1b66   :  { %4137 = vst.msk [vmem:[#allocation3 + $0x4] sm:$0xff] %vm112_vm0, %v4134_v6  ;;  %7586 = vmatprep.mubr.msk.f32.mxu1 %vm112_vm0, %v4134_v6 }
0x1b67   :  { %7587 = vmatmul.mubr.msk.f32.vlgmr.msra.gmra.mrb[98].mxu1 %vm112_vm0, %v4135_v62 }
0x1b68   :  { %8161 = vmatpush3.bf16.msra.mxu1 %v8160_v60  ;;  %7630 = vmatprep.mubr.msk.f32.mxu1 %vm8712_vm3, %v8713_v15  ;;  %v77_v60 = vld [vmem:[%s11366_s4] sm:$0xff] }
0x1b69   :  { %8162 = vmatprep.subr.bf16.mxu1 %v8711_v3 }
0x1b6c   :  { %8164 = vmatpush3.bf16.msra.mxu1 %v8163_v2  ;;  %v4141_v44 = vld [vmem:[#allocation3 + $0x10] sm:$0xf] }
0x1b6d   :  { %v4139_v63 = vld [vmem:[#allocation3] sm:$0xff]  ;;  %8165 = vmatprep.subr.bf16.mxu1 %v8711_v3  ;;  %v4140_v55 = vld [vmem:[#allocation3 + $0x8] sm:$0xff] }
0x1b6e   :  { %7606 = vmatmul.mubr.msk.f32.vlgmr.msra.gmra.mrb[72].mxu0 %vm112_vm0, %v4139_v63 }
0x1b6f   :  { %7608 = vmatprep.mubr.msk.f32.mxu0 %vm8712_vm3, %v8713_v15 }
0x1b70   :  { %8167 = vmatpush3.bf16.msra.mxu1 %v8166_v50 }
0x1b71   :  { %8168 = vmatprep.subr.bf16.mxu1 %v8711_v3 }
0x1b72   :  { %7609 = vmatmul.mubr.msk.f32.gmra.mrb[74].mxu0 %vm112_vm0, %v4140_v55 }
0x1b73   :  { %7611 = vmatprep.mubr.msk.f32.mxu0 %vm8712_vm3, %v8713_v15 }
0x1b74   :  { %8170 = vmatpush3.bf16.msra.mxu1 %v8169_v39 }
0x1b76   :  { %7612 = vmatmul.mubr.msk.f32.gmra.mrb[76].mxu0 %vm112_vm0, %v4141_v44 }
0x1b77   :  { %7631 = vmatmul.mubr.msk.f32.vlgmr.msra.gmra.mrb[100].mxu1 %vm112_vm0, %v4139_v63 }
0x1b78   :  { %7633 = vmatprep.mubr.msk.f32.mxu1 %vm8712_vm3, %v8713_v15 }
0x1b7b   :  { %7634 = vmatmul.mubr.msk.f32.gmra.mrb[102].mxu1 %vm112_vm0, %v4140_v55 }
0x1b7c   :  { %7636 = vmatprep.mubr.msk.f32.mxu1 %vm8712_vm3, %v8713_v15 }
0x1b7f   :  { %7637 = vmatmul.mubr.msk.f32.gmra.mrb[104].mxu1 %vm112_vm0, %v4141_v44 }
0x1c3a   :  { %v7588_v14 = vpop.f32.mrb[98].mxu1 }
0x1c3b   :  { %v4218_v16 = vpop.f32.mrb[99].mxu1  ;;  %v4224_v10 = vadd.f32 %v7588_v14, %v4145_v17  ;;  %v3282_v14 = vadd.f32 %v10331_v1, %v9862_v8 }
0x1c3c   :  { %v4219_v59 = vadd.f32 %v4218_v16, %v4145_v17  ;;  %v3283_v17 = vadd.f32 %v10333_v5, %v9867_v20  ;;  %v10571_v16 = vld [vmem:[%s11311_s8 + $0x8] sm:$0xff]  ;;  %v3284_v20 = vadd.f32 %v10337_v9, %v9872_v23 }
0x1c3e   :  { %7645 = vmatprep.mubr.msk.f32.mxu0 %vm112_vm0, %v4219_v59  ;;  %v3288_v59 = vrot.slane %v10571_v16, %v9382_v53 }
0x1c40   :  { %v3291_v5 = vadd.f32 %v3288_v59, %v3284_v20  ;;  %v3676_v20 = vld [vmem:[%s11321_s18 + $0x20] sm:$0xff] }
0x1c41   :  { %v4306_v36 = vpop.f32.mrb[72].mxu0 }
0x1c42   :  { %v7607_v28 = vpop.f32.mrb[73].mxu0  ;;  %v4307_v37 = vadd.f32 %v4306_v36, %v4230_v31 }
0x1c43   :  { %v3290_v28 = vadd.f32 %v3288_v59, %v3283_v17  ;;  %v3675_v17 = vld [vmem:[%s11321_s18 + $0x18] sm:$0xff] }
0x1c45   :  { %v4311_v58 = vpop.f32.mrb[74].mxu0  ;;  %v5012_v1 = vsel %vm230_vm1, %v3290_v28, 0.0 }
0x1c46   :  { %v4312_v12 = vadd.f32 %v4311_v58, %v4230_v31  ;;  %v7610_v29 = vpop.f32.mrb[75].mxu0 }
0x1c47   :  { %v5015_v29 = vsel %vm237_vm2, %v3291_v5, 0.0 }
0x1c48   :  { %v8171_v35 = vpack.c.bf16 %v4312_v12, %v4307_v37  ;;  %v3289_v37 = vadd.f32 %v3288_v59, %v3282_v14  ;;  %v3672_v14 = vld [vmem:[%s11321_s18] sm:$0xff] }
0x1c49   :  { %v4316_v43 = vpop.f32.mrb[76].mxu0 }
0x1c4a   :  { %v4317_v34 = vadd.f32 %v4316_v43, %v4230_v31  ;;  %v4390_v51 = vpop.f32.mrb[100].mxu1  ;;  %v7613_v52 = vpop.f32.mrb[77].mxu0  ;;  %8173 = vmatprep.subr.msk.bf16.mxu0 %vm10541_vm13, %v8171_v35  ;;  %v5009_v12 = vsel %vm230_vm1, %v3289_v37, 0.0 }
0x1c4b   :  { %v7632_v57 = vpop.f32.mrb[101].mxu1  ;;  %8176 = vmatpush3.bf16.xpose.msk.msra.mxu0 %vm10541_vm13, %v8171_v35  ;;  %v4391_v19 = vadd.f32 %v4390_v51, %v4323_v42 }
0x1c4c   :  { %7643 = vmatprep.subr.msk.mxu0 %vm112_vm0, %v4317_v34 }
0x1c4e   :  { %v4395_v26 = vpop.f32.mrb[102].mxu1 }
0x1c4f   :  { %v4396_v4 = vadd.f32 %v4395_v26, %v4323_v42  ;;  %v7635_v38 = vpop.f32.mrb[103].mxu1 }
0x1c51   :  { %v8177_v13 = vpack.c.bf16 %v4396_v4, %v4391_v19 }
0x1c52   :  { %v4400_v33 = vpop.f32.mrb[104].mxu1 }
0x1c53   :  { %v7638_v40 = vpop.f32.mrb[105].mxu1  ;;  %7644 = vmatpush3.xpose.msk.msra.mxu0 %vm112_vm0, %v4317_v34  ;;  %v4401_v46 = vadd.f32 %v4400_v33, %v4323_v42 }
0x1c54   :  { %8178 = vmatprep.subr.bf16.mxu0 %v8177_v13 }
0x1c56   :  { %7646 = vmatmul.mubr.msk.f32.vlgmr.msra.gmra.mrb[78].mxu0 %vm112_vm0, %v4224_v10 }
0x1c57   :  { %8180 = vmatpush3.bf16.msra.mxu0 %v8177_v13 }
0x1c58   :  { %7652 = vmatprep.subr.msk.mxu0 %vm535_vm8, %v4401_v46 }
0x1c5b   :  { %7653 = vmatpush3.msk.msra.mxu0 %vm535_vm8, %v4401_v46 }
0x1d29   :  { %v7647_v62 = vpop.f32.mrb[78].mxu0 }
0x1d2a   :  { %v4495_v6 = vmul.f32 0.125, %v7647_v62  ;;  %v4485_v0 = vpop.f32.mrb[79].mxu0 }
0x1d2b   :  { %v4494_v48 = vmul.f32 0.125, %v4485_v0  ;;  %v6415_v0 = vld [vmem:[%s11320_s17 + $0x148] sm:$0xff] }
0x1d2c   :  { %v4497_v2 = vadd.f32 %v4495_v6, %v78_v61 }
0x1d2d   :  { %v4496_v24 = vadd.f32 %v4494_v48, %v77_v60  ;;  %v6414_v60 = vld [vmem:[%s11320_s17 + $0x140] sm:$0xff]  ;;  %v6416_v48 = vld [vmem:[%s11320_s17 + $0x150] sm:$0xff] }
0x1d2e   :  { %v4501_v11 = vsel %vm483_vm6, %v4497_v2, -inf }
0x1d2f   :  { %4502 = vmax.xlane.f32.xlu1 %v4501_v11  ;;  %v4498_v50 = vsel %vm483_vm6, %v4496_v24, -inf }
0x1d30   :  { %4499 = vmax.xlane.f32.xlu0 %v4498_v50  ;;  %v6418_v50 = vld [vmem:[%s11320_s17 + $0x160] sm:$0xff] }
0x1dbc   :  { %v4503_v63 = vpop.xlane.xlu1 %4502 }
0x1dbd   :  { %v4505_v25 = vsub.f32 %v4497_v2, %v4503_v63  ;;  %v4500_v7 = vpop.xlane.xlu0 %4499  ;;  %v8181_v2 = vpack.c.bf16 %v6415_v0, %v6414_v60  ;;  %v6419_v63 = vld [vmem:[%s11320_s17 + $0x168] sm:$0xff] }
0x1dbe   :  { %v4504_v39 = vsub.f32 %v4496_v24, %v4500_v7  ;;  %v6417_v24 = vld [vmem:[%s11320_s17 + $0x158] sm:$0xff]  ;;  %v6420_v7 = vld [vmem:[%s11320_s17 + $0x170] sm:$0xff] }
0x1dbf   :  { %v4508_v55 = vmul.f32 1.442695, %v4505_v25  ;;  %v8185_v11 = vpack.c.bf16 %v6417_v24, %v6416_v48  ;;  %8182 = vmatprep.subr.bf16.mxu1 %v8181_v2  ;;  %v8189_v25 = vpack.c.bf16 %v6419_v63, %v6418_v50  ;;  %v3690_v48 = vld [vmem:[%s11322_s19 + $0x10] sm:$0xff]  ;;  %v3708_v24 = vld [vmem:[%s11322_s19 + $0xa0] sm:$0xff] }
0x1dc0   :  { %v4506_v44 = vmul.f32 1.442695, %v4504_v39  ;;  %8184 = vmatpush3.bf16.msra.mxu1 %v8181_v2  ;;  %v6421_v39 = vld [vmem:[%s11320_s17 + $0x178] sm:$0xff] }
0x1dc1   :  { %8633 = vpow2.f32 %v4508_v55  ;;  %8186 = vmatprep.subr.bf16.mxu1 %v8185_v11  ;;  %v8193_v55 = vpack.c.bf16 %v6421_v39, %v6420_v7  ;;  %v3691_v2 = vld [vmem:[%s11322_s19 + $0x18] sm:$0xff]  ;;  %v3693_v7 = vld [vmem:[%s11322_s19 + $0x28] sm:$0xff] }
0x1dc2   :  { %8635 = vpow2.f32 %v4506_v44  ;;  %v3673_v44 = vld [vmem:[%s11321_s18 + $0x8] sm:$0xff]  ;;  %v8219_v50 = vpack.c.bf16 %v3691_v2, %v3690_v48  ;;  %v3695_v48 = vld [vmem:[%s11322_s19 + $0x38] sm:$0xff] }
0x1dc3   :  { %v8197_v59 = vpack.c.bf16 %v3675_v17, %v3673_v44 }
0x1dc4   :  { %8188 = vmatpush3.bf16.msra.mxu1 %v8185_v11  ;;  %v3709_v11 = vld [vmem:[%s11322_s19 + $0xa8] sm:$0xff] }
0x1dc5   :  { %8190 = vmatprep.subr.bf16.mxu1 %v8189_v25  ;;  %8198 = vmatprep.subr.bf16.mxu0 %v8197_v59  ;;  %v8221_v63 = vpack.c.bf16 %v3709_v11, %v3708_v24  ;;  %v3712_v24 = vld [vmem:[%s11322_s19 + $0xc0] sm:$0xff]  ;;  %v3713_v11 = vld [vmem:[%s11322_s19 + $0xc8] sm:$0xff] }
0x1dc8   :  { %8192 = vmatpush3.bf16.msra.mxu1 %v8189_v25  ;;  %v3692_v25 = vld [vmem:[%s11322_s19 + $0x20] sm:$0xff] }
0x1dc9   :  { %8194 = vmatprep.subr.bf16.mxu1 %v8193_v55  ;;  %v8223_v39 = vpack.c.bf16 %v3693_v7, %v3692_v25  ;;  %v3697_v25 = vld [vmem:[%s11322_s19 + $0x48] sm:$0xff] }
0x1dcb   :  { %v8634_v36 = vpop.eup %8633 }
0x1dcc   :  { %v8636_v31 = vpop.eup %8635  ;;  %v4513_v58 = vsel %vm483_vm6, %v8634_v36, 0.0  ;;  %8196 = vmatpush3.bf16.msra.mxu1 %v8193_v55 }
0x1dcd   :  { %4514 = vadd.xlane.f32.xlu1 %v4513_v58  ;;  %v4510_v8 = vsel %vm483_vm6, %v8636_v31, 0.0 }
0x1dce   :  { %4511 = vadd.xlane.f32.xlu0 %v4510_v8  ;;  %v3678_v8 = vld [vmem:[%s11321_s18 + $0x30] sm:$0xff] }
0x1dd1   :  { %5013 = vadd.xlane.f32.xlu1 %v5012_v1  ;;  %v8203_v1 = vpack.c.bf16 %v3678_v8, %v3676_v20  ;;  %v4690_v20 = vrot.slane %v10426_v18, %v9451_v22 }
0x1dd2   :  { %5010 = vadd.xlane.f32.xlu0 %v5009_v12 }
0x1dd6   :  { %5016 = vadd.xlane.f32.xlu0 %v5015_v29  ;;  %v3681_v29 = vld [vmem:[%s11321_s18 + $0x48] sm:$0xff] }
0x1e5a   :  { %v4515_v35 = vpop.xlane.xlu1 %4514 }
0x1e5b   :  { %8637 = vrcp.f32 %v4515_v35  ;;  %v4512_v43 = vpop.xlane.xlu0 %4511  ;;  %v3683_v35 = vld [vmem:[%s11321_s18 + $0x58] sm:$0xff] }
0x1e5c   :  { %8639 = vrcp.f32 %v4512_v43  ;;  %v8205_v43 = vpack.c.bf16 %v3683_v35, %v3681_v29  ;;  %v6498_v29 = vld [vmem:[%s11319_s16 + $0x28] sm:$0xff] }
0x1e5e   :  { %v5014_v34 = vpop.xlane.xlu1 %5013 }
0x1e5f   :  { %v5019_v23 = vmul.f32 0.03125, %v5014_v34  ;;  %v5011_v9 = vpop.xlane.xlu0 %5010  ;;  %v3680_v34 = vld [vmem:[%s11321_s18 + $0x40] sm:$0xff] }
0x1e60   :  { %v5018_v51 = vmul.f32 0.03125, %v5011_v9 }
0x1e61   :  { %v10582_v52 = vsub.f32 %v3290_v28, %v5019_v23  ;;  %v3679_v28 = vld [vmem:[%s11321_s18 + $0x38] sm:$0xff]  ;;  %v3682_v23 = vld [vmem:[%s11321_s18 + $0x50] sm:$0xff] }
0x1e62   :  { %v10584_v42 = vsub.f32 %v3289_v37, %v5018_v51  ;;  %v8207_v9 = vpack.c.bf16 %v3682_v23, %v3680_v34  ;;  %v3685_v51 = vld [vmem:[%s11321_s18 + $0x68] sm:$0xff]  ;;  %v5051_v23 = vrot.slane %v10571_v16, %v9491_v47 }
0x1e63   :  { %v5017_v57 = vpop.xlane.xlu0 %5016  ;;  %v5025_v26 = vmul.f32 %v10582_v52, %v10582_v52 }
0x1e64   :  { %v5020_v19 = vmul.f32 0.03125, %v5017_v57  ;;  %v5024_v4 = vmul.f32 %v10584_v42, %v10584_v42  ;;  %v3687_v57 = vld [vmem:[%s11321_s18 + $0x78] sm:$0xff] }
0x1e65   :  { %v8638_v38 = vpop.eup %8637  ;;  %v5030_v13 = vsel %vm230_vm1, %v5025_v26, 0.0  ;;  %v8209_v26 = vpack.c.bf16 %v3687_v57, %v3685_v51  ;;  %v6499_v51 = vld [vmem:[%s11319_s16 + $0x30] sm:$0xff]  ;;  %v6500_v57 = vld [vmem:[%s11319_s16 + $0x38] sm:$0xff] }
0x1e66   :  { %v8640_v33 = vpop.eup %8639  ;;  %v10591_v40 = vsub.f32 %v3291_v5, %v5020_v19  ;;  %5031 = vadd.xlane.f32.xlu0 %v5030_v13  ;;  %v5027_v10 = vsel %vm230_vm1, %v5024_v4, 0.0  ;;  %v4519_v61 = vmul.f32 %v8638_v38, %v8634_v36  ;;  %v3674_v36 = vld [vmem:[%s11321_s18 + $0x10] sm:$0xff]  ;;  %v3684_v19 = vld [vmem:[%s11321_s18 + $0x60] sm:$0xff] }
0x1e67   :  { %5028 = vadd.xlane.f32.xlu1 %v5027_v10  ;;  %v4518_v46 = vmul.f32 %v8640_v33, %v8636_v31  ;;  %v3677_v31 = vld [vmem:[%s11321_s18 + $0x28] sm:$0xff]  ;;  %v8199_v58 = vpack.c.bf16 %v3674_v36, %v3672_v14  ;;  %v3686_v4 = vld [vmem:[%s11321_s18 + $0x70] sm:$0xff]  ;;  %v3704_v13 = vld [vmem:[%s11322_s19 + $0x80] sm:$0xff] }
0x1e68   :  { %v5026_v62 = vmul.f32 %v10591_v40, %v10591_v40  ;;  %v8201_v37 = vpack.c.bf16 %v3679_v28, %v3677_v31  ;;  %v8211_v38 = vpack.c.bf16 %v3686_v4, %v3684_v19  ;;  %v3705_v33 = vld [vmem:[%s11322_s19 + $0x88] sm:$0xff]  ;;  %v3688_v10 = vld [vmem:[%s11322_s19] sm:$0xff]  ;;  %v8249_v19 = vpack.c.bf16 %v6500_v57, %v6499_v51 }
0x1e69   :  { %7654 = vmatprep.mubr.msk.f32.mxu0 %vm483_vm6, %v4518_v46  ;;  %v8213_v46 = vpack.c.bf16 %v3705_v33, %v3704_v13 }
0x1e6a   :  { %7655 = vmatmul.mubr.msk.f32.vlgmr.msra.gmra.mrb[80].mxu0 %vm483_vm6, %v4519_v61  ;;  %v5033_v6 = vsel %vm237_vm2, %v5026_v62, 0.0  ;;  %v3689_v61 = vld [vmem:[%s11322_s19 + $0x8] sm:$0xff]  ;;  %v3706_v62 = vld [vmem:[%s11322_s19 + $0x90] sm:$0xff] }
0x1e6b   :  { %5034 = vadd.xlane.f32.xlu1 %v5033_v6  ;;  %4784 = vmatprep.mubr.f32.mxu0 %v8713_v15  ;;  %v3707_v6 = vld [vmem:[%s11322_s19 + $0x98] sm:$0xff]  ;;  %v8215_v60 = vpack.c.bf16 %v3689_v61, %v3688_v10 }
0x1e6c   :  { %8200 = vmatpush1.bf16.msra.mxu0 %v8199_v58  ;;  %v8217_v0 = vpack.c.bf16 %v3707_v6, %v3706_v62  ;;  %8214 = vmatprep.subr.bf16.mxu1 %v8213_v46  ;;  %v3710_v6 = vld [vmem:[%s11322_s19 + $0xb0] sm:$0xff] }
0x1e6d   :  { %8202 = vmatprep.subr.bf16.mxu0 %v8201_v37 }
0x1e70   :  { %8204 = vmatpush1.bf16.msra.mxu0 %v8203_v1 }
0x1e71   :  { %8206 = vmatprep.subr.bf16.mxu0 %v8205_v43 }
0x1e74   :  { %8208 = vmatpush1.bf16.msra.mxu0 %v8207_v9 }
0x1e75   :  { %8210 = vmatprep.subr.bf16.mxu0 %v8209_v26 }
0x1e78   :  { %8212 = vmatpush1.bf16.msra.mxu0 %v8211_v38 }
0x1e79   :  { %8245 = vmatprep.subr.bf16.mxu0 %v8711_v3 }
0x1ef3   :  { %v5032_v17 = vpop.xlane.xlu0 %5031 }
0x1ef4   :  { %v5029_v55 = vpop.xlane.xlu1 %5028  ;;  %v5037_v14 = vmul.f32 0.03125, %v5032_v17  ;;  %v3698_v17 = vld [vmem:[%s11322_s19 + $0x50] sm:$0xff] }
0x1ef5   :  { %v5036_v44 = vmul.f32 0.03125, %v5029_v55  ;;  %v3715_v55 = vld [vmem:[%s11322_s19 + $0xd8] sm:$0xff] }
0x1ef6   :  { %v5040_v31 = vadd.f32 1e-05, %v5037_v14  ;;  %v3699_v14 = vld [vmem:[%s11322_s19 + $0x58] sm:$0xff] }
0x1ef7   :  { %v5039_v59 = vadd.f32 1e-05, %v5036_v44 }
0x1ef8   :  { %v5035_v36 = vpop.xlane.xlu1 %5034 }
0x1ef9   :  { %8641 = vrsqrt.f32 %v5039_v59  ;;  %v5038_v28 = vmul.f32 0.03125, %v5035_v36  ;;  %v8235_v59 = vpack.c.bf16 %v3699_v14, %v3698_v17  ;;  %v3716_v36 = vld [vmem:[%s11322_s19 + $0xe0] sm:$0xff] }
0x1efa   :  { %8643 = vrsqrt.f32 %v5040_v31  ;;  %v3717_v31 = vld [vmem:[%s11322_s19 + $0xe8] sm:$0xff] }
0x1efb   :  { %v5041_v58 = vadd.f32 1e-05, %v5038_v28  ;;  %v8237_v28 = vpack.c.bf16 %v3717_v31, %v3716_v36 }
0x1efd   :  { %8645 = vrsqrt.f32 %v5041_v58  ;;  %v3700_v58 = vld [vmem:[%s11322_s19 + $0x60] sm:$0xff] }
0x1f03   :  { %v8642_v35 = vpop.eup %8641 }
0x1f04   :  { %v5045_v9 = vmul.f32 %v8642_v35, %v10584_v42  ;;  %v8644_v26 = vpop.eup %8643  ;;  %v5058_v42 = vrot.slane %v10571_v16, %v9494_v49 }
0x1f05   :  { %v5046_v13 = vmul.f32 %v8644_v26, %v10582_v52 }
0x1f06   :  { %v5052_v4 = vmul.f32 %v5051_v23, %v5045_v9 }
0x1f07   :  { %v8646_v33 = vpop.eup %8645  ;;  %v5053_v46 = vmul.f32 %v5051_v23, %v5046_v13 }
0x1f08   :  { %v5059_v10 = vadd.f32 %v5058_v42, %v5052_v4  ;;  %v5047_v61 = vmul.f32 %v8646_v33, %v10591_v40  ;;  %v3711_v40 = vld [vmem:[%s11322_s19 + $0xb8] sm:$0xff] }
0x1f09   :  { %v5060_v16 = vadd.f32 %v5058_v42, %v5053_v46  ;;  %v5065_v46 = vrot.slane %v10426_v18, %v9494_v49 }
0x1f0a   :  { %v5054_v62 = vmul.f32 %v5051_v23, %v5047_v61 }
0x1f0c   :  { %v5061_v52 = vadd.f32 %v5058_v42, %v5054_v62 }
0x1f3d   :  { %v7656_v5 = vpop.f32.mrb[80].mxu0 }
0x1f3e   :  { %v4595_v12 = vpop.f32.mrb[81].mxu0 }
0x1f3f   :  { %7673 = vmatprep.mubr.msk.f32.mxu1 %vm112_vm0, %v4595_v12  ;;  %v6497_v12 = vld [vmem:[%s11319_s16 + $0x20] sm:$0xff] }
0x1f40   :  { %7674 = vmatmul.mubr.msk.f32.vlgmr.msra.gmra.mrb[106].mxu1 %vm112_vm0, %v7656_v5  ;;  %v8246_v34 = vpack.c.bf16 %v6498_v29, %v6497_v12  ;;  %v3702_v12 = vld [vmem:[%s11322_s19 + $0x70] sm:$0xff]  ;;  %v3703_v29 = vld [vmem:[%s11322_s19 + $0x78] sm:$0xff] }
0x1f41   :  { %8216 = vmatpush3.bf16.msra.mxu1 %v8215_v60  ;;  %v8225_v60 = vpack.c.bf16 %v3711_v40, %v3710_v6  ;;  %v8243_v35 = vpack.c.bf16 %v3703_v29, %v3702_v12 }
0x1f42   :  { %8218 = vmatprep.subr.bf16.mxu1 %v8217_v0  ;;  %v3694_v0 = vld [vmem:[%s11322_s19 + $0x30] sm:$0xff] }
0x1f43   :  { %v8227_v2 = vpack.c.bf16 %v3695_v48, %v3694_v0 }
0x1f45   :  { %8220 = vmatpush3.bf16.msra.mxu1 %v8219_v50  ;;  %v8229_v50 = vpack.c.bf16 %v3713_v11, %v3712_v24 }
0x1f46   :  { %8222 = vmatprep.subr.bf16.mxu1 %v8221_v63  ;;  %v3696_v63 = vld [vmem:[%s11322_s19 + $0x40] sm:$0xff] }
0x1f47   :  { %v8231_v7 = vpack.c.bf16 %v3697_v25, %v3696_v63 }
0x1f49   :  { %8224 = vmatpush3.bf16.msra.mxu1 %v8223_v39  ;;  %v3714_v39 = vld [vmem:[%s11322_s19 + $0xd0] sm:$0xff] }
0x1f4a   :  { %8226 = vmatprep.subr.bf16.mxu1 %v8225_v60  ;;  %v8233_v44 = vpack.c.bf16 %v3715_v55, %v3714_v39 }
0x1f4d   :  { %8228 = vmatpush3.bf16.msra.mxu1 %v8227_v2 }
0x1f4e   :  { %8230 = vmatprep.subr.bf16.mxu1 %v8229_v50 }
0x1f51   :  { %8232 = vmatpush3.bf16.msra.mxu1 %v8231_v7 }
0x1f52   :  { %8234 = vmatprep.subr.bf16.mxu1 %v8233_v44 }
0x1f55   :  { %8236 = vmatpush3.bf16.msra.mxu1 %v8235_v59 }
0x1f56   :  { %8238 = vmatprep.subr.bf16.mxu1 %v8237_v28 }
0x2013   :  { %v7675_v37 = vpop.f32.mrb[106].mxu1 }
0x2014   :  { %v4676_v8 = vpop.f32.mrb[107].mxu1  ;;  %v4686_v1 = vadd.f32 %v7675_v37, %v10400_v21  ;;  %v3701_v37 = vld [vmem:[%s11322_s19 + $0x68] sm:$0xff] }
0x2015   :  { %v4685_v5 = vadd.f32 %v4676_v8, %v10406_v32  ;;  %v3718_v8 = vld [vmem:[%s11322_s19 + $0xf0] sm:$0xff] }
0x2016   :  { %v10726_v21 = vadd.f32 %v4690_v20, %v4686_v1  ;;  %v3719_v1 = vld [vmem:[%s11322_s19 + $0xf8] sm:$0xff] }
0x2017   :  { %v10721_v43 = vadd.f32 %v4690_v20, %v4685_v5  ;;  %v8239_v20 = vpack.c.bf16 %v3701_v37, %v3700_v58  ;;  %v8241_v5 = vpack.c.bf16 %v3719_v1, %v3718_v8 }
0x2018   :  { %v4694_v38 = vmul.f32 0.999995, %v10726_v21 }
0x2019   :  { %v4693_v32 = vmul.f32 0.999995, %v10721_v43  ;;  %8240 = vmatpush3.bf16.msra.mxu1 %v8239_v20 }
0x201a   :  { %8242 = vmatprep.subr.bf16.mxu1 %v8241_v5 }
0x201b   :  { %6447 = vmatmul.mubr.msk.f32.vlgmr.msra.gmra.mrb[82].mxu0 %vm112_vm0, %v4693_v32 }
0x201c   :  { %8247 = vmatpush3.bf16.msra.mxu0 %v8246_v34  ;;  %4790 = vmatprep.mubr.f32.mxu0 %v8713_v15  ;;  %v10816_v34 = vld [vmem:[%s11314_s11] sm:$0xf] }
0x201d   :  { %8248 = vmatprep.subr.bf16.mxu0 %v8711_v3  ;;  %8244 = vmatpush3.bf16.msra.mxu1 %v8243_v35  ;;  %v4699_v23 = vrot.slane %v10816_v34, %v8990_v27  ;;  %v4703_v9 = vrot.slane %v10816_v34, %v9321_v56 }
0x201f   :  { %6448 = vmatmul.mubr.msk.f32.gmra.mrb[84].mxu0 %vm112_vm0, %v4694_v38  ;;  %v4709_v32 = vrot.slane %v4699_v23, %v8990_v27  ;;  %v4713_v51 = vrot.slane %v4703_v9, %v8990_v27 }
0x2020   :  { %8250 = vmatpush3.bf16.msra.mxu0 %v8249_v19  ;;  %7684 = vmatprep.mubr.msk.f32.mxu0 %vm8712_vm3, %v8713_v15 }
0x2023   :  { %7685 = vmatmul.mubr.msk.f32.vlgmr.msra.gmra.mrb[86].mxu0 %vm230_vm1, %v5059_v10 }
0x2024   :  { %7687 = vmatprep.mubr.msk.f32.mxu0 %vm8712_vm3, %v8713_v15 }
0x2027   :  { %7688 = vmatmul.mubr.msk.f32.gmra.mrb[88].mxu0 %vm230_vm1, %v5060_v16 }
0x2028   :  { %7690 = vmatprep.mubr.msk.f32.mxu0 %vm8712_vm3, %v8713_v15 }
0x202b   :  { %7691 = vmatmul.mubr.msk.f32.gmra.mrb[90].mxu0 %vm230_vm1, %v5061_v52 }
0x20ee   :  { %v4786_v57 = vpop.f32.mrb[82].mxu0 }
0x20ef   :  { %v4787_v26 = vadd.f32 %v4786_v57, %v4709_v32  ;;  %v4788_v19 = vpop.f32.mrb[83].mxu0 }
0x20f0   :  { %v4789_v42 = vadd.f32 %v4788_v19, %v4713_v51  ;;  %v6450_v19 = vld [vmem:[%s11320_s17 + $0x188] sm:$0xff] }
0x20f1   :  { %v4801_v4 = vmul.f32 0.70710677, %v4787_v26  ;;  %v4797_v36 = vmul.f32 0.5, %v4787_v26  ;;  %v6449_v26 = vld [vmem:[%s11320_s17 + $0x180] sm:$0xff] }
0x20f2   :  { %v4802_v38 = vmul.f32 0.70710677, %v4789_v42  ;;  %v4792_v13 = vpop.f32.mrb[84].mxu0  ;;  %v4798_v39 = vmul.f32 0.5, %v4789_v42  ;;  %v8251_v42 = vpack.c.bf16 %v6450_v19, %v6449_v26 }
0x20f3   :  { %8647 = verf.f32 %v4801_v4  ;;  %v4793_v33 = vadd.f32 %v4792_v13, %v4709_v32  ;;  %v4794_v10 = vpop.f32.mrb[85].mxu0  ;;  %v6451_v4 = vld [vmem:[%s11320_s17 + $0x190] sm:$0xff] }
0x20f4   :  { %8649 = verf.f32 %v4802_v38  ;;  %v4795_v61 = vadd.f32 %v4794_v10, %v4713_v51  ;;  %8252 = vmatprep.subr.bf16.mxu0 %v8251_v42  ;;  %v6452_v38 = vld [vmem:[%s11320_s17 + $0x198] sm:$0xff]  ;;  %v6454_v10 = vld [vmem:[%s11320_s17 + $0x1a8] sm:$0xff] }
0x20f5   :  { %v4803_v16 = vmul.f32 0.70710677, %v4793_v33  ;;  %v4799_v9 = vmul.f32 0.5, %v4793_v33  ;;  %8254 = vmatpush3.bf16.msra.mxu0 %v8251_v42  ;;  %v8255_v13 = vpack.c.bf16 %v6452_v38, %v6451_v4  ;;  %v6453_v33 = vld [vmem:[%s11320_s17 + $0x1a0] sm:$0xff] }
0x20f6   :  { %v4804_v62 = vmul.f32 0.70710677, %v4795_v61  ;;  %v5141_v52 = vpop.f32.mrb[86].mxu0  ;;  %v4800_v29 = vmul.f32 0.5, %v4795_v61  ;;  %v6455_v61 = vld [vmem:[%s11320_s17 + $0x1b0] sm:$0xff] }
0x20f7   :  { %8651 = verf.f32 %v4803_v16  ;;  %v5142_v6 = vadd.f32 %v5141_v52, %v5065_v46  ;;  %v7686_v40 = vpop.f32.mrb[87].mxu0  ;;  %8256 = vmatprep.subr.bf16.mxu0 %v8255_v13  ;;  %v6456_v16 = vld [vmem:[%s11320_s17 + $0x1b8] sm:$0xff] }
0x20f8   :  { %8653 = verf.f32 %v4804_v62  ;;  %v8263_v62 = vpack.c.bf16 %v6456_v16, %v6455_v61 }
0x20f9   :  { %v5394_v60 = vsel %vm4068_vm4, %v5142_v6, 0.0  ;;  %v5396_v0 = vsel %vm4068_vm4, 0.0, %v5142_v6  ;;  %v5157_v2 = vmul.f32 0.5, %v5142_v6  ;;  %8258 = vmatpush3.bf16.msra.mxu0 %v8255_v13 }
0x20fa   :  { %5395 = vst.msk [vmem:[#allocation5 - $0x1] sm:$0x2] %vm4070_vm5, %v5394_v60  ;;  %v5146_v48 = vpop.f32.mrb[88].mxu0 }
0x20fb   :  { %5397 = vst.msk [vmem:[#allocation5 + $0x1] sm:$0x1] %vm4073_vm7, %v5396_v0  ;;  %v5147_v24 = vadd.f32 %v5146_v48, %v5065_v46  ;;  %v7689_v11 = vpop.f32.mrb[89].mxu0  ;;  %v5163_v44 = vrot.slane %v5157_v2, 4 }
0x20fc   :  { %5398 = vst.msk [vmem:[#allocation5 - $0x1] sm:$0x8] %vm4075_vm9, %v5394_v60  ;;  %v4897_v60 = vrot.slane %v10426_v18, %v9491_v47 }
0x20fd   :  { %5399 = vst.msk [vmem:[#allocation5 + $0x1] sm:$0x4] %vm4077_vm10, %v5396_v0  ;;  %v8648_v50 = vpop.eup %8647  ;;  %v5158_v63 = vmul.f32 0.5, %v5147_v24 }
0x20fe   :  { %v8650_v25 = vpop.eup %8649  ;;  %v4809_v7 = vadd.f32 1.0, %v8648_v50  ;;  %v5151_v55 = vpop.f32.mrb[90].mxu0 }
0x20ff   :  { %v4810_v41 = vadd.f32 1.0, %v8650_v25  ;;  %v5164_v17 = vrot.slane %v5158_v63, 4  ;;  %v5152_v14 = vadd.f32 %v5151_v55, %v5065_v46  ;;  %v7692_v59 = vpop.f32.mrb[91].mxu0  ;;  %v8259_v46 = vpack.c.bf16 %v6454_v10, %v6453_v33 }
0x2100   :  { %v4813_v1 = vmul.f32 %v4809_v7, %v4797_v36  ;;  %v6461_v36 = vld [vmem:[%s11320_s17 + $0x1e0] sm:$0xff] }
0x2101   :  { %v8652_v31 = vpop.eup %8651  ;;  %v5165_v28 = vsel %vm535_vm8, %v5163_v44, %v5164_v17  ;;  %v5159_v58 = vmul.f32 0.5, %v5152_v14  ;;  %v4814_v37 = vmul.f32 %v4810_v41, %v4798_v39  ;;  %8260 = vmatprep.subr.bf16.mxu0 %v8259_v46  ;;  %v6460_v14 = vld [vmem:[%s11320_s17 + $0x1d8] sm:$0xff] }
0x2102   :  { %v8654_v8 = vpop.eup %8653  ;;  %v4811_v5 = vadd.f32 1.0, %v8652_v31  ;;  %8262 = vmatpush3.bf16.msra.mxu0 %v8259_v46  ;;  %v6462_v31 = vld [vmem:[%s11320_s17 + $0x1e8] sm:$0xff] }
0x2103   :  { %v4812_v35 = vadd.f32 1.0, %v8654_v8  ;;  %v5166_v23 = vrot.slane %v5159_v58, 4  ;;  %4881 = vmatprep.mubr.f32.mxu1 %v4814_v37  ;;  %8264 = vmatprep.subr.bf16.mxu0 %v8263_v62  ;;  %v6463_v58 = vld [vmem:[%s11320_s17 + $0x1f0] sm:$0xff]  ;;  %v6464_v37 = vld [vmem:[%s11320_s17 + $0x1f8] sm:$0xff] }
0x2104   :  { %v10835_v20 = vld [vmem:[#allocation5] sm:$0xf]  ;;  %4882 = vmatmul.mubr.f32.vlgmr.msra.gmra.mrb[108].mxu1 %v4813_v1  ;;  %v4815_v57 = vmul.f32 %v4811_v5, %v4799_v9  ;;  %v8279_v8 = vpack.c.bf16 %v6464_v37, %v6463_v58  ;;  %v10904_v1 = vld [vmem:[%s11312_s9 + $0x10] sm:$0xff] }
0x2105   :  { %v5401_v12 = vsel %vm3950_vm11, %v10835_v20, 0.0  ;;  %v5167_v32 = vsel %vm535_vm8, %v5164_v17, %v5166_v23  ;;  %v4816_v51 = vmul.f32 %v4812_v35, %v4800_v29  ;;  %v6459_v17 = vld [vmem:[%s11320_s17 + $0x1d0] sm:$0xff]  ;;  %v5177_v5 = vrot.slane %v10904_v1, %v8990_v27 }
0x2106   :  { %5402 = vadd.xlane.f32.xlu0 %v5401_v12  ;;  %8266 = vmatpush3.bf16.msra.mxu0 %v8263_v62  ;;  %v8271_v59 = vpack.c.bf16 %v6460_v14, %v6459_v17  ;;  %v5262_v12 = vrot.slane %v10904_v1, %v9321_v56  ;;  %v5272_v29 = vrot.slane %v10904_v1, %v9382_v53 }
0x2107   :  { %4886 = vmatprep.mubr.f32.mxu1 %v4816_v51  ;;  %v5282_v35 = vrot.slane %v10904_v1, %v8998_v30 }
0x2108   :  { %4887 = vmatmul.mubr.f32.gmra.mrb[110].mxu1 %v4815_v57 }
0x21d7   :  { %v6949_v52 = vpop.f32.mrb[108].mxu1 }
0x21d8   :  { %v6950_v6 = vpop.f32.mrb[109].mxu1 }
0x21d9   :  { %v6951_v40 = vadd.f32 %v6950_v6, %v6949_v52 }
0x21db   :  { %v4892_v0 = vadd.f32 %v6951_v40, %v10721_v43  ;;  %v6952_v48 = vpop.f32.mrb[110].mxu1  ;;  %v6457_v43 = vld [vmem:[%s11320_s17 + $0x1c0] sm:$0xff] }
0x21dc   :  { %v6953_v2 = vpop.f32.mrb[111].mxu1 }
0x21dd   :  { %v4898_v24 = vadd.f32 %v4897_v60, %v4892_v0  ;;  %v6954_v11 = vadd.f32 %v6953_v2, %v6952_v48  ;;  %v5403_v2 = vpop.xlane.xlu0 %5402 }
0x21df   :  { %v5155_v50 = vmul.f32 0.5, %v4898_v24  ;;  %v4893_v63 = vadd.f32 %v6954_v11, %v10726_v21  ;;  %v6458_v21 = vld [vmem:[%s11320_s17 + $0x1c8] sm:$0xff]  ;;  %v5391_v24 = vrot.slane %v10904_v1, %v9451_v22  ;;  %v5404_v11 = vmul.f32 0.015625, %v5403_v2  ;;  %v8684_v22 = vld [vmem:[%s11310_s7] sm:$0xff] }
0x21e0   :  { %v8267_v44 = vpack.c.bf16 %v6458_v21, %v6457_v43  ;;  %v8683_v21 = vld [vmem:[%s11310_s7 + $0x8] sm:$0xff]  ;;  %v6477_v2 = vld [vmem:[%s11320_s17 + $0x260] sm:$0xff] }
0x21e1   :  { %v10868_v25 = vadd.f32 %v5165_v28, %v5155_v50  ;;  %v4899_v7 = vadd.f32 %v4897_v60, %v4893_v63  ;;  %v8275_v28 = vpack.c.bf16 %v6462_v31, %v6461_v36 }
0x21e2   :  { %8268 = vmatprep.subr.bf16.mxu0 %v8267_v44 }
0x21e3   :  { %v5156_v39 = vmul.f32 0.5, %v4899_v7  ;;  %v5172_v55 = vmul.f32 0.999995, %v10868_v25 }
0x21e5   :  { %v10871_v41 = vadd.f32 %v5167_v32, %v5156_v39  ;;  %7709 = vmatprep.mubr.msk.f32.mxu0 %vm112_vm0, %v5172_v55  ;;  %v5267_v32 = vrot.slane %v10904_v1, %v9385_v54 }
0x21e7   :  { %v5173_v18 = vmul.f32 0.999995, %v10871_v41 }
0x21e9   :  { %7710 = vmatmul.mubr.msk.f32.vlgmr.msra.gmra.mrb[92].mxu0 %vm112_vm0, %v5173_v18  ;;  %v5405_v18 = vsub.f32 %v10835_v20, %v5404_v11 }
0x21ea   :  { %8270 = vmatpush3.bf16.msra.mxu0 %v8267_v44 }
0x21eb   :  { %8272 = vmatprep.subr.bf16.mxu0 %v8271_v59  ;;  %v5406_v20 = vmul.f32 %v5405_v18, %v5405_v18 }
0x21ed   :  { %v5407_v14 = vsel %vm3950_vm11, %v5406_v20, 0.0 }
0x21ee   :  { %8274 = vmatpush3.bf16.msra.mxu0 %v8271_v59 }
0x21ef   :  { %8276 = vmatprep.subr.bf16.mxu0 %v8275_v28 }
0x21f2   :  { %8278 = vmatpush3.bf16.msra.mxu0 %v8275_v28 }
0x21f3   :  { %8280 = vmatprep.subr.bf16.mxu0 %v8279_v8 }
0x21f6   :  { %8282 = vmatpush3.bf16.msra.mxu0 %v8279_v8 }
0x21f7   :  { %8299 = vmatprep.subr.bf16.mxu0 %v8711_v3 }
0x22bc   :  { %v7711_v23 = vpop.f32.mrb[92].mxu0 }
0x22bd   :  { %v5256_v9 = vadd.f32 %v7711_v23, %v5177_v5  ;;  %v5250_v51 = vpop.f32.mrb[93].mxu0 }
0x22be   :  { %v5251_v57 = vadd.f32 %v5250_v51, %v5177_v5 }
0x22bf   :  { %v5289_v26 = vmul.f32 %v5262_v12, %v5256_v9  ;;  %v5291_v19 = vmul.f32 %v5272_v29, %v5256_v9  ;;  %v5297_v42 = vmul.f32 %v5282_v35, %v5256_v9 }
0x22c0   :  { %v5263_v4 = vmul.f32 %v5262_v12, %v5251_v57  ;;  %v5273_v38 = vmul.f32 %v5272_v29, %v5251_v57  ;;  %v5283_v13 = vmul.f32 %v5282_v35, %v5251_v57 }
0x22c1   :  { %v5290_v33 = vadd.f32 %v5289_v26, %v5267_v32  ;;  %v5293_v10 = vrot.slane %v5291_v19, 4  ;;  %v5299_v46 = vrot.slane %v5297_v42, 4  ;;  %v5422_v26 = vrot.slane %v10904_v1, %v9494_v49  ;;  %v6468_v49 = vld [vmem:[%s11320_s17 + $0x218] sm:$0xff] }
0x22c2   :  { %v5268_v61 = vadd.f32 %v5267_v32, %v5263_v4  ;;  %v5275_v16 = vrot.slane %v5273_v38, 4  ;;  %v5285_v62 = vrot.slane %v5283_v13, 4  ;;  %v5417_v32 = vrot.slane %v10904_v1, %v9491_v47  ;;  %v6465_v4 = vld [vmem:[%s11320_s17 + $0x200] sm:$0xff]  ;;  %v6466_v38 = vld [vmem:[%s11320_s17 + $0x208] sm:$0xff]  ;;  %v6467_v47 = vld [vmem:[%s11320_s17 + $0x210] sm:$0xff] }
0x22c3   :  { %v5295_v52 = vadd.f32 %v5293_v10, %v5290_v33  ;;  %v5301_v6 = vadd.f32 %v5299_v46, %v5290_v33  ;;  %v8283_v13 = vpack.c.bf16 %v6466_v38, %v6465_v4  ;;  %v8287_v1 = vpack.c.bf16 %v6468_v49, %v6467_v47  ;;  %v6469_v33 = vld [vmem:[%s11320_s17 + $0x220] sm:$0xff]  ;;  %v6470_v10 = vld [vmem:[%s11320_s17 + $0x228] sm:$0xff] }
0x22c4   :  { %v5277_v40 = vadd.f32 %v5275_v16, %v5268_v61  ;;  %v5287_v60 = vadd.f32 %v5285_v62, %v5268_v61  ;;  %v8291_v46 = vpack.c.bf16 %v6470_v10, %v6469_v33  ;;  %v6473_v61 = vld [vmem:[%s11320_s17 + $0x240] sm:$0xff]  ;;  %v6474_v16 = vld [vmem:[%s11320_s17 + $0x248] sm:$0xff] }
0x22c5   :  { %5296 = vst.msk [vmem:[#allocation4 + $0x8] sm:$0xf] %vm3950_vm11, %v5295_v52  ;;  %8284 = vmatprep.subr.bf16.mxu1 %v8283_v13  ;;  %v8300_v62 = vpack.c.bf16 %v6474_v16, %v6473_v61  ;;  %v6471_v52 = vld [vmem:[%s11320_s17 + $0x230] sm:$0xff] }
0x22c6   :  { %5302 = vst.msk [vmem:[#allocation4 + $0x8] sm:$0xf0] %vm3961_vm12, %v5301_v6  ;;  %5288 = vst.msk [vmem:[#allocation4] sm:$0xf0] %vm3961_vm12, %v5287_v60  ;;  %8286 = vmatpush3.bf16.msra.mxu1 %v8283_v13  ;;  %v6472_v6 = vld [vmem:[%s11320_s17 + $0x238] sm:$0xff] }
0x22c7   :  { %5278 = vst.msk [vmem:[#allocation4] sm:$0xf] %vm3950_vm11, %v5277_v40  ;;  %8288 = vmatprep.subr.bf16.mxu1 %v8287_v1  ;;  %v6475_v40 = vld [vmem:[%s11320_s17 + $0x250] sm:$0xff]  ;;  %v8295_v60 = vpack.c.bf16 %v6472_v6, %v6471_v52 }
0x22ca   :  { %8290 = vmatpush3.bf16.msra.mxu1 %v8287_v1 }
0x22cb   :  { %8292 = vmatprep.subr.bf16.mxu1 %v8291_v46 }
0x22cd   :  { %v5304_v48 = vld [vmem:[#allocation4 + $0x8] sm:$0xff] }
0x22ce   :  { %v5303_v0 = vld [vmem:[#allocation4] sm:$0xff]  ;;  %8294 = vmatpush3.bf16.msra.mxu1 %v8291_v46 }
0x22cf   :  { %7728 = vmatprep.mubr.msk.f32.mxu0 %vm112_vm0, %v5303_v0  ;;  %v6476_v0 = vld [vmem:[%s11320_s17 + $0x258] sm:$0xff]  ;;  %8296 = vmatprep.subr.bf16.mxu1 %v8295_v60 }
0x22d0   :  { %7729 = vmatmul.mubr.msk.f32.vlgmr.msra.gmra.mrb[94].mxu0 %vm112_vm0, %v5304_v48  ;;  %v8303_v48 = vpack.c.bf16 %v6476_v0, %v6475_v40 }
0x22d1   :  { %7766 = vmatprep.mubr.msk.f32.mxu0 %vm8712_vm3, %v8713_v15  ;;  %8301 = vmatpush3.bf16.msra.mxu0 %v8300_v62 }
0x22d2   :  { %8302 = vmatprep.subr.bf16.mxu0 %v8711_v3  ;;  %8298 = vmatpush3.bf16.msra.mxu1 %v8295_v60 }
0x22d3   :  { %8311 = vmatprep.subr.bf16.mxu1 %v8711_v3 }
0x22d5   :  { %8304 = vmatpush3.bf16.msra.mxu0 %v8303_v48 }
0x22d6   :  { %8305 = vmatprep.subr.bf16.mxu0 %v8711_v3 }
0x23a3   :  { %v7730_v50 = vpop.f32.mrb[94].mxu0 }
0x23a4   :  { %v5387_v63 = vadd.f32 %v7730_v50, %v10871_v41  ;;  %v5377_v7 = vpop.f32.mrb[95].mxu0  ;;  %v6479_v50 = vld [vmem:[%s11320_s17 + $0x270] sm:$0xff] }
0x23a5   :  { %v5386_v39 = vadd.f32 %v5377_v7, %v10868_v25 }
0x23a6   :  { %v10928_v55 = vadd.f32 %v5391_v24, %v5387_v63  ;;  %v6480_v63 = vld [vmem:[%s11320_s17 + $0x278] sm:$0xff] }
0x23a7   :  { %v10931_v43 = vadd.f32 %v5391_v24, %v5386_v39  ;;  %v6478_v24 = vld [vmem:[%s11320_s17 + $0x268] sm:$0xff]  ;;  %v8309_v7 = vpack.c.bf16 %v6480_v63, %v6479_v50 }
0x23a8   :  { %v5425_v44 = vadd.f32 %v8683_v21, %v10928_v55  ;;  %v8306_v11 = vpack.c.bf16 %v6478_v24, %v6477_v2 }
0x23a9   :  { %v5424_v41 = vadd.f32 %v8684_v22, %v10931_v43 }
0x23aa   :  { %v5429_v25 = vsel %vm112_vm0, %v5425_v44, 0.0  ;;  %8307 = vmatpush3.bf16.msra.mxu0 %v8306_v11 }
0x23ab   :  { %5430 = vadd.xlane.f32.xlu0 %v5429_v25  ;;  %v5426_v17 = vsel %vm112_vm0, %v5424_v41, 0.0  ;;  %8308 = vmatprep.subr.bf16.mxu0 %v8711_v3 }
0x23ac   :  { %5427 = vadd.xlane.f32.xlu1 %v5426_v17 }
0x23ae   :  { %8310 = vmatpush3.bf16.msra.mxu0 %v8309_v7 }
0x23b0   :  { %5408 = vadd.xlane.f32.xlu1 %v5407_v14 }
0x2438   :  { %v5431_v59 = vpop.xlane.xlu0 %5430 }
0x2439   :  { %v5433_v36 = vmul.f32 0.015625, %v5431_v59  ;;  %v5428_v31 = vpop.xlane.xlu1 %5427 }
0x243a   :  { %v5432_v28 = vmul.f32 0.015625, %v5428_v31  ;;  %v6482_v31 = vld [vmem:[%s11320_s17 + $0x288] sm:$0xff] }
0x243b   :  { %v10944_v58 = vsub.f32 %v5425_v44, %v5433_v36  ;;  %v6481_v36 = vld [vmem:[%s11320_s17 + $0x280] sm:$0xff] }
0x243c   :  { %v10946_v37 = vsub.f32 %v5424_v41, %v5432_v28 }
0x243d   :  { %v5409_v8 = vpop.xlane.xlu1 %5408  ;;  %v5437_v5 = vmul.f32 %v10944_v58, %v10944_v58 }
0x243e   :  { %v5410_v12 = vmul.f32 0.015625, %v5409_v8  ;;  %v5436_v29 = vmul.f32 %v10946_v37, %v10946_v37 }
0x243f   :  { %v5441_v35 = vsel %vm112_vm0, %v5437_v5, 0.0 }
0x2440   :  { %v5411_v23 = vadd.f32 1e-05, %v5410_v12  ;;  %5442 = vadd.xlane.f32.xlu1 %v5441_v35  ;;  %v5438_v9 = vsel %vm112_vm0, %v5436_v29, 0.0  ;;  %v8312_v12 = vpack.c.bf16 %v6482_v31, %v6481_v36  ;;  %v6485_v35 = vld [vmem:[%s11320_s17 + $0x2a0] sm:$0xff] }
0x2441   :  { %5439 = vadd.xlane.f32.xlu0 %v5438_v9 }
0x2442   :  { %8655 = vrsqrt.f32 %v5411_v23  ;;  %v6486_v23 = vld [vmem:[%s11320_s17 + $0x2a8] sm:$0xff] }
0x2443   :  { %v8318_v9 = vpack.c.bf16 %v6486_v23, %v6485_v35  ;;  %v6489_v35 = vld [vmem:[%s11320_s17 + $0x2c0] sm:$0xff]  ;;  %v6490_v23 = vld [vmem:[%s11320_s17 + $0x2c8] sm:$0xff] }
0x244c   :  { %v8656_v51 = vpop.eup %8655 }
0x244d   :  { %v5413_v57 = vmul.f32 %v8656_v51, %v5405_v18  ;;  %v6487_v51 = vld [vmem:[%s11320_s17 + $0x2b0] sm:$0xff] }
0x244f   :  { %v5418_v19 = vmul.f32 %v5417_v32, %v5413_v57  ;;  %v6488_v57 = vld [vmem:[%s11320_s17 + $0x2b8] sm:$0xff] }
0x2451   :  { %v5423_v42 = vadd.f32 %v5422_v26, %v5418_v19 }
0x2453   :  { %5456 = vst.msk [vmem:[#allocation3] sm:$0xf] %vm3950_vm11, %v5423_v42 }
0x24cd   :  { %v5443_v39 = vpop.xlane.xlu1 %5442 }
0x24ce   :  { %v5445_v18 = vmul.f32 0.015625, %v5443_v39  ;;  %v5440_v21 = vpop.xlane.xlu0 %5439 }
0x24cf   :  { %v5444_v44 = vmul.f32 0.015625, %v5440_v21 }
0x24d0   :  { %v5447_v22 = vadd.f32 1e-05, %v5445_v18 }
0x24d1   :  { %v5446_v41 = vadd.f32 1e-05, %v5444_v44 }
0x24d2   :  { %8657 = vrsqrt.f32 %v5447_v22  ;;  %v8685_v22 = vld [vmem:[%s11366_s4 + $0x8] sm:$0xff] }
0x24d3   :  { %8659 = vrsqrt.f32 %v5446_v41 }
0x24dc   :  { %v8658_v25 = vpop.eup %8657 }
0x24dd   :  { %v8660_v17 = vpop.eup %8659  ;;  %v5451_v20 = vmul.f32 %v8658_v25, %v10944_v58  ;;  %v6483_v58 = vld [vmem:[%s11320_s17 + $0x290] sm:$0xff]  ;;  %v8686_v25 = vld [vmem:[%s11366_s4] sm:$0xff] }
0x24de   :  { %v5450_v14 = vmul.f32 %v8660_v17, %v10946_v37  ;;  %v6484_v37 = vld [vmem:[%s11320_s17 + $0x298] sm:$0xff] }
0x24df   :  { %v5453_v59 = vmul.f32 %v5451_v20, %v5417_v32  ;;  %v8315_v29 = vpack.c.bf16 %v6484_v37, %v6483_v58 }
0x24e0   :  { %v5452_v28 = vmul.f32 %v5450_v14, %v5417_v32 }
0x24e1   :  { %v5455_v8 = vadd.f32 %v5453_v59, %v5422_v26 }
0x24e2   :  { %v5454_v5 = vadd.f32 %v5452_v28, %v5422_v26  ;;  %v8321_v26 = vpack.c.bf16 %v6488_v57, %v6487_v51  ;;  %v6492_v51 = vld [vmem:[%s11320_s17 + $0x2d8] sm:$0xff] }
0x24e3   :  { %5458 = vst.msk [vmem:[#allocation3 + $0xc] sm:$0xff] %vm112_vm0, %v5455_v8 }
0x24e4   :  { %5457 = vst.msk [vmem:[#allocation3 + $0x4] sm:$0xff] %vm112_vm0, %v5454_v5  ;;  %7747 = vmatprep.mubr.msk.f32.mxu1 %vm112_vm0, %v5454_v5 }
0x24e5   :  { %7748 = vmatmul.mubr.msk.f32.vlgmr.msra.gmra.mrb[112].mxu1 %vm112_vm0, %v5455_v8 }
0x24e6   :  { %8313 = vmatpush3.bf16.msra.mxu1 %v8312_v12  ;;  %7791 = vmatprep.mubr.msk.f32.mxu1 %vm8712_vm3, %v8713_v15 }
0x24e7   :  { %8314 = vmatprep.subr.bf16.mxu1 %v8711_v3 }
0x24ea   :  { %8316 = vmatpush3.bf16.msra.mxu1 %v8315_v29  ;;  %v5461_v42 = vld [vmem:[#allocation3 + $0x10] sm:$0xf] }
0x24eb   :  { %v5459_v32 = vld [vmem:[#allocation3] sm:$0xff]  ;;  %8317 = vmatprep.subr.bf16.mxu1 %v8711_v3  ;;  %v5460_v19 = vld [vmem:[#allocation3 + $0x8] sm:$0xff] }
0x24ec   :  { %7767 = vmatmul.mubr.msk.f32.vlgmr.msra.gmra.mrb[96].mxu0 %vm112_vm0, %v5459_v32 }
0x24ed   :  { %7769 = vmatprep.mubr.msk.f32.mxu0 %vm8712_vm3, %v8713_v15 }
0x24ee   :  { %8319 = vmatpush3.bf16.msra.mxu1 %v8318_v9  ;;  %v6491_v9 = vld [vmem:[%s11320_s17 + $0x2d0] sm:$0xff] }
0x24ef   :  { %8320 = vmatprep.subr.bf16.mxu1 %v8711_v3  ;;  %v11063_v3 = vld [vmem:[%s11312_s9 + $0x18] sm:$0x1f]  ;;  %v8337_v57 = vpack.c.bf16 %v6492_v51, %v6491_v9  ;;  %v6522_v51 = vld [vmem:[%s11322_s19 + $0x128] sm:$0xff] }
0x24f0   :  { %7770 = vmatmul.mubr.msk.f32.gmra.mrb[98].mxu0 %vm112_vm0, %v5460_v19  ;;  %v5465_v4 = vrot.slane %v11063_v3, %v8990_v27  ;;  %v5550_v1 = vrot.slane %v11063_v3, %v8998_v30  ;;  %v5643_v27 = vrot.slane %v11063_v3, %v9321_v56 }
0x24f1   :  { %7772 = vmatprep.mubr.msk.f32.mxu0 %vm8712_vm3, %v8713_v15 }
0x24f2   :  { %8322 = vmatpush3.bf16.msra.mxu1 %v8321_v26  ;;  %v6493_v26 = vld [vmem:[%s11320_s17 + $0x2e0] sm:$0xff] }
0x24f4   :  { %7773 = vmatmul.mubr.msk.f32.gmra.mrb[100].mxu0 %vm112_vm0, %v5461_v42 }
0x24f5   :  { %7792 = vmatmul.mubr.msk.f32.vlgmr.msra.gmra.mrb[114].mxu1 %vm112_vm0, %v5459_v32  ;;  %v8333_v32 = vpack.c.bf16 %v6490_v23, %v6489_v35  ;;  %v6538_v35 = vld [vmem:[%s11322_s19 + $0x1a8] sm:$0xff] }
0x24f6   :  { %7794 = vmatprep.mubr.msk.f32.mxu1 %vm8712_vm3, %v8713_v15 }
0x24f9   :  { %7795 = vmatmul.mubr.msk.f32.gmra.mrb[116].mxu1 %vm112_vm0, %v5460_v19  ;;  %v6494_v19 = vld [vmem:[%s11320_s17 + $0x2e8] sm:$0xff] }
0x24fa   :  { %7797 = vmatprep.mubr.msk.f32.mxu1 %vm8712_vm3, %v8713_v15 }
0x24fd   :  { %7798 = vmatmul.mubr.msk.f32.gmra.mrb[118].mxu1 %vm112_vm0, %v5461_v42  ;;  %v8341_v42 = vpack.c.bf16 %v6494_v19, %v6493_v26  ;;  %v6010_v19 = vrot.slane %v11063_v3, %v9382_v53 }
0x25b8   :  { %v7749_v38 = vpop.f32.mrb[112].mxu1 }
0x25b9   :  { %v5538_v13 = vpop.f32.mrb[113].mxu1  ;;  %v5544_v18 = vadd.f32 %v7749_v38, %v5465_v4  ;;  %v6496_v38 = vld [vmem:[%s11320_s17 + $0x2f8] sm:$0xff] }
0x25ba   :  { %v5539_v47 = vadd.f32 %v5538_v13, %v5465_v4  ;;  %v6495_v4 = vld [vmem:[%s11320_s17 + $0x2f0] sm:$0xff] }
0x25bb   :  { %v8345_v13 = vpack.c.bf16 %v6496_v38, %v6495_v4 }
0x25bc   :  { %7806 = vmatprep.mubr.msk.f32.mxu0 %vm112_vm0, %v5539_v47 }
0x25bf   :  { %v5626_v49 = vpop.f32.mrb[96].mxu0 }
0x25c0   :  { %v7768_v33 = vpop.f32.mrb[97].mxu0  ;;  %v5627_v46 = vadd.f32 %v5626_v49, %v5550_v1 }
0x25c3   :  { %v5631_v10 = vpop.f32.mrb[98].mxu0 }
0x25c4   :  { %v5632_v61 = vadd.f32 %v5631_v10, %v5550_v1  ;;  %v7771_v16 = vpop.f32.mrb[99].mxu0 }
0x25c5   :  { %v6504_v16 = vld [vmem:[%s11321_s18 + $0x98] sm:$0xff] }
0x25c6   :  { %v8323_v62 = vpack.c.bf16 %v5632_v61, %v5627_v46  ;;  %v6502_v61 = vld [vmem:[%s11321_s18 + $0x88] sm:$0xff] }
0x25c7   :  { %v5636_v52 = vpop.f32.mrb[100].mxu0 }
0x25c8   :  { %v5637_v6 = vadd.f32 %v5636_v52, %v5550_v1  ;;  %v5710_v40 = vpop.f32.mrb[114].mxu1  ;;  %v7774_v60 = vpop.f32.mrb[101].mxu0  ;;  %8325 = vmatprep.subr.msk.bf16.mxu0 %vm10541_vm13, %v8323_v62  ;;  %v8349_v52 = vpack.c.bf16 %v6504_v16, %v6502_v61  ;;  %v6541_v61 = vld [vmem:[%s11322_s19 + $0x1c0] sm:$0xff]  ;;  %v6542_v16 = vld [vmem:[%s11322_s19 + $0x1c8] sm:$0xff] }
0x25c9   :  { %v7793_v0 = vpop.f32.mrb[115].mxu1  ;;  %8328 = vmatpush3.bf16.xpose.msk.msra.mxu0 %vm10541_vm13, %v8323_v62  ;;  %v5711_v2 = vadd.f32 %v5710_v40, %v5643_v27  ;;  %v6501_v62 = vld [vmem:[%s11321_s18 + $0x80] sm:$0xff]  ;;  %v6506_v40 = vld [vmem:[%s11321_s18 + $0xa8] sm:$0xff]  ;;  %v6508_v60 = vld [vmem:[%s11321_s18 + $0xb8] sm:$0xff] }
0x25ca   :  { %7804 = vmatprep.subr.msk.mxu0 %vm112_vm0, %v5637_v6  ;;  %v8353_v0 = vpack.c.bf16 %v6508_v60, %v6506_v40  ;;  %v6543_v60 = vld [vmem:[%s11322_s19 + $0x1d0] sm:$0xff] }
0x25cc   :  { %v5715_v48 = vpop.f32.mrb[116].mxu1 }
0x25cd   :  { %v5716_v24 = vadd.f32 %v5715_v48, %v5643_v27  ;;  %v7796_v11 = vpop.f32.mrb[117].mxu1  ;;  %v6505_v48 = vld [vmem:[%s11321_s18 + $0xa0] sm:$0xff] }
0x25cf   :  { %v8329_v50 = vpack.c.bf16 %v5716_v24, %v5711_v2  ;;  %v6507_v2 = vld [vmem:[%s11321_s18 + $0xb0] sm:$0xff] }
0x25d0   :  { %v5720_v63 = vpop.f32.mrb[118].mxu1  ;;  %v8355_v24 = vpack.c.bf16 %v6507_v2, %v6505_v48  ;;  %v6527_v48 = vld [vmem:[%s11322_s19 + $0x150] sm:$0xff]  ;;  %v6528_v2 = vld [vmem:[%s11322_s19 + $0x158] sm:$0xff] }
0x25d1   :  { %v5721_v7 = vadd.f32 %v5720_v63, %v5643_v27  ;;  %v7799_v39 = vpop.f32.mrb[119].mxu1  ;;  %8330 = vmatprep.subr.bf16.mxu1 %v8329_v50  ;;  %7805 = vmatpush3.xpose.msk.msra.mxu0 %vm112_vm0, %v5637_v6  ;;  %v6503_v6 = vld [vmem:[%s11321_s18 + $0x90] sm:$0xff]  ;;  %v6510_v63 = vld [vmem:[%s11321_s18 + $0xc8] sm:$0xff] }
0x25d2   :  { %8332 = vmatpush3.bf16.msra.mxu1 %v8329_v50  ;;  %8334 = vmatprep.subr.bf16.mxu0 %v8333_v32  ;;  %v8351_v27 = vpack.c.bf16 %v6503_v6, %v6501_v62  ;;  %v8381_v62 = vpack.c.bf16 %v6542_v16, %v6541_v61  ;;  %v6526_v6 = vld [vmem:[%s11322_s19 + $0x148] sm:$0xff] }
0x25d3   :  { %7813 = vmatprep.subr.msk.mxu1 %vm535_vm8, %v5721_v7 }
0x25d4   :  { %7807 = vmatmul.mubr.msk.f32.vlgmr.msra.gmra.mrb[102].mxu0 %vm112_vm0, %v5544_v18  ;;  %v6509_v18 = vld [vmem:[%s11321_s18 + $0xc0] sm:$0xff] }
0x25d5   :  { %8336 = vmatpush3.bf16.msra.mxu0 %v8333_v32  ;;  %v6521_v32 = vld [vmem:[%s11322_s19 + $0x120] sm:$0xff] }
0x25d6   :  { %7814 = vmatpush3.msk.msra.mxu1 %vm535_vm8, %v5721_v7  ;;  %8338 = vmatprep.subr.bf16.mxu0 %v8337_v57  ;;  %v6512_v7 = vld [vmem:[%s11321_s18 + $0xd8] sm:$0xff] }
0x25d7   :  { %8350 = vmatprep.subr.bf16.mxu1 %v8349_v52  ;;  %v8357_v39 = vpack.c.bf16 %v6512_v7, %v6510_v63  ;;  %v6525_v52 = vld [vmem:[%s11322_s19 + $0x140] sm:$0xff] }
0x25d8   :  { %v8383_v40 = vpack.c.bf16 %v6526_v6, %v6525_v52  ;;  %v6529_v7 = vld [vmem:[%s11322_s19 + $0x160] sm:$0xff] }
0x25d9   :  { %8340 = vmatpush3.bf16.msra.mxu0 %v8337_v57  ;;  %v8375_v57 = vpack.c.bf16 %v6522_v51, %v6521_v32 }
0x25da   :  { %8342 = vmatprep.subr.bf16.mxu0 %v8341_v42 }
0x25dd   :  { %8344 = vmatpush3.bf16.msra.mxu0 %v8341_v42 }
0x25de   :  { %8346 = vmatprep.subr.bf16.mxu0 %v8345_v13 }
0x25e1   :  { %8348 = vmatpush3.bf16.msra.mxu0 %v8345_v13 }
0x26a7   :  { %v7808_v56 = vpop.f32.mrb[102].mxu0 }
0x26a8   :  { %v5815_v45 = vmul.f32 0.125, %v7808_v56  ;;  %v5805_v21 = vpop.f32.mrb[103].mxu0  ;;  %v6511_v56 = vld [vmem:[%s11321_s18 + $0xd0] sm:$0xff] }
0x26a9   :  { %v5814_v44 = vmul.f32 0.125, %v5805_v21  ;;  %v6514_v21 = vld [vmem:[%s11321_s18 + $0xe8] sm:$0xff] }
0x26aa   :  { %v5817_v41 = vadd.f32 %v8685_v22, %v5815_v45  ;;  %v8359_v45 = vpack.c.bf16 %v6511_v56, %v6509_v18  ;;  %v6547_v56 = vld [vmem:[%s11322_s19 + $0x1f0] sm:$0xff] }
0x26ab   :  { %v5816_v17 = vadd.f32 %v8686_v25, %v5814_v44  ;;  %v6516_v44 = vld [vmem:[%s11321_s18 + $0xf8] sm:$0xff]  ;;  %v6515_v25 = vld [vmem:[%s11321_s18 + $0xf0] sm:$0xff] }
0x26ac   :  { %v5821_v20 = vsel %vm483_vm6, %v5817_v41, -inf  ;;  %v8361_v22 = vpack.c.bf16 %v6516_v44, %v6514_v21  ;;  %v6531_v44 = vld [vmem:[%s11322_s19 + $0x170] sm:$0xff] }
0x26ad   :  { %5822 = vmax.xlane.f32.xlu1 %v5821_v20  ;;  %v5818_v14 = vsel %vm483_vm6, %v5816_v17, -inf  ;;  %v6533_v20 = vld [vmem:[%s11322_s19 + $0x180] sm:$0xff] }
0x26ae   :  { %5819 = vmax.xlane.f32.xlu0 %v5818_v14  ;;  %v6534_v14 = vld [vmem:[%s11322_s19 + $0x188] sm:$0xff] }
0x273a   :  { %v5823_v59 = vpop.xlane.xlu1 %5822 }
0x273b   :  { %v5825_v36 = vsub.f32 %v5817_v41, %v5823_v59  ;;  %v5820_v31 = vpop.xlane.xlu0 %5819  ;;  %v6513_v41 = vld [vmem:[%s11321_s18 + $0xe0] sm:$0xff] }
0x273c   :  { %v5824_v28 = vsub.f32 %v5816_v17, %v5820_v31  ;;  %v8363_v17 = vpack.c.bf16 %v6515_v25, %v6513_v41  ;;  %v6517_v59 = vld [vmem:[%s11322_s19 + $0x100] sm:$0xff]  ;;  %v6518_v31 = vld [vmem:[%s11322_s19 + $0x108] sm:$0xff]  ;;  %v6018_v25 = vrot.slane %v10816_v34, %v8998_v30 }
0x273d   :  { %v5828_v8 = vmul.f32 1.442695, %v5825_v36  ;;  %v8365_v36 = vpack.c.bf16 %v6534_v14, %v6533_v20 }
0x273e   :  { %v5826_v5 = vmul.f32 1.442695, %v5824_v28  ;;  %v6535_v28 = vld [vmem:[%s11322_s19 + $0x190] sm:$0xff]  ;;  %v6028_v20 = vrot.slane %v6018_v25, %v8998_v30 }
0x273f   :  { %8661 = vpow2.f32 %v5828_v8  ;;  %v6536_v8 = vld [vmem:[%s11322_s19 + $0x198] sm:$0xff]  ;;  %8366 = vmatprep.subr.bf16.mxu0 %v8365_v36 }
0x2740   :  { %8663 = vpow2.f32 %v5826_v5  ;;  %v8367_v5 = vpack.c.bf16 %v6518_v31, %v6517_v59 }
0x2749   :  { %v8662_v12 = vpop.eup %8661 }
0x274a   :  { %v8664_v58 = vpop.eup %8663  ;;  %v5833_v37 = vsel %vm483_vm6, %v8662_v12, 0.0 }
0x274b   :  { %5834 = vadd.xlane.f32.xlu1 %v5833_v37  ;;  %v5830_v29 = vsel %vm483_vm6, %v8664_v58, 0.0  ;;  %v6520_v37 = vld [vmem:[%s11322_s19 + $0x118] sm:$0xff] }
0x274c   :  { %5831 = vadd.xlane.f32.xlu0 %v5830_v29  ;;  %v6537_v29 = vld [vmem:[%s11322_s19 + $0x1a0] sm:$0xff] }
0x274d   :  { %v8373_v9 = vpack.c.bf16 %v6538_v35, %v6537_v29 }
0x27d8   :  { %v5835_v47 = vpop.xlane.xlu1 %5834 }
0x27d9   :  { %8665 = vrcp.f32 %v5835_v47  ;;  %v5832_v49 = vpop.xlane.xlu0 %5831 }
0x27da   :  { %8667 = vrcp.f32 %v5832_v49 }
0x27e3   :  { %v8666_v1 = vpop.eup %8665 }
0x27e4   :  { %v8668_v33 = vpop.eup %8667  ;;  %v5839_v46 = vmul.f32 %v8666_v1, %v8662_v12  ;;  %v8369_v12 = vpack.c.bf16 %v6536_v8, %v6535_v28 }
0x27e5   :  { %v5838_v10 = vmul.f32 %v8668_v33, %v8664_v58  ;;  %v6519_v58 = vld [vmem:[%s11322_s19 + $0x110] sm:$0xff] }
0x27e6   :  { %v8371_v23 = vpack.c.bf16 %v6520_v37, %v6519_v58 }
0x27e7   :  { %7815 = vmatprep.mubr.msk.f32.mxu1 %vm483_vm6, %v5838_v10  ;;  %v6523_v10 = vld [vmem:[%s11322_s19 + $0x130] sm:$0xff] }
0x27e8   :  { %7816 = vmatmul.mubr.msk.f32.vlgmr.msra.gmra.mrb[120].mxu1 %vm483_vm6, %v5839_v46 }
0x27e9   :  { %6103 = vmatprep.mubr.f32.mxu1 %v8713_v15  ;;  %8352 = vmatpush1.bf16.msra.mxu1 %v8351_v27  ;;  %v6544_v27 = vld [vmem:[%s11322_s19 + $0x1d8] sm:$0xff] }
0x27ea   :  { %8354 = vmatprep.subr.bf16.mxu1 %v8353_v0  ;;  %v8385_v0 = vpack.c.bf16 %v6544_v27, %v6543_v60 }
0x27ed   :  { %8356 = vmatpush1.bf16.msra.mxu1 %v8355_v24  ;;  %v8387_v24 = vpack.c.bf16 %v6528_v2, %v6527_v48 }
0x27ee   :  { %8358 = vmatprep.subr.bf16.mxu1 %v8357_v39  ;;  %v6530_v39 = vld [vmem:[%s11322_s19 + $0x168] sm:$0xff] }
0x27ef   :  { %v8391_v18 = vpack.c.bf16 %v6530_v39, %v6529_v7 }
0x27f1   :  { %8360 = vmatpush1.bf16.msra.mxu1 %v8359_v45  ;;  %v6548_v45 = vld [vmem:[%s11322_s19 + $0x1f8] sm:$0xff] }
0x27f2   :  { %8362 = vmatprep.subr.bf16.mxu1 %v8361_v22  ;;  %v8393_v21 = vpack.c.bf16 %v6548_v45, %v6547_v56  ;;  %v6532_v22 = vld [vmem:[%s11322_s19 + $0x178] sm:$0xff] }
0x27f3   :  { %v8395_v41 = vpack.c.bf16 %v6532_v22, %v6531_v44 }
0x27f5   :  { %8364 = vmatpush1.bf16.msra.mxu1 %v8363_v17  ;;  %v6022_v17 = vrot.slane %v10816_v34, %v9382_v53 }
0x27f7   :  { %v6032_v14 = vrot.slane %v6022_v17, %v8998_v30 }
0x28bb   :  { %v7817_v11 = vpop.f32.mrb[120].mxu1 }
0x28bc   :  { %v5915_v50 = vpop.f32.mrb[121].mxu1 }
0x28bd   :  { %7834 = vmatprep.mubr.msk.f32.mxu0 %vm112_vm0, %v5915_v50  ;;  %v6546_v50 = vld [vmem:[%s11322_s19 + $0x1e8] sm:$0xff] }
0x28be   :  { %7835 = vmatmul.mubr.msk.f32.vlgmr.msra.gmra.mrb[104].mxu0 %vm112_vm0, %v7817_v11  ;;  %v6545_v11 = vld [vmem:[%s11322_s19 + $0x1e0] sm:$0xff] }
0x28bf   :  { %8368 = vmatpush3.bf16.msra.mxu0 %v8367_v5  ;;  %v8389_v63 = vpack.c.bf16 %v6546_v50, %v6545_v11 }
0x28c0   :  { %8370 = vmatprep.subr.bf16.mxu0 %v8369_v12 }
0x28c3   :  { %8372 = vmatpush3.bf16.msra.mxu0 %v8371_v23 }
0x28c4   :  { %8374 = vmatprep.subr.bf16.mxu0 %v8373_v9 }
0x28c7   :  { %8376 = vmatpush3.bf16.msra.mxu0 %v8375_v57 }
0x2991   :  { %v7836_v26 = vpop.f32.mrb[104].mxu0 }
0x2992   :  { %v5996_v42 = vpop.f32.mrb[105].mxu0  ;;  %v6006_v4 = vadd.f32 %v7836_v26, %v10928_v55  ;;  %v6539_v55 = vld [vmem:[%s11322_s19 + $0x1b0] sm:$0xff] }
0x2993   :  { %v6005_v38 = vadd.f32 %v5996_v42, %v10931_v43  ;;  %v6540_v43 = vld [vmem:[%s11322_s19 + $0x1b8] sm:$0xff] }
0x2994   :  { %v11210_v47 = vadd.f32 %v6010_v19, %v6006_v4  ;;  %v8377_v33 = vpack.c.bf16 %v6540_v43, %v6539_v55 }
0x2995   :  { %v11208_v13 = vadd.f32 %v6010_v19, %v6005_v38 }
0x2996   :  { %v6014_v1 = vmul.f32 0.999995, %v11210_v47  ;;  %8378 = vmatprep.subr.bf16.mxu0 %v8377_v33 }
0x2997   :  { %v6013_v49 = vmul.f32 0.999995, %v11208_v13 }
0x2999   :  { %6574 = vmatmul.mubr.msk.f32.vlgmr.msra.gmra.mrb[122].mxu1 %vm112_vm0, %v6013_v49 }
0x299a   :  { %6109 = vmatprep.mubr.f32.mxu1 %v8713_v15  ;;  %v6524_v15 = vld [vmem:[%s11322_s19 + $0x138] sm:$0xff]  ;;  %s8728_s19 = smov [#allocation6]  }
0x299b   :  { %v8379_v46 = vpack.c.bf16 %v6524_v15, %v6523_v10  ;;  %s6243_s8 = sshll.u32 %s8728_s19, 4  ;;  %s6244_s8 = int_to_ptr.vmem [resolvable:$true] %s6243_s8 }
0x299c   :  { %s8687_s28 = scalar_lea.vmem %s6244_s8, 32  ;;  %p8692_p1 = scmp.lt.s32.totalorder %s6244_s8, %s6244_s8 }
0x299d   :  { %6575 = vmatmul.mubr.msk.f32.gmra.mrb[124].mxu1 %vm112_vm0, %v6014_v1  ;;  %8380 = vmatpush3.bf16.msra.mxu0 %v8379_v46  ;;  %v6216_v46 = vrot.slane %v11063_v3, %v9385_v54  ;;  %p8688_p0 = scmp.ne.s32.totalorder %s6244_s8, %s8687_s28  ;;  %p8693_p2 = scmp.lt.s32.totalorder %s8687_s28, %s8687_s28 }
0x299e   :  { %8382 = vmatprep.subr.bf16.mxu0 %v8381_v62 }
0x299f   :  { %p8694_p3 = por %p8693_p2, %p8692_p1 }
0x29a1   :  { %8384 = vmatpush3.bf16.msra.mxu0 %v8383_v40  ;;  %p8695_p4 = pnand %p8694_p3, %p8688_p0 }
0x29a2   :  { %8386 = vmatprep.subr.bf16.mxu0 %v8385_v0 }
0x29a5   :  { %8388 = vmatpush3.bf16.msra.mxu0 %v8387_v24 }
0x29a6   :  { %8390 = vmatprep.subr.bf16.mxu0 %v8389_v63 }
0x29a9   :  { %8392 = vmatpush3.bf16.msra.mxu0 %v8391_v18 }
0x29aa   :  { %8394 = vmatprep.subr.bf16.mxu0 %v8393_v21 }
0x29ad   :  { %8396 = vmatpush3.bf16.msra.mxu0 %v8395_v41 }
0x2a6c   :  { %v6105_v59 = vpop.f32.mrb[122].mxu1 }
0x2a6d   :  { %v6106_v36 = vadd.f32 %v6105_v59, %v6028_v20  ;;  %v6107_v31 = vpop.f32.mrb[123].mxu1 }
0x2a6e   :  { %v6108_v28 = vadd.f32 %v6107_v31, %v6032_v14 }
0x2a6f   :  { %v6120_v8 = vmul.f32 0.70710677, %v6106_v36  ;;  %v6116_v51 = vmul.f32 0.5, %v6106_v36 }
0x2a70   :  { %v6121_v5 = vmul.f32 0.70710677, %v6108_v28  ;;  %v6111_v12 = vpop.f32.mrb[124].mxu1  ;;  %v6117_v30 = vmul.f32 0.5, %v6108_v28 }
0x2a71   :  { %8669 = verf.f32 %v6120_v8  ;;  %v6112_v58 = vadd.f32 %v6111_v12, %v6028_v20  ;;  %v6113_v37 = vpop.f32.mrb[125].mxu1 }
0x2a72   :  { %8671 = verf.f32 %v6121_v5  ;;  %v6114_v29 = vadd.f32 %v6113_v37, %v6032_v14 }
0x2a73   :  { %v6122_v35 = vmul.f32 0.70710677, %v6112_v58  ;;  %v6118_v1 = vmul.f32 0.5, %v6112_v58 }
0x2a74   :  { %v6123_v23 = vmul.f32 0.70710677, %v6114_v29  ;;  %v6119_v38 = vmul.f32 0.5, %v6114_v29 }
0x2a75   :  { %8673 = verf.f32 %v6122_v35 }
0x2a76   :  { %8675 = verf.f32 %v6123_v23 }
0x2a7b   :  { %v8670_v53 = vpop.eup %8669 }
0x2a7c   :  { %v8672_v34 = vpop.eup %8671  ;;  %v6128_v9 = vadd.f32 1.0, %v8670_v53 }
0x2a7d   :  { %v6129_v32 = vadd.f32 1.0, %v8672_v34 }
0x2a7e   :  { %v6132_v42 = vmul.f32 %v6128_v9, %v6116_v51 }
0x2a7f   :  { %v8674_v57 = vpop.eup %8673  ;;  %v6133_v26 = vmul.f32 %v6129_v32, %v6117_v30 }
0x2a80   :  { %v8676_v19 = vpop.eup %8675  ;;  %v6130_v4 = vadd.f32 1.0, %v8674_v57 }
0x2a81   :  { %v6131_v49 = vadd.f32 1.0, %v8676_v19  ;;  %6200 = vmatprep.mubr.f32.mxu0 %v6133_v26 }
0x2a82   :  { %6201 = vmatmul.mubr.f32.vlgmr.msra.gmra.mrb[106].mxu0 %v6132_v42  ;;  %v6134_v43 = vmul.f32 %v6130_v4, %v6118_v1 }
0x2a83   :  { %v6135_v55 = vmul.f32 %v6131_v49, %v6119_v38 }
0x2a85   :  { %6205 = vmatprep.mubr.f32.mxu0 %v6135_v55 }
0x2a86   :  { %6206 = vmatmul.mubr.f32.gmra.mrb[108].mxu0 %v6134_v43 }
0x2b55   :  { %v7066_v33 = vpop.f32.mrb[106].mxu0 }
0x2b56   :  { %v7067_v10 = vpop.f32.mrb[107].mxu0 }
0x2b57   :  { %v7068_v15 = vadd.f32 %v7067_v10, %v7066_v33 }
0x2b59   :  { %v6211_v61 = vadd.f32 %v7068_v15, %v11208_v13  ;;  %v7069_v16 = vpop.f32.mrb[108].mxu0 }
0x2b5a   :  { %v7070_v62 = vpop.f32.mrb[109].mxu0 }
0x2b5b   :  { %v6217_v52 = vadd.f32 %v6216_v46, %v6211_v61  ;;  %v7071_v6 = vadd.f32 %v7070_v62, %v7069_v16 }
0x2b5d   :  { %v6219_v40 = vsel %vm112_vm0, %v6217_v52, 0.0  ;;  %v6212_v60 = vadd.f32 %v7071_v6, %v11210_v47 }
0x2b5e   :  { %v6220_v27 = vrot.slane %v6219_v40, 4 }
0x2b5f   :  { %v6218_v0 = vadd.f32 %v6216_v46, %v6212_v60 }
0x2b60   :  { %v6221_v48 = vadd.f32 %v6220_v27, %v6219_v40 }
0x2b61   :  { %v6228_v2 = vsel %vm112_vm0, %v6218_v0, 0.0 }
0x2b62   :  { %v6222_v24 = vrot.slane %v6221_v48, 2  ;;  %v6229_v11 = vrot.slane %v6228_v2, 4 }
0x2b64   :  { %v6230_v50 = vadd.f32 %v6229_v11, %v6228_v2  ;;  %v6223_v63 = vadd.f32 %v6222_v24, %v6221_v48 }
0x2b66   :  { %v6231_v54 = vrot.slane %v6230_v50, 2  ;;  %v6224_v3 = vrot.slane %v6223_v63, 1 }
0x2b68   :  { %v6225_v13 = vadd.f32 %v6224_v3, %v6223_v63  ;;  %v6232_v7 = vadd.f32 %v6231_v54, %v6230_v50 }
0x2b6a   :  { %v6226_v39 = vmul.f32 0.124999374, %v6225_v13  ;;  %v6233_v18 = vrot.slane %v6232_v7, 1 }
0x2b6c   :  { %6227 = vst.msk [vmem:[#allocation6] sm:$0x1] %vm4073_vm7, %v6226_v39  ;;  %v6234_v47 = vadd.f32 %v6233_v18, %v6232_v7 }
0x2b6e   :  { %v6235_v56 = vmul.f32 0.124999374, %v6234_v47 }
0x2b70   :  { %6236 = vst.msk [vmem:[#allocation6 + $0x1] sm:$0x1] %vm4073_vm7, %v6235_v56 }
0x2b71   :  { %8698 = shalt.err (!%p8695_p4)
}
0x2b72   :  { %s8699_s25 = scalar_lea.hbm %s11323_s20, 32 }
0x2b73   :  { %p8700_p5 = scmp.ne.s32.totalorder %s11323_s20, %s8699_s25  ;;  %p8703_p6 = scmp.lt.u32.totalorder %s8699_s25, %s11323_s20 }
0x2b75   :  { %p8705_p7 = pnand %p8703_p6, %p8700_p5 }
0x2b77   :  { %8708 = shalt.err (!%p8705_p7)
}
0x2b78   :  { %6246 = dma.vmem_to_hbm [thread:$0]  %s6244_s8, 32, %s11323_s20, [#allocation7]  }
0x2b79   :  { %8709 = dma.done.wait [#allocation7], 32  }
0x2b7a   :  { %8710 = vsyncadd [#allocation7], 4294967264 }
0x2b7b   :  { %6250 = vsyncpa [#allocation7], 1 }

</bundles_post_ra>
